<compile_context>
chip_gen: v7x
topology: tpu7x:2x2x1
jax: 0.10.0
libtpu: 0.0.40
codegen_flags: <defaults>
</compile_context>

<pallas_src>
import math
import functools
import numpy as np
import jax
import jax.numpy as jnp
from jax.experimental import pallas as pl
from jax.experimental.pallas import tpu as pltpu

D = 3            # XConv dim=3 (spatial dimension of `pos`)
K = 3            # kernel_size=3 (number of neighbors)
KK = K * K
LANE = 128       # TPU lane width: final output padded to 128 lanes (unmasked vst)
EPS = 1e-5       # BatchNorm1d eps
MAX_TILE = 512   # max points per grid step (small VMEM footprint on v5e/v6e/v7x)


def _elu(x):
    return jnp.where(x > 0, x, jnp.exp(jnp.minimum(x, 0.0)) - 1.0)


def _dot(a, b):
    # bf16 operands on the MXU, f32 accumulation (native bf16 MXU on v6e/v7x;
    # elementwise / BN math stays f32 which is the right split on v5e).
    return jnp.dot(a.astype(jnp.bfloat16), b.astype(jnp.bfloat16),
                   preferred_element_type=jnp.float32)


def _norm(a, stats):
    # stats: [2, W]   row 0 = mean, row 1 = 1/sqrt(var + eps)
    return (a - stats[0:1, :]) * stats[1:2, :]


# --------------------------------------------------------------------------------------
# Pallas call 1: global BatchNorm statistics (3 phases x row tiles, grid-carried sums)
# --------------------------------------------------------------------------------------
def _stats_kernel(cnt_nk, cnt_n,
                  mask_ref, pos_ref,
                  w1_ref, b1_ref, w2_ref, b2_ref,
                  wl_ref, bl_ref, m1_ref, bc1_ref, m2_ref, bc2_ref,
                  s1_ref, s2_ref, s3_ref, s4_ref, s5_ref):
    phase = pl.program_id(0)
    tile = pl.program_id(1)
    last = pl.num_programs(1) - 1
    mask = mask_ref[...]                       # [TN, 1], 1.0 for valid (non-pad) rows

    def accum(s_ref, acts, cnt):
        # s_ref rows: [sum, sumsq] while accumulating; [mean, inv_std] after finalize.
        @pl.when(tile == 0)
        def _():
            s_ref[...] = jnp.zeros_like(s_ref)

        s = s_ref[...]
        ssum, ssq = s[0:1, :], s[1:2, :]
        for a in acts:
            am = a * mask
            ssum = ssum + jnp.sum(am, axis=0, keepdims=True)
            ssq = ssq + jnp.sum(am * a, axis=0, keepdims=True)
        s_ref[...] = jnp.concatenate([ssum, ssq], axis=0)

        @pl.when(tile == last)
        def _():
            st = s_ref[...]
            mu = st[0:1, :] / cnt
            var = st[1:2, :] / cnt - mu * mu            # biased variance (training BN)
            s_ref[...] = jnp.concatenate([mu, jax.lax.rsqrt(var + EPS)], axis=0)

    def mlp1_a1(k):                                      # pre-BN1 activation, [TN, C_delta]
        return _elu(_dot(pos_ref[k], w1_ref[...]) + b1_ref[...])

    def mlp2_a3():                                       # pre-BN3 activation, [TN, K*K]
        h = bl_ref[...]
        for k in range(K):
            h = h + _dot(pos_ref[k], wl_ref[k])          # == pos.view(N, K*D) @ wl
        return _elu(h)

    @pl.when(phase == 0)
    def _():
        accum(s1_ref, [mlp1_a1(k) for k in range(K)], cnt_nk)
        accum(s3_ref, [mlp2_a3()], cnt_n)

    @pl.when(phase == 1)
    def _():
        a2s = []
        for k in range(K):
            h = _norm(mlp1_a1(k), s1_ref[...])
            a2s.append(_elu(_dot(h, w2_ref[...]) + b2_ref[...]))
        accum(s2_ref, a2s, cnt_nk)
        t3 = _norm(mlp2_a3(), s3_ref[...])
        accum(s4_ref, [_elu(_dot(t3, m1_ref[...]) + bc1_ref[...])], cnt_n)

    @pl.when(phase == 2)
    def _():
        t3 = _norm(mlp2_a3(), s3_ref[...])
        t4 = _norm(_elu(_dot(t3, m1_ref[...]) + bc1_ref[...]), s4_ref[...])
        accum(s5_ref, [_dot(t4, m2_ref[...]) + bc2_ref[...]], cnt_n)    # no ELU before BN5


# --------------------------------------------------------------------------------------
# Pallas call 2: fully fused forward (per row tile, embarrassingly parallel)
# --------------------------------------------------------------------------------------
def _apply_kernel(pos_ref, xg_ref,
                  s1_ref, s2_ref, s3_ref, s4_ref, s5_ref,
                  w1_ref, b1_ref, w2_ref, b2_ref,
                  wl_ref, bl_ref, m1_ref, bc1_ref, m2_ref, bc2_ref,
                  md_ref, bd_ref, wf_ref, bf_ref, o_ref):
    s1, s2, s3, s4, s5 = (s1_ref[...], s2_ref[...], s3_ref[...],
                          s4_ref[...], s5_ref[...])

    # ---- mlp1: x_star per neighbor k (k is a leading axis -> no unaligned lane slices)
    x_star = []
    for k in range(K):
        h = _norm(_elu(_dot(pos_ref[k], w1_ref[...]) + b1_ref[...]), s1)
        x_star.append(_norm(_elu(_dot(h, w2_ref[...]) + b2_ref[...]), s2))   # [TN, C_delta]
    xg = [xg_ref[k] for k in range(K)]                                       # [TN, C_in]

    # ---- mlp2 -> transform matrix T, flat: column (k*K + j) == T[n, k, j]
    h = bl_ref[...]
    for k in range(K):
        h = h + _dot(pos_ref[k], wl_ref[k])
    t3 = _norm(_elu(h), s3)
    t4 = _norm(_elu(_dot(t3, m1_ref[...]) + bc1_ref[...]), s4)
    T = _norm(_dot(t4, m2_ref[...]) + bc2_ref[...], s5)                      # [TN, K*K]

    # ---- x_transformed = x_star @ T, flattened j-major (column j*C + c), then
    #      depthwise Conv1d as ONE dense matmul [TN, K*C] @ [K*C, C*dm]
    #      (single MXU contraction pass; the lane concat is cheap XLU work that
    #      overlaps with MXU).
    pieces = []
    for j in range(K):
        cols = [T[:, k * K + j:k * K + j + 1] for k in range(K)]             # [TN, 1]
        xd = sum(x_star[k] * cols[k] for k in range(K))                      # [TN, C_delta]
        xx = sum(xg[k] * cols[k] for k in range(K))                          # [TN, C_in]
        pieces += [xd, xx]
    xt = jnp.concatenate(pieces, axis=-1)                                    # [TN, K*C]
    d = bd_ref[...] + _dot(xt, md_ref[...])                                  # [TN, C*dm]

    # ---- final Linear(C*dm, C_out), zero-padded to 128 lanes (unmasked stores)
    o_ref[...] = _dot(d, wf_ref[...]) + bf_ref[...]


def _const_specs(arrays, ngrid):
    specs = []
    for a in arrays:
        nd = a.ndim
        if ngrid == 1:
            specs.append(pl.BlockSpec(a.shape, lambda i, nd=nd: (0,) * nd))
        else:
            specs.append(pl.BlockSpec(a.shape, lambda p, i, nd=nd: (0,) * nd))
    return specs


def init_params(key, in_size, out_size, mid_size):
    C_in, C_delta, C_out = in_size, mid_size, out_size
    C = C_in + C_delta
    dm = int(math.ceil(C_out / C))          # depth_multiplier
    ks = jax.random.split(key, 16)

    def rnd(k, shape, scale=0.1):
        return jax.random.normal(k, shape, jnp.float32) * scale

    # mlp1: Linear(D, C_delta), Linear(C_delta, C_delta)   (stored as [in, out])
    w1 = rnd(ks[0], (D, C_delta));        b1 = rnd(ks[1], (1, C_delta))
    w2 = rnd(ks[2], (C_delta, C_delta));  b2 = rnd(ks[3], (1, C_delta))
    # mlp2: Linear(D*K, K^2) + two Conv1d(K, K^2, K, groups=K)
    wl = rnd(ks[4], (D * K, KK));         bl = rnd(ks[5], (1, KK))
    wc1 = rnd(ks[6], (KK, 1, K));         bc1 = rnd(ks[7], (1, KK))
    wc2 = rnd(ks[8], (KK, 1, K));         bc2 = rnd(ks[9], (1, KK))
    # conv: Conv1d(C, C*dm, K, groups=C) + Linear(C*dm, C_out)
    wd = rnd(ks[10], (C * dm, 1, K));     bd = rnd(ks[11], (1, C * dm))
    wf = rnd(ks[12], (C_out, C * dm));    bf = rnd(ks[13], (1, C_out))

    def grouped_kxk_to_dense(wc):
        # Conv1d(K, K*K, K, groups=K) on [N,K,K] -> dense [K*K, K*K]:
        # out[:, k*K+j] = sum_i M[k*K+i, k*K+j] * in[:, k*K+i]
        wc_np = np.asarray(wc)
        M = np.zeros((KK, KK), np.float32)
        for k in range(K):
            M[k * K:(k + 1) * K, k * K:(k + 1) * K] = wc_np[k * K:(k + 1) * K, 0, :].T
        return jnp.asarray(M)

    m1 = grouped_kxk_to_dense(wc1)
    m2 = grouped_kxk_to_dense(wc2)

    # Depthwise Conv1d(C, C*dm, K, groups=C) as dense [K*C, C*dm] acting on
    # x_transformed laid out j-major: column (j*C + c).
    wd_np = np.asarray(wd)
    Md = np.zeros((K * C, C * dm), np.float32)
    for c in range(C):
        for m in range(dm):
            for j in range(K):
                Md[j * C + c, c * dm + m] = wd_np[c * dm + m, 0, j]

    return dict(w1=w1, b1=b1, w2=w2, b2=b2, wl=wl, bl=bl,
                m1=m1, bc1=bc1, m2=m2, bc2=bc2,
                md=jnp.asarray(Md), bd=bd,
                wf=jnp.asarray(np.asarray(wf).T),   # [C*dm, C_out]
                bf=bf)


@jax.jit
def mdl_conv_bn_forward(x, pos, params):
    N = pos.shape[0]
    C_in = x.shape[1]
    C_delta = params["w1"].shape[1]
    C = C_in + C_delta
    C_out = params["wf"].shape[1]
    dm = params["bd"].shape[1] // C
    assert max(C_delta, KK, K * C, C * dm, C_out) <= LANE

    # ---- knn_graph(pos, K, loop=True) + gathers (glue), no [N,N,3] intermediate ----
    # TODO(synk): k-NN top-k selection and index gathers stay in plain JAX;
    #             no clean Pallas equivalent for top-k on TPU.
    sq = jnp.sum(pos * pos, axis=-1)
    d2 = sq[:, None] + sq[None, :] - 2.0 * (pos @ pos.T)        # [N, N]
    _, col = jax.lax.top_k(-d2, K)                              # K nearest incl. self
    pos_rel = pos[col] - pos[:, None, :]                        # [N, K, D]
    x_gath = x[col]                                             # [N, K, C_in]

    # k as leading (non-minor) axis -> per-k views are full-lane blocks inside kernels
    pos_k = jnp.transpose(pos_rel, (1, 0, 2)).astype(jnp.float32)   # [K, N, D]
    xg_k = jnp.transpose(x_gath, (1, 0, 2)).astype(jnp.float32)     # [K, N, C_in]

    # ---- row tiling (pad N to a tile multiple; pad rows masked out of BN stats) ----
    def rup(a, b):
        return ((a + b - 1) // b) * b
    TN = min(MAX_TILE, rup(N, 8))
    Np = rup(N, TN)
    n_tiles = Np // TN
    if Np != N:
        pad = Np - N
        pos_k = jnp.pad(pos_k, ((0, 0), (0, pad), (0, 0)))
        xg_k = jnp.pad(xg_k, ((0, 0), (0, pad), (0, 0)))
    mask = jnp.asarray((np.arange(Np) < N).astype(np.float32).reshape(Np, 1))

    wl3 = params["wl"].reshape(K, D, KK)                            # per-k rows of wl
    wf_p = jnp.zeros((C * dm, LANE), jnp.float32).at[:, :C_out].set(params["wf"])
    bf_p = jnp.zeros((1, LANE), jnp.float32).at[:, :C_out].set(params["bf"])

    weights_a = (params["w1"], params["b1"], params["w2"], params["b2"],
                 wl3, params["bl"], params["m1"], params["bc1"],
                 params["m2"], params["bc2"])

    # ---- Pallas call 1: global BN statistics (3 sequential phases x row tiles) ----
    stat_shapes = ((2, C_delta), (2, C_delta), (2, KK), (2, KK), (2, KK))
    stats = pl.pallas_call(
        functools.partial(_stats_kernel, float(N * K), float(N)),
        out_shape=tuple(jax.ShapeDtypeStruct(s, jnp.float32) for s in stat_shapes),
        grid=(3, n_tiles),
        in_specs=[pl.BlockSpec((TN, 1), lambda p, i: (i, 0)),
                  pl.BlockSpec((K, TN, D), lambda p, i: (0, i, 0))]
                 + _const_specs(weights_a, 2),
        out_specs=tuple(pl.BlockSpec(s, lambda p, i: (0, 0)) for s in stat_shapes),
        compiler_params=pltpu.CompilerParams(
            dimension_semantics=("arbitrary", "arbitrary")),
    )(mask, pos_k, *weights_a)
    stats = tuple(stats)

    # ---- Pallas call 2: fused forward, parallel over row tiles (both TCs on v7x) ----
    weights_b = weights_a + (params["md"], params["bd"], wf_p, bf_p)
    out_pad = pl.pallas_call(
        _apply_kernel,
        out_shape=jax.ShapeDtypeStruct((Np, LANE), jnp.float32),
        grid=(n_tiles,),
        in_specs=[pl.BlockSpec((K, TN, D), lambda i: (0, i, 0)),
                  pl.BlockSpec((K, TN, C_in), lambda i: (0, i, 0))]
                 + _const_specs(stats + weights_b, 1),
        out_specs=pl.BlockSpec((TN, LANE), lambda i: (i, 0)),
        compiler_params=pltpu.CompilerParams(dimension_semantics=("parallel",)),
    )(pos_k, xg_k, *stats, *weights_b)

    return out_pad[:N, :C_out]


if __name__ == "__main__":
    key = jax.random.PRNGKey(0)
    k_x, k_pos, k_param = jax.random.split(key, 3)

    in_size, out_size, mid_size = 8, 32, 16   # MdlConvBn(in_size, out_size, mid_size)
    N = 64                                    # number of points

    x = jax.random.normal(k_x, (N, in_size), jnp.float32)
    pos = jax.random.normal(k_pos, (N, D), jnp.float32)
    params = init_params(k_param, in_size, out_size, mid_size)

    out = mdl_conv_bn_forward(x, pos, params)
    out = jax.block_until_ready(out)

    assert out.shape == (N, out_size), out.shape
    assert bool(jnp.all(jnp.isfinite(out)))
    print("KERNEL_OK")
</pallas_src>

<mosaic_0001>
module attributes {stable_mosaic.version = 11 : i64} {
  func.func @_stats_kernel(%arg0: i32, %arg1: i32, %arg2: memref<64x1xf32, #tpu.memory_space<vmem>>, %arg3: memref<3x64x3xf32, #tpu.memory_space<vmem>>, %arg4: memref<3x16xf32, #tpu.memory_space<vmem>>, %arg5: memref<1x16xf32, #tpu.memory_space<vmem>>, %arg6: memref<16x16xf32, #tpu.memory_space<vmem>>, %arg7: memref<1x16xf32, #tpu.memory_space<vmem>>, %arg8: memref<3x3x9xf32, #tpu.memory_space<vmem>>, %arg9: memref<1x9xf32, #tpu.memory_space<vmem>>, %arg10: memref<9x9xf32, #tpu.memory_space<vmem>>, %arg11: memref<1x9xf32, #tpu.memory_space<vmem>>, %arg12: memref<9x9xf32, #tpu.memory_space<vmem>>, %arg13: memref<1x9xf32, #tpu.memory_space<vmem>>, %arg14: memref<2x16xf32, #tpu.memory_space<vmem>>, %arg15: memref<2x16xf32, #tpu.memory_space<vmem>>, %arg16: memref<2x9xf32, #tpu.memory_space<vmem>>, %arg17: memref<2x9xf32, #tpu.memory_space<vmem>>, %arg18: memref<2x9xf32, #tpu.memory_space<vmem>>) attributes {dimension_semantics = [#tpu.dimension_semantics<arbitrary>, #tpu.dimension_semantics<arbitrary>], iteration_bounds = array<i64: 3, 1>, scalar_prefetch = 0 : i64, scratch_operands = 0 : i64, tpu.core_type = #tpu.core_type<tc>, window_params = [{transform_indices = @transform_0, window_bounds = array<i64: 64, 1>}, {transform_indices = @transform_1, window_bounds = array<i64: 3, 64, 3>}, {pipeline_mode = #tpu.pipeline_mode<synchronous>, transform_indices = @transform_2, window_bounds = array<i64: 3, 16>}, {pipeline_mode = #tpu.pipeline_mode<synchronous>, transform_indices = @transform_3, window_bounds = array<i64: 1, 16>}, {pipeline_mode = #tpu.pipeline_mode<synchronous>, transform_indices = @transform_4, window_bounds = array<i64: 16, 16>}, {pipeline_mode = #tpu.pipeline_mode<synchronous>, transform_indices = @transform_5, window_bounds = array<i64: 1, 16>}, {pipeline_mode = #tpu.pipeline_mode<synchronous>, transform_indices = @transform_6, window_bounds = array<i64: 3, 3, 9>}, {pipeline_mode = #tpu.pipeline_mode<synchronous>, transform_indices = @transform_7, window_bounds = array<i64: 1, 9>}, {pipeline_mode = #tpu.pipeline_mode<synchronous>, transform_indices = @transform_8, window_bounds = array<i64: 9, 9>}, {pipeline_mode = #tpu.pipeline_mode<synchronous>, transform_indices = @transform_9, window_bounds = array<i64: 1, 9>}, {pipeline_mode = #tpu.pipeline_mode<synchronous>, transform_indices = @transform_10, window_bounds = array<i64: 9, 9>}, {pipeline_mode = #tpu.pipeline_mode<synchronous>, transform_indices = @transform_11, window_bounds = array<i64: 1, 9>}, {pipeline_mode = #tpu.pipeline_mode<synchronous>, transform_indices = @transform_12, window_bounds = array<i64: 2, 16>}, {pipeline_mode = #tpu.pipeline_mode<synchronous>, transform_indices = @transform_13, window_bounds = array<i64: 2, 16>}, {pipeline_mode = #tpu.pipeline_mode<synchronous>, transform_indices = @transform_14, window_bounds = array<i64: 2, 9>}, {pipeline_mode = #tpu.pipeline_mode<synchronous>, transform_indices = @transform_15, window_bounds = array<i64: 2, 9>}, {pipeline_mode = #tpu.pipeline_mode<synchronous>, transform_indices = @transform_16, window_bounds = array<i64: 2, 9>}]} {
    %c0 = arith.constant 0 : index
    %c0_0 = arith.constant 0 : index
    %0 = vector.load %arg2[%c0, %c0_0] : memref<64x1xf32, #tpu.memory_space<vmem>>, vector<64x1xf32>
    %c0_i32 = arith.constant 0 : i32
    %1 = arith.cmpi eq, %arg0, %c0_i32 : i32
    %2 = arith.extui %1 : i1 to i32
    %c0_i32_1 = arith.constant 0 : i32
    %3 = arith.cmpi ne, %2, %c0_i32_1 : i32
    scf.if %3 {
      %c0_4 = arith.constant 0 : index
      %c0_5 = arith.constant 0 : index
      %c0_6 = arith.constant 0 : index
      %10 = vector.load %arg3[%c0_4, %c0_5, %c0_6] : memref<3x64x3xf32, #tpu.memory_space<vmem>>, vector<1x64x3xf32>
      %11 = vector.shape_cast %10 : vector<1x64x3xf32> to vector<64x3xf32>
      %c0_7 = arith.constant 0 : index
      %c0_8 = arith.constant 0 : index
      %12 = vector.load %arg4[%c0_7, %c0_8] : memref<3x16xf32, #tpu.memory_space<vmem>>, vector<3x16xf32>
      %13 = arith.truncf %11 : vector<64x3xf32> to vector<64x3xbf16>
      %14 = arith.truncf %12 : vector<3x16xf32> to vector<3x16xbf16>
      %cst = arith.constant dense<0.000000e+00> : vector<64x16xf32>
      %15 = tpu.matmul %13, %14, %cst {dimension_numbers = #tpu.dot_dimension_numbers<[1], [0], [0], [1], [0, 0, 1, 1], [], []>} : vector<64x3xbf16>, vector<3x16xbf16>, vector<64x16xf32> -> vector<64x16xf32>
      %c0_9 = arith.constant 0 : index
      %c0_10 = arith.constant 0 : index
      %16 = vector.load %arg5[%c0_9, %c0_10] : memref<1x16xf32, #tpu.memory_space<vmem>>, vector<1x16xf32>
      %17 = vector.broadcast %16 : vector<1x16xf32> to vector<64x16xf32>
      %18 = arith.addf %15, %17 : vector<64x16xf32>
      %cst_11 = arith.constant 0.000000e+00 : f32
      %19 = vector.broadcast %cst_11 : f32 to vector<64x16xf32>
      %20 = arith.cmpf ogt, %18, %19 : vector<64x16xf32>
      %cst_12 = arith.constant 0.000000e+00 : f32
      %21 = vector.broadcast %cst_12 : f32 to vector<64x16xf32>
      %22 = arith.minimumf %18, %21 : vector<64x16xf32>
      %23 = math.exp %22 : vector<64x16xf32>
      %cst_13 = arith.constant 1.000000e+00 : f32
      %24 = vector.broadcast %cst_13 : f32 to vector<64x16xf32>
      %25 = arith.subf %23, %24 : vector<64x16xf32>
      %26 = arith.select %20, %18, %25 : vector<64x16xi1>, vector<64x16xf32>
      %c1 = arith.constant 1 : index
      %c0_14 = arith.constant 0 : index
      %c0_15 = arith.constant 0 : index
      %27 = vector.load %arg3[%c1, %c0_14, %c0_15] : memref<3x64x3xf32, #tpu.memory_space<vmem>>, vector<1x64x3xf32>
      %28 = vector.shape_cast %27 : vector<1x64x3xf32> to vector<64x3xf32>
      %c0_16 = arith.constant 0 : index
      %c0_17 = arith.constant 0 : index
      %29 = vector.load %arg4[%c0_16, %c0_17] : memref<3x16xf32, #tpu.memory_space<vmem>>, vector<3x16xf32>
      %30 = arith.truncf %28 : vector<64x3xf32> to vector<64x3xbf16>
      %31 = arith.truncf %29 : vector<3x16xf32> to vector<3x16xbf16>
      %cst_18 = arith.constant dense<0.000000e+00> : vector<64x16xf32>
      %32 = tpu.matmul %30, %31, %cst_18 {dimension_numbers = #tpu.dot_dimension_numbers<[1], [0], [0], [1], [0, 0, 1, 1], [], []>} : vector<64x3xbf16>, vector<3x16xbf16>, vector<64x16xf32> -> vector<64x16xf32>
      %c0_19 = arith.constant 0 : index
      %c0_20 = arith.constant 0 : index
      %33 = vector.load %arg5[%c0_19, %c0_20] : memref<1x16xf32, #tpu.memory_space<vmem>>, vector<1x16xf32>
      %34 = vector.broadcast %33 : vector<1x16xf32> to vector<64x16xf32>
      %35 = arith.addf %32, %34 : vector<64x16xf32>
      %cst_21 = arith.constant 0.000000e+00 : f32
      %36 = vector.broadcast %cst_21 : f32 to vector<64x16xf32>
      %37 = arith.cmpf ogt, %35, %36 : vector<64x16xf32>
      %cst_22 = arith.constant 0.000000e+00 : f32
      %38 = vector.broadcast %cst_22 : f32 to vector<64x16xf32>
      %39 = arith.minimumf %35, %38 : vector<64x16xf32>
      %40 = math.exp %39 : vector<64x16xf32>
      %cst_23 = arith.constant 1.000000e+00 : f32
      %41 = vector.broadcast %cst_23 : f32 to vector<64x16xf32>
      %42 = arith.subf %40, %41 : vector<64x16xf32>
      %43 = arith.select %37, %35, %42 : vector<64x16xi1>, vector<64x16xf32>
      %c2 = arith.constant 2 : index
      %c0_24 = arith.constant 0 : index
      %c0_25 = arith.constant 0 : index
      %44 = vector.load %arg3[%c2, %c0_24, %c0_25] : memref<3x64x3xf32, #tpu.memory_space<vmem>>, vector<1x64x3xf32>
      %45 = vector.shape_cast %44 : vector<1x64x3xf32> to vector<64x3xf32>
      %c0_26 = arith.constant 0 : index
      %c0_27 = arith.constant 0 : index
      %46 = vector.load %arg4[%c0_26, %c0_27] : memref<3x16xf32, #tpu.memory_space<vmem>>, vector<3x16xf32>
      %47 = arith.truncf %45 : vector<64x3xf32> to vector<64x3xbf16>
      %48 = arith.truncf %46 : vector<3x16xf32> to vector<3x16xbf16>
      %cst_28 = arith.constant dense<0.000000e+00> : vector<64x16xf32>
      %49 = tpu.matmul %47, %48, %cst_28 {dimension_numbers = #tpu.dot_dimension_numbers<[1], [0], [0], [1], [0, 0, 1, 1], [], []>} : vector<64x3xbf16>, vector<3x16xbf16>, vector<64x16xf32> -> vector<64x16xf32>
      %c0_29 = arith.constant 0 : index
      %c0_30 = arith.constant 0 : index
      %50 = vector.load %arg5[%c0_29, %c0_30] : memref<1x16xf32, #tpu.memory_space<vmem>>, vector<1x16xf32>
      %51 = vector.broadcast %50 : vector<1x16xf32> to vector<64x16xf32>
      %52 = arith.addf %49, %51 : vector<64x16xf32>
      %cst_31 = arith.constant 0.000000e+00 : f32
      %53 = vector.broadcast %cst_31 : f32 to vector<64x16xf32>
      %54 = arith.cmpf ogt, %52, %53 : vector<64x16xf32>
      %cst_32 = arith.constant 0.000000e+00 : f32
      %55 = vector.broadcast %cst_32 : f32 to vector<64x16xf32>
      %56 = arith.minimumf %52, %55 : vector<64x16xf32>
      %57 = math.exp %56 : vector<64x16xf32>
      %cst_33 = arith.constant 1.000000e+00 : f32
      %58 = vector.broadcast %cst_33 : f32 to vector<64x16xf32>
      %59 = arith.subf %57, %58 : vector<64x16xf32>
      %60 = arith.select %54, %52, %59 : vector<64x16xi1>, vector<64x16xf32>
      %c0_i32_34 = arith.constant 0 : i32
      %61 = arith.cmpi eq, %arg1, %c0_i32_34 : i32
      %62 = arith.extui %61 : i1 to i32
      %c0_i32_35 = arith.constant 0 : i32
      %63 = arith.cmpi ne, %62, %c0_i32_35 : i32
      scf.if %63 {
        %cst_84 = arith.constant 0.000000e+00 : f32
        %153 = vector.broadcast %cst_84 : f32 to vector<2x16xf32>
        %c0_85 = arith.constant 0 : index
        %c0_86 = arith.constant 0 : index
        %154 = vector.load %arg14[%c0_85, %c0_86] : memref<2x16xf32, #tpu.memory_space<vmem>>, vector<2x16xf32>
        tpu.vector_store %arg14[%c0_85, %c0_86], %153 {strides = array<i32>} : memref<2x16xf32, #tpu.memory_space<vmem>>, vector<2x16xf32>,
      } else {
      }
      %c0_36 = arith.constant 0 : index
      %c0_37 = arith.constant 0 : index
      %64 = vector.load %arg14[%c0_36, %c0_37] : memref<2x16xf32, #tpu.memory_space<vmem>>, vector<2x16xf32>
      %65 = vector.extract_strided_slice %64 {offsets = [0, 0], sizes = [1, 16], strides = [1, 1]} : vector<2x16xf32> to vector<1x16xf32>
      %66 = vector.extract_strided_slice %64 {offsets = [1, 0], sizes = [1, 16], strides = [1, 1]} : vector<2x16xf32> to vector<1x16xf32>
      %67 = vector.broadcast %0 : vector<64x1xf32> to vector<64x16xf32>
      %68 = arith.mulf %26, %67 : vector<64x16xf32>
      %cst_38 = arith.constant dense<0.000000e+00> : vector<16xf32>
      %69 = vector.multi_reduction <add>, %68, %cst_38 [0] : vector<64x16xf32> to vector<16xf32>
      %70 = vector.shape_cast %69 : vector<16xf32> to vector<1x16xf32>
      %71 = arith.addf %65, %70 : vector<1x16xf32>
      %72 = arith.mulf %68, %26 : vector<64x16xf32>
      %cst_39 = arith.constant dense<0.000000e+00> : vector<16xf32>
      %73 = vector.multi_reduction <add>, %72, %cst_39 [0] : vector<64x16xf32> to vector<16xf32>
      %74 = vector.shape_cast %73 : vector<16xf32> to vector<1x16xf32>
      %75 = arith.addf %66, %74 : vector<1x16xf32>
      %76 = vector.broadcast %0 : vector<64x1xf32> to vector<64x16xf32>
      %77 = arith.mulf %43, %76 : vector<64x16xf32>
      %cst_40 = arith.constant dense<0.000000e+00> : vector<16xf32>
      %78 = vector.multi_reduction <add>, %77, %cst_40 [0] : vector<64x16xf32> to vector<16xf32>
      %79 = vector.shape_cast %78 : vector<16xf32> to vector<1x16xf32>
      %80 = arith.addf %71, %79 : vector<1x16xf32>
      %81 = arith.mulf %77, %43 : vector<64x16xf32>
      %cst_41 = arith.constant dense<0.000000e+00> : vector<16xf32>
      %82 = vector.multi_reduction <add>, %81, %cst_41 [0] : vector<64x16xf32> to vector<16xf32>
      %83 = vector.shape_cast %82 : vector<16xf32> to vector<1x16xf32>
      %84 = arith.addf %75, %83 : vector<1x16xf32>
      %85 = vector.broadcast %0 : vector<64x1xf32> to vector<64x16xf32>
      %86 = arith.mulf %60, %85 : vector<64x16xf32>
      %cst_42 = arith.constant dense<0.000000e+00> : vector<16xf32>
      %87 = vector.multi_reduction <add>, %86, %cst_42 [0] : vector<64x16xf32> to vector<16xf32>
      %88 = vector.shape_cast %87 : vector<16xf32> to vector<1x16xf32>
      %89 = arith.addf %80, %88 : vector<1x16xf32>
      %90 = arith.mulf %86, %60 : vector<64x16xf32>
      %cst_43 = arith.constant dense<0.000000e+00> : vector<16xf32>
      %91 = vector.multi_reduction <add>, %90, %cst_43 [0] : vector<64x16xf32> to vector<16xf32>
      %92 = vector.shape_cast %91 : vector<16xf32> to vector<1x16xf32>
      %93 = arith.addf %84, %92 : vector<1x16xf32>
      %94 = tpu.concatenate %89, %93 in 0 : vector<1x16xf32>, vector<1x16xf32> -> vector<2x16xf32>
      %c0_44 = arith.constant 0 : index
      %c0_45 = arith.constant 0 : index
      %95 = vector.load %arg14[%c0_44, %c0_45] : memref<2x16xf32, #tpu.memory_space<vmem>>, vector<2x16xf32>
      tpu.vector_store %arg14[%c0_44, %c0_45], %94 {strides = array<i32>} : memref<2x16xf32, #tpu.memory_space<vmem>>, vector<2x16xf32>,
      %c0_i32_46 = arith.constant 0 : i32
      %96 = arith.cmpi eq, %arg1, %c0_i32_46 : i32
      %97 = arith.extui %96 : i1 to i32
      %c0_i32_47 = arith.constant 0 : i32
      %98 = arith.cmpi ne, %97, %c0_i32_47 : i32
      scf.if %98 {
        %c0_84 = arith.constant 0 : index
        %c0_85 = arith.constant 0 : index
        %153 = vector.load %arg14[%c0_84, %c0_85] : memref<2x16xf32, #tpu.memory_space<vmem>>, vector<2x16xf32>
        %154 = vector.extract_strided_slice %153 {offsets = [0, 0], sizes = [1, 16], strides = [1, 1]} : vector<2x16xf32> to vector<1x16xf32>
        %cst_86 = arith.constant 1.920000e+02 : f32
        %155 = vector.broadcast %cst_86 : f32 to vector<1x16xf32>
        %156 = arith.divf %154, %155 : vector<1x16xf32>
        %157 = vector.extract_strided_slice %153 {offsets = [1, 0], sizes = [1, 16], strides = [1, 1]} : vector<2x16xf32> to vector<1x16xf32>
        %cst_87 = arith.constant 1.920000e+02 : f32
        %158 = vector.broadcast %cst_87 : f32 to vector<1x16xf32>
        %159 = arith.divf %157, %158 : vector<1x16xf32>
        %160 = arith.mulf %156, %156 : vector<1x16xf32>
        %161 = arith.subf %159, %160 : vector<1x16xf32>
        %cst_88 = arith.constant 9.99999974E-6 : f32
        %162 = vector.broadcast %cst_88 : f32 to vector<1x16xf32>
        %163 = arith.addf %161, %162 : vector<1x16xf32>
        %164 = math.rsqrt %163 : vector<1x16xf32>
        %165 = tpu.concatenate %156, %164 in 0 : vector<1x16xf32>, vector<1x16xf32> -> vector<2x16xf32>
        %c0_89 = arith.constant 0 : index
        %c0_90 = arith.constant 0 : index
        %166 = vector.load %arg14[%c0_89, %c0_90] : memref<2x16xf32, #tpu.memory_space<vmem>>, vector<2x16xf32>
        tpu.vector_store %arg14[%c0_89, %c0_90], %165 {strides = array<i32>} : memref<2x16xf32, #tpu.memory_space<vmem>>, vector<2x16xf32>,
      } else {
      }
      %c0_48 = arith.constant 0 : index
      %c0_49 = arith.constant 0 : index
      %99 = vector.load %arg9[%c0_48, %c0_49] : memref<1x9xf32, #tpu.memory_space<vmem>>, vector<1x9xf32>
      %c0_50 = arith.constant 0 : index
      %c0_51 = arith.constant 0 : index
      %c0_52 = arith.constant 0 : index
      %100 = vector.load %arg3[%c0_50, %c0_51, %c0_52] : memref<3x64x3xf32, #tpu.memory_space<vmem>>, vector<1x64x3xf32>
      %101 = vector.shape_cast %100 : vector<1x64x3xf32> to vector<64x3xf32>
      %c0_53 = arith.constant 0 : index
      %c0_54 = arith.constant 0 : index
      %c0_55 = arith.constant 0 : index
      %102 = vector.load %arg8[%c0_53, %c0_54, %c0_55] : memref<3x3x9xf32, #tpu.memory_space<vmem>>, vector<1x3x9xf32>
      %103 = vector.shape_cast %102 : vector<1x3x9xf32> to vector<3x9xf32>
      %104 = arith.truncf %101 : vector<64x3xf32> to vector<64x3xbf16>
      %105 = arith.truncf %103 : vector<3x9xf32> to vector<3x9xbf16>
      %cst_56 = arith.constant dense<0.000000e+00> : vector<64x9xf32>
      %106 = tpu.matmul %104, %105, %cst_56 {dimension_numbers = #tpu.dot_dimension_numbers<[1], [0], [0], [1], [0, 0, 1, 1], [], []>} : vector<64x3xbf16>, vector<3x9xbf16>, vector<64x9xf32> -> vector<64x9xf32>
      %107 = vector.broadcast %99 : vector<1x9xf32> to vector<64x9xf32>
      %108 = arith.addf %107, %106 : vector<64x9xf32>
      %c1_57 = arith.constant 1 : index
      %c0_58 = arith.constant 0 : index
      %c0_59 = arith.constant 0 : index
      %109 = vector.load %arg3[%c1_57, %c0_58, %c0_59] : memref<3x64x3xf32, #tpu.memory_space<vmem>>, vector<1x64x3xf32>
      %110 = vector.shape_cast %109 : vector<1x64x3xf32> to vector<64x3xf32>
      %c1_60 = arith.constant 1 : index
      %c0_61 = arith.constant 0 : index
      %c0_62 = arith.constant 0 : index
      %111 = vector.load %arg8[%c1_60, %c0_61, %c0_62] : memref<3x3x9xf32, #tpu.memory_space<vmem>>, vector<1x3x9xf32>
      %112 = vector.shape_cast %111 : vector<1x3x9xf32> to vector<3x9xf32>
      %113 = arith.truncf %110 : vector<64x3xf32> to vector<64x3xbf16>
      %114 = arith.truncf %112 : vector<3x9xf32> to vector<3x9xbf16>
      %cst_63 = arith.constant dense<0.000000e+00> : vector<64x9xf32>
      %115 = tpu.matmul %113, %114, %cst_63 {dimension_numbers = #tpu.dot_dimension_numbers<[1], [0], [0], [1], [0, 0, 1, 1], [], []>} : vector<64x3xbf16>, vector<3x9xbf16>, vector<64x9xf32> -> vector<64x9xf32>
      %116 = arith.addf %108, %115 : vector<64x9xf32>
      %c2_64 = arith.constant 2 : index
      %c0_65 = arith.constant 0 : index
      %c0_66 = arith.constant 0 : index
      %117 = vector.load %arg3[%c2_64, %c0_65, %c0_66] : memref<3x64x3xf32, #tpu.memory_space<vmem>>, vector<1x64x3xf32>
      %118 = vector.shape_cast %117 : vector<1x64x3xf32> to vector<64x3xf32>
      %c2_67 = arith.constant 2 : index
      %c0_68 = arith.constant 0 : index
      %c0_69 = arith.constant 0 : index
      %119 = vector.load %arg8[%c2_67, %c0_68, %c0_69] : memref<3x3x9xf32, #tpu.memory_space<vmem>>, vector<1x3x9xf32>
      %120 = vector.shape_cast %119 : vector<1x3x9xf32> to vector<3x9xf32>
      %121 = arith.truncf %118 : vector<64x3xf32> to vector<64x3xbf16>
      %122 = arith.truncf %120 : vector<3x9xf32> to vector<3x9xbf16>
      %cst_70 = arith.constant dense<0.000000e+00> : vector<64x9xf32>
      %123 = tpu.matmul %121, %122, %cst_70 {dimension_numbers = #tpu.dot_dimension_numbers<[1], [0], [0], [1], [0, 0, 1, 1], [], []>} : vector<64x3xbf16>, vector<3x9xbf16>, vector<64x9xf32> -> vector<64x9xf32>
      %124 = arith.addf %116, %123 : vector<64x9xf32>
      %cst_71 = arith.constant 0.000000e+00 : f32
      %125 = vector.broadcast %cst_71 : f32 to vector<64x9xf32>
      %126 = arith.cmpf ogt, %124, %125 : vector<64x9xf32>
      %cst_72 = arith.constant 0.000000e+00 : f32
      %127 = vector.broadcast %cst_72 : f32 to vector<64x9xf32>
      %128 = arith.minimumf %124, %127 : vector<64x9xf32>
      %129 = math.exp %128 : vector<64x9xf32>
      %cst_73 = arith.constant 1.000000e+00 : f32
      %130 = vector.broadcast %cst_73 : f32 to vector<64x9xf32>
      %131 = arith.subf %129, %130 : vector<64x9xf32>
      %132 = arith.select %126, %124, %131 : vector<64x9xi1>, vector<64x9xf32>
      %c0_i32_74 = arith.constant 0 : i32
      %133 = arith.cmpi eq, %arg1, %c0_i32_74 : i32
      %134 = arith.extui %133 : i1 to i32
      %c0_i32_75 = arith.constant 0 : i32
      %135 = arith.cmpi ne, %134, %c0_i32_75 : i32
      scf.if %135 {
        %cst_84 = arith.constant 0.000000e+00 : f32
        %153 = vector.broadcast %cst_84 : f32 to vector<2x9xf32>
        %c0_85 = arith.constant 0 : index
        %c0_86 = arith.constant 0 : index
        %154 = vector.load %arg16[%c0_85, %c0_86] : memref<2x9xf32, #tpu.memory_space<vmem>>, vector<2x9xf32>
        tpu.vector_store %arg16[%c0_85, %c0_86], %153 {strides = array<i32>} : memref<2x9xf32, #tpu.memory_space<vmem>>, vector<2x9xf32>,
      } else {
      }
      %c0_76 = arith.constant 0 : index
      %c0_77 = arith.constant 0 : index
      %136 = vector.load %arg16[%c0_76, %c0_77] : memref<2x9xf32, #tpu.memory_space<vmem>>, vector<2x9xf32>
      %137 = vector.extract_strided_slice %136 {offsets = [0, 0], sizes = [1, 9], strides = [1, 1]} : vector<2x9xf32> to vector<1x9xf32>
      %138 = vector.extract_strided_slice %136 {offsets = [1, 0], sizes = [1, 9], strides = [1, 1]} : vector<2x9xf32> to vector<1x9xf32>
      %139 = vector.broadcast %0 : vector<64x1xf32> to vector<64x9xf32>
      %140 = arith.mulf %132, %139 : vector<64x9xf32>
      %cst_78 = arith.constant dense<0.000000e+00> : vector<9xf32>
      %141 = vector.multi_reduction <add>, %140, %cst_78 [0] : vector<64x9xf32> to vector<9xf32>
      %142 = vector.shape_cast %141 : vector<9xf32> to vector<1x9xf32>
      %143 = arith.addf %137, %142 : vector<1x9xf32>
      %144 = arith.mulf %140, %132 : vector<64x9xf32>
      %cst_79 = arith.constant dense<0.000000e+00> : vector<9xf32>
      %145 = vector.multi_reduction <add>, %144, %cst_79 [0] : vector<64x9xf32> to vector<9xf32>
      %146 = vector.shape_cast %145 : vector<9xf32> to vector<1x9xf32>
      %147 = arith.addf %138, %146 : vector<1x9xf32>
      %148 = tpu.concatenate %143, %147 in 0 : vector<1x9xf32>, vector<1x9xf32> -> vector<2x9xf32>
      %c0_80 = arith.constant 0 : index
      %c0_81 = arith.constant 0 : index
      %149 = vector.load %arg16[%c0_80, %c0_81] : memref<2x9xf32, #tpu.memory_space<vmem>>, vector<2x9xf32>
      tpu.vector_store %arg16[%c0_80, %c0_81], %148 {strides = array<i32>} : memref<2x9xf32, #tpu.memory_space<vmem>>, vector<2x9xf32>,
      %c0_i32_82 = arith.constant 0 : i32
      %150 = arith.cmpi eq, %arg1, %c0_i32_82 : i32
      %151 = arith.extui %150 : i1 to i32
      %c0_i32_83 = arith.constant 0 : i32
      %152 = arith.cmpi ne, %151, %c0_i32_83 : i32
      scf.if %152 {
        %c0_84 = arith.constant 0 : index
        %c0_85 = arith.constant 0 : index
        %153 = vector.load %arg16[%c0_84, %c0_85] : memref<2x9xf32, #tpu.memory_space<vmem>>, vector<2x9xf32>
        %154 = vector.extract_strided_slice %153 {offsets = [0, 0], sizes = [1, 9], strides = [1, 1]} : vector<2x9xf32> to vector<1x9xf32>
        %cst_86 = arith.constant 6.400000e+01 : f32
        %155 = vector.broadcast %cst_86 : f32 to vector<1x9xf32>
        %156 = arith.divf %154, %155 : vector<1x9xf32>
        %157 = vector.extract_strided_slice %153 {offsets = [1, 0], sizes = [1, 9], strides = [1, 1]} : vector<2x9xf32> to vector<1x9xf32>
        %cst_87 = arith.constant 6.400000e+01 : f32
        %158 = vector.broadcast %cst_87 : f32 to vector<1x9xf32>
        %159 = arith.divf %157, %158 : vector<1x9xf32>
        %160 = arith.mulf %156, %156 : vector<1x9xf32>
        %161 = arith.subf %159, %160 : vector<1x9xf32>
        %cst_88 = arith.constant 9.99999974E-6 : f32
        %162 = vector.broadcast %cst_88 : f32 to vector<1x9xf32>
        %163 = arith.addf %161, %162 : vector<1x9xf32>
        %164 = math.rsqrt %163 : vector<1x9xf32>
        %165 = tpu.concatenate %156, %164 in 0 : vector<1x9xf32>, vector<1x9xf32> -> vector<2x9xf32>
        %c0_89 = arith.constant 0 : index
        %c0_90 = arith.constant 0 : index
        %166 = vector.load %arg16[%c0_89, %c0_90] : memref<2x9xf32, #tpu.memory_space<vmem>>, vector<2x9xf32>
        tpu.vector_store %arg16[%c0_89, %c0_90], %165 {strides = array<i32>} : memref<2x9xf32, #tpu.memory_space<vmem>>, vector<2x9xf32>,
      } else {
      }
    } else {
    }
    %c1_i32 = arith.constant 1 : i32
    %4 = arith.cmpi eq, %arg0, %c1_i32 : i32
    %5 = arith.extui %4 : i1 to i32
    %c0_i32_2 = arith.constant 0 : i32
    %6 = arith.cmpi ne, %5, %c0_i32_2 : i32
    scf.if %6 {
      %c0_4 = arith.constant 0 : index
      %c0_5 = arith.constant 0 : index
      %c0_6 = arith.constant 0 : index
      %10 = vector.load %arg3[%c0_4, %c0_5, %c0_6] : memref<3x64x3xf32, #tpu.memory_space<vmem>>, vector<1x64x3xf32>
      %11 = vector.shape_cast %10 : vector<1x64x3xf32> to vector<64x3xf32>
      %c0_7 = arith.constant 0 : index
      %c0_8 = arith.constant 0 : index
      %12 = vector.load %arg4[%c0_7, %c0_8] : memref<3x16xf32, #tpu.memory_space<vmem>>, vector<3x16xf32>
      %13 = arith.truncf %11 : vector<64x3xf32> to vector<64x3xbf16>
      %14 = arith.truncf %12 : vector<3x16xf32> to vector<3x16xbf16>
      %cst = arith.constant dense<0.000000e+00> : vector<64x16xf32>
      %15 = tpu.matmul %13, %14, %cst {dimension_numbers = #tpu.dot_dimension_numbers<[1], [0], [0], [1], [0, 0, 1, 1], [], []>} : vector<64x3xbf16>, vector<3x16xbf16>, vector<64x16xf32> -> vector<64x16xf32>
      %c0_9 = arith.constant 0 : index
      %c0_10 = arith.constant 0 : index
      %16 = vector.load %arg5[%c0_9, %c0_10] : memref<1x16xf32, #tpu.memory_space<vmem>>, vector<1x16xf32>
      %17 = vector.broadcast %16 : vector<1x16xf32> to vector<64x16xf32>
      %18 = arith.addf %15, %17 : vector<64x16xf32>
      %cst_11 = arith.constant 0.000000e+00 : f32
      %19 = vector.broadcast %cst_11 : f32 to vector<64x16xf32>
      %20 = arith.cmpf ogt, %18, %19 : vector<64x16xf32>
      %cst_12 = arith.constant 0.000000e+00 : f32
      %21 = vector.broadcast %cst_12 : f32 to vector<64x16xf32>
      %22 = arith.minimumf %18, %21 : vector<64x16xf32>
      %23 = math.exp %22 : vector<64x16xf32>
      %cst_13 = arith.constant 1.000000e+00 : f32
      %24 = vector.broadcast %cst_13 : f32 to vector<64x16xf32>
      %25 = arith.subf %23, %24 : vector<64x16xf32>
      %26 = arith.select %20, %18, %25 : vector<64x16xi1>, vector<64x16xf32>
      %c0_14 = arith.constant 0 : index
      %c0_15 = arith.constant 0 : index
      %27 = vector.load %arg14[%c0_14, %c0_15] : memref<2x16xf32, #tpu.memory_space<vmem>>, vector<2x16xf32>
      %28 = vector.extract_strided_slice %27 {offsets = [0, 0], sizes = [1, 16], strides = [1, 1]} : vector<2x16xf32> to vector<1x16xf32>
      %29 = vector.broadcast %28 : vector<1x16xf32> to vector<64x16xf32>
      %30 = arith.subf %26, %29 : vector<64x16xf32>
      %31 = vector.extract_strided_slice %27 {offsets = [1, 0], sizes = [1, 16], strides = [1, 1]} : vector<2x16xf32> to vector<1x16xf32>
      %32 = vector.broadcast %31 : vector<1x16xf32> to vector<64x16xf32>
      %33 = arith.mulf %30, %32 : vector<64x16xf32>
      %c0_16 = arith.constant 0 : index
      %c0_17 = arith.constant 0 : index
      %34 = vector.load %arg6[%c0_16, %c0_17] : memref<16x16xf32, #tpu.memory_space<vmem>>, vector<16x16xf32>
      %35 = arith.truncf %33 : vector<64x16xf32> to vector<64x16xbf16>
      %36 = arith.truncf %34 : vector<16x16xf32> to vector<16x16xbf16>
      %cst_18 = arith.constant dense<0.000000e+00> : vector<64x16xf32>
      %37 = tpu.matmul %35, %36, %cst_18 {dimension_numbers = #tpu.dot_dimension_numbers<[1], [0], [0], [1], [0, 0, 1, 1], [], []>} : vector<64x16xbf16>, vector<16x16xbf16>, vector<64x16xf32> -> vector<64x16xf32>
      %c0_19 = arith.constant 0 : index
      %c0_20 = arith.constant 0 : index
      %38 = vector.load %arg7[%c0_19, %c0_20] : memref<1x16xf32, #tpu.memory_space<vmem>>, vector<1x16xf32>
      %39 = vector.broadcast %38 : vector<1x16xf32> to vector<64x16xf32>
      %40 = arith.addf %37, %39 : vector<64x16xf32>
      %cst_21 = arith.constant 0.000000e+00 : f32
      %41 = vector.broadcast %cst_21 : f32 to vector<64x16xf32>
      %42 = arith.cmpf ogt, %40, %41 : vector<64x16xf32>
      %cst_22 = arith.constant 0.000000e+00 : f32
      %43 = vector.broadcast %cst_22 : f32 to vector<64x16xf32>
      %44 = arith.minimumf %40, %43 : vector<64x16xf32>
      %45 = math.exp %44 : vector<64x16xf32>
      %cst_23 = arith.constant 1.000000e+00 : f32
      %46 = vector.broadcast %cst_23 : f32 to vector<64x16xf32>
      %47 = arith.subf %45, %46 : vector<64x16xf32>
      %48 = arith.select %42, %40, %47 : vector<64x16xi1>, vector<64x16xf32>
      %c1 = arith.constant 1 : index
      %c0_24 = arith.constant 0 : index
      %c0_25 = arith.constant 0 : index
      %49 = vector.load %arg3[%c1, %c0_24, %c0_25] : memref<3x64x3xf32, #tpu.memory_space<vmem>>, vector<1x64x3xf32>
      %50 = vector.shape_cast %49 : vector<1x64x3xf32> to vector<64x3xf32>
      %c0_26 = arith.constant 0 : index
      %c0_27 = arith.constant 0 : index
      %51 = vector.load %arg4[%c0_26, %c0_27] : memref<3x16xf32, #tpu.memory_space<vmem>>, vector<3x16xf32>
      %52 = arith.truncf %50 : vector<64x3xf32> to vector<64x3xbf16>
      %53 = arith.truncf %51 : vector<3x16xf32> to vector<3x16xbf16>
      %cst_28 = arith.constant dense<0.000000e+00> : vector<64x16xf32>
      %54 = tpu.matmul %52, %53, %cst_28 {dimension_numbers = #tpu.dot_dimension_numbers<[1], [0], [0], [1], [0, 0, 1, 1], [], []>} : vector<64x3xbf16>, vector<3x16xbf16>, vector<64x16xf32> -> vector<64x16xf32>
      %c0_29 = arith.constant 0 : index
      %c0_30 = arith.constant 0 : index
      %55 = vector.load %arg5[%c0_29, %c0_30] : memref<1x16xf32, #tpu.memory_space<vmem>>, vector<1x16xf32>
      %56 = vector.broadcast %55 : vector<1x16xf32> to vector<64x16xf32>
      %57 = arith.addf %54, %56 : vector<64x16xf32>
      %cst_31 = arith.constant 0.000000e+00 : f32
      %58 = vector.broadcast %cst_31 : f32 to vector<64x16xf32>
      %59 = arith.cmpf ogt, %57, %58 : vector<64x16xf32>
      %cst_32 = arith.constant 0.000000e+00 : f32
      %60 = vector.broadcast %cst_32 : f32 to vector<64x16xf32>
      %61 = arith.minimumf %57, %60 : vector<64x16xf32>
      %62 = math.exp %61 : vector<64x16xf32>
      %cst_33 = arith.constant 1.000000e+00 : f32
      %63 = vector.broadcast %cst_33 : f32 to vector<64x16xf32>
      %64 = arith.subf %62, %63 : vector<64x16xf32>
      %65 = arith.select %59, %57, %64 : vector<64x16xi1>, vector<64x16xf32>
      %c0_34 = arith.constant 0 : index
      %c0_35 = arith.constant 0 : index
      %66 = vector.load %arg14[%c0_34, %c0_35] : memref<2x16xf32, #tpu.memory_space<vmem>>, vector<2x16xf32>
      %67 = vector.extract_strided_slice %66 {offsets = [0, 0], sizes = [1, 16], strides = [1, 1]} : vector<2x16xf32> to vector<1x16xf32>
      %68 = vector.broadcast %67 : vector<1x16xf32> to vector<64x16xf32>
      %69 = arith.subf %65, %68 : vector<64x16xf32>
      %70 = vector.extract_strided_slice %66 {offsets = [1, 0], sizes = [1, 16], strides = [1, 1]} : vector<2x16xf32> to vector<1x16xf32>
      %71 = vector.broadcast %70 : vector<1x16xf32> to vector<64x16xf32>
      %72 = arith.mulf %69, %71 : vector<64x16xf32>
      %c0_36 = arith.constant 0 : index
      %c0_37 = arith.constant 0 : index
      %73 = vector.load %arg6[%c0_36, %c0_37] : memref<16x16xf32, #tpu.memory_space<vmem>>, vector<16x16xf32>
      %74 = arith.truncf %72 : vector<64x16xf32> to vector<64x16xbf16>
      %75 = arith.truncf %73 : vector<16x16xf32> to vector<16x16xbf16>
      %cst_38 = arith.constant dense<0.000000e+00> : vector<64x16xf32>
      %76 = tpu.matmul %74, %75, %cst_38 {dimension_numbers = #tpu.dot_dimension_numbers<[1], [0], [0], [1], [0, 0, 1, 1], [], []>} : vector<64x16xbf16>, vector<16x16xbf16>, vector<64x16xf32> -> vector<64x16xf32>
      %c0_39 = arith.constant 0 : index
      %c0_40 = arith.constant 0 : index
      %77 = vector.load %arg7[%c0_39, %c0_40] : memref<1x16xf32, #tpu.memory_space<vmem>>, vector<1x16xf32>
      %78 = vector.broadcast %77 : vector<1x16xf32> to vector<64x16xf32>
      %79 = arith.addf %76, %78 : vector<64x16xf32>
      %cst_41 = arith.constant 0.000000e+00 : f32
      %80 = vector.broadcast %cst_41 : f32 to vector<64x16xf32>
      %81 = arith.cmpf ogt, %79, %80 : vector<64x16xf32>
      %cst_42 = arith.constant 0.000000e+00 : f32
      %82 = vector.broadcast %cst_42 : f32 to vector<64x16xf32>
      %83 = arith.minimumf %79, %82 : vector<64x16xf32>
      %84 = math.exp %83 : vector<64x16xf32>
      %cst_43 = arith.constant 1.000000e+00 : f32
      %85 = vector.broadcast %cst_43 : f32 to vector<64x16xf32>
      %86 = arith.subf %84, %85 : vector<64x16xf32>
      %87 = arith.select %81, %79, %86 : vector<64x16xi1>, vector<64x16xf32>
      %c2 = arith.constant 2 : index
      %c0_44 = arith.constant 0 : index
      %c0_45 = arith.constant 0 : index
      %88 = vector.load %arg3[%c2, %c0_44, %c0_45] : memref<3x64x3xf32, #tpu.memory_space<vmem>>, vector<1x64x3xf32>
      %89 = vector.shape_cast %88 : vector<1x64x3xf32> to vector<64x3xf32>
      %c0_46 = arith.constant 0 : index
      %c0_47 = arith.constant 0 : index
      %90 = vector.load %arg4[%c0_46, %c0_47] : memref<3x16xf32, #tpu.memory_space<vmem>>, vector<3x16xf32>
      %91 = arith.truncf %89 : vector<64x3xf32> to vector<64x3xbf16>
      %92 = arith.truncf %90 : vector<3x16xf32> to vector<3x16xbf16>
      %cst_48 = arith.constant dense<0.000000e+00> : vector<64x16xf32>
      %93 = tpu.matmul %91, %92, %cst_48 {dimension_numbers = #tpu.dot_dimension_numbers<[1], [0], [0], [1], [0, 0, 1, 1], [], []>} : vector<64x3xbf16>, vector<3x16xbf16>, vector<64x16xf32> -> vector<64x16xf32>
      %c0_49 = arith.constant 0 : index
      %c0_50 = arith.constant 0 : index
      %94 = vector.load %arg5[%c0_49, %c0_50] : memref<1x16xf32, #tpu.memory_space<vmem>>, vector<1x16xf32>
      %95 = vector.broadcast %94 : vector<1x16xf32> to vector<64x16xf32>
      %96 = arith.addf %93, %95 : vector<64x16xf32>
      %cst_51 = arith.constant 0.000000e+00 : f32
      %97 = vector.broadcast %cst_51 : f32 to vector<64x16xf32>
      %98 = arith.cmpf ogt, %96, %97 : vector<64x16xf32>
      %cst_52 = arith.constant 0.000000e+00 : f32
      %99 = vector.broadcast %cst_52 : f32 to vector<64x16xf32>
      %100 = arith.minimumf %96, %99 : vector<64x16xf32>
      %101 = math.exp %100 : vector<64x16xf32>
      %cst_53 = arith.constant 1.000000e+00 : f32
      %102 = vector.broadcast %cst_53 : f32 to vector<64x16xf32>
      %103 = arith.subf %101, %102 : vector<64x16xf32>
      %104 = arith.select %98, %96, %103 : vector<64x16xi1>, vector<64x16xf32>
      %c0_54 = arith.constant 0 : index
      %c0_55 = arith.constant 0 : index
      %105 = vector.load %arg14[%c0_54, %c0_55] : memref<2x16xf32, #tpu.memory_space<vmem>>, vector<2x16xf32>
      %106 = vector.extract_strided_slice %105 {offsets = [0, 0], sizes = [1, 16], strides = [1, 1]} : vector<2x16xf32> to vector<1x16xf32>
      %107 = vector.broadcast %106 : vector<1x16xf32> to vector<64x16xf32>
      %108 = arith.subf %104, %107 : vector<64x16xf32>
      %109 = vector.extract_strided_slice %105 {offsets = [1, 0], sizes = [1, 16], strides = [1, 1]} : vector<2x16xf32> to vector<1x16xf32>
      %110 = vector.broadcast %109 : vector<1x16xf32> to vector<64x16xf32>
      %111 = arith.mulf %108, %110 : vector<64x16xf32>
      %c0_56 = arith.constant 0 : index
      %c0_57 = arith.constant 0 : index
      %112 = vector.load %arg6[%c0_56, %c0_57] : memref<16x16xf32, #tpu.memory_space<vmem>>, vector<16x16xf32>
      %113 = arith.truncf %111 : vector<64x16xf32> to vector<64x16xbf16>
      %114 = arith.truncf %112 : vector<16x16xf32> to vector<16x16xbf16>
      %cst_58 = arith.constant dense<0.000000e+00> : vector<64x16xf32>
      %115 = tpu.matmul %113, %114, %cst_58 {dimension_numbers = #tpu.dot_dimension_numbers<[1], [0], [0], [1], [0, 0, 1, 1], [], []>} : vector<64x16xbf16>, vector<16x16xbf16>, vector<64x16xf32> -> vector<64x16xf32>
      %c0_59 = arith.constant 0 : index
      %c0_60 = arith.constant 0 : index
      %116 = vector.load %arg7[%c0_59, %c0_60] : memref<1x16xf32, #tpu.memory_space<vmem>>, vector<1x16xf32>
      %117 = vector.broadcast %116 : vector<1x16xf32> to vector<64x16xf32>
      %118 = arith.addf %115, %117 : vector<64x16xf32>
      %cst_61 = arith.constant 0.000000e+00 : f32
      %119 = vector.broadcast %cst_61 : f32 to vector<64x16xf32>
      %120 = arith.cmpf ogt, %118, %119 : vector<64x16xf32>
      %cst_62 = arith.constant 0.000000e+00 : f32
      %121 = vector.broadcast %cst_62 : f32 to vector<64x16xf32>
      %122 = arith.minimumf %118, %121 : vector<64x16xf32>
      %123 = math.exp %122 : vector<64x16xf32>
      %cst_63 = arith.constant 1.000000e+00 : f32
      %124 = vector.broadcast %cst_63 : f32 to vector<64x16xf32>
      %125 = arith.subf %123, %124 : vector<64x16xf32>
      %126 = arith.select %120, %118, %125 : vector<64x16xi1>, vector<64x16xf32>
      %c0_i32_64 = arith.constant 0 : i32
      %127 = arith.cmpi eq, %arg1, %c0_i32_64 : i32
      %128 = arith.extui %127 : i1 to i32
      %c0_i32_65 = arith.constant 0 : i32
      %129 = arith.cmpi ne, %128, %c0_i32_65 : i32
      scf.if %129 {
        %cst_124 = arith.constant 0.000000e+00 : f32
        %241 = vector.broadcast %cst_124 : f32 to vector<2x16xf32>
        %c0_125 = arith.constant 0 : index
        %c0_126 = arith.constant 0 : index
        %242 = vector.load %arg15[%c0_125, %c0_126] : memref<2x16xf32, #tpu.memory_space<vmem>>, vector<2x16xf32>
        tpu.vector_store %arg15[%c0_125, %c0_126], %241 {strides = array<i32>} : memref<2x16xf32, #tpu.memory_space<vmem>>, vector<2x16xf32>,
      } else {
      }
      %c0_66 = arith.constant 0 : index
      %c0_67 = arith.constant 0 : index
      %130 = vector.load %arg15[%c0_66, %c0_67] : memref<2x16xf32, #tpu.memory_space<vmem>>, vector<2x16xf32>
      %131 = vector.extract_strided_slice %130 {offsets = [0, 0], sizes = [1, 16], strides = [1, 1]} : vector<2x16xf32> to vector<1x16xf32>
      %132 = vector.extract_strided_slice %130 {offsets = [1, 0], sizes = [1, 16], strides = [1, 1]} : vector<2x16xf32> to vector<1x16xf32>
      %133 = vector.broadcast %0 : vector<64x1xf32> to vector<64x16xf32>
      %134 = arith.mulf %48, %133 : vector<64x16xf32>
      %cst_68 = arith.constant dense<0.000000e+00> : vector<16xf32>
      %135 = vector.multi_reduction <add>, %134, %cst_68 [0] : vector<64x16xf32> to vector<16xf32>
      %136 = vector.shape_cast %135 : vector<16xf32> to vector<1x16xf32>
      %137 = arith.addf %131, %136 : vector<1x16xf32>
      %138 = arith.mulf %134, %48 : vector<64x16xf32>
      %cst_69 = arith.constant dense<0.000000e+00> : vector<16xf32>
      %139 = vector.multi_reduction <add>, %138, %cst_69 [0] : vector<64x16xf32> to vector<16xf32>
      %140 = vector.shape_cast %139 : vector<16xf32> to vector<1x16xf32>
      %141 = arith.addf %132, %140 : vector<1x16xf32>
      %142 = vector.broadcast %0 : vector<64x1xf32> to vector<64x16xf32>
      %143 = arith.mulf %87, %142 : vector<64x16xf32>
      %cst_70 = arith.constant dense<0.000000e+00> : vector<16xf32>
      %144 = vector.multi_reduction <add>, %143, %cst_70 [0] : vector<64x16xf32> to vector<16xf32>
      %145 = vector.shape_cast %144 : vector<16xf32> to vector<1x16xf32>
      %146 = arith.addf %137, %145 : vector<1x16xf32>
      %147 = arith.mulf %143, %87 : vector<64x16xf32>
      %cst_71 = arith.constant dense<0.000000e+00> : vector<16xf32>
      %148 = vector.multi_reduction <add>, %147, %cst_71 [0] : vector<64x16xf32> to vector<16xf32>
      %149 = vector.shape_cast %148 : vector<16xf32> to vector<1x16xf32>
      %150 = arith.addf %141, %149 : vector<1x16xf32>
      %151 = vector.broadcast %0 : vector<64x1xf32> to vector<64x16xf32>
      %152 = arith.mulf %126, %151 : vector<64x16xf32>
      %cst_72 = arith.constant dense<0.000000e+00> : vector<16xf32>
      %153 = vector.multi_reduction <add>, %152, %cst_72 [0] : vector<64x16xf32> to vector<16xf32>
      %154 = vector.shape_cast %153 : vector<16xf32> to vector<1x16xf32>
      %155 = arith.addf %146, %154 : vector<1x16xf32>
      %156 = arith.mulf %152, %126 : vector<64x16xf32>
      %cst_73 = arith.constant dense<0.000000e+00> : vector<16xf32>
      %157 = vector.multi_reduction <add>, %156, %cst_73 [0] : vector<64x16xf32> to vector<16xf32>
      %158 = vector.shape_cast %157 : vector<16xf32> to vector<1x16xf32>
      %159 = arith.addf %150, %158 : vector<1x16xf32>
      %160 = tpu.concatenate %155, %159 in 0 : vector<1x16xf32>, vector<1x16xf32> -> vector<2x16xf32>
      %c0_74 = arith.constant 0 : index
      %c0_75 = arith.constant 0 : index
      %161 = vector.load %arg15[%c0_74, %c0_75] : memref<2x16xf32, #tpu.memory_space<vmem>>, vector<2x16xf32>
      tpu.vector_store %arg15[%c0_74, %c0_75], %160 {strides = array<i32>} : memref<2x16xf32, #tpu.memory_space<vmem>>, vector<2x16xf32>,
      %c0_i32_76 = arith.constant 0 : i32
      %162 = arith.cmpi eq, %arg1, %c0_i32_76 : i32
      %163 = arith.extui %162 : i1 to i32
      %c0_i32_77 = arith.constant 0 : i32
      %164 = arith.cmpi ne, %163, %c0_i32_77 : i32
      scf.if %164 {
        %c0_124 = arith.constant 0 : index
        %c0_125 = arith.constant 0 : index
        %241 = vector.load %arg15[%c0_124, %c0_125] : memref<2x16xf32, #tpu.memory_space<vmem>>, vector<2x16xf32>
        %242 = vector.extract_strided_slice %241 {offsets = [0, 0], sizes = [1, 16], strides = [1, 1]} : vector<2x16xf32> to vector<1x16xf32>
        %cst_126 = arith.constant 1.920000e+02 : f32
        %243 = vector.broadcast %cst_126 : f32 to vector<1x16xf32>
        %244 = arith.divf %242, %243 : vector<1x16xf32>
        %245 = vector.extract_strided_slice %241 {offsets = [1, 0], sizes = [1, 16], strides = [1, 1]} : vector<2x16xf32> to vector<1x16xf32>
        %cst_127 = arith.constant 1.920000e+02 : f32
        %246 = vector.broadcast %cst_127 : f32 to vector<1x16xf32>
        %247 = arith.divf %245, %246 : vector<1x16xf32>
        %248 = arith.mulf %244, %244 : vector<1x16xf32>
        %249 = arith.subf %247, %248 : vector<1x16xf32>
        %cst_128 = arith.constant 9.99999974E-6 : f32
        %250 = vector.broadcast %cst_128 : f32 to vector<1x16xf32>
        %251 = arith.addf %249, %250 : vector<1x16xf32>
        %252 = math.rsqrt %251 : vector<1x16xf32>
        %253 = tpu.concatenate %244, %252 in 0 : vector<1x16xf32>, vector<1x16xf32> -> vector<2x16xf32>
        %c0_129 = arith.constant 0 : index
        %c0_130 = arith.constant 0 : index
        %254 = vector.load %arg15[%c0_129, %c0_130] : memref<2x16xf32, #tpu.memory_space<vmem>>, vector<2x16xf32>
        tpu.vector_store %arg15[%c0_129, %c0_130], %253 {strides = array<i32>} : memref<2x16xf32, #tpu.memory_space<vmem>>, vector<2x16xf32>,
      } else {
      }
      %c0_78 = arith.constant 0 : index
      %c0_79 = arith.constant 0 : index
      %165 = vector.load %arg9[%c0_78, %c0_79] : memref<1x9xf32, #tpu.memory_space<vmem>>, vector<1x9xf32>
      %c0_80 = arith.constant 0 : index
      %c0_81 = arith.constant 0 : index
      %c0_82 = arith.constant 0 : index
      %166 = vector.load %arg3[%c0_80, %c0_81, %c0_82] : memref<3x64x3xf32, #tpu.memory_space<vmem>>, vector<1x64x3xf32>
      %167 = vector.shape_cast %166 : vector<1x64x3xf32> to vector<64x3xf32>
      %c0_83 = arith.constant 0 : index
      %c0_84 = arith.constant 0 : index
      %c0_85 = arith.constant 0 : index
      %168 = vector.load %arg8[%c0_83, %c0_84, %c0_85] : memref<3x3x9xf32, #tpu.memory_space<vmem>>, vector<1x3x9xf32>
      %169 = vector.shape_cast %168 : vector<1x3x9xf32> to vector<3x9xf32>
      %170 = arith.truncf %167 : vector<64x3xf32> to vector<64x3xbf16>
      %171 = arith.truncf %169 : vector<3x9xf32> to vector<3x9xbf16>
      %cst_86 = arith.constant dense<0.000000e+00> : vector<64x9xf32>
      %172 = tpu.matmul %170, %171, %cst_86 {dimension_numbers = #tpu.dot_dimension_numbers<[1], [0], [0], [1], [0, 0, 1, 1], [], []>} : vector<64x3xbf16>, vector<3x9xbf16>, vector<64x9xf32> -> vector<64x9xf32>
      %173 = vector.broadcast %165 : vector<1x9xf32> to vector<64x9xf32>
      %174 = arith.addf %173, %172 : vector<64x9xf32>
      %c1_87 = arith.constant 1 : index
      %c0_88 = arith.constant 0 : index
      %c0_89 = arith.constant 0 : index
      %175 = vector.load %arg3[%c1_87, %c0_88, %c0_89] : memref<3x64x3xf32, #tpu.memory_space<vmem>>, vector<1x64x3xf32>
      %176 = vector.shape_cast %175 : vector<1x64x3xf32> to vector<64x3xf32>
      %c1_90 = arith.constant 1 : index
      %c0_91 = arith.constant 0 : index
      %c0_92 = arith.constant 0 : index
      %177 = vector.load %arg8[%c1_90, %c0_91, %c0_92] : memref<3x3x9xf32, #tpu.memory_space<vmem>>, vector<1x3x9xf32>
      %178 = vector.shape_cast %177 : vector<1x3x9xf32> to vector<3x9xf32>
      %179 = arith.truncf %176 : vector<64x3xf32> to vector<64x3xbf16>
      %180 = arith.truncf %178 : vector<3x9xf32> to vector<3x9xbf16>
      %cst_93 = arith.constant dense<0.000000e+00> : vector<64x9xf32>
      %181 = tpu.matmul %179, %180, %cst_93 {dimension_numbers = #tpu.dot_dimension_numbers<[1], [0], [0], [1], [0, 0, 1, 1], [], []>} : vector<64x3xbf16>, vector<3x9xbf16>, vector<64x9xf32> -> vector<64x9xf32>
      %182 = arith.addf %174, %181 : vector<64x9xf32>
      %c2_94 = arith.constant 2 : index
      %c0_95 = arith.constant 0 : index
      %c0_96 = arith.constant 0 : index
      %183 = vector.load %arg3[%c2_94, %c0_95, %c0_96] : memref<3x64x3xf32, #tpu.memory_space<vmem>>, vector<1x64x3xf32>
      %184 = vector.shape_cast %183 : vector<1x64x3xf32> to vector<64x3xf32>
      %c2_97 = arith.constant 2 : index
      %c0_98 = arith.constant 0 : index
      %c0_99 = arith.constant 0 : index
      %185 = vector.load %arg8[%c2_97, %c0_98, %c0_99] : memref<3x3x9xf32, #tpu.memory_space<vmem>>, vector<1x3x9xf32>
      %186 = vector.shape_cast %185 : vector<1x3x9xf32> to vector<3x9xf32>
      %187 = arith.truncf %184 : vector<64x3xf32> to vector<64x3xbf16>
      %188 = arith.truncf %186 : vector<3x9xf32> to vector<3x9xbf16>
      %cst_100 = arith.constant dense<0.000000e+00> : vector<64x9xf32>
      %189 = tpu.matmul %187, %188, %cst_100 {dimension_numbers = #tpu.dot_dimension_numbers<[1], [0], [0], [1], [0, 0, 1, 1], [], []>} : vector<64x3xbf16>, vector<3x9xbf16>, vector<64x9xf32> -> vector<64x9xf32>
      %190 = arith.addf %182, %189 : vector<64x9xf32>
      %cst_101 = arith.constant 0.000000e+00 : f32
      %191 = vector.broadcast %cst_101 : f32 to vector<64x9xf32>
      %192 = arith.cmpf ogt, %190, %191 : vector<64x9xf32>
      %cst_102 = arith.constant 0.000000e+00 : f32
      %193 = vector.broadcast %cst_102 : f32 to vector<64x9xf32>
      %194 = arith.minimumf %190, %193 : vector<64x9xf32>
      %195 = math.exp %194 : vector<64x9xf32>
      %cst_103 = arith.constant 1.000000e+00 : f32
      %196 = vector.broadcast %cst_103 : f32 to vector<64x9xf32>
      %197 = arith.subf %195, %196 : vector<64x9xf32>
      %198 = arith.select %192, %190, %197 : vector<64x9xi1>, vector<64x9xf32>
      %c0_104 = arith.constant 0 : index
      %c0_105 = arith.constant 0 : index
      %199 = vector.load %arg16[%c0_104, %c0_105] : memref<2x9xf32, #tpu.memory_space<vmem>>, vector<2x9xf32>
      %200 = vector.extract_strided_slice %199 {offsets = [0, 0], sizes = [1, 9], strides = [1, 1]} : vector<2x9xf32> to vector<1x9xf32>
      %201 = vector.broadcast %200 : vector<1x9xf32> to vector<64x9xf32>
      %202 = arith.subf %198, %201 : vector<64x9xf32>
      %203 = vector.extract_strided_slice %199 {offsets = [1, 0], sizes = [1, 9], strides = [1, 1]} : vector<2x9xf32> to vector<1x9xf32>
      %204 = vector.broadcast %203 : vector<1x9xf32> to vector<64x9xf32>
      %205 = arith.mulf %202, %204 : vector<64x9xf32>
      %c0_106 = arith.constant 0 : index
      %c0_107 = arith.constant 0 : index
      %206 = vector.load %arg10[%c0_106, %c0_107] : memref<9x9xf32, #tpu.memory_space<vmem>>, vector<9x9xf32>
      %207 = arith.truncf %205 : vector<64x9xf32> to vector<64x9xbf16>
      %208 = arith.truncf %206 : vector<9x9xf32> to vector<9x9xbf16>
      %cst_108 = arith.constant dense<0.000000e+00> : vector<64x9xf32>
      %209 = tpu.matmul %207, %208, %cst_108 {dimension_numbers = #tpu.dot_dimension_numbers<[1], [0], [0], [1], [0, 0, 1, 1], [], []>} : vector<64x9xbf16>, vector<9x9xbf16>, vector<64x9xf32> -> vector<64x9xf32>
      %c0_109 = arith.constant 0 : index
      %c0_110 = arith.constant 0 : index
      %210 = vector.load %arg11[%c0_109, %c0_110] : memref<1x9xf32, #tpu.memory_space<vmem>>, vector<1x9xf32>
      %211 = vector.broadcast %210 : vector<1x9xf32> to vector<64x9xf32>
      %212 = arith.addf %209, %211 : vector<64x9xf32>
      %cst_111 = arith.constant 0.000000e+00 : f32
      %213 = vector.broadcast %cst_111 : f32 to vector<64x9xf32>
      %214 = arith.cmpf ogt, %212, %213 : vector<64x9xf32>
      %cst_112 = arith.constant 0.000000e+00 : f32
      %215 = vector.broadcast %cst_112 : f32 to vector<64x9xf32>
      %216 = arith.minimumf %212, %215 : vector<64x9xf32>
      %217 = math.exp %216 : vector<64x9xf32>
      %cst_113 = arith.constant 1.000000e+00 : f32
      %218 = vector.broadcast %cst_113 : f32 to vector<64x9xf32>
      %219 = arith.subf %217, %218 : vector<64x9xf32>
      %220 = arith.select %214, %212, %219 : vector<64x9xi1>, vector<64x9xf32>
      %c0_i32_114 = arith.constant 0 : i32
      %221 = arith.cmpi eq, %arg1, %c0_i32_114 : i32
      %222 = arith.extui %221 : i1 to i32
      %c0_i32_115 = arith.constant 0 : i32
      %223 = arith.cmpi ne, %222, %c0_i32_115 : i32
      scf.if %223 {
        %cst_124 = arith.constant 0.000000e+00 : f32
        %241 = vector.broadcast %cst_124 : f32 to vector<2x9xf32>
        %c0_125 = arith.constant 0 : index
        %c0_126 = arith.constant 0 : index
        %242 = vector.load %arg17[%c0_125, %c0_126] : memref<2x9xf32, #tpu.memory_space<vmem>>, vector<2x9xf32>
        tpu.vector_store %arg17[%c0_125, %c0_126], %241 {strides = array<i32>} : memref<2x9xf32, #tpu.memory_space<vmem>>, vector<2x9xf32>,
      } else {
      }
      %c0_116 = arith.constant 0 : index
      %c0_117 = arith.constant 0 : index
      %224 = vector.load %arg17[%c0_116, %c0_117] : memref<2x9xf32, #tpu.memory_space<vmem>>, vector<2x9xf32>
      %225 = vector.extract_strided_slice %224 {offsets = [0, 0], sizes = [1, 9], strides = [1, 1]} : vector<2x9xf32> to vector<1x9xf32>
      %226 = vector.extract_strided_slice %224 {offsets = [1, 0], sizes = [1, 9], strides = [1, 1]} : vector<2x9xf32> to vector<1x9xf32>
      %227 = vector.broadcast %0 : vector<64x1xf32> to vector<64x9xf32>
      %228 = arith.mulf %220, %227 : vector<64x9xf32>
      %cst_118 = arith.constant dense<0.000000e+00> : vector<9xf32>
      %229 = vector.multi_reduction <add>, %228, %cst_118 [0] : vector<64x9xf32> to vector<9xf32>
      %230 = vector.shape_cast %229 : vector<9xf32> to vector<1x9xf32>
      %231 = arith.addf %225, %230 : vector<1x9xf32>
      %232 = arith.mulf %228, %220 : vector<64x9xf32>
      %cst_119 = arith.constant dense<0.000000e+00> : vector<9xf32>
      %233 = vector.multi_reduction <add>, %232, %cst_119 [0] : vector<64x9xf32> to vector<9xf32>
      %234 = vector.shape_cast %233 : vector<9xf32> to vector<1x9xf32>
      %235 = arith.addf %226, %234 : vector<1x9xf32>
      %236 = tpu.concatenate %231, %235 in 0 : vector<1x9xf32>, vector<1x9xf32> -> vector<2x9xf32>
      %c0_120 = arith.constant 0 : index
      %c0_121 = arith.constant 0 : index
      %237 = vector.load %arg17[%c0_120, %c0_121] : memref<2x9xf32, #tpu.memory_space<vmem>>, vector<2x9xf32>
      tpu.vector_store %arg17[%c0_120, %c0_121], %236 {strides = array<i32>} : memref<2x9xf32, #tpu.memory_space<vmem>>, vector<2x9xf32>,
      %c0_i32_122 = arith.constant 0 : i32
      %238 = arith.cmpi eq, %arg1, %c0_i32_122 : i32
      %239 = arith.extui %238 : i1 to i32
      %c0_i32_123 = arith.constant 0 : i32
      %240 = arith.cmpi ne, %239, %c0_i32_123 : i32
      scf.if %240 {
        %c0_124 = arith.constant 0 : index
        %c0_125 = arith.constant 0 : index
        %241 = vector.load %arg17[%c0_124, %c0_125] : memref<2x9xf32, #tpu.memory_space<vmem>>, vector<2x9xf32>
        %242 = vector.extract_strided_slice %241 {offsets = [0, 0], sizes = [1, 9], strides = [1, 1]} : vector<2x9xf32> to vector<1x9xf32>
        %cst_126 = arith.constant 6.400000e+01 : f32
        %243 = vector.broadcast %cst_126 : f32 to vector<1x9xf32>
        %244 = arith.divf %242, %243 : vector<1x9xf32>
        %245 = vector.extract_strided_slice %241 {offsets = [1, 0], sizes = [1, 9], strides = [1, 1]} : vector<2x9xf32> to vector<1x9xf32>
        %cst_127 = arith.constant 6.400000e+01 : f32
        %246 = vector.broadcast %cst_127 : f32 to vector<1x9xf32>
        %247 = arith.divf %245, %246 : vector<1x9xf32>
        %248 = arith.mulf %244, %244 : vector<1x9xf32>
        %249 = arith.subf %247, %248 : vector<1x9xf32>
        %cst_128 = arith.constant 9.99999974E-6 : f32
        %250 = vector.broadcast %cst_128 : f32 to vector<1x9xf32>
        %251 = arith.addf %249, %250 : vector<1x9xf32>
        %252 = math.rsqrt %251 : vector<1x9xf32>
        %253 = tpu.concatenate %244, %252 in 0 : vector<1x9xf32>, vector<1x9xf32> -> vector<2x9xf32>
        %c0_129 = arith.constant 0 : index
        %c0_130 = arith.constant 0 : index
        %254 = vector.load %arg17[%c0_129, %c0_130] : memref<2x9xf32, #tpu.memory_space<vmem>>, vector<2x9xf32>
        tpu.vector_store %arg17[%c0_129, %c0_130], %253 {strides = array<i32>} : memref<2x9xf32, #tpu.memory_space<vmem>>, vector<2x9xf32>,
      } else {
      }
    } else {
    }
    %c2_i32 = arith.constant 2 : i32
    %7 = arith.cmpi eq, %arg0, %c2_i32 : i32
    %8 = arith.extui %7 : i1 to i32
    %c0_i32_3 = arith.constant 0 : i32
    %9 = arith.cmpi ne, %8, %c0_i32_3 : i32
    scf.if %9 {
      %c0_4 = arith.constant 0 : index
      %c0_5 = arith.constant 0 : index
      %10 = vector.load %arg9[%c0_4, %c0_5] : memref<1x9xf32, #tpu.memory_space<vmem>>, vector<1x9xf32>
      %c0_6 = arith.constant 0 : index
      %c0_7 = arith.constant 0 : index
      %c0_8 = arith.constant 0 : index
      %11 = vector.load %arg3[%c0_6, %c0_7, %c0_8] : memref<3x64x3xf32, #tpu.memory_space<vmem>>, vector<1x64x3xf32>
      %12 = vector.shape_cast %11 : vector<1x64x3xf32> to vector<64x3xf32>
      %c0_9 = arith.constant 0 : index
      %c0_10 = arith.constant 0 : index
      %c0_11 = arith.constant 0 : index
      %13 = vector.load %arg8[%c0_9, %c0_10, %c0_11] : memref<3x3x9xf32, #tpu.memory_space<vmem>>, vector<1x3x9xf32>
      %14 = vector.shape_cast %13 : vector<1x3x9xf32> to vector<3x9xf32>
      %15 = arith.truncf %12 : vector<64x3xf32> to vector<64x3xbf16>
      %16 = arith.truncf %14 : vector<3x9xf32> to vector<3x9xbf16>
      %cst = arith.constant dense<0.000000e+00> : vector<64x9xf32>
      %17 = tpu.matmul %15, %16, %cst {dimension_numbers = #tpu.dot_dimension_numbers<[1], [0], [0], [1], [0, 0, 1, 1], [], []>} : vector<64x3xbf16>, vector<3x9xbf16>, vector<64x9xf32> -> vector<64x9xf32>
      %18 = vector.broadcast %10 : vector<1x9xf32> to vector<64x9xf32>
      %19 = arith.addf %18, %17 : vector<64x9xf32>
      %c1 = arith.constant 1 : index
      %c0_12 = arith.constant 0 : index
      %c0_13 = arith.constant 0 : index
      %20 = vector.load %arg3[%c1, %c0_12, %c0_13] : memref<3x64x3xf32, #tpu.memory_space<vmem>>, vector<1x64x3xf32>
      %21 = vector.shape_cast %20 : vector<1x64x3xf32> to vector<64x3xf32>
      %c1_14 = arith.constant 1 : index
      %c0_15 = arith.constant 0 : index
      %c0_16 = arith.constant 0 : index
      %22 = vector.load %arg8[%c1_14, %c0_15, %c0_16] : memref<3x3x9xf32, #tpu.memory_space<vmem>>, vector<1x3x9xf32>
      %23 = vector.shape_cast %22 : vector<1x3x9xf32> to vector<3x9xf32>
      %24 = arith.truncf %21 : vector<64x3xf32> to vector<64x3xbf16>
      %25 = arith.truncf %23 : vector<3x9xf32> to vector<3x9xbf16>
      %cst_17 = arith.constant dense<0.000000e+00> : vector<64x9xf32>
      %26 = tpu.matmul %24, %25, %cst_17 {dimension_numbers = #tpu.dot_dimension_numbers<[1], [0], [0], [1], [0, 0, 1, 1], [], []>} : vector<64x3xbf16>, vector<3x9xbf16>, vector<64x9xf32> -> vector<64x9xf32>
      %27 = arith.addf %19, %26 : vector<64x9xf32>
      %c2 = arith.constant 2 : index
      %c0_18 = arith.constant 0 : index
      %c0_19 = arith.constant 0 : index
      %28 = vector.load %arg3[%c2, %c0_18, %c0_19] : memref<3x64x3xf32, #tpu.memory_space<vmem>>, vector<1x64x3xf32>
      %29 = vector.shape_cast %28 : vector<1x64x3xf32> to vector<64x3xf32>
      %c2_20 = arith.constant 2 : index
      %c0_21 = arith.constant 0 : index
      %c0_22 = arith.constant 0 : index
      %30 = vector.load %arg8[%c2_20, %c0_21, %c0_22] : memref<3x3x9xf32, #tpu.memory_space<vmem>>, vector<1x3x9xf32>
      %31 = vector.shape_cast %30 : vector<1x3x9xf32> to vector<3x9xf32>
      %32 = arith.truncf %29 : vector<64x3xf32> to vector<64x3xbf16>
      %33 = arith.truncf %31 : vector<3x9xf32> to vector<3x9xbf16>
      %cst_23 = arith.constant dense<0.000000e+00> : vector<64x9xf32>
      %34 = tpu.matmul %32, %33, %cst_23 {dimension_numbers = #tpu.dot_dimension_numbers<[1], [0], [0], [1], [0, 0, 1, 1], [], []>} : vector<64x3xbf16>, vector<3x9xbf16>, vector<64x9xf32> -> vector<64x9xf32>
      %35 = arith.addf %27, %34 : vector<64x9xf32>
      %cst_24 = arith.constant 0.000000e+00 : f32
      %36 = vector.broadcast %cst_24 : f32 to vector<64x9xf32>
      %37 = arith.cmpf ogt, %35, %36 : vector<64x9xf32>
      %cst_25 = arith.constant 0.000000e+00 : f32
      %38 = vector.broadcast %cst_25 : f32 to vector<64x9xf32>
      %39 = arith.minimumf %35, %38 : vector<64x9xf32>
      %40 = math.exp %39 : vector<64x9xf32>
      %cst_26 = arith.constant 1.000000e+00 : f32
      %41 = vector.broadcast %cst_26 : f32 to vector<64x9xf32>
      %42 = arith.subf %40, %41 : vector<64x9xf32>
      %43 = arith.select %37, %35, %42 : vector<64x9xi1>, vector<64x9xf32>
      %c0_27 = arith.constant 0 : index
      %c0_28 = arith.constant 0 : index
      %44 = vector.load %arg16[%c0_27, %c0_28] : memref<2x9xf32, #tpu.memory_space<vmem>>, vector<2x9xf32>
      %45 = vector.extract_strided_slice %44 {offsets = [0, 0], sizes = [1, 9], strides = [1, 1]} : vector<2x9xf32> to vector<1x9xf32>
      %46 = vector.broadcast %45 : vector<1x9xf32> to vector<64x9xf32>
      %47 = arith.subf %43, %46 : vector<64x9xf32>
      %48 = vector.extract_strided_slice %44 {offsets = [1, 0], sizes = [1, 9], strides = [1, 1]} : vector<2x9xf32> to vector<1x9xf32>
      %49 = vector.broadcast %48 : vector<1x9xf32> to vector<64x9xf32>
      %50 = arith.mulf %47, %49 : vector<64x9xf32>
      %c0_29 = arith.constant 0 : index
      %c0_30 = arith.constant 0 : index
      %51 = vector.load %arg10[%c0_29, %c0_30] : memref<9x9xf32, #tpu.memory_space<vmem>>, vector<9x9xf32>
      %52 = arith.truncf %50 : vector<64x9xf32> to vector<64x9xbf16>
      %53 = arith.truncf %51 : vector<9x9xf32> to vector<9x9xbf16>
      %cst_31 = arith.constant dense<0.000000e+00> : vector<64x9xf32>
      %54 = tpu.matmul %52, %53, %cst_31 {dimension_numbers = #tpu.dot_dimension_numbers<[1], [0], [0], [1], [0, 0, 1, 1], [], []>} : vector<64x9xbf16>, vector<9x9xbf16>, vector<64x9xf32> -> vector<64x9xf32>
      %c0_32 = arith.constant 0 : index
      %c0_33 = arith.constant 0 : index
      %55 = vector.load %arg11[%c0_32, %c0_33] : memref<1x9xf32, #tpu.memory_space<vmem>>, vector<1x9xf32>
      %56 = vector.broadcast %55 : vector<1x9xf32> to vector<64x9xf32>
      %57 = arith.addf %54, %56 : vector<64x9xf32>
      %cst_34 = arith.constant 0.000000e+00 : f32
      %58 = vector.broadcast %cst_34 : f32 to vector<64x9xf32>
      %59 = arith.cmpf ogt, %57, %58 : vector<64x9xf32>
      %cst_35 = arith.constant 0.000000e+00 : f32
      %60 = vector.broadcast %cst_35 : f32 to vector<64x9xf32>
      %61 = arith.minimumf %57, %60 : vector<64x9xf32>
      %62 = math.exp %61 : vector<64x9xf32>
      %cst_36 = arith.constant 1.000000e+00 : f32
      %63 = vector.broadcast %cst_36 : f32 to vector<64x9xf32>
      %64 = arith.subf %62, %63 : vector<64x9xf32>
      %65 = arith.select %59, %57, %64 : vector<64x9xi1>, vector<64x9xf32>
      %c0_37 = arith.constant 0 : index
      %c0_38 = arith.constant 0 : index
      %66 = vector.load %arg17[%c0_37, %c0_38] : memref<2x9xf32, #tpu.memory_space<vmem>>, vector<2x9xf32>
      %67 = vector.extract_strided_slice %66 {offsets = [0, 0], sizes = [1, 9], strides = [1, 1]} : vector<2x9xf32> to vector<1x9xf32>
      %68 = vector.broadcast %67 : vector<1x9xf32> to vector<64x9xf32>
      %69 = arith.subf %65, %68 : vector<64x9xf32>
      %70 = vector.extract_strided_slice %66 {offsets = [1, 0], sizes = [1, 9], strides = [1, 1]} : vector<2x9xf32> to vector<1x9xf32>
      %71 = vector.broadcast %70 : vector<1x9xf32> to vector<64x9xf32>
      %72 = arith.mulf %69, %71 : vector<64x9xf32>
      %c0_39 = arith.constant 0 : index
      %c0_40 = arith.constant 0 : index
      %73 = vector.load %arg12[%c0_39, %c0_40] : memref<9x9xf32, #tpu.memory_space<vmem>>, vector<9x9xf32>
      %74 = arith.truncf %72 : vector<64x9xf32> to vector<64x9xbf16>
      %75 = arith.truncf %73 : vector<9x9xf32> to vector<9x9xbf16>
      %cst_41 = arith.constant dense<0.000000e+00> : vector<64x9xf32>
      %76 = tpu.matmul %74, %75, %cst_41 {dimension_numbers = #tpu.dot_dimension_numbers<[1], [0], [0], [1], [0, 0, 1, 1], [], []>} : vector<64x9xbf16>, vector<9x9xbf16>, vector<64x9xf32> -> vector<64x9xf32>
      %c0_42 = arith.constant 0 : index
      %c0_43 = arith.constant 0 : index
      %77 = vector.load %arg13[%c0_42, %c0_43] : memref<1x9xf32, #tpu.memory_space<vmem>>, vector<1x9xf32>
      %78 = vector.broadcast %77 : vector<1x9xf32> to vector<64x9xf32>
      %79 = arith.addf %76, %78 : vector<64x9xf32>
      %c0_i32_44 = arith.constant 0 : i32
      %80 = arith.cmpi eq, %arg1, %c0_i32_44 : i32
      %81 = arith.extui %80 : i1 to i32
      %c0_i32_45 = arith.constant 0 : i32
      %82 = arith.cmpi ne, %81, %c0_i32_45 : i32
      scf.if %82 {
        %cst_54 = arith.constant 0.000000e+00 : f32
        %100 = vector.broadcast %cst_54 : f32 to vector<2x9xf32>
        %c0_55 = arith.constant 0 : index
        %c0_56 = arith.constant 0 : index
        %101 = vector.load %arg18[%c0_55, %c0_56] : memref<2x9xf32, #tpu.memory_space<vmem>>, vector<2x9xf32>
        tpu.vector_store %arg18[%c0_55, %c0_56], %100 {strides = array<i32>} : memref<2x9xf32, #tpu.memory_space<vmem>>, vector<2x9xf32>,
      } else {
      }
      %c0_46 = arith.constant 0 : index
      %c0_47 = arith.constant 0 : index
      %83 = vector.load %arg18[%c0_46, %c0_47] : memref<2x9xf32, #tpu.memory_space<vmem>>, vector<2x9xf32>
      %84 = vector.extract_strided_slice %83 {offsets = [0, 0], sizes = [1, 9], strides = [1, 1]} : vector<2x9xf32> to vector<1x9xf32>
      %85 = vector.extract_strided_slice %83 {offsets = [1, 0], sizes = [1, 9], strides = [1, 1]} : vector<2x9xf32> to vector<1x9xf32>
      %86 = vector.broadcast %0 : vector<64x1xf32> to vector<64x9xf32>
      %87 = arith.mulf %79, %86 : vector<64x9xf32>
      %cst_48 = arith.constant dense<0.000000e+00> : vector<9xf32>
      %88 = vector.multi_reduction <add>, %87, %cst_48 [0] : vector<64x9xf32> to vector<9xf32>
      %89 = vector.shape_cast %88 : vector<9xf32> to vector<1x9xf32>
      %90 = arith.addf %84, %89 : vector<1x9xf32>
      %91 = arith.mulf %87, %79 : vector<64x9xf32>
      %cst_49 = arith.constant dense<0.000000e+00> : vector<9xf32>
      %92 = vector.multi_reduction <add>, %91, %cst_49 [0] : vector<64x9xf32> to vector<9xf32>
      %93 = vector.shape_cast %92 : vector<9xf32> to vector<1x9xf32>
      %94 = arith.addf %85, %93 : vector<1x9xf32>
      %95 = tpu.concatenate %90, %94 in 0 : vector<1x9xf32>, vector<1x9xf32> -> vector<2x9xf32>
      %c0_50 = arith.constant 0 : index
      %c0_51 = arith.constant 0 : index
      %96 = vector.load %arg18[%c0_50, %c0_51] : memref<2x9xf32, #tpu.memory_space<vmem>>, vector<2x9xf32>
      tpu.vector_store %arg18[%c0_50, %c0_51], %95 {strides = array<i32>} : memref<2x9xf32, #tpu.memory_space<vmem>>, vector<2x9xf32>,
      %c0_i32_52 = arith.constant 0 : i32
      %97 = arith.cmpi eq, %arg1, %c0_i32_52 : i32
      %98 = arith.extui %97 : i1 to i32
      %c0_i32_53 = arith.constant 0 : i32
      %99 = arith.cmpi ne, %98, %c0_i32_53 : i32
      scf.if %99 {
        %c0_54 = arith.constant 0 : index
        %c0_55 = arith.constant 0 : index
        %100 = vector.load %arg18[%c0_54, %c0_55] : memref<2x9xf32, #tpu.memory_space<vmem>>, vector<2x9xf32>
        %101 = vector.extract_strided_slice %100 {offsets = [0, 0], sizes = [1, 9], strides = [1, 1]} : vector<2x9xf32> to vector<1x9xf32>
        %cst_56 = arith.constant 6.400000e+01 : f32
        %102 = vector.broadcast %cst_56 : f32 to vector<1x9xf32>
        %103 = arith.divf %101, %102 : vector<1x9xf32>
        %104 = vector.extract_strided_slice %100 {offsets = [1, 0], sizes = [1, 9], strides = [1, 1]} : vector<2x9xf32> to vector<1x9xf32>
        %cst_57 = arith.constant 6.400000e+01 : f32
        %105 = vector.broadcast %cst_57 : f32 to vector<1x9xf32>
        %106 = arith.divf %104, %105 : vector<1x9xf32>
        %107 = arith.mulf %103, %103 : vector<1x9xf32>
        %108 = arith.subf %106, %107 : vector<1x9xf32>
        %cst_58 = arith.constant 9.99999974E-6 : f32
        %109 = vector.broadcast %cst_58 : f32 to vector<1x9xf32>
        %110 = arith.addf %108, %109 : vector<1x9xf32>
        %111 = math.rsqrt %110 : vector<1x9xf32>
        %112 = tpu.concatenate %103, %111 in 0 : vector<1x9xf32>, vector<1x9xf32> -> vector<2x9xf32>
        %c0_59 = arith.constant 0 : index
        %c0_60 = arith.constant 0 : index
        %113 = vector.load %arg18[%c0_59, %c0_60] : memref<2x9xf32, #tpu.memory_space<vmem>>, vector<2x9xf32>
        tpu.vector_store %arg18[%c0_59, %c0_60], %112 {strides = array<i32>} : memref<2x9xf32, #tpu.memory_space<vmem>>, vector<2x9xf32>,
      } else {
      }
    } else {
    }
    return
  }
  func.func @transform_0(%arg0: i32, %arg1: i32) -> (i32, i32) {
    %c0_i32 = arith.constant 0 : i32
    %c0_i32_0 = arith.constant 0 : i32
    return %arg1, %c0_i32 : i32, i32
  }
  func.func @transform_1(%arg0: i32, %arg1: i32) -> (i32, i32, i32) {
    %c0_i32 = arith.constant 0 : i32
    %c0_i32_0 = arith.constant 0 : i32
    %c0_i32_1 = arith.constant 0 : i32
    return %c0_i32, %arg1, %c0_i32_0 : i32, i32, i32
  }
  func.func @transform_2(%arg0: i32, %arg1: i32) -> (i32, i32) {
    %c0_i32 = arith.constant 0 : i32
    %c0_i32_0 = arith.constant 0 : i32
    %c0_i32_1 = arith.constant 0 : i32
    return %c0_i32, %c0_i32_0 : i32, i32
  }
  func.func @transform_3(%arg0: i32, %arg1: i32) -> (i32, i32) {
    %c0_i32 = arith.constant 0 : i32
    %c0_i32_0 = arith.constant 0 : i32
    %c0_i32_1 = arith.constant 0 : i32
    return %c0_i32, %c0_i32_0 : i32, i32
  }
  func.func @transform_4(%arg0: i32, %arg1: i32) -> (i32, i32) {
    %c0_i32 = arith.constant 0 : i32
    %c0_i32_0 = arith.constant 0 : i32
    %c0_i32_1 = arith.constant 0 : i32
    return %c0_i32, %c0_i32_0 : i32, i32
  }
  func.func @transform_5(%arg0: i32, %arg1: i32) -> (i32, i32) {
    %c0_i32 = arith.constant 0 : i32
    %c0_i32_0 = arith.constant 0 : i32
    %c0_i32_1 = arith.constant 0 : i32
    return %c0_i32, %c0_i32_0 : i32, i32
  }
  func.func @transform_6(%arg0: i32, %arg1: i32) -> (i32, i32, i32) {
    %c0_i32 = arith.constant 0 : i32
    %c0_i32_0 = arith.constant 0 : i32
    %c0_i32_1 = arith.constant 0 : i32
    %c0_i32_2 = arith.constant 0 : i32
    return %c0_i32, %c0_i32_0, %c0_i32_1 : i32, i32, i32
  }
  func.func @transform_7(%arg0: i32, %arg1: i32) -> (i32, i32) {
    %c0_i32 = arith.constant 0 : i32
    %c0_i32_0 = arith.constant 0 : i32
    %c0_i32_1 = arith.constant 0 : i32
    return %c0_i32, %c0_i32_0 : i32, i32
  }
  func.func @transform_8(%arg0: i32, %arg1: i32) -> (i32, i32) {
    %c0_i32 = arith.constant 0 : i32
    %c0_i32_0 = arith.constant 0 : i32
    %c0_i32_1 = arith.constant 0 : i32
    return %c0_i32, %c0_i32_0 : i32, i32
  }
  func.func @transform_9(%arg0: i32, %arg1: i32) -> (i32, i32) {
    %c0_i32 = arith.constant 0 : i32
    %c0_i32_0 = arith.constant 0 : i32
    %c0_i32_1 = arith.constant 0 : i32
    return %c0_i32, %c0_i32_0 : i32, i32
  }
  func.func @transform_10(%arg0: i32, %arg1: i32) -> (i32, i32) {
    %c0_i32 = arith.constant 0 : i32
    %c0_i32_0 = arith.constant 0 : i32
    %c0_i32_1 = arith.constant 0 : i32
    return %c0_i32, %c0_i32_0 : i32, i32
  }
  func.func @transform_11(%arg0: i32, %arg1: i32) -> (i32, i32) {
    %c0_i32 = arith.constant 0 : i32
    %c0_i32_0 = arith.constant 0 : i32
    %c0_i32_1 = arith.constant 0 : i32
    return %c0_i32, %c0_i32_0 : i32, i32
  }
  func.func @transform_12(%arg0: i32, %arg1: i32) -> (i32, i32) {
    %c0_i32 = arith.constant 0 : i32
    %c0_i32_0 = arith.constant 0 : i32
    %c0_i32_1 = arith.constant 0 : i32
    return %c0_i32, %c0_i32_0 : i32, i32
  }
  func.func @transform_13(%arg0: i32, %arg1: i32) -> (i32, i32) {
    %c0_i32 = arith.constant 0 : i32
    %c0_i32_0 = arith.constant 0 : i32
    %c0_i32_1 = arith.constant 0 : i32
    return %c0_i32, %c0_i32_0 : i32, i32
  }
  func.func @transform_14(%arg0: i32, %arg1: i32) -> (i32, i32) {
    %c0_i32 = arith.constant 0 : i32
    %c0_i32_0 = arith.constant 0 : i32
    %c0_i32_1 = arith.constant 0 : i32
    return %c0_i32, %c0_i32_0 : i32, i32
  }
  func.func @transform_15(%arg0: i32, %arg1: i32) -> (i32, i32) {
    %c0_i32 = arith.constant 0 : i32
    %c0_i32_0 = arith.constant 0 : i32
    %c0_i32_1 = arith.constant 0 : i32
    return %c0_i32, %c0_i32_0 : i32, i32
  }
  func.func @transform_16(%arg0: i32, %arg1: i32) -> (i32, i32) {
    %c0_i32 = arith.constant 0 : i32
    %c0_i32_0 = arith.constant 0 : i32
    %c0_i32_1 = arith.constant 0 : i32
    return %c0_i32, %c0_i32_0 : i32, i32
  }
}

module attributes {stable_mosaic.version = 11 : i64} {
  func.func @_apply_kernel(%arg0: i32, %arg1: memref<3x64x3xf32, #tpu.memory_space<vmem>>, %arg2: memref<3x64x8xf32, #tpu.memory_space<vmem>>, %arg3: memref<2x16xf32, #tpu.memory_space<vmem>>, %arg4: memref<2x16xf32, #tpu.memory_space<vmem>>, %arg5: memref<2x9xf32, #tpu.memory_space<vmem>>, %arg6: memref<2x9xf32, #tpu.memory_space<vmem>>, %arg7: memref<2x9xf32, #tpu.memory_space<vmem>>, %arg8: memref<3x16xf32, #tpu.memory_space<vmem>>, %arg9: memref<1x16xf32, #tpu.memory_space<vmem>>, %arg10: memref<16x16xf32, #tpu.memory_space<vmem>>, %arg11: memref<1x16xf32, #tpu.memory_space<vmem>>, %arg12: memref<3x3x9xf32, #tpu.memory_space<vmem>>, %arg13: memref<1x9xf32, #tpu.memory_space<vmem>>, %arg14: memref<9x9xf32, #tpu.memory_space<vmem>>, %arg15: memref<1x9xf32, #tpu.memory_space<vmem>>, %arg16: memref<9x9xf32, #tpu.memory_space<vmem>>, %arg17: memref<1x9xf32, #tpu.memory_space<vmem>>, %arg18: memref<72x48xf32, #tpu.memory_space<vmem>>, %arg19: memref<1x48xf32, #tpu.memory_space<vmem>>, %arg20: memref<48x128xf32, #tpu.memory_space<vmem>>, %arg21: memref<1x128xf32, #tpu.memory_space<vmem>>, %arg22: memref<64x128xf32, #tpu.memory_space<vmem>>) attributes {dimension_semantics = [#tpu.dimension_semantics<parallel>], iteration_bounds = array<i64: 1>, scalar_prefetch = 0 : i64, scratch_operands = 0 : i64, tpu.core_type = #tpu.core_type<tc>, window_params = [{transform_indices = @transform_0, window_bounds = array<i64: 3, 64, 3>}, {transform_indices = @transform_1, window_bounds = array<i64: 3, 64, 8>}, {pipeline_mode = #tpu.pipeline_mode<synchronous>, transform_indices = @transform_2, window_bounds = array<i64: 2, 16>}, {pipeline_mode = #tpu.pipeline_mode<synchronous>, transform_indices = @transform_3, window_bounds = array<i64: 2, 16>}, {pipeline_mode = #tpu.pipeline_mode<synchronous>, transform_indices = @transform_4, window_bounds = array<i64: 2, 9>}, {pipeline_mode = #tpu.pipeline_mode<synchronous>, transform_indices = @transform_5, window_bounds = array<i64: 2, 9>}, {pipeline_mode = #tpu.pipeline_mode<synchronous>, transform_indices = @transform_6, window_bounds = array<i64: 2, 9>}, {pipeline_mode = #tpu.pipeline_mode<synchronous>, transform_indices = @transform_7, window_bounds = array<i64: 3, 16>}, {pipeline_mode = #tpu.pipeline_mode<synchronous>, transform_indices = @transform_8, window_bounds = array<i64: 1, 16>}, {pipeline_mode = #tpu.pipeline_mode<synchronous>, transform_indices = @transform_9, window_bounds = array<i64: 16, 16>}, {pipeline_mode = #tpu.pipeline_mode<synchronous>, transform_indices = @transform_10, window_bounds = array<i64: 1, 16>}, {pipeline_mode = #tpu.pipeline_mode<synchronous>, transform_indices = @transform_11, window_bounds = array<i64: 3, 3, 9>}, {pipeline_mode = #tpu.pipeline_mode<synchronous>, transform_indices = @transform_12, window_bounds = array<i64: 1, 9>}, {pipeline_mode = #tpu.pipeline_mode<synchronous>, transform_indices = @transform_13, window_bounds = array<i64: 9, 9>}, {pipeline_mode = #tpu.pipeline_mode<synchronous>, transform_indices = @transform_14, window_bounds = array<i64: 1, 9>}, {pipeline_mode = #tpu.pipeline_mode<synchronous>, transform_indices = @transform_15, window_bounds = array<i64: 9, 9>}, {pipeline_mode = #tpu.pipeline_mode<synchronous>, transform_indices = @transform_16, window_bounds = array<i64: 1, 9>}, {pipeline_mode = #tpu.pipeline_mode<synchronous>, transform_indices = @transform_17, window_bounds = array<i64: 72, 48>}, {pipeline_mode = #tpu.pipeline_mode<synchronous>, transform_indices = @transform_18, window_bounds = array<i64: 1, 48>}, {pipeline_mode = #tpu.pipeline_mode<synchronous>, transform_indices = @transform_19, window_bounds = array<i64: 48, 128>}, {pipeline_mode = #tpu.pipeline_mode<synchronous>, transform_indices = @transform_20, window_bounds = array<i64: 1, 128>}, {transform_indices = @transform_21, window_bounds = array<i64: 64, 128>}]} {
    %c0 = arith.constant 0 : index
    %c0_0 = arith.constant 0 : index
    %0 = vector.load %arg3[%c0, %c0_0] : memref<2x16xf32, #tpu.memory_space<vmem>>, vector<2x16xf32>
    %c0_1 = arith.constant 0 : index
    %c0_2 = arith.constant 0 : index
    %1 = vector.load %arg4[%c0_1, %c0_2] : memref<2x16xf32, #tpu.memory_space<vmem>>, vector<2x16xf32>
    %c0_3 = arith.constant 0 : index
    %c0_4 = arith.constant 0 : index
    %2 = vector.load %arg5[%c0_3, %c0_4] : memref<2x9xf32, #tpu.memory_space<vmem>>, vector<2x9xf32>
    %c0_5 = arith.constant 0 : index
    %c0_6 = arith.constant 0 : index
    %3 = vector.load %arg6[%c0_5, %c0_6] : memref<2x9xf32, #tpu.memory_space<vmem>>, vector<2x9xf32>
    %c0_7 = arith.constant 0 : index
    %c0_8 = arith.constant 0 : index
    %4 = vector.load %arg7[%c0_7, %c0_8] : memref<2x9xf32, #tpu.memory_space<vmem>>, vector<2x9xf32>
    %c0_9 = arith.constant 0 : index
    %c0_10 = arith.constant 0 : index
    %c0_11 = arith.constant 0 : index
    %5 = vector.load %arg1[%c0_9, %c0_10, %c0_11] : memref<3x64x3xf32, #tpu.memory_space<vmem>>, vector<1x64x3xf32>
    %6 = vector.shape_cast %5 : vector<1x64x3xf32> to vector<64x3xf32>
    %c0_12 = arith.constant 0 : index
    %c0_13 = arith.constant 0 : index
    %7 = vector.load %arg8[%c0_12, %c0_13] : memref<3x16xf32, #tpu.memory_space<vmem>>, vector<3x16xf32>
    %8 = arith.truncf %6 : vector<64x3xf32> to vector<64x3xbf16>
    %9 = arith.truncf %7 : vector<3x16xf32> to vector<3x16xbf16>
    %cst = arith.constant dense<0.000000e+00> : vector<64x16xf32>
    %10 = tpu.matmul %8, %9, %cst {dimension_numbers = #tpu.dot_dimension_numbers<[1], [0], [0], [1], [0, 0, 1, 1], [], []>} : vector<64x3xbf16>, vector<3x16xbf16>, vector<64x16xf32> -> vector<64x16xf32>
    %c0_14 = arith.constant 0 : index
    %c0_15 = arith.constant 0 : index
    %11 = vector.load %arg9[%c0_14, %c0_15] : memref<1x16xf32, #tpu.memory_space<vmem>>, vector<1x16xf32>
    %12 = vector.broadcast %11 : vector<1x16xf32> to vector<64x16xf32>
    %13 = arith.addf %10, %12 : vector<64x16xf32>
    %cst_16 = arith.constant 0.000000e+00 : f32
    %14 = vector.broadcast %cst_16 : f32 to vector<64x16xf32>
    %15 = arith.cmpf ogt, %13, %14 : vector<64x16xf32>
    %cst_17 = arith.constant 0.000000e+00 : f32
    %16 = vector.broadcast %cst_17 : f32 to vector<64x16xf32>
    %17 = arith.minimumf %13, %16 : vector<64x16xf32>
    %18 = math.exp %17 : vector<64x16xf32>
    %cst_18 = arith.constant 1.000000e+00 : f32
    %19 = vector.broadcast %cst_18 : f32 to vector<64x16xf32>
    %20 = arith.subf %18, %19 : vector<64x16xf32>
    %21 = arith.select %15, %13, %20 : vector<64x16xi1>, vector<64x16xf32>
    %22 = vector.extract_strided_slice %0 {offsets = [0, 0], sizes = [1, 16], strides = [1, 1]} : vector<2x16xf32> to vector<1x16xf32>
    %23 = vector.broadcast %22 : vector<1x16xf32> to vector<64x16xf32>
    %24 = arith.subf %21, %23 : vector<64x16xf32>
    %25 = vector.extract_strided_slice %0 {offsets = [1, 0], sizes = [1, 16], strides = [1, 1]} : vector<2x16xf32> to vector<1x16xf32>
    %26 = vector.broadcast %25 : vector<1x16xf32> to vector<64x16xf32>
    %27 = arith.mulf %24, %26 : vector<64x16xf32>
    %c0_19 = arith.constant 0 : index
    %c0_20 = arith.constant 0 : index
    %28 = vector.load %arg10[%c0_19, %c0_20] : memref<16x16xf32, #tpu.memory_space<vmem>>, vector<16x16xf32>
    %29 = arith.truncf %27 : vector<64x16xf32> to vector<64x16xbf16>
    %30 = arith.truncf %28 : vector<16x16xf32> to vector<16x16xbf16>
    %cst_21 = arith.constant dense<0.000000e+00> : vector<64x16xf32>
    %31 = tpu.matmul %29, %30, %cst_21 {dimension_numbers = #tpu.dot_dimension_numbers<[1], [0], [0], [1], [0, 0, 1, 1], [], []>} : vector<64x16xbf16>, vector<16x16xbf16>, vector<64x16xf32> -> vector<64x16xf32>
    %c0_22 = arith.constant 0 : index
    %c0_23 = arith.constant 0 : index
    %32 = vector.load %arg11[%c0_22, %c0_23] : memref<1x16xf32, #tpu.memory_space<vmem>>, vector<1x16xf32>
    %33 = vector.broadcast %32 : vector<1x16xf32> to vector<64x16xf32>
    %34 = arith.addf %31, %33 : vector<64x16xf32>
    %cst_24 = arith.constant 0.000000e+00 : f32
    %35 = vector.broadcast %cst_24 : f32 to vector<64x16xf32>
    %36 = arith.cmpf ogt, %34, %35 : vector<64x16xf32>
    %cst_25 = arith.constant 0.000000e+00 : f32
    %37 = vector.broadcast %cst_25 : f32 to vector<64x16xf32>
    %38 = arith.minimumf %34, %37 : vector<64x16xf32>
    %39 = math.exp %38 : vector<64x16xf32>
    %cst_26 = arith.constant 1.000000e+00 : f32
    %40 = vector.broadcast %cst_26 : f32 to vector<64x16xf32>
    %41 = arith.subf %39, %40 : vector<64x16xf32>
    %42 = arith.select %36, %34, %41 : vector<64x16xi1>, vector<64x16xf32>
    %43 = vector.extract_strided_slice %1 {offsets = [0, 0], sizes = [1, 16], strides = [1, 1]} : vector<2x16xf32> to vector<1x16xf32>
    %44 = vector.broadcast %43 : vector<1x16xf32> to vector<64x16xf32>
    %45 = arith.subf %42, %44 : vector<64x16xf32>
    %46 = vector.extract_strided_slice %1 {offsets = [1, 0], sizes = [1, 16], strides = [1, 1]} : vector<2x16xf32> to vector<1x16xf32>
    %47 = vector.broadcast %46 : vector<1x16xf32> to vector<64x16xf32>
    %48 = arith.mulf %45, %47 : vector<64x16xf32>
    %c1 = arith.constant 1 : index
    %c0_27 = arith.constant 0 : index
    %c0_28 = arith.constant 0 : index
    %49 = vector.load %arg1[%c1, %c0_27, %c0_28] : memref<3x64x3xf32, #tpu.memory_space<vmem>>, vector<1x64x3xf32>
    %50 = vector.shape_cast %49 : vector<1x64x3xf32> to vector<64x3xf32>
    %c0_29 = arith.constant 0 : index
    %c0_30 = arith.constant 0 : index
    %51 = vector.load %arg8[%c0_29, %c0_30] : memref<3x16xf32, #tpu.memory_space<vmem>>, vector<3x16xf32>
    %52 = arith.truncf %50 : vector<64x3xf32> to vector<64x3xbf16>
    %53 = arith.truncf %51 : vector<3x16xf32> to vector<3x16xbf16>
    %cst_31 = arith.constant dense<0.000000e+00> : vector<64x16xf32>
    %54 = tpu.matmul %52, %53, %cst_31 {dimension_numbers = #tpu.dot_dimension_numbers<[1], [0], [0], [1], [0, 0, 1, 1], [], []>} : vector<64x3xbf16>, vector<3x16xbf16>, vector<64x16xf32> -> vector<64x16xf32>
    %c0_32 = arith.constant 0 : index
    %c0_33 = arith.constant 0 : index
    %55 = vector.load %arg9[%c0_32, %c0_33] : memref<1x16xf32, #tpu.memory_space<vmem>>, vector<1x16xf32>
    %56 = vector.broadcast %55 : vector<1x16xf32> to vector<64x16xf32>
    %57 = arith.addf %54, %56 : vector<64x16xf32>
    %cst_34 = arith.constant 0.000000e+00 : f32
    %58 = vector.broadcast %cst_34 : f32 to vector<64x16xf32>
    %59 = arith.cmpf ogt, %57, %58 : vector<64x16xf32>
    %cst_35 = arith.constant 0.000000e+00 : f32
    %60 = vector.broadcast %cst_35 : f32 to vector<64x16xf32>
    %61 = arith.minimumf %57, %60 : vector<64x16xf32>
    %62 = math.exp %61 : vector<64x16xf32>
    %cst_36 = arith.constant 1.000000e+00 : f32
    %63 = vector.broadcast %cst_36 : f32 to vector<64x16xf32>
    %64 = arith.subf %62, %63 : vector<64x16xf32>
    %65 = arith.select %59, %57, %64 : vector<64x16xi1>, vector<64x16xf32>
    %66 = vector.extract_strided_slice %0 {offsets = [0, 0], sizes = [1, 16], strides = [1, 1]} : vector<2x16xf32> to vector<1x16xf32>
    %67 = vector.broadcast %66 : vector<1x16xf32> to vector<64x16xf32>
    %68 = arith.subf %65, %67 : vector<64x16xf32>
    %69 = vector.extract_strided_slice %0 {offsets = [1, 0], sizes = [1, 16], strides = [1, 1]} : vector<2x16xf32> to vector<1x16xf32>
    %70 = vector.broadcast %69 : vector<1x16xf32> to vector<64x16xf32>
    %71 = arith.mulf %68, %70 : vector<64x16xf32>
    %c0_37 = arith.constant 0 : index
    %c0_38 = arith.constant 0 : index
    %72 = vector.load %arg10[%c0_37, %c0_38] : memref<16x16xf32, #tpu.memory_space<vmem>>, vector<16x16xf32>
    %73 = arith.truncf %71 : vector<64x16xf32> to vector<64x16xbf16>
    %74 = arith.truncf %72 : vector<16x16xf32> to vector<16x16xbf16>
    %cst_39 = arith.constant dense<0.000000e+00> : vector<64x16xf32>
    %75 = tpu.matmul %73, %74, %cst_39 {dimension_numbers = #tpu.dot_dimension_numbers<[1], [0], [0], [1], [0, 0, 1, 1], [], []>} : vector<64x16xbf16>, vector<16x16xbf16>, vector<64x16xf32> -> vector<64x16xf32>
    %c0_40 = arith.constant 0 : index
    %c0_41 = arith.constant 0 : index
    %76 = vector.load %arg11[%c0_40, %c0_41] : memref<1x16xf32, #tpu.memory_space<vmem>>, vector<1x16xf32>
    %77 = vector.broadcast %76 : vector<1x16xf32> to vector<64x16xf32>
    %78 = arith.addf %75, %77 : vector<64x16xf32>
    %cst_42 = arith.constant 0.000000e+00 : f32
    %79 = vector.broadcast %cst_42 : f32 to vector<64x16xf32>
    %80 = arith.cmpf ogt, %78, %79 : vector<64x16xf32>
    %cst_43 = arith.constant 0.000000e+00 : f32
    %81 = vector.broadcast %cst_43 : f32 to vector<64x16xf32>
    %82 = arith.minimumf %78, %81 : vector<64x16xf32>
    %83 = math.exp %82 : vector<64x16xf32>
    %cst_44 = arith.constant 1.000000e+00 : f32
    %84 = vector.broadcast %cst_44 : f32 to vector<64x16xf32>
    %85 = arith.subf %83, %84 : vector<64x16xf32>
    %86 = arith.select %80, %78, %85 : vector<64x16xi1>, vector<64x16xf32>
    %87 = vector.extract_strided_slice %1 {offsets = [0, 0], sizes = [1, 16], strides = [1, 1]} : vector<2x16xf32> to vector<1x16xf32>
    %88 = vector.broadcast %87 : vector<1x16xf32> to vector<64x16xf32>
    %89 = arith.subf %86, %88 : vector<64x16xf32>
    %90 = vector.extract_strided_slice %1 {offsets = [1, 0], sizes = [1, 16], strides = [1, 1]} : vector<2x16xf32> to vector<1x16xf32>
    %91 = vector.broadcast %90 : vector<1x16xf32> to vector<64x16xf32>
    %92 = arith.mulf %89, %91 : vector<64x16xf32>
    %c2 = arith.constant 2 : index
    %c0_45 = arith.constant 0 : index
    %c0_46 = arith.constant 0 : index
    %93 = vector.load %arg1[%c2, %c0_45, %c0_46] : memref<3x64x3xf32, #tpu.memory_space<vmem>>, vector<1x64x3xf32>
    %94 = vector.shape_cast %93 : vector<1x64x3xf32> to vector<64x3xf32>
    %c0_47 = arith.constant 0 : index
    %c0_48 = arith.constant 0 : index
    %95 = vector.load %arg8[%c0_47, %c0_48] : memref<3x16xf32, #tpu.memory_space<vmem>>, vector<3x16xf32>
    %96 = arith.truncf %94 : vector<64x3xf32> to vector<64x3xbf16>
    %97 = arith.truncf %95 : vector<3x16xf32> to vector<3x16xbf16>
    %cst_49 = arith.constant dense<0.000000e+00> : vector<64x16xf32>
    %98 = tpu.matmul %96, %97, %cst_49 {dimension_numbers = #tpu.dot_dimension_numbers<[1], [0], [0], [1], [0, 0, 1, 1], [], []>} : vector<64x3xbf16>, vector<3x16xbf16>, vector<64x16xf32> -> vector<64x16xf32>
    %c0_50 = arith.constant 0 : index
    %c0_51 = arith.constant 0 : index
    %99 = vector.load %arg9[%c0_50, %c0_51] : memref<1x16xf32, #tpu.memory_space<vmem>>, vector<1x16xf32>
    %100 = vector.broadcast %99 : vector<1x16xf32> to vector<64x16xf32>
    %101 = arith.addf %98, %100 : vector<64x16xf32>
    %cst_52 = arith.constant 0.000000e+00 : f32
    %102 = vector.broadcast %cst_52 : f32 to vector<64x16xf32>
    %103 = arith.cmpf ogt, %101, %102 : vector<64x16xf32>
    %cst_53 = arith.constant 0.000000e+00 : f32
    %104 = vector.broadcast %cst_53 : f32 to vector<64x16xf32>
    %105 = arith.minimumf %101, %104 : vector<64x16xf32>
    %106 = math.exp %105 : vector<64x16xf32>
    %cst_54 = arith.constant 1.000000e+00 : f32
    %107 = vector.broadcast %cst_54 : f32 to vector<64x16xf32>
    %108 = arith.subf %106, %107 : vector<64x16xf32>
    %109 = arith.select %103, %101, %108 : vector<64x16xi1>, vector<64x16xf32>
    %110 = vector.extract_strided_slice %0 {offsets = [0, 0], sizes = [1, 16], strides = [1, 1]} : vector<2x16xf32> to vector<1x16xf32>
    %111 = vector.broadcast %110 : vector<1x16xf32> to vector<64x16xf32>
    %112 = arith.subf %109, %111 : vector<64x16xf32>
    %113 = vector.extract_strided_slice %0 {offsets = [1, 0], sizes = [1, 16], strides = [1, 1]} : vector<2x16xf32> to vector<1x16xf32>
    %114 = vector.broadcast %113 : vector<1x16xf32> to vector<64x16xf32>
    %115 = arith.mulf %112, %114 : vector<64x16xf32>
    %c0_55 = arith.constant 0 : index
    %c0_56 = arith.constant 0 : index
    %116 = vector.load %arg10[%c0_55, %c0_56] : memref<16x16xf32, #tpu.memory_space<vmem>>, vector<16x16xf32>
    %117 = arith.truncf %115 : vector<64x16xf32> to vector<64x16xbf16>
    %118 = arith.truncf %116 : vector<16x16xf32> to vector<16x16xbf16>
    %cst_57 = arith.constant dense<0.000000e+00> : vector<64x16xf32>
    %119 = tpu.matmul %117, %118, %cst_57 {dimension_numbers = #tpu.dot_dimension_numbers<[1], [0], [0], [1], [0, 0, 1, 1], [], []>} : vector<64x16xbf16>, vector<16x16xbf16>, vector<64x16xf32> -> vector<64x16xf32>
    %c0_58 = arith.constant 0 : index
    %c0_59 = arith.constant 0 : index
    %120 = vector.load %arg11[%c0_58, %c0_59] : memref<1x16xf32, #tpu.memory_space<vmem>>, vector<1x16xf32>
    %121 = vector.broadcast %120 : vector<1x16xf32> to vector<64x16xf32>
    %122 = arith.addf %119, %121 : vector<64x16xf32>
    %cst_60 = arith.constant 0.000000e+00 : f32
    %123 = vector.broadcast %cst_60 : f32 to vector<64x16xf32>
    %124 = arith.cmpf ogt, %122, %123 : vector<64x16xf32>
    %cst_61 = arith.constant 0.000000e+00 : f32
    %125 = vector.broadcast %cst_61 : f32 to vector<64x16xf32>
    %126 = arith.minimumf %122, %125 : vector<64x16xf32>
    %127 = math.exp %126 : vector<64x16xf32>
    %cst_62 = arith.constant 1.000000e+00 : f32
    %128 = vector.broadcast %cst_62 : f32 to vector<64x16xf32>
    %129 = arith.subf %127, %128 : vector<64x16xf32>
    %130 = arith.select %124, %122, %129 : vector<64x16xi1>, vector<64x16xf32>
    %131 = vector.extract_strided_slice %1 {offsets = [0, 0], sizes = [1, 16], strides = [1, 1]} : vector<2x16xf32> to vector<1x16xf32>
    %132 = vector.broadcast %131 : vector<1x16xf32> to vector<64x16xf32>
    %133 = arith.subf %130, %132 : vector<64x16xf32>
    %134 = vector.extract_strided_slice %1 {offsets = [1, 0], sizes = [1, 16], strides = [1, 1]} : vector<2x16xf32> to vector<1x16xf32>
    %135 = vector.broadcast %134 : vector<1x16xf32> to vector<64x16xf32>
    %136 = arith.mulf %133, %135 : vector<64x16xf32>
    %c0_63 = arith.constant 0 : index
    %c0_64 = arith.constant 0 : index
    %c0_65 = arith.constant 0 : index
    %137 = vector.load %arg2[%c0_63, %c0_64, %c0_65] : memref<3x64x8xf32, #tpu.memory_space<vmem>>, vector<1x64x8xf32>
    %138 = vector.shape_cast %137 : vector<1x64x8xf32> to vector<64x8xf32>
    %c1_66 = arith.constant 1 : index
    %c0_67 = arith.constant 0 : index
    %c0_68 = arith.constant 0 : index
    %139 = vector.load %arg2[%c1_66, %c0_67, %c0_68] : memref<3x64x8xf32, #tpu.memory_space<vmem>>, vector<1x64x8xf32>
    %140 = vector.shape_cast %139 : vector<1x64x8xf32> to vector<64x8xf32>
    %c2_69 = arith.constant 2 : index
    %c0_70 = arith.constant 0 : index
    %c0_71 = arith.constant 0 : index
    %141 = vector.load %arg2[%c2_69, %c0_70, %c0_71] : memref<3x64x8xf32, #tpu.memory_space<vmem>>, vector<1x64x8xf32>
    %142 = vector.shape_cast %141 : vector<1x64x8xf32> to vector<64x8xf32>
    %c0_72 = arith.constant 0 : index
    %c0_73 = arith.constant 0 : index
    %143 = vector.load %arg13[%c0_72, %c0_73] : memref<1x9xf32, #tpu.memory_space<vmem>>, vector<1x9xf32>
    %c0_74 = arith.constant 0 : index
    %c0_75 = arith.constant 0 : index
    %c0_76 = arith.constant 0 : index
    %144 = vector.load %arg1[%c0_74, %c0_75, %c0_76] : memref<3x64x3xf32, #tpu.memory_space<vmem>>, vector<1x64x3xf32>
    %145 = vector.shape_cast %144 : vector<1x64x3xf32> to vector<64x3xf32>
    %c0_77 = arith.constant 0 : index
    %c0_78 = arith.constant 0 : index
    %c0_79 = arith.constant 0 : index
    %146 = vector.load %arg12[%c0_77, %c0_78, %c0_79] : memref<3x3x9xf32, #tpu.memory_space<vmem>>, vector<1x3x9xf32>
    %147 = vector.shape_cast %146 : vector<1x3x9xf32> to vector<3x9xf32>
    %148 = arith.truncf %145 : vector<64x3xf32> to vector<64x3xbf16>
    %149 = arith.truncf %147 : vector<3x9xf32> to vector<3x9xbf16>
    %cst_80 = arith.constant dense<0.000000e+00> : vector<64x9xf32>
    %150 = tpu.matmul %148, %149, %cst_80 {dimension_numbers = #tpu.dot_dimension_numbers<[1], [0], [0], [1], [0, 0, 1, 1], [], []>} : vector<64x3xbf16>, vector<3x9xbf16>, vector<64x9xf32> -> vector<64x9xf32>
    %151 = vector.broadcast %143 : vector<1x9xf32> to vector<64x9xf32>
    %152 = arith.addf %151, %150 : vector<64x9xf32>
    %c1_81 = arith.constant 1 : index
    %c0_82 = arith.constant 0 : index
    %c0_83 = arith.constant 0 : index
    %153 = vector.load %arg1[%c1_81, %c0_82, %c0_83] : memref<3x64x3xf32, #tpu.memory_space<vmem>>, vector<1x64x3xf32>
    %154 = vector.shape_cast %153 : vector<1x64x3xf32> to vector<64x3xf32>
    %c1_84 = arith.constant 1 : index
    %c0_85 = arith.constant 0 : index
    %c0_86 = arith.constant 0 : index
    %155 = vector.load %arg12[%c1_84, %c0_85, %c0_86] : memref<3x3x9xf32, #tpu.memory_space<vmem>>, vector<1x3x9xf32>
    %156 = vector.shape_cast %155 : vector<1x3x9xf32> to vector<3x9xf32>
    %157 = arith.truncf %154 : vector<64x3xf32> to vector<64x3xbf16>
    %158 = arith.truncf %156 : vector<3x9xf32> to vector<3x9xbf16>
    %cst_87 = arith.constant dense<0.000000e+00> : vector<64x9xf32>
    %159 = tpu.matmul %157, %158, %cst_87 {dimension_numbers = #tpu.dot_dimension_numbers<[1], [0], [0], [1], [0, 0, 1, 1], [], []>} : vector<64x3xbf16>, vector<3x9xbf16>, vector<64x9xf32> -> vector<64x9xf32>
    %160 = arith.addf %152, %159 : vector<64x9xf32>
    %c2_88 = arith.constant 2 : index
    %c0_89 = arith.constant 0 : index
    %c0_90 = arith.constant 0 : index
    %161 = vector.load %arg1[%c2_88, %c0_89, %c0_90] : memref<3x64x3xf32, #tpu.memory_space<vmem>>, vector<1x64x3xf32>
    %162 = vector.shape_cast %161 : vector<1x64x3xf32> to vector<64x3xf32>
    %c2_91 = arith.constant 2 : index
    %c0_92 = arith.constant 0 : index
    %c0_93 = arith.constant 0 : index
    %163 = vector.load %arg12[%c2_91, %c0_92, %c0_93] : memref<3x3x9xf32, #tpu.memory_space<vmem>>, vector<1x3x9xf32>
    %164 = vector.shape_cast %163 : vector<1x3x9xf32> to vector<3x9xf32>
    %165 = arith.truncf %162 : vector<64x3xf32> to vector<64x3xbf16>
    %166 = arith.truncf %164 : vector<3x9xf32> to vector<3x9xbf16>
    %cst_94 = arith.constant dense<0.000000e+00> : vector<64x9xf32>
    %167 = tpu.matmul %165, %166, %cst_94 {dimension_numbers = #tpu.dot_dimension_numbers<[1], [0], [0], [1], [0, 0, 1, 1], [], []>} : vector<64x3xbf16>, vector<3x9xbf16>, vector<64x9xf32> -> vector<64x9xf32>
    %168 = arith.addf %160, %167 : vector<64x9xf32>
    %cst_95 = arith.constant 0.000000e+00 : f32
    %169 = vector.broadcast %cst_95 : f32 to vector<64x9xf32>
    %170 = arith.cmpf ogt, %168, %169 : vector<64x9xf32>
    %cst_96 = arith.constant 0.000000e+00 : f32
    %171 = vector.broadcast %cst_96 : f32 to vector<64x9xf32>
    %172 = arith.minimumf %168, %171 : vector<64x9xf32>
    %173 = math.exp %172 : vector<64x9xf32>
    %cst_97 = arith.constant 1.000000e+00 : f32
    %174 = vector.broadcast %cst_97 : f32 to vector<64x9xf32>
    %175 = arith.subf %173, %174 : vector<64x9xf32>
    %176 = arith.select %170, %168, %175 : vector<64x9xi1>, vector<64x9xf32>
    %177 = vector.extract_strided_slice %2 {offsets = [0, 0], sizes = [1, 9], strides = [1, 1]} : vector<2x9xf32> to vector<1x9xf32>
    %178 = vector.broadcast %177 : vector<1x9xf32> to vector<64x9xf32>
    %179 = arith.subf %176, %178 : vector<64x9xf32>
    %180 = vector.extract_strided_slice %2 {offsets = [1, 0], sizes = [1, 9], strides = [1, 1]} : vector<2x9xf32> to vector<1x9xf32>
    %181 = vector.broadcast %180 : vector<1x9xf32> to vector<64x9xf32>
    %182 = arith.mulf %179, %181 : vector<64x9xf32>
    %c0_98 = arith.constant 0 : index
    %c0_99 = arith.constant 0 : index
    %183 = vector.load %arg14[%c0_98, %c0_99] : memref<9x9xf32, #tpu.memory_space<vmem>>, vector<9x9xf32>
    %184 = arith.truncf %182 : vector<64x9xf32> to vector<64x9xbf16>
    %185 = arith.truncf %183 : vector<9x9xf32> to vector<9x9xbf16>
    %cst_100 = arith.constant dense<0.000000e+00> : vector<64x9xf32>
    %186 = tpu.matmul %184, %185, %cst_100 {dimension_numbers = #tpu.dot_dimension_numbers<[1], [0], [0], [1], [0, 0, 1, 1], [], []>} : vector<64x9xbf16>, vector<9x9xbf16>, vector<64x9xf32> -> vector<64x9xf32>
    %c0_101 = arith.constant 0 : index
    %c0_102 = arith.constant 0 : index
    %187 = vector.load %arg15[%c0_101, %c0_102] : memref<1x9xf32, #tpu.memory_space<vmem>>, vector<1x9xf32>
    %188 = vector.broadcast %187 : vector<1x9xf32> to vector<64x9xf32>
    %189 = arith.addf %186, %188 : vector<64x9xf32>
    %cst_103 = arith.constant 0.000000e+00 : f32
    %190 = vector.broadcast %cst_103 : f32 to vector<64x9xf32>
    %191 = arith.cmpf ogt, %189, %190 : vector<64x9xf32>
    %cst_104 = arith.constant 0.000000e+00 : f32
    %192 = vector.broadcast %cst_104 : f32 to vector<64x9xf32>
    %193 = arith.minimumf %189, %192 : vector<64x9xf32>
    %194 = math.exp %193 : vector<64x9xf32>
    %cst_105 = arith.constant 1.000000e+00 : f32
    %195 = vector.broadcast %cst_105 : f32 to vector<64x9xf32>
    %196 = arith.subf %194, %195 : vector<64x9xf32>
    %197 = arith.select %191, %189, %196 : vector<64x9xi1>, vector<64x9xf32>
    %198 = vector.extract_strided_slice %3 {offsets = [0, 0], sizes = [1, 9], strides = [1, 1]} : vector<2x9xf32> to vector<1x9xf32>
    %199 = vector.broadcast %198 : vector<1x9xf32> to vector<64x9xf32>
    %200 = arith.subf %197, %199 : vector<64x9xf32>
    %201 = vector.extract_strided_slice %3 {offsets = [1, 0], sizes = [1, 9], strides = [1, 1]} : vector<2x9xf32> to vector<1x9xf32>
    %202 = vector.broadcast %201 : vector<1x9xf32> to vector<64x9xf32>
    %203 = arith.mulf %200, %202 : vector<64x9xf32>
    %c0_106 = arith.constant 0 : index
    %c0_107 = arith.constant 0 : index
    %204 = vector.load %arg16[%c0_106, %c0_107] : memref<9x9xf32, #tpu.memory_space<vmem>>, vector<9x9xf32>
    %205 = arith.truncf %203 : vector<64x9xf32> to vector<64x9xbf16>
    %206 = arith.truncf %204 : vector<9x9xf32> to vector<9x9xbf16>
    %cst_108 = arith.constant dense<0.000000e+00> : vector<64x9xf32>
    %207 = tpu.matmul %205, %206, %cst_108 {dimension_numbers = #tpu.dot_dimension_numbers<[1], [0], [0], [1], [0, 0, 1, 1], [], []>} : vector<64x9xbf16>, vector<9x9xbf16>, vector<64x9xf32> -> vector<64x9xf32>
    %c0_109 = arith.constant 0 : index
    %c0_110 = arith.constant 0 : index
    %208 = vector.load %arg17[%c0_109, %c0_110] : memref<1x9xf32, #tpu.memory_space<vmem>>, vector<1x9xf32>
    %209 = vector.broadcast %208 : vector<1x9xf32> to vector<64x9xf32>
    %210 = arith.addf %207, %209 : vector<64x9xf32>
    %211 = vector.extract_strided_slice %4 {offsets = [0, 0], sizes = [1, 9], strides = [1, 1]} : vector<2x9xf32> to vector<1x9xf32>
    %212 = vector.broadcast %211 : vector<1x9xf32> to vector<64x9xf32>
    %213 = arith.subf %210, %212 : vector<64x9xf32>
    %214 = vector.extract_strided_slice %4 {offsets = [1, 0], sizes = [1, 9], strides = [1, 1]} : vector<2x9xf32> to vector<1x9xf32>
    %215 = vector.broadcast %214 : vector<1x9xf32> to vector<64x9xf32>
    %216 = arith.mulf %213, %215 : vector<64x9xf32>
    %217 = vector.extract_strided_slice %216 {offsets = [0, 0], sizes = [64, 1], strides = [1, 1]} : vector<64x9xf32> to vector<64x1xf32>
    %218 = vector.extract_strided_slice %216 {offsets = [0, 3], sizes = [64, 1], strides = [1, 1]} : vector<64x9xf32> to vector<64x1xf32>
    %219 = vector.extract_strided_slice %216 {offsets = [0, 6], sizes = [64, 1], strides = [1, 1]} : vector<64x9xf32> to vector<64x1xf32>
    %220 = vector.broadcast %217 : vector<64x1xf32> to vector<64x16xf32>
    %221 = arith.mulf %48, %220 : vector<64x16xf32>
    %cst_111 = arith.constant 0.000000e+00 : f32
    %222 = vector.broadcast %cst_111 : f32 to vector<64x16xf32>
    %223 = arith.addf %222, %221 : vector<64x16xf32>
    %224 = vector.broadcast %218 : vector<64x1xf32> to vector<64x16xf32>
    %225 = arith.mulf %92, %224 : vector<64x16xf32>
    %226 = arith.addf %223, %225 : vector<64x16xf32>
    %227 = vector.broadcast %219 : vector<64x1xf32> to vector<64x16xf32>
    %228 = arith.mulf %136, %227 : vector<64x16xf32>
    %229 = arith.addf %226, %228 : vector<64x16xf32>
    %230 = vector.broadcast %217 : vector<64x1xf32> to vector<64x8xf32>
    %231 = arith.mulf %138, %230 : vector<64x8xf32>
    %cst_112 = arith.constant 0.000000e+00 : f32
    %232 = vector.broadcast %cst_112 : f32 to vector<64x8xf32>
    %233 = arith.addf %232, %231 : vector<64x8xf32>
    %234 = vector.broadcast %218 : vector<64x1xf32> to vector<64x8xf32>
    %235 = arith.mulf %140, %234 : vector<64x8xf32>
    %236 = arith.addf %233, %235 : vector<64x8xf32>
    %237 = vector.broadcast %219 : vector<64x1xf32> to vector<64x8xf32>
    %238 = arith.mulf %142, %237 : vector<64x8xf32>
    %239 = arith.addf %236, %238 : vector<64x8xf32>
    %240 = vector.extract_strided_slice %216 {offsets = [0, 1], sizes = [64, 1], strides = [1, 1]} : vector<64x9xf32> to vector<64x1xf32>
    %241 = vector.extract_strided_slice %216 {offsets = [0, 4], sizes = [64, 1], strides = [1, 1]} : vector<64x9xf32> to vector<64x1xf32>
    %242 = vector.extract_strided_slice %216 {offsets = [0, 7], sizes = [64, 1], strides = [1, 1]} : vector<64x9xf32> to vector<64x1xf32>
    %243 = vector.broadcast %240 : vector<64x1xf32> to vector<64x16xf32>
    %244 = arith.mulf %48, %243 : vector<64x16xf32>
    %cst_113 = arith.constant 0.000000e+00 : f32
    %245 = vector.broadcast %cst_113 : f32 to vector<64x16xf32>
    %246 = arith.addf %245, %244 : vector<64x16xf32>
    %247 = vector.broadcast %241 : vector<64x1xf32> to vector<64x16xf32>
    %248 = arith.mulf %92, %247 : vector<64x16xf32>
    %249 = arith.addf %246, %248 : vector<64x16xf32>
    %250 = vector.broadcast %242 : vector<64x1xf32> to vector<64x16xf32>
    %251 = arith.mulf %136, %250 : vector<64x16xf32>
    %252 = arith.addf %249, %251 : vector<64x16xf32>
    %253 = vector.broadcast %240 : vector<64x1xf32> to vector<64x8xf32>
    %254 = arith.mulf %138, %253 : vector<64x8xf32>
    %cst_114 = arith.constant 0.000000e+00 : f32
    %255 = vector.broadcast %cst_114 : f32 to vector<64x8xf32>
    %256 = arith.addf %255, %254 : vector<64x8xf32>
    %257 = vector.broadcast %241 : vector<64x1xf32> to vector<64x8xf32>
    %258 = arith.mulf %140, %257 : vector<64x8xf32>
    %259 = arith.addf %256, %258 : vector<64x8xf32>
    %260 = vector.broadcast %242 : vector<64x1xf32> to vector<64x8xf32>
    %261 = arith.mulf %142, %260 : vector<64x8xf32>
    %262 = arith.addf %259, %261 : vector<64x8xf32>
    %263 = vector.extract_strided_slice %216 {offsets = [0, 2], sizes = [64, 1], strides = [1, 1]} : vector<64x9xf32> to vector<64x1xf32>
    %264 = vector.extract_strided_slice %216 {offsets = [0, 5], sizes = [64, 1], strides = [1, 1]} : vector<64x9xf32> to vector<64x1xf32>
    %265 = vector.extract_strided_slice %216 {offsets = [0, 8], sizes = [64, 1], strides = [1, 1]} : vector<64x9xf32> to vector<64x1xf32>
    %266 = vector.broadcast %263 : vector<64x1xf32> to vector<64x16xf32>
    %267 = arith.mulf %48, %266 : vector<64x16xf32>
    %cst_115 = arith.constant 0.000000e+00 : f32
    %268 = vector.broadcast %cst_115 : f32 to vector<64x16xf32>
    %269 = arith.addf %268, %267 : vector<64x16xf32>
    %270 = vector.broadcast %264 : vector<64x1xf32> to vector<64x16xf32>
    %271 = arith.mulf %92, %270 : vector<64x16xf32>
    %272 = arith.addf %269, %271 : vector<64x16xf32>
    %273 = vector.broadcast %265 : vector<64x1xf32> to vector<64x16xf32>
    %274 = arith.mulf %136, %273 : vector<64x16xf32>
    %275 = arith.addf %272, %274 : vector<64x16xf32>
    %276 = vector.broadcast %263 : vector<64x1xf32> to vector<64x8xf32>
    %277 = arith.mulf %138, %276 : vector<64x8xf32>
    %cst_116 = arith.constant 0.000000e+00 : f32
    %278 = vector.broadcast %cst_116 : f32 to vector<64x8xf32>
    %279 = arith.addf %278, %277 : vector<64x8xf32>
    %280 = vector.broadcast %264 : vector<64x1xf32> to vector<64x8xf32>
    %281 = arith.mulf %140, %280 : vector<64x8xf32>
    %282 = arith.addf %279, %281 : vector<64x8xf32>
    %283 = vector.broadcast %265 : vector<64x1xf32> to vector<64x8xf32>
    %284 = arith.mulf %142, %283 : vector<64x8xf32>
    %285 = arith.addf %282, %284 : vector<64x8xf32>
    %286 = tpu.concatenate %229, %239, %252, %262, %275, %285 in 1 : vector<64x16xf32>, vector<64x8xf32>, vector<64x16xf32>, vector<64x8xf32>, vector<64x16xf32>, vector<64x8xf32> -> vector<64x72xf32>
    %c0_117 = arith.constant 0 : index
    %c0_118 = arith.constant 0 : index
    %287 = vector.load %arg19[%c0_117, %c0_118] : memref<1x48xf32, #tpu.memory_space<vmem>>, vector<1x48xf32>
    %c0_119 = arith.constant 0 : index
    %c0_120 = arith.constant 0 : index
    %288 = vector.load %arg18[%c0_119, %c0_120] : memref<72x48xf32, #tpu.memory_space<vmem>>, vector<72x48xf32>
    %289 = arith.truncf %286 : vector<64x72xf32> to vector<64x72xbf16>
    %290 = arith.truncf %288 : vector<72x48xf32> to vector<72x48xbf16>
    %cst_121 = arith.constant dense<0.000000e+00> : vector<64x48xf32>
    %291 = tpu.matmul %289, %290, %cst_121 {dimension_numbers = #tpu.dot_dimension_numbers<[1], [0], [0], [1], [0, 0, 1, 1], [], []>} : vector<64x72xbf16>, vector<72x48xbf16>, vector<64x48xf32> -> vector<64x48xf32>
    %292 = vector.broadcast %287 : vector<1x48xf32> to vector<64x48xf32>
    %293 = arith.addf %292, %291 : vector<64x48xf32>
    %c0_122 = arith.constant 0 : index
    %c0_123 = arith.constant 0 : index
    %294 = vector.load %arg20[%c0_122, %c0_123] : memref<48x128xf32, #tpu.memory_space<vmem>>, vector<48x128xf32>
    %295 = arith.truncf %293 : vector<64x48xf32> to vector<64x48xbf16>
    %296 = arith.truncf %294 : vector<48x128xf32> to vector<48x128xbf16>
    %cst_124 = arith.constant dense<0.000000e+00> : vector<64x128xf32>
    %297 = tpu.matmul %295, %296, %cst_124 {dimension_numbers = #tpu.dot_dimension_numbers<[1], [0], [0], [1], [0, 0, 1, 1], [], []>} : vector<64x48xbf16>, vector<48x128xbf16>, vector<64x128xf32> -> vector<64x128xf32>
    %c0_125 = arith.constant 0 : index
    %c0_126 = arith.constant 0 : index
    %298 = vector.load %arg21[%c0_125, %c0_126] : memref<1x128xf32, #tpu.memory_space<vmem>>, vector<1x128xf32>
    %299 = vector.broadcast %298 : vector<1x128xf32> to vector<64x128xf32>
    %300 = arith.addf %297, %299 : vector<64x128xf32>
    %c0_127 = arith.constant 0 : index
    %c0_128 = arith.constant 0 : index
    %301 = vector.load %arg22[%c0_127, %c0_128] : memref<64x128xf32, #tpu.memory_space<vmem>>, vector<64x128xf32>
    tpu.vector_store %arg22[%c0_127, %c0_128], %300 {strides = array<i32>} : memref<64x128xf32, #tpu.memory_space<vmem>>, vector<64x128xf32>,
    return
  }
  func.func @transform_0(%arg0: i32) -> (i32, i32, i32) {
    %c0_i32 = arith.constant 0 : i32
    %c0_i32_0 = arith.constant 0 : i32
    %c0_i32_1 = arith.constant 0 : i32
    return %c0_i32, %arg0, %c0_i32_0 : i32, i32, i32
  }
  func.func @transform_1(%arg0: i32) -> (i32, i32, i32) {
    %c0_i32 = arith.constant 0 : i32
    %c0_i32_0 = arith.constant 0 : i32
    %c0_i32_1 = arith.constant 0 : i32
    return %c0_i32, %arg0, %c0_i32_0 : i32, i32, i32
  }
  func.func @transform_2(%arg0: i32) -> (i32, i32) {
    %c0_i32 = arith.constant 0 : i32
    %c0_i32_0 = arith.constant 0 : i32
    %c0_i32_1 = arith.constant 0 : i32
    return %c0_i32, %c0_i32_0 : i32, i32
  }
  func.func @transform_3(%arg0: i32) -> (i32, i32) {
    %c0_i32 = arith.constant 0 : i32
    %c0_i32_0 = arith.constant 0 : i32
    %c0_i32_1 = arith.constant 0 : i32
    return %c0_i32, %c0_i32_0 : i32, i32
  }
  func.func @transform_4(%arg0: i32) -> (i32, i32) {
    %c0_i32 = arith.constant 0 : i32
    %c0_i32_0 = arith.constant 0 : i32
    %c0_i32_1 = arith.constant 0 : i32
    return %c0_i32, %c0_i32_0 : i32, i32
  }
  func.func @transform_5(%arg0: i32) -> (i32, i32) {
    %c0_i32 = arith.constant 0 : i32
    %c0_i32_0 = arith.constant 0 : i32
    %c0_i32_1 = arith.constant 0 : i32
    return %c0_i32, %c0_i32_0 : i32, i32
  }
  func.func @transform_6(%arg0: i32) -> (i32, i32) {
    %c0_i32 = arith.constant 0 : i32
    %c0_i32_0 = arith.constant 0 : i32
    %c0_i32_1 = arith.constant 0 : i32
    return %c0_i32, %c0_i32_0 : i32, i32
  }
  func.func @transform_7(%arg0: i32) -> (i32, i32) {
    %c0_i32 = arith.constant 0 : i32
    %c0_i32_0 = arith.constant 0 : i32
    %c0_i32_1 = arith.constant 0 : i32
    return %c0_i32, %c0_i32_0 : i32, i32
  }
  func.func @transform_8(%arg0: i32) -> (i32, i32) {
    %c0_i32 = arith.constant 0 : i32
    %c0_i32_0 = arith.constant 0 : i32
    %c0_i32_1 = arith.constant 0 : i32
    return %c0_i32, %c0_i32_0 : i32, i32
  }
  func.func @transform_9(%arg0: i32) -> (i32, i32) {
    %c0_i32 = arith.constant 0 : i32
    %c0_i32_0 = arith.constant 0 : i32
    %c0_i32_1 = arith.constant 0 : i32
    return %c0_i32, %c0_i32_0 : i32, i32
  }
  func.func @transform_10(%arg0: i32) -> (i32, i32) {
    %c0_i32 = arith.constant 0 : i32
    %c0_i32_0 = arith.constant 0 : i32
    %c0_i32_1 = arith.constant 0 : i32
    return %c0_i32, %c0_i32_0 : i32, i32
  }
  func.func @transform_11(%arg0: i32) -> (i32, i32, i32) {
    %c0_i32 = arith.constant 0 : i32
    %c0_i32_0 = arith.constant 0 : i32
    %c0_i32_1 = arith.constant 0 : i32
    %c0_i32_2 = arith.constant 0 : i32
    return %c0_i32, %c0_i32_0, %c0_i32_1 : i32, i32, i32
  }
  func.func @transform_12(%arg0: i32) -> (i32, i32) {
    %c0_i32 = arith.constant 0 : i32
    %c0_i32_0 = arith.constant 0 : i32
    %c0_i32_1 = arith.constant 0 : i32
    return %c0_i32, %c0_i32_0 : i32, i32
  }
  func.func @transform_13(%arg0: i32) -> (i32, i32) {
    %c0_i32 = arith.constant 0 : i32
    %c0_i32_0 = arith.constant 0 : i32
    %c0_i32_1 = arith.constant 0 : i32
    return %c0_i32, %c0_i32_0 : i32, i32
  }
  func.func @transform_14(%arg0: i32) -> (i32, i32) {
    %c0_i32 = arith.constant 0 : i32
    %c0_i32_0 = arith.constant 0 : i32
    %c0_i32_1 = arith.constant 0 : i32
    return %c0_i32, %c0_i32_0 : i32, i32
  }
  func.func @transform_15(%arg0: i32) -> (i32, i32) {
    %c0_i32 = arith.constant 0 : i32
    %c0_i32_0 = arith.constant 0 : i32
    %c0_i32_1 = arith.constant 0 : i32
    return %c0_i32, %c0_i32_0 : i32, i32
  }
  func.func @transform_16(%arg0: i32) -> (i32, i32) {
    %c0_i32 = arith.constant 0 : i32
    %c0_i32_0 = arith.constant 0 : i32
    %c0_i32_1 = arith.constant 0 : i32
    return %c0_i32, %c0_i32_0 : i32, i32
  }
  func.func @transform_17(%arg0: i32) -> (i32, i32) {
    %c0_i32 = arith.constant 0 : i32
    %c0_i32_0 = arith.constant 0 : i32
    %c0_i32_1 = arith.constant 0 : i32
    return %c0_i32, %c0_i32_0 : i32, i32
  }
  func.func @transform_18(%arg0: i32) -> (i32, i32) {
    %c0_i32 = arith.constant 0 : i32
    %c0_i32_0 = arith.constant 0 : i32
    %c0_i32_1 = arith.constant 0 : i32
    return %c0_i32, %c0_i32_0 : i32, i32
  }
  func.func @transform_19(%arg0: i32) -> (i32, i32) {
    %c0_i32 = arith.constant 0 : i32
    %c0_i32_0 = arith.constant 0 : i32
    %c0_i32_1 = arith.constant 0 : i32
    return %c0_i32, %c0_i32_0 : i32, i32
  }
  func.func @transform_20(%arg0: i32) -> (i32, i32) {
    %c0_i32 = arith.constant 0 : i32
    %c0_i32_0 = arith.constant 0 : i32
    %c0_i32_1 = arith.constant 0 : i32
    return %c0_i32, %c0_i32_0 : i32, i32
  }
  func.func @transform_21(%arg0: i32) -> (i32, i32) {
    %c0_i32 = arith.constant 0 : i32
    %c0_i32_0 = arith.constant 0 : i32
    return %arg0, %c0_i32 : i32, i32
  }
}

</mosaic_0001>

<bundles_post_ra>
// kernel: mdl_conv_bn_forward.3
= control target key start
LH: loop header
LB: loop body
LE: loop exit
PB: predicated region body
PF: predicated region fallthrough
CT: control target
= control target key end

     0   :  { %vm108_vm0 = vcmask 1040384   ;;  %vm109_vm1 = vcmask 1041408   ;;  %v3367_v1 = vmov 65535   ;;  %vm95_vm2 = vcmask 23552   ;;  %s3377_s30 = smov 16   ;;  %s4910_s7 = inlined_call_operand.vmem [shape: f32[3,16], index: 7, kind: input, shape index: {}]   ;;  %s4911_s0 = inlined_call_operand.vmem [shape: f32[3,64,3], index: 0, kind: input, shape index: {}]   ;;  %s4912_s11 = inlined_call_operand.vmem [shape: f32[3,3,9], index: 11, kind: input, shape index: {}]   ;;  %s4913_s9 = inlined_call_operand.vmem [shape: f32[16,16], index: 9, kind: input, shape index: {}]   ;;  %s4914_s8 = inlined_call_operand.vmem [shape: f32[1,16], index: 8, kind: input, shape index: {}]   ;;  %s4915_s2 = inlined_call_operand.vmem [shape: f32[2,16], index: 2, kind: input, shape index: {}]   ;;  %s4916_s13 = inlined_call_operand.vmem [shape: f32[9,9], index: 13, kind: input, shape index: {}]   ;;  %s4917_s12 = inlined_call_operand.vmem [shape: f32[1,9], index: 12, kind: input, shape index: {}]   ;;  %s4918_s4 = inlined_call_operand.vmem [shape: f32[2,9], index: 4, kind: input, shape index: {}]   ;;  %s4919_s15 = inlined_call_operand.vmem [shape: f32[9,9], index: 15, kind: input, shape index: {}]   ;;  %s4920_s10 = inlined_call_operand.vmem [shape: f32[1,16], index: 10, kind: input, shape index: {}]   ;;  %s4921_s3 = inlined_call_operand.vmem [shape: f32[2,16], index: 3, kind: input, shape index: {}]   ;;  %s4922_s14 = inlined_call_operand.vmem [shape: f32[1,9], index: 14, kind: input, shape index: {}]   ;;  %s4923_s5 = inlined_call_operand.vmem [shape: f32[2,9], index: 5, kind: input, shape index: {}]   ;;  %s4924_s6 = inlined_call_operand.vmem [shape: f32[2,9], index: 6, kind: input, shape index: {}]   ;;  %s4925_s16 = inlined_call_operand.vmem [shape: f32[1,9], index: 16, kind: input, shape index: {}]   ;;  %s4926_s1 = inlined_call_operand.vmem [shape: f32[3,64,8], index: 1, kind: input, shape index: {}]   ;;  %s4927_s17 = inlined_call_operand.vmem [shape: f32[72,48], index: 17, kind: input, shape index: {}]   ;;  %s4928_s19 = inlined_call_operand.vmem [shape: f32[48,128], index: 19, kind: input, shape index: {}]   ;;  %s4929_s18 = inlined_call_operand.vmem [shape: f32[1,48], index: 18, kind: input, shape index: {}]   ;;  %s4930_s20 = inlined_call_operand.vmem [shape: f32[1,128], index: 20, kind: input, shape index: {}]   ;;  %s4931_s21 = inlined_call_operand.vmem [shape: f32[64,128], index: 21, kind: output, shape index: {}]  }
   0x1   :  { %4954 = sst [smem:[#allocation15_spill]] %s4910_s7  ;;  %v110_v2 = vsel %vm108_vm0, 4294967295, %v3367_v1  ;;  %vm1382_vm3 = vcmask 1043456   ;;  %vm266_vm0 = vcmask 130048  }
   0x2   :  { %4955 = sst [smem:[#allocation16_spill]] %s4911_s0  ;;  %s4960_s26 = sld [smem:[#allocation15_spill]]  ;;  %v3502_v6 = vsel %vm109_vm1, %v110_v2, 0 }
   0x3   :  { %4956 = sst [smem:[#allocation17_spill]] %s4912_s11  ;;  %s4961_s28 = sld [smem:[#allocation16_spill]] }
   0x4   :  { %4957 = sst [smem:[#allocation18_spill]] %s4913_s9  ;;  %s4962_s23 = sld [smem:[#allocation17_spill]] }
   0x5   :  { %4958 = sst [smem:[#allocation19_spill]] %s4914_s8  ;;  %s4963_s9 = sld [smem:[#allocation18_spill]] }
   0x6   :  { %4959 = sst [smem:[#allocation20_spill]] %s4915_s2  ;;  %s4964_s2 = sld [smem:[#allocation19_spill]] }
   0x7   :  { %s4965_s24 = sld [smem:[#allocation20_spill]] }
   0x8   :  { %v82_v0 = vld [vmem:[%s4960_s26] sm:$0x7] }
   0x9   :  { %v74_v3 = vld [vmem:[%s4961_s28] sm:$0xff]  ;;  %v75_v4 = vld [vmem:[%s4961_s28 + $0x8] sm:$0xff]  ;;  %v87_v5 = vpack.c.bf16 %v82_v0, %v82_v0  ;;  %v76_v8 = vld [vmem:[%s4961_s28 + $0x10] sm:$0xff] }
   0xa   :  { %v3504_v7 = vpack.c.bf16 %v75_v4, %v74_v3  ;;  %v78_v9 = vld [vmem:[%s4961_s28 + $0x20] sm:$0xff]  ;;  %v77_v10 = vld [vmem:[%s4961_s28 + $0x18] sm:$0xff]  ;;  %v79_v11 = vld [vmem:[%s4961_s28 + $0x28] sm:$0xff] }
   0xb   :  { %v2681_v12 = vld [vmem:[%s4961_s28 + $0x40] sm:$0xff]  ;;  %v113_v13 = vand.u32 %v3502_v6, %v87_v5  ;;  %v3524_v14 = vpack.c.bf16 %v79_v11, %v78_v9  ;;  %v2682_v15 = vld [vmem:[%s4961_s28 + $0x48] sm:$0xff]  ;;  %v80_v16 = vld [vmem:[%s4961_s28 + $0x30] sm:$0xff]  ;;  %v84_v18 = vpack.c.bf16 %v77_v10, %v76_v8 }
   0xc   :  { %2885 = vmatprep.mubr.msk.bf16.mxu0 %vm95_vm2, %v3504_v7  ;;  %v81_v17 = vld [vmem:[%s4961_s28 + $0x38] sm:$0xff]  ;;  %v425_v20 = vpack.c.bf16 %v2682_v15, %v2681_v12  ;;  %v1041_v21 = vld [vmem:[%s4962_s23] sm:$0x7]  ;;  %v2683_v22 = vld [vmem:[%s4961_s28 + $0x50] sm:$0xff] }
   0xd   :  { %2883 = vmatprep.subr.bf16.mxu0 %v113_v13  ;;  %3025 = vmatprep.subr.bf16.mxu1 %v113_v13  ;;  %v86_v19 = vpack.c.bf16 %v81_v17, %v80_v16  ;;  %v2684_v23 = vld [vmem:[%s4961_s28 + $0x58] sm:$0xff]  ;;  %v2685_v24 = vld [vmem:[%s4961_s28 + $0x60] sm:$0xff]  ;;  %v2686_v25 = vld [vmem:[%s4961_s28 + $0x68] sm:$0xff]  ;;  %v1042_v26 = vpack.c.bf16 %v1041_v21, %v1041_v21 }
   0xe   :  { %2884 = vmatpush3.bf16.msra.mxu0 %v113_v13  ;;  %3026 = vmatpush3.bf16.msra.mxu1 %v113_v13  ;;  %v426_v27 = vpack.c.bf16 %v2684_v23, %v2683_v22  ;;  %v427_v28 = vpack.c.bf16 %v2686_v25, %v2685_v24  ;;  %v2687_v30 = vld [vmem:[%s4961_s28 + $0x70] sm:$0xff]  ;;  %v2688_v31 = vld [vmem:[%s4961_s28 + $0x78] sm:$0xff]  ;;  %v2713_v32 = vld [vmem:[%s4961_s28 + $0x80] sm:$0xff] }
   0xf   :  { %2903 = vmatprep.subr.bf16.mxu0 %v113_v13  ;;  %2889 = vmatprep.mubr.msk.bf16.mxu1 %vm95_vm2, %v3524_v14  ;;  %v1044_v29 = vand.u32 %v1042_v26, %v3502_v6  ;;  %v2714_v33 = vld [vmem:[%s4961_s28 + $0x88] sm:$0xff]  ;;  %v428_v34 = vpack.c.bf16 %v2688_v31, %v2687_v30  ;;  %v2766_v36 = vld [vmem:[%s4962_s23 + $0x4] sm:$0x7]  ;;  %v2715_v37 = vld [vmem:[%s4961_s28 + $0x90] sm:$0xff] }
  0x10   :  { %v724_v35 = vpack.c.bf16 %v2714_v33, %v2713_v32  ;;  %v2716_v38 = vld [vmem:[%s4961_s28 + $0x98] sm:$0xff]  ;;  %v2717_v39 = vld [vmem:[%s4961_s28 + $0xa0] sm:$0xff]  ;;  %v2718_v40 = vld [vmem:[%s4961_s28 + $0xa8] sm:$0xff]  ;;  %v1127_v41 = vpack.c.bf16 %v2766_v36, %v2766_v36 }
  0x11   :  { %2886 = vmatmul.mubr.msk.bf16.vlgmr.msra.gmra.mrb[0].mxu0 %vm95_vm2, %v84_v18  ;;  %2890 = vmatmul.mubr.msk.bf16.vlgmr.msra.gmra.mrb[0].mxu1 %vm95_vm2, %v86_v19  ;;  %v725_v42 = vpack.c.bf16 %v2716_v38, %v2715_v37  ;;  %v726_v43 = vpack.c.bf16 %v2718_v40, %v2717_v39  ;;  %v2719_v45 = vld [vmem:[%s4961_s28 + $0xb0] sm:$0xff]  ;;  %v2720_v46 = vld [vmem:[%s4961_s28 + $0xb8] sm:$0xff]  ;;  %v2771_v48 = vld [vmem:[%s4962_s23 + $0x8] sm:$0x7] }
  0x12   :  { %2904 = vmatpush3.bf16.msra.mxu0 %v113_v13  ;;  %2905 = vmatprep.mubr.msk.bf16.mxu0 %vm95_vm2, %v425_v20  ;;  %v1129_v44 = vand.u32 %v1127_v41, %v3502_v6  ;;  %v727_v47 = vpack.c.bf16 %v2720_v46, %v2719_v45  ;;  %v1206_v49 = vpack.c.bf16 %v2771_v48, %v2771_v48  ;;  %v252_v51 = vld [vmem:[%s4963_s9] sm:$0xff]  ;;  %v253_v52 = vld [vmem:[%s4963_s9 + $0x8] sm:$0xff] }
  0x13   :  { %2923 = vmatprep.subr.bf16.mxu0 %v113_v13  ;;  %v3621_v53 = vpack.c.bf16 %v253_v52, %v252_v51  ;;  %v3629_v54 = vld [vmem:[%s4964_s2] ss:$0 sm:$0xff]  ;;  %s3379_s2 = smov 40  }
  0x14   :  { %v1208_v50 = vand.u32 %v1206_v49, %v3502_v6  ;;  %v228_v6 = vlaneseq  ;;  %v69_v37 = vld [vmem:[%s4965_s24] sm:$0x3] }
  0x15   :  { %2893 = vmatprep.subr.bf16.mxu1 %v3621_v53 }
  0x16   :  { %2894 = vmatpush3.bf16.msra.mxu1 %v3621_v53 }
  0x17   :  { %2913 = vmatprep.subr.bf16.mxu1 %v3621_v53 }
  0x19   :  { %2906 = vmatmul.mubr.msk.bf16.vlgmr.msra.gmra.mrb[4].mxu0 %vm95_vm2, %v426_v27 }
  0x1a   :  { %2924 = vmatpush3.bf16.msra.mxu0 %v113_v13  ;;  %2909 = vmatprep.mubr.msk.bf16.mxu0 %vm95_vm2, %v427_v28 }
  0x1b   :  { %2943 = vmatprep.subr.bf16.mxu0 %v1044_v29 }
  0x21   :  { %2910 = vmatmul.mubr.msk.bf16.gmra.mrb[8].mxu0 %vm95_vm2, %v428_v34 }
  0x22   :  { %2925 = vmatprep.mubr.msk.bf16.mxu0 %vm95_vm2, %v724_v35 }
  0x29   :  { %2926 = vmatmul.mubr.msk.bf16.vlgmr.msra.gmra.mrb[12].mxu0 %vm95_vm2, %v725_v42 }
  0x2a   :  { %2944 = vmatpush3.bf16.msra.mxu0 %v1044_v29  ;;  %2929 = vmatprep.mubr.msk.bf16.mxu0 %vm95_vm2, %v726_v43 }
  0x2b   :  { %2953 = vmatprep.subr.bf16.mxu0 %v1129_v44 }
  0x31   :  { %2930 = vmatmul.mubr.msk.bf16.gmra.mrb[16].mxu0 %vm95_vm2, %v727_v47 }
  0x32   :  { %2945 = vmatprep.mubr.msk.bf16.mxu0 %vm95_vm2, %v3504_v7 }
  0x39   :  { %2946 = vmatmul.mubr.msk.bf16.vlgmr.msra.gmra.mrb[20].mxu0 %vm95_vm2, %v84_v18  ;;  %v229_v18 = vshrl.u32 %v228_v6, 7 }
  0x3a   :  { %2954 = vmatpush3.bf16.msra.mxu0 %v1129_v44  ;;  %2949 = vmatprep.mubr.msk.bf16.mxu0 %vm95_vm2, %v3524_v14 }
  0x3b   :  { %2963 = vmatprep.subr.bf16.mxu0 %v1208_v50  ;;  %v3672_v31 = vsub.s32 0, %v229_v18  ;;  %v3687_v46 = vsub.s32 1, %v229_v18 }
  0x3d   :  { %v3685_v45 = vrot.slane %v69_v37, %v3672_v31  ;;  %v3702_v6 = vrot.slane %v69_v37, %v3687_v46 }
  0x41   :  { %2950 = vmatmul.mubr.msk.bf16.gmra.mrb[24].mxu0 %vm95_vm2, %v86_v19 }
  0x42   :  { %2955 = vmatprep.mubr.msk.bf16.mxu0 %vm95_vm2, %v425_v20 }
  0x49   :  { %2956 = vmatmul.mubr.msk.bf16.vlgmr.msra.gmra.mrb[20].mxu0 %vm95_vm2, %v426_v27 }
  0x4a   :  { %2964 = vmatpush3.bf16.msra.mxu0 %v1208_v50  ;;  %2959 = vmatprep.mubr.msk.bf16.mxu0 %vm95_vm2, %v427_v28 }
  0x51   :  { %2960 = vmatmul.mubr.msk.bf16.gmra.mrb[24].mxu0 %vm95_vm2, %v428_v34 }
  0x52   :  { %2965 = vmatprep.mubr.msk.bf16.mxu0 %vm95_vm2, %v724_v35 }
  0x59   :  { %2966 = vmatmul.mubr.msk.bf16.vlgmr.msra.gmra.mrb[20].mxu0 %vm95_vm2, %v725_v42 }
  0x5a   :  { %2969 = vmatprep.mubr.msk.bf16.mxu0 %vm95_vm2, %v726_v43 }
  0x61   :  { %2970 = vmatmul.mubr.msk.bf16.gmra.mrb[24].mxu0 %vm95_vm2, %v727_v47  ;;  %vm1383_vm2 = vcmask 1044480  }
  0xe4   :  { %v2887_v55 = vpop.f32.mrb[0].mxu0  ;;  %v2891_v56 = vpop.f32.mrb[0].mxu1 }
  0xe5   :  { %v3632_v57 = vadd.f32 %v2887_v55, %v3629_v54  ;;  %v149_v58 = vpop.f32.mrb[1].mxu0  ;;  %v3635_v59 = vadd.f32 %v2891_v56, %v3629_v54  ;;  %v165_v60 = vpop.f32.mrb[1].mxu1 }
  0xe6   :  { %v3638_v61 = vadd.f32 %v3629_v54, %v149_v58  ;;  %v2888_v62 = vpop.f32.mrb[2].mxu0  ;;  %v2892_v63 = vpop.f32.mrb[2].mxu1  ;;  %v3645_v4 = vadd.f32 %v3629_v54, %v165_v60 }
  0xe7   :  { %v190_v0 = vmin.f32 %v3632_v57, 0.0  ;;  %v3642_v2 = vadd.f32 %v2888_v62, %v3629_v54  ;;  %v152_v3 = vpop.f32.mrb[3].mxu0  ;;  %v168_v5 = vpop.f32.mrb[3].mxu1  ;;  %v194_v9 = vmin.f32 %v3635_v59, 0.0  ;;  %v3656_v17 = vadd.f32 %v2892_v63, %v3629_v54 }
  0xe8   :  { %v188_v7 = vmin.f32 %v3638_v61, 0.0  ;;  %v3649_v8 = vadd.f32 %v3629_v54, %v152_v3  ;;  %v192_v16 = vmin.f32 %v3645_v4, 0.0  ;;  %v3662_v24 = vadd.f32 %v3629_v54, %v168_v5 }
  0xe9   :  { %v200_v10 = vmul.f32 1.442695, %v190_v0  ;;  %v191_v11 = vmin.f32 %v3642_v2, 0.0  ;;  %v208_v14 = vmul.f32 1.442695, %v194_v9  ;;  %v195_v26 = vmin.f32 %v3656_v17, 0.0 }
  0xea   :  { %v196_v12 = vmul.f32 1.442695, %v188_v7  ;;  %v189_v13 = vmin.f32 %v3649_v8, 0.0  ;;  %v204_v22 = vmul.f32 1.442695, %v192_v16  ;;  %v193_v36 = vmin.f32 %v3662_v24, 0.0 }
  0xeb   :  { %3238 = vpow2.f32 %v200_v10  ;;  %v202_v15 = vmul.f32 1.442695, %v191_v11  ;;  %v210_v33 = vmul.f32 1.442695, %v195_v26  ;;  %vm182_vm4 = vcmp.gt.f32.partialorder %v3632_v57, 0.0 }
  0xec   :  { %3240 = vpow2.f32 %v196_v12  ;;  %v198_v19 = vmul.f32 1.442695, %v189_v13  ;;  %v2907_v20 = vpop.f32.mrb[4].mxu0  ;;  %v206_v41 = vmul.f32 1.442695, %v193_v36  ;;  %vm183_vm5 = vcmp.gt.f32.partialorder %v3642_v2, 0.0 }
  0xed   :  { %3242 = vpow2.f32 %v202_v15  ;;  %v3659_v21 = vadd.f32 %v2907_v20, %v3629_v54  ;;  %v475_v23 = vpop.f32.mrb[5].mxu0  ;;  %v3707_v7 = vsel %vm1382_vm3, 4294967295, %v3367_v1  ;;  %vm186_vm6 = vcmp.gt.f32.partialorder %v3635_v59, 0.0 }
  0xee   :  { %3244 = vpow2.f32 %v198_v19  ;;  %v3665_v25 = vadd.f32 %v3629_v54, %v475_v23  ;;  %v2908_v27 = vpop.f32.mrb[6].mxu0  ;;  %vm180_vm7 = vcmp.gt.f32.partialorder %v3638_v61, 0.0  ;;  %vm181_vm8 = vcmp.gt.f32.partialorder %v3649_v8, 0.0 }
  0xef   :  { %3246 = vpow2.f32 %v208_v14  ;;  %v516_v28 = vmin.f32 %v3659_v21, 0.0  ;;  %v3670_v29 = vadd.f32 %v2908_v27, %v3629_v54  ;;  %v478_v30 = vpop.f32.mrb[7].mxu0  ;;  %vm184_vm9 = vcmp.gt.f32.partialorder %v3645_v4, 0.0 }
  0xf0   :  { %v514_v32 = vmin.f32 %v3665_v25, 0.0  ;;  %3248 = vpow2.f32 %v204_v22  ;;  %v3681_v39 = vadd.f32 %v3629_v54, %v478_v30  ;;  %vm187_vm10 = vcmp.gt.f32.partialorder %v3656_v17, 0.0 }
  0xf1   :  { %v526_v34 = vmul.f32 1.442695, %v516_v28  ;;  %v517_v35 = vmin.f32 %v3670_v29, 0.0  ;;  %3250 = vpow2.f32 %v210_v33  ;;  %vm508_vm11 = vcmp.gt.f32.partialorder %v3659_v21, 0.0 }
  0xf2   :  { %v522_v38 = vmul.f32 1.442695, %v514_v32  ;;  %v515_v42 = vmin.f32 %v3681_v39, 0.0  ;;  %vm185_vm12 = vcmp.gt.f32.partialorder %v3662_v24, 0.0  ;;  %vm506_vm13 = vcmp.gt.f32.partialorder %v3665_v25, 0.0 }
  0xf3   :  { %3252 = vpow2.f32 %v526_v34  ;;  %v528_v40 = vmul.f32 1.442695, %v517_v35  ;;  %vm509_vm14 = vcmp.gt.f32.partialorder %v3670_v29, 0.0  ;;  %vm507_vm15 = vcmp.gt.f32.partialorder %v3681_v39, 0.0 }
  0xf4   :  { %3254 = vpow2.f32 %v522_v38  ;;  %v2911_v43 = vpop.f32.mrb[8].mxu0  ;;  %v524_v51 = vmul.f32 1.442695, %v515_v42 }
  0xf5   :  { %v3239_v44 = vpop.eup %3238  ;;  %3256 = vpow2.f32 %v528_v40  ;;  %v3690_v47 = vadd.f32 %v2911_v43, %v3629_v54  ;;  %v491_v48 = vpop.f32.mrb[9].mxu0 }
  0xf6   :  { %v3241_v49 = vpop.eup %3240  ;;  %v2662_v50 = vadd.f32 -1.0, %v3239_v44  ;;  %3258 = vpow2.f32 %v206_v41  ;;  %v2912_v52 = vpop.f32.mrb[10].mxu0  ;;  %v3695_v58 = vadd.f32 %v3629_v54, %v491_v48 }
  0xf7   :  { %v3243_v55 = vpop.eup %3242  ;;  %v520_v56 = vmin.f32 %v3690_v47, 0.0  ;;  %v3697_v60 = vpop.f32.mrb[11].mxu0  ;;  %3260 = vpow2.f32 %v524_v51  ;;  %v2660_v9 = vadd.f32 -1.0, %v3241_v49  ;;  %v3737_v40 = vadd.f32 %v2912_v52, %v3629_v54 }
  0xf8   :  { %v3245_v62 = vpop.eup %3244  ;;  %v222_v63 = vsel %vm182_vm4, %v3632_v57, %v2662_v50  ;;  %v2663_v0 = vadd.f32 -1.0, %v3243_v55  ;;  %v518_v15 = vmin.f32 %v3695_v58, 0.0  ;;  %vm512_vm1 = vcmp.gt.f32.partialorder %v3690_v47, 0.0 }
  0xf9   :  { %v3247_v3 = vpop.eup %3246  ;;  %v234_v5 = vsub.f32 %v222_v63, %v3685_v45  ;;  %v2661_v11 = vadd.f32 -1.0, %v3245_v62  ;;  %v534_v14 = vmul.f32 1.442695, %v520_v56  ;;  %v220_v23 = vsel %vm180_vm7, %v3638_v61, %v2660_v9 }
  0xfa   :  { %v223_v10 = vsel %vm183_vm5, %v3642_v2, %v2663_v0  ;;  %v3249_v57 = vpop.eup %3248  ;;  %v2666_v13 = vadd.f32 -1.0, %v3247_v3  ;;  %v530_v35 = vmul.f32 1.442695, %v518_v15  ;;  %v232_v41 = vsub.f32 %v220_v23, %v3685_v45 }
  0xfb   :  { %v235_v12 = vsub.f32 %v223_v10, %v3685_v45  ;;  %v3251_v16 = vpop.eup %3250  ;;  %v3718_v18 = vmul.f32 %v3702_v6, %v234_v5  ;;  %v221_v26 = vsel %vm181_vm8, %v3649_v8, %v2661_v11  ;;  %v2664_v28 = vadd.f32 -1.0, %v3249_v57 }
  0xfc   :  { %v2927_v1 = vpop.f32.mrb[12].mxu0  ;;  %v226_v34 = vsel %vm186_vm6, %v3635_v59, %v2666_v13  ;;  %3262 = vpow2.f32 %v534_v14  ;;  %v2667_v8 = vadd.f32 -1.0, %v3251_v16  ;;  %v233_v43 = vsub.f32 %v221_v26, %v3685_v45 }
  0xfd   :  { %v3253_v2 = vpop.eup %3252  ;;  %v3721_v19 = vmul.f32 %v3702_v6, %v235_v12  ;;  %v774_v20 = vpop.f32.mrb[13].mxu0  ;;  %v224_v44 = vsel %vm184_vm9, %v3645_v4, %v2664_v28  ;;  %3264 = vpow2.f32 %v530_v35  ;;  %v521_v56 = vmin.f32 %v3737_v40, 0.0 }
  0xfe   :  { %v3255_v22 = vpop.eup %3254  ;;  %v2695_v27 = vadd.f32 -1.0, %v3253_v2  ;;  %v2928_v30 = vpop.f32.mrb[14].mxu0  ;;  %v227_v52 = vsel %vm187_vm10, %v3656_v17, %v2667_v8  ;;  %v3756_v62 = vadd.f32 %v3629_v54, %v3697_v60  ;;  %v3765_v0 = vadd.f32 %v2927_v1, %v3629_v54 }
  0xff   :  { %v3257_v32 = vpop.eup %3256  ;;  %v255_v33 = vpack.c.bf16 %v3721_v19, %v3718_v18  ;;  %v777_v36 = vpop.f32.mrb[15].mxu0  ;;  %v2693_v49 = vadd.f32 -1.0, %v3255_v22  ;;  %v3768_v3 = vadd.f32 %v3629_v54, %v774_v20  ;;  %v244_v5 = vmul.f32 %v3702_v6, %v232_v41 }
 0x100   :  { %v3259_v37 = vpop.eup %3258  ;;  %v548_v61 = vsel %vm508_vm11, %v3659_v21, %v2695_v27  ;;  %v2696_v38 = vadd.f32 -1.0, %v3257_v32  ;;  %v238_v21 = vsub.f32 %v226_v34, %v3685_v45  ;;  %v245_v9 = vmul.f32 %v3702_v6, %v233_v43 }
 0x101   :  { %v556_v42 = vsub.f32 %v548_v61, %v3685_v45  ;;  %v3261_v59 = vpop.eup %3260  ;;  %v2665_v51 = vadd.f32 -1.0, %v3259_v37  ;;  %v236_v60 = vsub.f32 %v224_v44, %v3685_v45  ;;  %v536_v10 = vmul.f32 1.442695, %v521_v56 }
 0x102   :  { %v549_v48 = vsel %vm509_vm14, %v3670_v29, %v2696_v38  ;;  %v2694_v55 = vadd.f32 -1.0, %v3261_v59  ;;  %v3774_v57 = vmul.f32 %v3702_v6, %v238_v21  ;;  %v519_v14 = vmin.f32 %v3756_v62, 0.0 }
 0x103   :  { %v557_v50 = vsub.f32 %v549_v48, %v3685_v45  ;;  %v3759_v4 = vmul.f32 %v556_v42, %v3702_v6  ;;  %v225_v13 = vsel %vm185_vm12, %v3662_v24, %v2665_v51  ;;  %v239_v16 = vsub.f32 %v227_v52, %v3685_v45  ;;  %v1356_v52 = vld [vmem:[%s4916_s13 + $0x8] sm:$0x1] }
 0x104   :  { %v2931_v63 = vpop.f32.mrb[16].mxu0  ;;  %v547_v1 = vsel %vm507_vm15, %v3681_v39, %v2694_v55  ;;  %3266 = vpow2.f32 %v536_v10  ;;  %v815_v2 = vmin.f32 %v3765_v0, 0.0  ;;  %v546_v22 = vsel %vm506_vm13, %v3665_v25, %v2693_v49 }
 0x105   :  { %v3762_v29 = vmul.f32 %v557_v50, %v3702_v6  ;;  %v790_v17 = vpop.f32.mrb[17].mxu0  ;;  %v532_v24 = vmul.f32 1.442695, %v519_v14  ;;  %v813_v23 = vmin.f32 %v3768_v3, 0.0  ;;  %v3793_v26 = vadd.f32 %v2928_v30, %v3629_v54 }
 0x106   :  { %v2932_v11 = vpop.f32.mrb[18].mxu0  ;;  %v3263_v20 = vpop.eup %3262  ;;  %v237_v27 = vsub.f32 %v225_v13, %v3685_v45  ;;  %v825_v28 = vmul.f32 1.442695, %v815_v2  ;;  %v3797_v39 = vadd.f32 %v3629_v54, %v777_v36  ;;  %v254_v32 = vpack.c.bf16 %v245_v9, %v244_v5  ;;  %v1355_v9 = vld [vmem:[%s4916_s13] sm:$0xff] }
 0x107   :  { %v571_v12 = vpack.c.bf16 %v3762_v29, %v3759_v4  ;;  %v793_v15 = vpop.f32.mrb[19].mxu0  ;;  %v555_v34 = vsub.f32 %v547_v1, %v3685_v45  ;;  %vm510_vm4 = vcmp.gt.f32.partialorder %v3695_v58, 0.0  ;;  %3268 = vpow2.f32 %v532_v24  ;;  %v3265_v36 = vpop.eup %3264 }
 0x108   :  { %v821_v25 = vmul.f32 1.442695, %v813_v23  ;;  %v816_v35 = vmin.f32 %v3793_v26, 0.0  ;;  %v248_v37 = vmul.f32 %v3702_v6, %v236_v60  ;;  %v554_v30 = vsub.f32 %v546_v22, %v3685_v45  ;;  %2895 = vmatprep.mubr.msk.bf16.mxu1 %vm266_vm0, %v254_v32 }
 0x109   :  { %v2699_v61 = vadd.f32 -1.0, %v3263_v20  ;;  %3270 = vpow2.f32 %v825_v28  ;;  %v814_v38 = vmin.f32 %v3797_v39, 0.0  ;;  %2896 = vmatmul.mubr.msk.bf16.vlgmr.msra.gmra.mrb[4].mxu1 %vm266_vm0, %v255_v33  ;;  %v3811_v41 = vadd.f32 %v2931_v63, %v3629_v54 }
 0x10a   :  { %3272 = vpow2.f32 %v821_v25  ;;  %v827_v8 = vmul.f32 1.442695, %v816_v35  ;;  %v249_v42 = vmul.f32 %v3702_v6, %v237_v27  ;;  %v3815_v59 = vadd.f32 %v3629_v54, %v790_v17  ;;  %2914 = vmatpush3.bf16.msra.mxu1 %v3621_v53 }
 0x10b   :  { %v3818_v43 = vadd.f32 %v2932_v11, %v3629_v54  ;;  %v3821_v21 = vadd.f32 %v3629_v54, %v793_v15  ;;  %v251_v18 = vmul.f32 %v3702_v6, %v239_v16  ;;  %v563_v19 = vmul.f32 %v555_v34, %v3702_v6  ;;  %2933 = vmatprep.subr.bf16.mxu1 %v3621_v53 }
 0x10c   :  { %3274 = vpow2.f32 %v827_v8  ;;  %v823_v33 = vmul.f32 1.442695, %v814_v38  ;;  %v2697_v44 = vadd.f32 -1.0, %v3265_v36  ;;  %vm513_vm5 = vcmp.gt.f32.partialorder %v3737_v40, 0.0 }
 0x10d   :  { %v819_v48 = vmin.f32 %v3811_v41, 0.0  ;;  %v817_v49 = vmin.f32 %v3815_v59, 0.0  ;;  %v562_v54 = vmul.f32 %v554_v30, %v3702_v6  ;;  %v552_v50 = vsel %vm512_vm1, %v3690_v47, %v2699_v61 }
 0x10e   :  { %3276 = vpow2.f32 %v823_v33  ;;  %v820_v51 = vmin.f32 %v3818_v43, 0.0  ;;  %v3267_v55 = vpop.eup %3266  ;;  %v818_v17 = vmin.f32 %v3821_v21, 0.0  ;;  %v256_v5 = vpack.c.bf16 %v249_v42, %v248_v37 }
 0x10f   :  { %v833_v56 = vmul.f32 1.442695, %v819_v48  ;;  %v829_v63 = vmul.f32 1.442695, %v817_v49  ;;  %v2700_v60 = vadd.f32 -1.0, %v3267_v55  ;;  %v257_v47 = vpack.c.bf16 %v251_v18, %v3774_v57 }
 0x110   :  { %v835_v10 = vmul.f32 1.442695, %v820_v51  ;;  %v570_v11 = vpack.c.bf16 %v563_v19, %v562_v54  ;;  %v560_v13 = vsub.f32 %v552_v50, %v3685_v45  ;;  %v550_v14 = vsel %vm510_vm4, %v3695_v58, %v2697_v44  ;;  %2899 = vmatprep.mubr.msk.bf16.mxu1 %vm266_vm0, %v256_v5 }
 0x111   :  { %3278 = vpow2.f32 %v833_v56  ;;  %v831_v15 = vmul.f32 1.442695, %v818_v17  ;;  %v3269_v16 = vpop.eup %3268  ;;  %v553_v1 = vsel %vm513_vm5, %v3737_v40, %v2700_v60  ;;  %2900 = vmatmul.mubr.msk.bf16.gmra.mrb[8].mxu1 %vm266_vm0, %v257_v47  ;;  %v1361_v57 = vpack.c.bf16 %v1356_v52, %v1355_v9 }
 0x112   :  { %3280 = vpow2.f32 %v829_v63  ;;  %v3854_v2 = vsel %vm1383_vm2, %v3707_v7, 0  ;;  %v561_v58 = vsub.f32 %v553_v1, %v3685_v45  ;;  %vm511_vm6 = vcmp.gt.f32.partialorder %v3756_v62, 0.0  ;;  %2915 = vmatprep.mubr.msk.bf16.mxu1 %vm266_vm0, %v570_v11 }
 0x113   :  { %v3271_v20 = vpop.eup %3270  ;;  %v2698_v22 = vadd.f32 -1.0, %v3269_v16  ;;  %3282 = vpow2.f32 %v835_v10  ;;  %v558_v40 = vsub.f32 %v550_v14, %v3685_v45  ;;  %vm807_vm7 = vcmp.gt.f32.partialorder %v3765_v0, 0.0 }
 0x114   :  { %v3273_v24 = vpop.eup %3272  ;;  %v2727_v23 = vadd.f32 -1.0, %v3271_v20  ;;  %3284 = vpow2.f32 %v831_v15  ;;  %v568_v27 = vmul.f32 %v560_v13, %v3702_v6  ;;  %v569_v7 = vmul.f32 %v561_v58, %v3702_v6 }
 0x115   :  { %v551_v28 = vsel %vm511_vm6, %v3756_v62, %v2698_v22  ;;  %v2725_v32 = vadd.f32 -1.0, %v3273_v24  ;;  %vm805_vm8 = vcmp.gt.f32.partialorder %v3768_v3, 0.0  ;;  %v1387_v36 = vand.u32 %v3854_v2, %v1361_v57 }
 0x116   :  { %v3275_v34 = vpop.eup %3274  ;;  %v559_v25 = vsub.f32 %v551_v28, %v3685_v45  ;;  %v847_v35 = vsel %vm807_vm7, %v3765_v0, %v2727_v23  ;;  %v573_v61 = vpack.c.bf16 %v569_v7, %v568_v27  ;;  %v566_v38 = vmul.f32 %v558_v40, %v3702_v6 }
 0x117   :  { %v845_v37 = vsel %vm805_vm8, %v3768_v3, %v2725_v32  ;;  %v2728_v30 = vadd.f32 -1.0, %v3275_v34  ;;  %v855_v62 = vsub.f32 %v847_v35, %v3685_v45  ;;  %vm808_vm9 = vcmp.gt.f32.partialorder %v3793_v26, 0.0 }
 0x118   :  { %v3277_v8 = vpop.eup %3276  ;;  %v567_v42 = vmul.f32 %v559_v25, %v3702_v6  ;;  %v853_v18 = vsub.f32 %v845_v37, %v3685_v45  ;;  %vm806_vm10 = vcmp.gt.f32.partialorder %v3797_v39, 0.0  ;;  %vm811_vm11 = vcmp.gt.f32.partialorder %v3811_v41, 0.0 }
 0x119   :  { %v848_v0 = vsel %vm808_vm9, %v3793_v26, %v2728_v30  ;;  %v2726_v19 = vadd.f32 -1.0, %v3277_v8  ;;  %2916 = vmatmul.mubr.msk.bf16.vlgmr.msra.gmra.mrb[12].mxu1 %vm266_vm0, %v571_v12  ;;  %v863_v54 = vmul.f32 %v855_v62, %v3702_v6  ;;  %vm809_vm12 = vcmp.gt.f32.partialorder %v3815_v59, 0.0 }
 0x11a   :  { %v856_v3 = vsub.f32 %v848_v0, %v3685_v45  ;;  %v572_v33 = vpack.c.bf16 %v567_v42, %v566_v38  ;;  %2934 = vmatpush3.bf16.msra.mxu1 %v3621_v53  ;;  %v861_v29 = vmul.f32 %v853_v18, %v3702_v6  ;;  %vm812_vm13 = vcmp.gt.f32.partialorder %v3818_v43, 0.0 }
 0x11b   :  { %v3279_v44 = vpop.eup %3278  ;;  %v846_v48 = vsel %vm806_vm10, %v3797_v39, %v2726_v19  ;;  %2973 = vmatprep.subr.bf16.mxu1 %v1387_v36  ;;  %vm810_vm14 = vcmp.gt.f32.partialorder %v3821_v21, 0.0  ;;  %vm1369_vm6 = vcmask 72704  }
 0x11c   :  { %v3281_v49 = vpop.eup %3280  ;;  %v864_v26 = vmul.f32 %v856_v3, %v3702_v6  ;;  %v854_v50 = vsub.f32 %v846_v48, %v3685_v45  ;;  %v2731_v51 = vadd.f32 -1.0, %v3279_v44  ;;  %2919 = vmatprep.mubr.msk.bf16.mxu1 %vm266_vm0, %v572_v33  ;;  %v71_v3 = vld [vmem:[%s4918_s4] sm:$0x3] }
 0x11d   :  { %v3283_v4 = vpop.eup %3282  ;;  %v2729_v12 = vadd.f32 -1.0, %v3281_v49 }
 0x11e   :  { %v3285_v53 = vpop.eup %3284  ;;  %v870_v39 = vpack.c.bf16 %v864_v26, %v863_v54  ;;  %v862_v52 = vmul.f32 %v854_v50, %v3702_v6  ;;  %v851_v55 = vsel %vm811_vm11, %v3811_v41, %v2731_v51  ;;  %v2732_v56 = vadd.f32 -1.0, %v3283_v4 }
 0x11f   :  { %v859_v63 = vsub.f32 %v851_v55, %v3685_v45  ;;  %v849_v17 = vsel %vm809_vm12, %v3815_v59, %v2729_v12  ;;  %v2730_v5 = vadd.f32 -1.0, %v3285_v53  ;;  %v1334_v26 = vrot.slane %v71_v3, %v3672_v31 }
 0x120   :  { %v857_v9 = vsub.f32 %v849_v17, %v3685_v45  ;;  %v852_v60 = vsel %vm812_vm13, %v3818_v43, %v2732_v56  ;;  %v869_v10 = vpack.c.bf16 %v862_v52, %v861_v29 }
 0x121   :  { %v860_v47 = vsub.f32 %v852_v60, %v3685_v45  ;;  %v850_v11 = vsel %vm810_vm14, %v3821_v21, %v2730_v5  ;;  %2920 = vmatmul.mubr.msk.bf16.gmra.mrb[16].mxu1 %vm266_vm0, %v573_v61  ;;  %v867_v59 = vmul.f32 %v859_v63, %v3702_v6  ;;  %v2765_v21 = vld [vmem:[%s4917_s12] ss:$0 sm:$0xff] }
 0x122   :  { %v858_v41 = vsub.f32 %v850_v11, %v3685_v45  ;;  %2935 = vmatprep.mubr.msk.bf16.mxu1 %vm266_vm0, %v869_v10  ;;  %v865_v14 = vmul.f32 %v857_v9, %v3702_v6 }
 0x123   :  { %v868_v13 = vmul.f32 %v860_v47, %v3702_v6 }
 0x124   :  { %v866_v43 = vmul.f32 %v858_v41, %v3702_v6 }
 0x125   :  { %v872_v15 = vpack.c.bf16 %v868_v13, %v867_v59 }
 0x126   :  { %v871_v16 = vpack.c.bf16 %v866_v43, %v865_v14 }
 0x129   :  { %2936 = vmatmul.mubr.msk.bf16.vlgmr.msra.gmra.mrb[20].mxu1 %vm266_vm0, %v870_v39  ;;  %v1346_v39 = vrot.slane %v71_v3, %v3687_v46 }
 0x12a   :  { %2939 = vmatprep.mubr.msk.bf16.mxu1 %vm266_vm0, %v871_v16  ;;  %2974 = vmatpush3.bf16.msra.mxu1 %v1387_v36 }
 0x12c   :  { %v2967_v1 = vpop.f32.mrb[20].mxu0 }
 0x12d   :  { %v3027_v45 = vadd.f32 %v2967_v1, %v2765_v21  ;;  %v1244_v57 = vpop.f32.mrb[21].mxu0 }
 0x12e   :  { %v3028_v20 = vadd.f32 %v2765_v21, %v1244_v57  ;;  %v2968_v58 = vpop.f32.mrb[22].mxu0 }
 0x12f   :  { %v1293_v22 = vmin.f32 %v3027_v45, 0.0  ;;  %v3029_v24 = vadd.f32 %v2968_v58, %v2765_v21  ;;  %v1247_v40 = vpop.f32.mrb[23].mxu0  ;;  %vm1285_vm15 = vcmp.gt.f32.partialorder %v3027_v45, 0.0 }
 0x130   :  { %v1291_v6 = vmin.f32 %v3028_v20, 0.0  ;;  %v3030_v23 = vadd.f32 %v2765_v21, %v1247_v40  ;;  %vm1283_vm1 = vcmp.gt.f32.partialorder %v3028_v20, 0.0 }
 0x131   :  { %v1303_v27 = vmul.f32 1.442695, %v1293_v22  ;;  %v1294_v7 = vmin.f32 %v3029_v24, 0.0  ;;  %2940 = vmatmul.mubr.msk.bf16.gmra.mrb[24].mxu1 %vm266_vm0, %v872_v15  ;;  %vm1286_vm2 = vcmp.gt.f32.partialorder %v3029_v24, 0.0 }
 0x132   :  { %v1299_v28 = vmul.f32 1.442695, %v1291_v6  ;;  %v1292_v32 = vmin.f32 %v3030_v23, 0.0  ;;  %vm1284_vm4 = vcmp.gt.f32.partialorder %v3030_v23, 0.0 }
 0x133   :  { %3286 = vpow2.f32 %v1303_v27  ;;  %v1305_v34 = vmul.f32 1.442695, %v1294_v7 }
 0x134   :  { %3288 = vpow2.f32 %v1299_v28  ;;  %v1301_v25 = vmul.f32 1.442695, %v1292_v32  ;;  %v2971_v35 = vpop.f32.mrb[24].mxu0 }
 0x135   :  { %3290 = vpow2.f32 %v1305_v34  ;;  %v3031_v37 = vadd.f32 %v2971_v35, %v2765_v21  ;;  %v1260_v30 = vpop.f32.mrb[25].mxu0 }
 0x136   :  { %3292 = vpow2.f32 %v1301_v25  ;;  %v3032_v61 = vadd.f32 %v2765_v21, %v1260_v30  ;;  %v2972_v36 = vpop.f32.mrb[26].mxu0  ;;  %v1526_v30 = vld [vmem:[%s4919_s15] sm:$0xff] }
 0x137   :  { %v1297_v8 = vmin.f32 %v3031_v37, 0.0  ;;  %v3033_v38 = vadd.f32 %v2972_v36, %v2765_v21  ;;  %v1263_v42 = vpop.f32.mrb[27].mxu0  ;;  %vm1289_vm5 = vcmp.gt.f32.partialorder %v3031_v37, 0.0 }
 0x138   :  { %v1295_v62 = vmin.f32 %v3032_v61, 0.0  ;;  %v3034_v18 = vadd.f32 %v2765_v21, %v1263_v42  ;;  %vm1287_vm7 = vcmp.gt.f32.partialorder %v3032_v61, 0.0 }
 0x139   :  { %v1311_v0 = vmul.f32 1.442695, %v1297_v8  ;;  %v1298_v19 = vmin.f32 %v3033_v38, 0.0  ;;  %vm1290_vm8 = vcmp.gt.f32.partialorder %v3033_v38, 0.0 }
 0x13a   :  { %v1307_v33 = vmul.f32 1.442695, %v1295_v62  ;;  %v1296_v44 = vmin.f32 %v3034_v18, 0.0  ;;  %vm1288_vm9 = vcmp.gt.f32.partialorder %v3034_v18, 0.0 }
 0x13b   :  { %3294 = vpow2.f32 %v1311_v0  ;;  %v1313_v48 = vmul.f32 1.442695, %v1298_v19  ;;  %v3940_v0 = vld [vmem:[%s4920_s10] ss:$0 sm:$0xff] }
 0x13c   :  { %3296 = vpow2.f32 %v1307_v33  ;;  %v1309_v49 = vmul.f32 1.442695, %v1296_v44 }
 0x13d   :  { %v3287_v54 = vpop.eup %3286  ;;  %3298 = vpow2.f32 %v1313_v48 }
 0x13e   :  { %v3289_v50 = vpop.eup %3288  ;;  %v2778_v51 = vadd.f32 -1.0, %v3287_v54  ;;  %3300 = vpow2.f32 %v1309_v49 }
 0x13f   :  { %v3291_v4 = vpop.eup %3290  ;;  %v2776_v29 = vadd.f32 -1.0, %v3289_v50 }
 0x140   :  { %v3293_v12 = vpop.eup %3292  ;;  %v1325_v53 = vsel %vm1285_vm15, %v3027_v45, %v2778_v51  ;;  %v2779_v52 = vadd.f32 -1.0, %v3291_v4 }
 0x141   :  { %v1337_v55 = vsub.f32 %v1325_v53, %v1334_v26  ;;  %v1323_v56 = vsel %vm1283_vm1, %v3028_v20, %v2776_v29  ;;  %v2777_v63 = vadd.f32 -1.0, %v3293_v12 }
 0x142   :  { %v1335_v17 = vsub.f32 %v1323_v56, %v1334_v26  ;;  %v1326_v5 = vsel %vm1286_vm2, %v3029_v24, %v2779_v52 }
 0x143   :  { %v1338_v9 = vsub.f32 %v1326_v5, %v1334_v26  ;;  %v1324_v60 = vsel %vm1284_vm4, %v3030_v23, %v2777_v63  ;;  %v1349_v11 = vmul.f32 %v1346_v39, %v1337_v55 }
 0x144   :  { %v1336_v10 = vsub.f32 %v1324_v60, %v1334_v26  ;;  %v1347_v13 = vmul.f32 %v1346_v39, %v1335_v17  ;;  %v70_v17 = vld [vmem:[%s4921_s3] sm:$0x3] }
 0x145   :  { %v3295_v47 = vpop.eup %3294  ;;  %v1350_v41 = vmul.f32 %v1346_v39, %v1338_v9 }
 0x146   :  { %v3297_v59 = vpop.eup %3296  ;;  %v1348_v14 = vmul.f32 %v1346_v39, %v1336_v10  ;;  %v2782_v43 = vadd.f32 -1.0, %v3295_v47 }
 0x147   :  { %v3299_v15 = vpop.eup %3298  ;;  %v1358_v16 = vpack.c.bf16 %v1350_v41, %v1349_v11  ;;  %v2780_v21 = vadd.f32 -1.0, %v3297_v59  ;;  %v3959_v11 = vrot.slane %v70_v17, %v3672_v31 }
 0x148   :  { %v3301_v1 = vpop.eup %3300  ;;  %v1329_v45 = vsel %vm1289_vm5, %v3031_v37, %v2782_v43  ;;  %v2783_v57 = vadd.f32 -1.0, %v3299_v15  ;;  %v1357_v20 = vpack.c.bf16 %v1348_v14, %v1347_v13 }
 0x149   :  { %v1341_v58 = vsub.f32 %v1329_v45, %v1334_v26  ;;  %v1327_v22 = vsel %vm1287_vm7, %v3032_v61, %v2780_v21  ;;  %v2781_v24 = vadd.f32 -1.0, %v3301_v1  ;;  %v1527_v61 = vld [vmem:[%s4919_s15 + $0x8] sm:$0x1]  ;;  %v3963_v21 = vrot.slane %v70_v17, %v3687_v46  ;;  %s3378_s15 = smov 24  }
 0x14a   :  { %v1339_v40 = vsub.f32 %v1327_v22, %v1334_v26  ;;  %v1330_v6 = vsel %vm1290_vm8, %v3033_v38, %v2783_v57  ;;  %2975 = vmatprep.mubr.msk.bf16.mxu1 %vm1369_vm6, %v1357_v20  ;;  %v1532_v36 = vpack.c.bf16 %v1527_v61, %v1526_v30 }
 0x14b   :  { %v1342_v23 = vsub.f32 %v1330_v6, %v1334_v26  ;;  %v1328_v27 = vsel %vm1288_vm9, %v3034_v18, %v2781_v24  ;;  %2976 = vmatmul.mubr.msk.bf16.vlgmr.msra.gmra.mrb[28].mxu1 %vm1369_vm6, %v1358_v16  ;;  %v1353_v28 = vmul.f32 %v1346_v39, %v1341_v58 }
 0x14c   :  { %v1340_v7 = vsub.f32 %v1328_v27, %v1334_v26  ;;  %v1351_v34 = vmul.f32 %v1346_v39, %v1339_v40  ;;  %v1553_v8 = vand.u32 %v1532_v36, %v3854_v2 }
 0x14d   :  { %v1354_v32 = vmul.f32 %v1346_v39, %v1342_v23 }
 0x14e   :  { %v1352_v25 = vmul.f32 %v1346_v39, %v1340_v7  ;;  %2983 = vmatprep.subr.bf16.mxu1 %v1553_v8 }
 0x14f   :  { %v1360_v35 = vpack.c.bf16 %v1354_v32, %v1353_v28  ;;  %2984 = vmatpush3.bf16.msra.mxu1 %v1553_v8 }
 0x150   :  { %v1359_v37 = vpack.c.bf16 %v1352_v25, %v1351_v34 }
 0x152   :  { %2979 = vmatprep.mubr.msk.bf16.mxu1 %vm1369_vm6, %v1359_v37 }
 0x153   :  { %2980 = vmatmul.mubr.msk.bf16.gmra.mrb[32].mxu1 %vm1369_vm6, %v1360_v35 }
 0x1dc   :  { %v3929_v38 = vpop.f32.mrb[4].mxu1 }
 0x1dd   :  { %v3931_v42 = vpop.f32.mrb[5].mxu1 }
 0x1de   :  { %v3933_v62 = vpop.f32.mrb[6].mxu1 }
 0x1df   :  { %v3935_v18 = vpop.f32.mrb[7].mxu1 }
 0x1e4   :  { %v2901_v19 = vpop.f32.mrb[8].mxu1 }
 0x1e5   :  { %v338_v3 = vadd.f32 %v2901_v19, %v3940_v0  ;;  %v329_v33 = vpop.f32.mrb[9].mxu1 }
 0x1e6   :  { %v330_v2 = vadd.f32 %v3940_v0, %v329_v33  ;;  %v2902_v44 = vpop.f32.mrb[10].mxu1 }
 0x1e7   :  { %v358_v48 = vmin.f32 %v338_v3, 0.0  ;;  %v341_v49 = vadd.f32 %v2902_v44, %v3940_v0  ;;  %v332_v54 = vpop.f32.mrb[11].mxu1  ;;  %vm350_vm10 = vcmp.gt.f32.partialorder %v338_v3, 0.0 }
 0x1e8   :  { %v356_v26 = vmin.f32 %v330_v2, 0.0  ;;  %v333_v50 = vadd.f32 %v3940_v0, %v332_v54  ;;  %vm348_vm11 = vcmp.gt.f32.partialorder %v330_v2, 0.0 }
 0x1e9   :  { %v372_v51 = vmul.f32 1.442695, %v358_v48  ;;  %v359_v4 = vmin.f32 %v341_v49, 0.0  ;;  %vm351_vm12 = vcmp.gt.f32.partialorder %v341_v49, 0.0 }
 0x1ea   :  { %v368_v29 = vmul.f32 1.442695, %v356_v26  ;;  %v357_v12 = vmin.f32 %v333_v50, 0.0  ;;  %vm349_vm13 = vcmp.gt.f32.partialorder %v333_v50, 0.0 }
 0x1eb   :  { %3302 = vpow2.f32 %v372_v51  ;;  %v374_v53 = vmul.f32 1.442695, %v359_v4 }
 0x1ec   :  { %3304 = vpow2.f32 %v368_v29  ;;  %v370_v39 = vmul.f32 1.442695, %v357_v12  ;;  %v3946_v52 = vpop.f32.mrb[12].mxu1 }
 0x1ed   :  { %3306 = vpow2.f32 %v374_v53  ;;  %v3948_v55 = vpop.f32.mrb[13].mxu1 }
 0x1ee   :  { %3308 = vpow2.f32 %v370_v39  ;;  %v3950_v56 = vpop.f32.mrb[14].mxu1 }
 0x1ef   :  { %v3952_v63 = vpop.f32.mrb[15].mxu1 }
 0x1f4   :  { %v2921_v5 = vpop.f32.mrb[16].mxu1 }
 0x1f5   :  { %v3303_v9 = vpop.eup %3302  ;;  %v645_v60 = vadd.f32 %v2921_v5, %v3940_v0  ;;  %v636_v10 = vpop.f32.mrb[17].mxu1 }
 0x1f6   :  { %v3305_v47 = vpop.eup %3304  ;;  %v2679_v41 = vadd.f32 -1.0, %v3303_v9  ;;  %v637_v59 = vadd.f32 %v3940_v0, %v636_v10  ;;  %v2922_v13 = vpop.f32.mrb[18].mxu1 }
 0x1f7   :  { %v3307_v14 = vpop.eup %3306  ;;  %v2677_v43 = vadd.f32 -1.0, %v3305_v47  ;;  %v665_v15 = vmin.f32 %v645_v60, 0.0  ;;  %v639_v16 = vpop.f32.mrb[19].mxu1  ;;  %v648_v28 = vadd.f32 %v2922_v13, %v3940_v0  ;;  %vm657_vm14 = vcmp.gt.f32.partialorder %v645_v60, 0.0 }
 0x1f8   :  { %v3309_v1 = vpop.eup %3308  ;;  %v390_v45 = vsel %vm350_vm10, %v338_v3, %v2679_v41  ;;  %v2680_v57 = vadd.f32 -1.0, %v3307_v14  ;;  %v663_v23 = vmin.f32 %v637_v59, 0.0  ;;  %v640_v25 = vadd.f32 %v3940_v0, %v639_v16 }
 0x1f9   :  { %v402_v20 = vsub.f32 %v390_v45, %v3959_v11  ;;  %v3966_v58 = vsel %vm348_vm11, %v330_v2, %v2677_v43  ;;  %v2678_v22 = vadd.f32 -1.0, %v3309_v1  ;;  %v679_v24 = vmul.f32 1.442695, %v665_v15 }
 0x1fa   :  { %v400_v40 = vsub.f32 %v3966_v58, %v3959_v11  ;;  %v3970_v6 = vsel %vm351_vm12, %v341_v49, %v2680_v57  ;;  %v675_v34 = vmul.f32 1.442695, %v663_v23  ;;  %v666_v37 = vmin.f32 %v648_v28, 0.0 }
 0x1fb   :  { %v403_v27 = vsub.f32 %v3970_v6, %v3959_v11  ;;  %v3974_v7 = vsel %vm349_vm13, %v333_v50, %v2678_v22  ;;  %3310 = vpow2.f32 %v679_v24  ;;  %v3985_v61 = vmul.f32 %v3963_v21, %v402_v20 }
 0x1fc   :  { %v401_v32 = vsub.f32 %v3974_v7, %v3959_v11  ;;  %v3980_v35 = vpop.f32.mrb[20].mxu1  ;;  %3312 = vpow2.f32 %v675_v34  ;;  %v664_v36 = vmin.f32 %v640_v25, 0.0  ;;  %v681_v19 = vmul.f32 1.442695, %v666_v37 }
 0x1fd   :  { %v3982_v30 = vpop.f32.mrb[21].mxu1  ;;  %vm655_vm15 = vcmp.gt.f32.partialorder %v637_v59, 0.0  ;;  %vm658_vm1 = vcmp.gt.f32.partialorder %v648_v28, 0.0  ;;  %vm656_vm2 = vcmp.gt.f32.partialorder %v640_v25, 0.0  ;;  %v4006_v23 = vmul.f32 %v3963_v21, %v400_v40 }
 0x1fe   :  { %v3987_v8 = vpop.f32.mrb[22].mxu1  ;;  %v677_v33 = vmul.f32 1.442695, %v664_v36  ;;  %3314 = vpow2.f32 %v681_v19  ;;  %v2784_v19 = vld [vmem:[%s4922_s14] ss:$0 sm:$0xff]  ;;  %s3380_s14 = smov 48  }
 0x1ff   :  { %v3989_v3 = vpop.f32.mrb[23].mxu1  ;;  %4966 = vst [vmem:[#allocation2_spill] sm:$0xff] %v4006_v23 }
 0x200   :  { %3316 = vpow2.f32 %v677_v33 }
 0x204   :  { %v2941_v2 = vpop.f32.mrb[24].mxu1 }
 0x205   :  { %v3311_v44 = vpop.eup %3310  ;;  %v935_v48 = vpop.f32.mrb[25].mxu1  ;;  %v944_v54 = vadd.f32 %v2941_v2, %v3940_v0 }
 0x206   :  { %v2711_v49 = vadd.f32 -1.0, %v3311_v44  ;;  %v2942_v26 = vpop.f32.mrb[26].mxu1  ;;  %v936_v50 = vadd.f32 %v3940_v0, %v935_v48  ;;  %v3313_v29 = vpop.eup %3312 }
 0x207   :  { %v947_v51 = vadd.f32 %v2942_v26, %v3940_v0  ;;  %v938_v4 = vpop.f32.mrb[27].mxu1  ;;  %v2709_v39 = vadd.f32 -1.0, %v3313_v29  ;;  %v964_v17 = vmin.f32 %v944_v54, 0.0  ;;  %vm956_vm4 = vcmp.gt.f32.partialorder %v944_v54, 0.0 }
 0x208   :  { %v697_v12 = vsel %vm657_vm14, %v645_v60, %v2711_v49  ;;  %v962_v5 = vmin.f32 %v936_v50, 0.0  ;;  %v3315_v9 = vpop.eup %3314  ;;  %v939_v13 = vadd.f32 %v3940_v0, %v938_v4  ;;  %vm954_vm5 = vcmp.gt.f32.partialorder %v936_v50, 0.0 }
 0x209   :  { %v705_v53 = vsub.f32 %v697_v12, %v3959_v11  ;;  %v695_v10 = vsel %vm655_vm15, %v637_v59, %v2709_v39  ;;  %v978_v47 = vmul.f32 1.442695, %v964_v17  ;;  %v965_v41 = vmin.f32 %v947_v51, 0.0 }
 0x20a   :  { %v3317_v14 = vpop.eup %3316  ;;  %v703_v43 = vsub.f32 %v695_v10, %v3959_v11  ;;  %v2712_v15 = vadd.f32 -1.0, %v3315_v9  ;;  %v974_v16 = vmul.f32 1.442695, %v962_v5  ;;  %v963_v57 = vmin.f32 %v939_v13, 0.0 }
 0x20b   :  { %v2710_v1 = vadd.f32 -1.0, %v3317_v14  ;;  %3318 = vpow2.f32 %v978_v47  ;;  %v980_v60 = vmul.f32 1.442695, %v965_v41  ;;  %v3999_v22 = vmul.f32 %v705_v53, %v3963_v21 }
 0x20c   :  { %v698_v45 = vsel %vm658_vm1, %v648_v28, %v2712_v15  ;;  %3320 = vpow2.f32 %v974_v16  ;;  %v976_v6 = vmul.f32 1.442695, %v963_v57  ;;  %v4012_v28 = vmul.f32 %v3963_v21, %v403_v27 }
 0x20d   :  { %v706_v20 = vsub.f32 %v698_v45, %v3959_v11  ;;  %v696_v59 = vsel %vm656_vm2, %v640_v25, %v2710_v1  ;;  %3322 = vpow2.f32 %v980_v60  ;;  %v4018_v25 = vmul.f32 %v3963_v21, %v401_v32 }
 0x20e   :  { %v704_v24 = vsub.f32 %v696_v59, %v3959_v11  ;;  %4968 = vst [vmem:[#allocation4_spill] sm:$0xff] %v4012_v28  ;;  %3324 = vpow2.f32 %v976_v6  ;;  %v4021_v37 = vmul.f32 %v703_v43, %v3963_v21  ;;  %vm957_vm7 = vcmp.gt.f32.partialorder %v947_v51, 0.0 }
 0x20f   :  { %v4009_v7 = vmul.f32 %v706_v20, %v3963_v21  ;;  %4970 = vst [vmem:[#allocation6_spill] sm:$0xff] %v4018_v25  ;;  %vm955_vm8 = vcmp.gt.f32.partialorder %v939_v13, 0.0  ;;  %v4982_v25 = vmov 0  }
 0x210   :  { %v4015_v34 = vmul.f32 %v704_v24, %v3963_v21  ;;  %4971 = vst [vmem:[#allocation7_spill] sm:$0xff] %v4021_v37 }
 0x211   :  { %4967 = vst [vmem:[#allocation3_spill] sm:$0xff] %v4009_v7 }
 0x212   :  { %4969 = vst [vmem:[#allocation5_spill] sm:$0xff] %v4015_v34 }
 0x215   :  { %v3319_v58 = vpop.eup %3318 }
 0x216   :  { %v3321_v36 = vpop.eup %3320  ;;  %v2743_v40 = vadd.f32 -1.0, %v3319_v58 }
 0x217   :  { %v3323_v33 = vpop.eup %3322  ;;  %v2741_v27 = vadd.f32 -1.0, %v3321_v36 }
 0x218   :  { %v996_v2 = vsel %vm956_vm4, %v944_v54, %v2743_v40  ;;  %v2744_v44 = vadd.f32 -1.0, %v3323_v33  ;;  %v3325_v29 = vpop.eup %3324 }
 0x219   :  { %v1004_v32 = vsub.f32 %v996_v2, %v3959_v11  ;;  %v994_v49 = vsel %vm954_vm5, %v936_v50, %v2741_v27  ;;  %v2742_v9 = vadd.f32 -1.0, %v3325_v29 }
 0x21a   :  { %v1002_v12 = vsub.f32 %v994_v49, %v3959_v11  ;;  %v997_v53 = vsel %vm957_vm7, %v947_v51, %v2744_v44 }
 0x21b   :  { %v1005_v5 = vsub.f32 %v997_v53, %v3959_v11  ;;  %v995_v43 = vsel %vm955_vm8, %v939_v13, %v2742_v9  ;;  %v4030_v15 = vmul.f32 %v1004_v32, %v3963_v21 }
 0x21c   :  { %v4033_v16 = vmul.f32 %v1002_v12, %v3963_v21  ;;  %v1003_v51 = vsub.f32 %v995_v43, %v3959_v11  ;;  %v72_v12 = vld [vmem:[%s4923_s5] sm:$0x3] }
 0x21d   :  { %4972 = vst [vmem:[#allocation8_spill] sm:$0xff] %v4030_v15  ;;  %v4037_v57 = vmul.f32 %v1005_v5, %v3963_v21 }
 0x21e   :  { %v2977_v48 = vpop.f32.mrb[28].mxu1  ;;  %4973 = vst [vmem:[#allocation9_spill] sm:$0xff] %v4033_v16  ;;  %v4040_v13 = vmul.f32 %v1003_v51, %v3963_v21 }
 0x21f   :  { %v1432_v26 = vadd.f32 %v2977_v48, %v2784_v19  ;;  %v1423_v4 = vpop.f32.mrb[29].mxu1  ;;  %4974 = vst [vmem:[#allocation10_spill] sm:$0xff] %v4037_v57  ;;  %v1017_v57 = vld [vmem:[%s4926_s1 + $0x18] sm:$0xff] }
 0x220   :  { %v1424_v39 = vadd.f32 %v2784_v19, %v1423_v4  ;;  %v2978_v17 = vpop.f32.mrb[30].mxu1  ;;  %4975 = vst [vmem:[#allocation11_spill] sm:$0xff] %v4040_v13  ;;  %v4381_v13 = vld [vmem:[%s4926_s1 + $0x50] sm:$0xff] }
 0x221   :  { %v1464_v10 = vmin.f32 %v1432_v26, 0.0  ;;  %v1426_v54 = vpop.f32.mrb[31].mxu1  ;;  %v1435_v41 = vadd.f32 %v2978_v17, %v2784_v19  ;;  %vm1456_vm9 = vcmp.gt.f32.partialorder %v1432_v26, 0.0 }
 0x222   :  { %v1462_v47 = vmin.f32 %v1424_v39, 0.0  ;;  %v1427_v14 = vadd.f32 %v2784_v19, %v1426_v54  ;;  %v1505_v54 = vrot.slane %v72_v12, %v3672_v31  ;;  %vm1454_vm10 = vcmp.gt.f32.partialorder %v1424_v39, 0.0 }
 0x223   :  { %v1474_v50 = vmul.f32 1.442695, %v1464_v10  ;;  %v1465_v60 = vmin.f32 %v1435_v41, 0.0  ;;  %vm1457_vm11 = vcmp.gt.f32.partialorder %v1435_v41, 0.0 }
 0x224   :  { %v1470_v1 = vmul.f32 1.442695, %v1462_v47  ;;  %v1463_v45 = vmin.f32 %v1427_v14, 0.0  ;;  %vm1455_vm12 = vcmp.gt.f32.partialorder %v1427_v14, 0.0 }
 0x225   :  { %3326 = vpow2.f32 %v1474_v50  ;;  %v1476_v20 = vmul.f32 1.442695, %v1465_v60 }
 0x226   :  { %3328 = vpow2.f32 %v1470_v1  ;;  %v2981_v59 = vpop.f32.mrb[32].mxu1  ;;  %v1472_v24 = vmul.f32 1.442695, %v1463_v45  ;;  %v1517_v45 = vrot.slane %v72_v12, %v3687_v46 }
 0x227   :  { %v1448_v6 = vadd.f32 %v2981_v59, %v2784_v19  ;;  %v1439_v58 = vpop.f32.mrb[33].mxu1  ;;  %3330 = vpow2.f32 %v1476_v20 }
 0x228   :  { %v1440_v36 = vadd.f32 %v2784_v19, %v1439_v58  ;;  %v2982_v40 = vpop.f32.mrb[34].mxu1  ;;  %3332 = vpow2.f32 %v1472_v24 }
 0x229   :  { %v1468_v33 = vmin.f32 %v1448_v6, 0.0  ;;  %v1451_v27 = vadd.f32 %v2982_v40, %v2784_v19  ;;  %v1442_v2 = vpop.f32.mrb[35].mxu1  ;;  %vm1460_vm13 = vcmp.gt.f32.partialorder %v1448_v6, 0.0 }
 0x22a   :  { %v1466_v44 = vmin.f32 %v1440_v36, 0.0  ;;  %v1443_v48 = vadd.f32 %v2784_v19, %v1442_v2  ;;  %vm1458_vm14 = vcmp.gt.f32.partialorder %v1440_v36, 0.0 }
 0x22b   :  { %v1482_v32 = vmul.f32 1.442695, %v1468_v33  ;;  %v1469_v49 = vmin.f32 %v1451_v27, 0.0  ;;  %vm1461_vm15 = vcmp.gt.f32.partialorder %v1451_v27, 0.0 }
 0x22c   :  { %v1478_v4 = vmul.f32 1.442695, %v1466_v44  ;;  %v1467_v29 = vmin.f32 %v1443_v48, 0.0  ;;  %vm1459_vm1 = vcmp.gt.f32.partialorder %v1443_v48, 0.0 }
 0x22d   :  { %3334 = vpow2.f32 %v1482_v32  ;;  %v1484_v53 = vmul.f32 1.442695, %v1469_v49 }
 0x22e   :  { %3336 = vpow2.f32 %v1478_v4  ;;  %v1480_v17 = vmul.f32 1.442695, %v1467_v29 }
 0x22f   :  { %v3327_v5 = vpop.eup %3326  ;;  %3338 = vpow2.f32 %v1484_v53 }
 0x230   :  { %v3329_v9 = vpop.eup %3328  ;;  %v2791_v10 = vadd.f32 -1.0, %v3327_v5  ;;  %3340 = vpow2.f32 %v1480_v17 }
 0x231   :  { %v2789_v19 = vadd.f32 -1.0, %v3329_v9  ;;  %v3331_v47 = vpop.eup %3330 }
 0x232   :  { %v1496_v43 = vsel %vm1456_vm9, %v1432_v26, %v2791_v10  ;;  %v3333_v50 = vpop.eup %3332  ;;  %v2792_v1 = vadd.f32 -1.0, %v3331_v47 }
 0x233   :  { %v1494_v51 = vsel %vm1454_vm10, %v1424_v39, %v2789_v19  ;;  %v1508_v60 = vsub.f32 %v1496_v43, %v1505_v54  ;;  %v2790_v20 = vadd.f32 -1.0, %v3333_v50 }
 0x234   :  { %v1506_v59 = vsub.f32 %v1494_v51, %v1505_v54  ;;  %v1497_v24 = vsel %vm1457_vm11, %v1435_v41, %v2792_v1 }
 0x235   :  { %v1509_v58 = vsub.f32 %v1497_v24, %v1505_v54  ;;  %v1495_v40 = vsel %vm1455_vm12, %v1427_v14, %v2790_v20  ;;  %v1520_v32 = vmul.f32 %v1517_v45, %v1508_v60 }
 0x236   :  { %v1507_v2 = vsub.f32 %v1495_v40, %v1505_v54  ;;  %v1518_v39 = vmul.f32 %v1517_v45, %v1506_v59 }
 0x237   :  { %v3335_v33 = vpop.eup %3334  ;;  %v1521_v49 = vmul.f32 %v1517_v45, %v1509_v58 }
 0x238   :  { %v3337_v44 = vpop.eup %3336  ;;  %v2795_v26 = vadd.f32 -1.0, %v3335_v33  ;;  %v1519_v29 = vmul.f32 %v1517_v45, %v1507_v2 }
 0x239   :  { %v3339_v4 = vpop.eup %3338  ;;  %v2793_v53 = vadd.f32 -1.0, %v3337_v44  ;;  %v1529_v17 = vpack.c.bf16 %v1521_v49, %v1520_v32 }
 0x23a   :  { %v3341_v12 = vpop.eup %3340  ;;  %v1500_v5 = vsel %vm1460_vm13, %v1448_v6, %v2795_v26  ;;  %v2796_v41 = vadd.f32 -1.0, %v3339_v4  ;;  %v1528_v19 = vpack.c.bf16 %v1519_v29, %v1518_v39 }
 0x23b   :  { %v1512_v9 = vsub.f32 %v1500_v5, %v1505_v54  ;;  %v1498_v10 = vsel %vm1458_vm14, %v1440_v36, %v2793_v53  ;;  %v2794_v14 = vadd.f32 -1.0, %v3341_v12  ;;  %v4943_v36 = vmov 1  }
 0x23c   :  { %v1510_v47 = vsub.f32 %v1498_v10, %v1505_v54  ;;  %v1501_v43 = vsel %vm1461_vm15, %v1451_v27, %v2796_v41  ;;  %2985 = vmatprep.mubr.msk.bf16.mxu1 %vm1369_vm6, %v1528_v19  ;;  %3069 = vset.pattern.permute.xlu1 %v4943_v36  ;;  %v4940_v27 = vmov 0   ;;  %v3370_v5 = vmov 4  }
 0x23d   :  { %v1513_v50 = vsub.f32 %v1501_v43, %v1505_v54  ;;  %v1499_v51 = vsel %vm1459_vm1, %v1443_v48, %v2794_v14  ;;  %2986 = vmatmul.mubr.msk.bf16.vlgmr.msra.gmra.mrb[36].mxu1 %vm1369_vm6, %v1529_v17  ;;  %v1524_v60 = vmul.f32 %v1517_v45, %v1512_v9  ;;  %3067 = vset.pattern.permute.xlu0 %v4940_v27  ;;  %v73_v48 = vld [vmem:[%s4924_s6] sm:$0x3]  ;;  %v3371_v41 = vmov 3  }
 0x23e   :  { %v1511_v1 = vsub.f32 %v1499_v51, %v1505_v54  ;;  %v1522_v59 = vmul.f32 %v1517_v45, %v1510_v47  ;;  %v4059_v54 = vld [vmem:[%s4925_s16] ss:$0 sm:$0xff]  ;;  %v4066_v2 = vrot.slane %v73_v48, %v3687_v46  ;;  %s3381_s16 = smov 64   ;;  %vm2405_vm15 = vcmask 326656  }
 0x23f   :  { %v1525_v20 = vmul.f32 %v1517_v45, %v1513_v50  ;;  %vm2414_vm1 = vcmask 392192  }
 0x240   :  { %v1523_v6 = vmul.f32 %v1517_v45, %v1511_v1  ;;  %v4062_v45 = vrot.slane %v73_v48, %v3672_v31 }
 0x241   :  { %v1531_v24 = vpack.c.bf16 %v1525_v20, %v1524_v60  ;;  %v4938_v60 = vmov 7   ;;  %v4941_v20 = vmov 6  }
 0x242   :  { %v1530_v58 = vpack.c.bf16 %v1523_v6, %v1522_v59 }
 0x244   :  { %2989 = vmatprep.mubr.msk.bf16.mxu1 %vm1369_vm6, %v1530_v58  ;;  %v4936_v58 = vmov 5  }
 0x245   :  { %2990 = vmatmul.mubr.msk.bf16.gmra.mrb[40].mxu1 %vm1369_vm6, %v1531_v24  ;;  %v3374_v24 = vmov 2  }
 0x310   :  { %v2987_v40 = vpop.f32.mrb[36].mxu1 }
 0x311   :  { %v1598_v33 = vadd.f32 %v2987_v40, %v4059_v54  ;;  %v1589_v44 = vpop.f32.mrb[37].mxu1  ;;  %v4935_v40 = vmov 8  }
 0x312   :  { %v2988_v32 = vpop.f32.mrb[38].mxu1  ;;  %v1590_v59 = vadd.f32 %v4059_v54, %v1589_v44 }
 0x313   :  { %v1626_v49 = vsub.f32 %v1598_v33, %v4062_v45  ;;  %v1592_v26 = vpop.f32.mrb[39].mxu1  ;;  %v1601_v33 = vadd.f32 %v2988_v32, %v4059_v54 }
 0x314   :  { %v1624_v6 = vsub.f32 %v1590_v59, %v4062_v45 }
 0x315   :  { %v1638_v4 = vmul.f32 %v4066_v2, %v1626_v49  ;;  %v1627_v44 = vsub.f32 %v1601_v33, %v4062_v45 }
 0x316   :  { %v1636_v48 = vmul.f32 %v4066_v2, %v1624_v6 }
 0x317   :  { %1853 = vperm.xlu1 %3069, %v1638_v4   ;;  %1656 = vperm.xlu0 %3067, %v1638_v4   ;;  %v1639_v49 = vmul.f32 %v4066_v2, %v1627_v44 }
 0x318   :  { %v2991_v39 = vpop.f32.mrb[40].mxu1 }
 0x319   :  { %v1614_v29 = vadd.f32 %v2991_v39, %v4059_v54  ;;  %v1605_v31 = vpop.f32.mrb[41].mxu1 }
 0x31a   :  { %v1606_v53 = vadd.f32 %v4059_v54, %v1605_v31  ;;  %v2992_v12 = vpop.f32.mrb[42].mxu1 }
 0x31b   :  { %v1630_v17 = vsub.f32 %v1614_v29, %v4062_v45  ;;  %v1617_v46 = vadd.f32 %v2992_v12, %v4059_v54  ;;  %3070 = vset.pattern.permute.xlu1 %v3370_v5  ;;  %3068 = vset.pattern.permute.xlu0 %v3371_v41  ;;  %v1608_v9 = vpop.f32.mrb[43].mxu1 }
 0x31c   :  { %v1628_v10 = vsub.f32 %v1606_v53, %v4062_v45  ;;  %v1609_v14 = vadd.f32 %v4059_v54, %v1608_v9  ;;  %1901 = vperm.xlu1 %3070, %v1638_v4   ;;  %1709 = vperm.xlu0 %3068, %v1638_v4  }
 0x31d   :  { %v4079_v19 = vmul.f32 %v4066_v2, %v1630_v17  ;;  %v1631_v47 = vsub.f32 %v1617_v46, %v4062_v45  ;;  %v4177_v46 = vadd.f32 %v3940_v0, %v3948_v55 }
 0x31e   :  { %v4083_v43 = vmul.f32 %v4066_v2, %v1628_v10  ;;  %v1629_v50 = vsub.f32 %v1609_v14, %v4062_v45 }
 0x31f   :  { %v4087_v51 = vmul.f32 %v4066_v2, %v1631_v47  ;;  %v659_v47 = vmin.f32 %v4177_v46, 0.0  ;;  %vm651_vm7 = vcmp.gt.f32.partialorder %v4177_v46, 0.0 }
 0x320   :  { %v4090_v1 = vmul.f32 %v4066_v2, %v1629_v50  ;;  %3072 = vset.pattern.permute.xlu1 %v4938_v60  ;;  %3071 = vset.pattern.permute.xlu0 %v4941_v20 }
 0x321   :  { %1949 = vperm.xlu1 %3072, %v1638_v4   ;;  %1757 = vperm.xlu0 %3071, %v1638_v4  }
 0x325   :  { %3073 = vset.pattern.permute.xlu1 %v3374_v24  ;;  %3074 = vset.pattern.permute.xlu0 %v4936_v58 }
 0x326   :  { %2045 = vperm.xlu1 %3073, %v1638_v4   ;;  %2093 = vperm.xlu0 %3074, %v1638_v4  }
 0x32a   :  { %3075 = vset.pattern.permute.xlu1 %v4935_v40  ;;  %3076 = vset.pattern.permute.xlu0 %v4940_v27 }
 0x32b   :  { %2141 = vperm.xlu1 %3075, %v1638_v4   ;;  %1646 = vperm.xlu0 %3076, %v1636_v48   ;;  %v1593_v4 = vadd.f32 %v4059_v54, %v1592_v26  ;;  %v322_v54 = vadd.f32 %v3929_v38, %v3940_v0  ;;  %v928_v38 = vadd.f32 %v3980_v35, %v3940_v0 }
 0x32c   :  { %v4170_v35 = vadd.f32 %v3940_v0, %v3931_v42  ;;  %v4183_v42 = vadd.f32 %v3940_v0, %v3982_v30 }
 0x32d   :  { %v1625_v32 = vsub.f32 %v1593_v4, %v4062_v45  ;;  %v354_v45 = vmin.f32 %v322_v54, 0.0  ;;  %vm346_vm6 = vcmp.gt.f32.partialorder %v322_v54, 0.0  ;;  %vm952_vm4 = vcmp.gt.f32.partialorder %v928_v38, 0.0 }
 0x32e   :  { %v352_v17 = vmin.f32 %v4170_v35, 0.0  ;;  %v958_v50 = vmin.f32 %v4183_v42, 0.0  ;;  %vm344_vm5 = vcmp.gt.f32.partialorder %v4170_v35, 0.0  ;;  %vm950_vm8 = vcmp.gt.f32.partialorder %v4183_v42, 0.0 }
 0x32f   :  { %3077 = vset.pattern.permute.xlu1 %v3371_v41  ;;  %3080 = vset.pattern.permute.xlu0 %v4941_v20  ;;  %v4115_v39 = vmul.f32 %v4066_v2, %v1625_v32  ;;  %v629_v2 = vadd.f32 %v3946_v52, %v3940_v0  ;;  %v364_v26 = vmul.f32 1.442695, %v354_v45  ;;  %v960_v52 = vmin.f32 %v928_v38, 0.0 }
 0x330   :  { %1701 = vperm.xlu1 %3077, %v1636_v48   ;;  %1749 = vperm.xlu0 %3080, %v1636_v48   ;;  %v360_v14 = vmul.f32 1.442695, %v352_v17  ;;  %v966_v33 = vmul.f32 1.442695, %v958_v50 }
 0x331   :  { %v661_v29 = vmin.f32 %v629_v2, 0.0  ;;  %3342 = vpow2.f32 %v364_v26  ;;  %v970_v53 = vmul.f32 1.442695, %v960_v52  ;;  %vm653_vm2 = vcmp.gt.f32.partialorder %v629_v2, 0.0 }
 0x333   :  { %v671_v31 = vmul.f32 1.442695, %v661_v29 }
 0x334   :  { %3078 = vset.pattern.permute.xlu1 %v4943_v36  ;;  %3083 = vset.pattern.permute.xlu0 %v4936_v58 }
 0x335   :  { %1845 = vperm.xlu1 %3078, %v1636_v48   ;;  %2085 = vperm.xlu0 %3083, %v1636_v48   ;;  %3344 = vpow2.f32 %v671_v31 }
 0x336   :  { %3346 = vpow2.f32 %v970_v53 }
 0x337   :  { %3348 = vpow2.f32 %v360_v14 }
 0x339   :  { %3079 = vset.pattern.permute.xlu1 %v3370_v5  ;;  %3087 = vset.pattern.permute.xlu0 %v4943_v36 }
 0x33a   :  { %1893 = vperm.xlu1 %3079, %v1636_v48   ;;  %1857 = vperm.xlu0 %3087, %v1639_v49  }
 0x33b   :  { %v3343_v12 = vpop.eup %3342 }
 0x33c   :  { %v2675_v9 = vadd.f32 -1.0, %v3343_v12 }
 0x33e   :  { %3081 = vset.pattern.permute.xlu1 %v4938_v60  ;;  %3090 = vset.pattern.permute.xlu0 %v4938_v60  ;;  %v386_v55 = vsel %vm346_vm6, %v322_v54, %v2675_v9  ;;  %vm2423_vm6 = vcmask 523264  }
 0x33f   :  { %1941 = vperm.xlu1 %3081, %v1636_v48   ;;  %1953 = vperm.xlu0 %3090, %v1639_v49   ;;  %v3345_v10 = vpop.eup %3344  ;;  %v398_v6 = vsub.f32 %v386_v55, %v3959_v11 }
 0x340   :  { %v2707_v59 = vadd.f32 -1.0, %v3345_v10  ;;  %v3347_v30 = vpop.eup %3346 }
 0x341   :  { %v410_v4 = vmul.f32 %v3963_v21, %v398_v6  ;;  %v3349_v29 = vpop.eup %3348 }
 0x342   :  { %v693_v44 = vsel %vm653_vm2, %v629_v2, %v2707_v59  ;;  %v2673_v10 = vadd.f32 -1.0, %v3349_v29  ;;  %vm2451_vm2 = vcmask 588800  }
 0x343   :  { %3082 = vset.pattern.permute.xlu1 %v3374_v24  ;;  %3094 = vset.pattern.permute.xlu0 %v4940_v27  ;;  %v701_v32 = vsub.f32 %v693_v44, %v3959_v11 }
 0x344   :  { %2037 = vperm.xlu1 %3082, %v1636_v48   ;;  %1651 = vperm.xlu0 %3094, %v4115_v39   ;;  %v384_v44 = vsel %vm344_vm5, %v4170_v35, %v2673_v10 }
 0x345   :  { %v709_v26 = vmul.f32 %v701_v32, %v3963_v21  ;;  %v396_v29 = vsub.f32 %v384_v44, %v3959_v11 }
 0x348   :  { %3084 = vset.pattern.permute.xlu1 %v4935_v40  ;;  %3096 = vset.pattern.permute.xlu0 %v4943_v36 }
 0x349   :  { %2133 = vperm.xlu1 %3084, %v1636_v48   ;;  %1849 = vperm.xlu0 %3096, %v4115_v39   ;;  %v667_v48 = vmul.f32 1.442695, %v659_v47 }
 0x34b   :  { %3350 = vpow2.f32 %v667_v48 }
 0x34c   :  { %3352 = vpow2.f32 %v966_v33 }
 0x34d   :  { %3085 = vset.pattern.permute.xlu1 %v4940_v27  ;;  %3099 = vset.pattern.permute.xlu0 %v4938_v60 }
 0x34e   :  { %1661 = vperm.xlu1 %3085, %v1639_v49   ;;  %1945 = vperm.xlu0 %3099, %v4115_v39  }
 0x352   :  { %3086 = vset.pattern.permute.xlu1 %v3371_v41  ;;  %3102 = vset.pattern.permute.xlu0 %v4935_v40 }
 0x353   :  { %1713 = vperm.xlu1 %3086, %v1639_v49   ;;  %2137 = vperm.xlu0 %3102, %v4115_v39  }
 0x355   :  { %v3351_v55 = vpop.eup %3350 }
 0x356   :  { %v3353_v59 = vpop.eup %3352 }
 0x357   :  { %3088 = vset.pattern.permute.xlu1 %v3370_v5  ;;  %3104 = vset.pattern.permute.xlu0 %v3371_v41  ;;  %v2737_v32 = vadd.f32 -1.0, %v3353_v59  ;;  %v4256_v59 = vmul.f32 %v3963_v21, %v396_v29 }
 0x358   :  { %1905 = vperm.xlu1 %3088, %v1639_v49   ;;  %1725 = vperm.xlu0 %3104, %v4079_v19  }
 0x35c   :  { %3089 = vset.pattern.permute.xlu1 %v4941_v20  ;;  %3105 = vset.pattern.permute.xlu0 %v4943_v36 }
 0x35d   :  { %1761 = vperm.xlu1 %3089, %v1639_v49   ;;  %1869 = vperm.xlu0 %3105, %v4079_v19  }
 0x361   :  { %3091 = vset.pattern.permute.xlu1 %v3374_v24  ;;  %3108 = vset.pattern.permute.xlu0 %v4938_v60 }
 0x362   :  { %2049 = vperm.xlu1 %3091, %v1639_v49   ;;  %1965 = vperm.xlu0 %3108, %v4079_v19  }
 0x366   :  { %3092 = vset.pattern.permute.xlu1 %v4936_v58  ;;  %3111 = vset.pattern.permute.xlu0 %v4940_v27 }
 0x367   :  { %2097 = vperm.xlu1 %3092, %v1639_v49   ;;  %1666 = vperm.xlu0 %3111, %v4083_v43  }
 0x36b   :  { %3093 = vset.pattern.permute.xlu1 %v4935_v40  ;;  %3113 = vset.pattern.permute.xlu0 %v4943_v36 }
 0x36c   :  { %2145 = vperm.xlu1 %3093, %v1639_v49   ;;  %1861 = vperm.xlu0 %3113, %v4083_v43   ;;  %v2739_v49 = vadd.f32 -1.0, %v3347_v30 }
 0x36e   :  { %v992_v2 = vsel %vm952_vm4, %v928_v38, %v2739_v49  ;;  %v4218_v38 = vadd.f32 %v3940_v0, %v3935_v18  ;;  %v2705_v49 = vadd.f32 -1.0, %v3351_v55 }
 0x36f   :  { %v1000_v31 = vsub.f32 %v992_v2, %v3959_v11 }
 0x370   :  { %3095 = vset.pattern.permute.xlu1 %v3371_v41  ;;  %3116 = vset.pattern.permute.xlu0 %v4938_v60  ;;  %v353_v18 = vmin.f32 %v4218_v38, 0.0  ;;  %v691_v10 = vsel %vm651_vm7, %v4177_v46, %v2705_v49  ;;  %vm345_vm9 = vcmp.gt.f32.partialorder %v4218_v38, 0.0 }
 0x371   :  { %1705 = vperm.xlu1 %3095, %v4115_v39   ;;  %1957 = vperm.xlu0 %3116, %v4083_v43   ;;  %v1008_v50 = vmul.f32 %v1000_v31, %v3963_v21 }
 0x372   :  { %v362_v31 = vmul.f32 1.442695, %v353_v18 }
 0x374   :  { %3354 = vpow2.f32 %v362_v31 }
 0x375   :  { %3097 = vset.pattern.permute.xlu1 %v3370_v5  ;;  %3119 = vset.pattern.permute.xlu0 %v4935_v40 }
 0x376   :  { %1897 = vperm.xlu1 %3097, %v4115_v39   ;;  %2149 = vperm.xlu0 %3119, %v4083_v43  }
 0x37a   :  { %3098 = vset.pattern.permute.xlu1 %v4941_v20  ;;  %3123 = vset.pattern.permute.xlu0 %v3370_v5 }
 0x37b   :  { %1753 = vperm.xlu1 %3098, %v4115_v39   ;;  %1921 = vperm.xlu0 %3123, %v4087_v51  }
 0x37f   :  { %3100 = vset.pattern.permute.xlu1 %v3374_v24  ;;  %3126 = vset.pattern.permute.xlu0 %v3374_v24 }
 0x380   :  { %2041 = vperm.xlu1 %3100, %v4115_v39   ;;  %2065 = vperm.xlu0 %3126, %v4087_v51  }
 0x384   :  { %3101 = vset.pattern.permute.xlu1 %v4936_v58  ;;  %3129 = vset.pattern.permute.xlu0 %v3371_v41 }
 0x385   :  { %2089 = vperm.xlu1 %3101, %v4115_v39   ;;  %1721 = vperm.xlu0 %3129, %v4090_v1  }
 0x389   :  { %3103 = vset.pattern.permute.xlu1 %v4940_v27  ;;  %3131 = vset.pattern.permute.xlu0 %v3370_v5 }
 0x38a   :  { %1676 = vperm.xlu1 %3103, %v4079_v19   ;;  %1913 = vperm.xlu0 %3131, %v4090_v1  }
 0x38e   :  { %3106 = vset.pattern.permute.xlu1 %v3370_v5  ;;  %3134 = vset.pattern.permute.xlu0 %v3374_v24 }
 0x38f   :  { %1917 = vperm.xlu1 %3106, %v4079_v19   ;;  %2057 = vperm.xlu0 %3134, %v4090_v1  }
 0x393   :  { %3107 = vset.pattern.permute.xlu1 %v4941_v20  ;;  %3137 = vset.pattern.permute.xlu0 %v4935_v40 }
 0x394   :  { %1773 = vperm.xlu1 %3107, %v4079_v19   ;;  %2161 = vperm.xlu0 %3137, %v4087_v51  }
 0x396   :  { %v4200_v39 = vpop.permute.xlu1 %1853  ;;  %v4202_v54 = vpop.permute.xlu0 %1656 }
 0x397   :  { %v1686_v45 = vmul.f32 %v4202_v54, %v410_v4  ;;  %v1878_v12 = vmul.f32 %v4200_v39, %v410_v4 }
 0x398   :  { %3109 = vset.pattern.permute.xlu1 %v3374_v24 }
 0x399   :  { %2061 = vperm.xlu1 %3109, %v4079_v19  }
 0x39b   :  { %v4209_v52 = vpop.permute.xlu1 %1901  ;;  %v4211_v53 = vpop.permute.xlu0 %1709 }
 0x39c   :  { %v1926_v17 = vmul.f32 %v4209_v52, %v709_v26  ;;  %v1734_v9 = vmul.f32 %v4211_v53, %v709_v26 }
 0x39d   :  { %3110 = vset.pattern.permute.xlu1 %v4936_v58 }
 0x39e   :  { %v1934_v14 = vadd.f32 %v1926_v17, %v1878_v12  ;;  %v1742_v47 = vadd.f32 %v1734_v9, %v1686_v45  ;;  %2109 = vperm.xlu1 %3110, %v4079_v19  }
 0x3a0   :  { %v4223_v30 = vpop.permute.xlu1 %1949  ;;  %v4225_v6 = vpop.permute.xlu0 %1757 }
 0x3a1   :  { %v1974_v48 = vmul.f32 %v4223_v30, %v1008_v50  ;;  %v1782_v33 = vmul.f32 %v4225_v6, %v1008_v50 }
 0x3a2   :  { %3112 = vset.pattern.permute.xlu1 %v3371_v41 }
 0x3a3   :  { %v4233_v45 = vadd.f32 %v1974_v48, %v1934_v14  ;;  %v4235_v2 = vadd.f32 %v1782_v33, %v1742_v47  ;;  %1717 = vperm.xlu1 %3112, %v4083_v43   ;;  %v990_v14 = vsel %vm950_vm8, %v4183_v42, %v2737_v32  ;;  %v4252_v47 = vadd.f32 %v3933_v62, %v3940_v0 }
 0x3a4   :  { %v4271_v48 = vadd.f32 %v3950_v56, %v3940_v0 }
 0x3a5   :  { %4976 = vst [vmem:[#allocation12_spill] sm:$0xff] %v4235_v2  ;;  %v4239_v12 = vpop.permute.xlu1 %2045  ;;  %v4241_v17 = vpop.permute.xlu0 %2093  ;;  %v355_v18 = vmin.f32 %v4252_v47, 0.0  ;;  %vm347_vm10 = vcmp.gt.f32.partialorder %v4252_v47, 0.0  ;;  %v4981_v2 = vmov 5  }
 0x3a6   :  { %v2070_v35 = vmul.f32 %v4239_v12, %v410_v4  ;;  %v2118_v9 = vmul.f32 %v4241_v17, %v709_v26  ;;  %v699_v4 = vsub.f32 %v691_v10, %v3959_v11  ;;  %v998_v26 = vsub.f32 %v990_v14, %v3959_v11  ;;  %v4290_v10 = vld [vmem:[%s4920_s10] ss:$0 sm:$0xff] }
 0x3a7   :  { %3114 = vset.pattern.permute.xlu1 %v3370_v5  ;;  %v366_v29 = vmul.f32 1.442695, %v355_v18  ;;  %v662_v0 = vmin.f32 %v4271_v48, 0.0  ;;  %v4294_v14 = vadd.f32 %v4290_v10, %v3987_v8  ;;  %vm654_vm11 = vcmp.gt.f32.partialorder %v4271_v48, 0.0 }
 0x3a8   :  { %v2126_v55 = vadd.f32 %v2118_v9, %v2070_v35  ;;  %1909 = vperm.xlu1 %3114, %v4083_v43   ;;  %v707_v44 = vmul.f32 %v699_v4, %v3963_v21  ;;  %v1006_v49 = vmul.f32 %v998_v26, %v3963_v21  ;;  %v3355_v9 = vpop.eup %3354 }
 0x3a9   :  { %3356 = vpow2.f32 %v366_v29  ;;  %vm953_vm12 = vcmp.gt.f32.partialorder %v4294_v14, 0.0 }
 0x3aa   :  { %v4260_v46 = vpop.permute.xlu1 %2141  ;;  %v4262_v42 = vpop.permute.xlu0 %1646 }
 0x3ab   :  { %v2166_v5 = vmul.f32 %v4260_v46, %v1008_v50  ;;  %v1684_v62 = vmul.f32 %v4262_v42, %v4256_v59 }
 0x3ac   :  { %3115 = vset.pattern.permute.xlu1 %v4941_v20 }
 0x3ad   :  { %v4273_v33 = vadd.f32 %v2166_v5, %v2126_v55  ;;  %1765 = vperm.xlu1 %3115, %v4083_v43   ;;  %v2674_v5 = vadd.f32 -1.0, %v3355_v9 }
 0x3af   :  { %v4278_v50 = vpop.permute.xlu1 %1701  ;;  %v4280_v32 = vpop.permute.xlu0 %1749 }
 0x3b0   :  { %v1732_v31 = vmul.f32 %v4278_v50, %v707_v44  ;;  %v1780_v35 = vmul.f32 %v4280_v32, %v1006_v49 }
 0x3b1   :  { %3117 = vset.pattern.permute.xlu1 %v3374_v24  ;;  %v673_v24 = vmul.f32 1.442695, %v662_v0 }
 0x3b2   :  { %v1740_v56 = vadd.f32 %v1732_v31, %v1684_v62  ;;  %2053 = vperm.xlu1 %3117, %v4083_v43   ;;  %v961_v62 = vmin.f32 %v4294_v14, 0.0 }
 0x3b3   :  { %3358 = vpow2.f32 %v673_v24 }
 0x3b4   :  { %v4296_v55 = vadd.f32 %v1780_v35, %v1740_v56  ;;  %v4298_v4 = vpop.permute.xlu1 %1845  ;;  %v4300_v26 = vpop.permute.xlu0 %2085  ;;  %v385_v35 = vsel %vm345_vm9, %v4218_v38, %v2674_v5  ;;  %v972_v0 = vmul.f32 1.442695, %v961_v62 }
 0x3b5   :  { %v1876_v8 = vmul.f32 %v4298_v4, %v4256_v59  ;;  %v3357_v56 = vpop.eup %3356  ;;  %v397_v9 = vsub.f32 %v385_v35, %v3959_v11  ;;  %v2116_v35 = vmul.f32 %v4300_v26, %v707_v44 }
 0x3b6   :  { %4977 = vst [vmem:[#allocation13_spill] sm:$0xff] %v4296_v55  ;;  %3118 = vset.pattern.permute.xlu1 %v4936_v58  ;;  %3360 = vpow2.f32 %v972_v0  ;;  %v2676_v60 = vadd.f32 -1.0, %v3357_v56  ;;  %v4978_v55 = vmov 6  }
 0x3b7   :  { %2101 = vperm.xlu1 %3118, %v4083_v43   ;;  %v4327_v5 = vmul.f32 %v3963_v21, %v397_v9 }
 0x3b8   :  { %v387_v0 = vsel %vm347_vm10, %v4252_v47, %v2676_v60  ;;  %v4353_v60 = vadd.f32 %v4290_v10, %v3952_v63 }
 0x3b9   :  { %v4305_v18 = vpop.permute.xlu1 %1893  ;;  %v4307_v29 = vpop.permute.xlu0 %1857  ;;  %v399_v9 = vsub.f32 %v387_v0, %v3959_v11 }
 0x3ba   :  { %v1924_v31 = vmul.f32 %v4305_v18, %v707_v44  ;;  %vm652_vm13 = vcmp.gt.f32.partialorder %v4353_v60, 0.0 }
 0x3bb   :  { %3120 = vset.pattern.permute.xlu1 %v4940_v27 }
 0x3bc   :  { %v1932_v43 = vadd.f32 %v1924_v31, %v1876_v8  ;;  %1681 = vperm.xlu1 %3120, %v4087_v51  }
 0x3bd   :  { %v3359_v62 = vpop.eup %3358 }
 0x3be   :  { %v4317_v24 = vpop.permute.xlu1 %1941  ;;  %v4319_v40 = vpop.permute.xlu0 %1953 }
 0x3bf   :  { %v1972_v58 = vmul.f32 %v4317_v24, %v1006_v49 }
 0x3c0   :  { %3121 = vset.pattern.permute.xlu1 %v3371_v41  ;;  %v3361_v44 = vpop.eup %3360 }
 0x3c1   :  { %v4323_v38 = vadd.f32 %v1972_v58, %v1932_v43  ;;  %1729 = vperm.xlu1 %3121, %v4087_v51   ;;  %v2708_v43 = vadd.f32 -1.0, %v3359_v62  ;;  %v4359_v62 = vmul.f32 %v3963_v21, %v399_v9 }
 0x3c3   :  { %v4329_v8 = vpop.permute.xlu1 %2037  ;;  %v4331_v31 = vpop.permute.xlu0 %1651  ;;  %v694_v20 = vsel %vm654_vm11, %v4271_v48, %v2708_v43  ;;  %v660_v48 = vmin.f32 %v4353_v60, 0.0  ;;  %v4980_v43 = vmov 7  }
 0x3c4   :  { %v2068_v41 = vmul.f32 %v4329_v8, %v4256_v59  ;;  %v4339_v58 = vmul.f32 %v4331_v31, %v4327_v5 }
 0x3c5   :  { %3122 = vset.pattern.permute.xlu1 %v4943_v36 }
 0x3c6   :  { %v2124_v56 = vadd.f32 %v2116_v35, %v2068_v41  ;;  %1873 = vperm.xlu1 %3122, %v4087_v51   ;;  %v702_v35 = vsub.f32 %v694_v20, %v3959_v11  ;;  %v2740_v41 = vadd.f32 -1.0, %v3361_v44  ;;  %v4373_v20 = vadd.f32 %v4290_v10, %v3989_v3  ;;  %v4388_v3 = vld [vmem:[%s4926_s1 + $0x58] sm:$0xff]  ;;  %v4393_v10 = vld [vmem:[%s4926_s1 + $0x10] sm:$0xff] }
 0x3c8   :  { %v4345_v27 = vpop.permute.xlu1 %2133  ;;  %v993_v63 = vsel %vm953_vm12, %v4294_v14, %v2740_v41  ;;  %vm951_vm14 = vcmp.gt.f32.partialorder %v4373_v20, 0.0 }
 0x3c9   :  { %v2164_v59 = vmul.f32 %v4345_v27, %v1006_v49  ;;  %v1001_v36 = vsub.f32 %v993_v63, %v3959_v11 }
 0x3ca   :  { %3124 = vset.pattern.permute.xlu1 %v4978_v55 }
 0x3cb   :  { %v4355_v47 = vadd.f32 %v2164_v59, %v2124_v56  ;;  %1777 = vperm.xlu1 %3124, %v4087_v51   ;;  %v4369_v56 = vmul.f32 %v702_v35, %v3963_v21  ;;  %v669_v59 = vmul.f32 1.442695, %v660_v48  ;;  %v959_v35 = vmin.f32 %v4373_v20, 0.0 }
 0x3cc   :  { %v1814_v48 = vmul.f32 %v4381_v13, %v4211_v53  ;;  %v4405_v63 = vmul.f32 %v1001_v36, %v3963_v21  ;;  %v1798_v53 = vmul.f32 %v4202_v54, %v4393_v10 }
 0x3cd   :  { %4979 = vst [vmem:[#allocation14_spill] sm:$0xff] %v4355_v47  ;;  %v1662_v49 = vpop.permute.xlu1 %1661  ;;  %3362 = vpow2.f32 %v669_v59  ;;  %v968_v34 = vmul.f32 1.442695, %v959_v35 }
 0x3ce   :  { %v1687_v0 = vmul.f32 %v1662_v49, %v4359_v62  ;;  %v1975_v7 = vmul.f32 %v4319_v40, %v4405_v63  ;;  %v1822_v16 = vadd.f32 %v1814_v48, %v1798_v53 }
 0x3cf   :  { %3125 = vset.pattern.permute.xlu1 %v4980_v43  ;;  %3364 = vpow2.f32 %v968_v34  ;;  %v1990_v34 = vmul.f32 %v4200_v39, %v4393_v10 }
 0x3d0   :  { %1969 = vperm.xlu1 %3125, %v4087_v51  }
 0x3d2   :  { %v1714_v9 = vpop.permute.xlu1 %1713 }
 0x3d3   :  { %v1735_v44 = vmul.f32 %v1714_v9, %v4369_v56 }
 0x3d4   :  { %3127 = vset.pattern.permute.xlu1 %v4981_v2 }
 0x3d5   :  { %v1743_v14 = vadd.f32 %v1735_v44, %v1687_v0  ;;  %2113 = vperm.xlu1 %3127, %v4087_v51   ;;  %v4400_v51 = vld [vmem:[%s4926_s1 + $0x90] sm:$0xff]  ;;  %v1879_v0 = vmul.f32 %v4307_v29, %v4359_v62  ;;  %v1815_v44 = vmul.f32 %v4388_v3, %v1714_v9  ;;  %v1799_v9 = vmul.f32 %v1662_v49, %v1017_v57 }
 0x3d6   :  { %v1830_v36 = vmul.f32 %v4400_v51, %v4225_v6  ;;  %v1991_v49 = vmul.f32 %v4307_v29, %v1017_v57 }
 0x3d7   :  { %v1906_v41 = vpop.permute.xlu1 %1905  ;;  %v1823_v37 = vadd.f32 %v1815_v44, %v1799_v9 }
 0x3d8   :  { %v1927_v59 = vmul.f32 %v1906_v41, %v4369_v56  ;;  %v2007_v23 = vmul.f32 %v4388_v3, %v1906_v41  ;;  %v1838_v6 = vadd.f32 %v1830_v36, %v1822_v16  ;;  %v2022_v16 = vmul.f32 %v4400_v51, %v4223_v30 }
 0x3d9   :  { %3128 = vset.pattern.permute.xlu1 %v4982_v25  ;;  %v2756_v25 = vld [vmem:[%s4926_s1 + $0x98] sm:$0xff] }
 0x3da   :  { %v1935_v28 = vadd.f32 %v1927_v59, %v1879_v0  ;;  %1671 = vperm.xlu1 %3128, %v4090_v1   ;;  %v4983_v0 = vmov 1   ;;  %v2015_v41 = vadd.f32 %v2007_v23, %v1991_v49  ;;  %v1850_v49 = vpop.permute.xlu0 %1849 }
 0x3dc   :  { %v1983_v54 = vadd.f32 %v1975_v7, %v1935_v28  ;;  %v1762_v35 = vpop.permute.xlu1 %1761  ;;  %v3363_v7 = vpop.eup %3362  ;;  %v2006_v28 = vmul.f32 %v4381_v13, %v4209_v52 }
 0x3dd   :  { %v1783_v15 = vmul.f32 %v1762_v35, %v4405_v63  ;;  %v1831_v47 = vmul.f32 %v2756_v25, %v1762_v35 }
 0x3de   :  { %3130 = vset.pattern.permute.xlu1 %v4983_v0  ;;  %v3143_v59 = vpack.i.bf16 %v1983_v54, %v4233_v45  ;;  %v2023_v45 = vmul.f32 %v2756_v25, %v4319_v40  ;;  %v3365_v40 = vpop.eup %3364 }
 0x3df   :  { %v4428_v48 = vadd.f32 %v1783_v15, %v1743_v14  ;;  %v1839_v53 = vadd.f32 %v1831_v47, %v1823_v37  ;;  %1865 = vperm.xlu1 %3130, %v4090_v1   ;;  %v2706_v37 = vadd.f32 -1.0, %v3363_v7  ;;  %v2014_v15 = vadd.f32 %v2006_v28, %v1990_v34 }
 0x3e0   :  { %v2031_v23 = vadd.f32 %v2023_v45, %v2015_v41  ;;  %v2738_v35 = vadd.f32 -1.0, %v3365_v40 }
 0x3e1   :  { %v2050_v44 = vpop.permute.xlu1 %2049  ;;  %v3138_v9 = vpack.i.bf16 %v1839_v53, %v1838_v6  ;;  %v2030_v29 = vadd.f32 %v2022_v16, %v2014_v15 }
 0x3e2   :  { %v2071_v39 = vmul.f32 %v2050_v44, %v4359_v62  ;;  %v2182_v62 = vmul.f32 %v4239_v12, %v4393_v10  ;;  %v991_v10 = vsel %vm951_vm14, %v4373_v20, %v2738_v35  ;;  %v4984_v20 = vmov 8  }
 0x3e3   :  { %3132 = vset.pattern.permute.xlu1 %v4978_v55  ;;  %3139 = vrot.lane.b32.xlu0 %v3138_v9, %s3377_s30  ;;  %v692_v55 = vsel %vm652_vm13, %v4353_v60, %v2706_v37  ;;  %v3148_v14 = vpack.i.bf16 %v2031_v23, %v2030_v29  ;;  %v2198_v60 = vmul.f32 %v4381_v13, %v4241_v17 }
 0x3e4   :  { %1769 = vperm.xlu1 %3132, %v4090_v1   ;;  %v700_v54 = vsub.f32 %v692_v55, %v3959_v11  ;;  %v999_v53 = vsub.f32 %v991_v10, %v3959_v11  ;;  %v2746_v11 = vld [vmem:[%s4926_s1 + $0x48] sm:$0xff]  ;;  %v2436_v10 = vld [vmem:[%s4927_s17 + $0x18] sm:$0xff] }
 0x3e6   :  { %v2098_v52 = vpop.permute.xlu1 %2097  ;;  %v4463_v13 = vmul.f32 %v700_v54, %v3963_v21  ;;  %v1007_v34 = vmul.f32 %v999_v53, %v3963_v21 }
 0x3e7   :  { %v2119_v30 = vmul.f32 %v2098_v52, %v4369_v56  ;;  %3144 = vrot.lane.b32.xlu0 %v3143_v59, %s3378_s15  ;;  %v2199_v36 = vmul.f32 %v4388_v3, %v2098_v52  ;;  %v2214_v3 = vmul.f32 %v4400_v51, %v4260_v46  ;;  %v4471_v51 = vld [vmem:[%s4926_s1 + $0x40] sm:$0xff] }
 0x3e8   :  { %3133 = vset.pattern.permute.xlu1 %v4980_v43  ;;  %v2183_v43 = vmul.f32 %v2050_v44, %v1017_v57  ;;  %v2206_v57 = vadd.f32 %v2198_v60, %v2182_v62  ;;  %v1812_v41 = vmul.f32 %v4471_v51, %v4278_v50  ;;  %v1946_v44 = vpop.permute.xlu0 %1945  ;;  %v2753_v50 = vld [vmem:[%s4926_s1 + $0x80] sm:$0xff] }
 0x3e9   :  { %v2127_v47 = vadd.f32 %v2119_v30, %v2071_v39  ;;  %1961 = vperm.xlu1 %3133, %v4090_v1   ;;  %v1973_v15 = vmul.f32 %v1946_v44, %v1007_v34  ;;  %v1828_v29 = vmul.f32 %v2753_v50, %v4280_v32  ;;  %v2754_v39 = vld [vmem:[%s4926_s1 + $0x88] sm:$0xff]  ;;  %v2004_v32 = vmul.f32 %v4471_v51, %v4305_v18  ;;  %v2435_v18 = vld [vmem:[%s4927_s17 + $0x10] sm:$0xff] }
 0x3ea   :  { %v2207_v6 = vadd.f32 %v2199_v36, %v2183_v43  ;;  %v2222_v46 = vadd.f32 %v2214_v3, %v2206_v57  ;;  %v2020_v3 = vmul.f32 %v2753_v50, %v4317_v24  ;;  %v2447_v57 = vpack.c.bf16 %v2436_v10, %v2435_v18  ;;  %v4988_v18 = vld [vmem:[#allocation2_spill] sm:$0xff] }
 0x3eb   :  { %v2146_v56 = vpop.permute.xlu1 %2145  ;;  %3149 = vrot.lane.b32.xlu0 %v3148_v14, %s3379_s2 }
 0x3ec   :  { %v2167_v0 = vmul.f32 %v2146_v56, %v4405_v63  ;;  %v2215_v59 = vmul.f32 %v2756_v25, %v2146_v56  ;;  %v2434_v56 = vld [vmem:[%s4927_s17 + $0x8] sm:$0xff] }
 0x3ed   :  { %3135 = vset.pattern.permute.xlu1 %v4981_v2 }
 0x3ee   :  { %v2175_v12 = vadd.f32 %v2167_v0, %v2127_v47  ;;  %2105 = vperm.xlu1 %3135, %v4090_v1   ;;  %v2223_v17 = vadd.f32 %v2215_v59, %v2207_v6  ;;  %v2021_v6 = vmul.f32 %v2754_v39, %v1946_v44 }
 0x3f0   :  { %v1706_v63 = vpop.permute.xlu1 %1705  ;;  %v3153_v2 = vpack.i.bf16 %v2175_v12, %v4273_v33  ;;  %v4480_v33 = vld [vmem:[%s4926_s1] sm:$0xff]  ;;  %v3158_v28 = vpack.i.bf16 %v2223_v17, %v2222_v46  ;;  %v2138_v12 = vpop.permute.xlu0 %2137 }
 0x3f1   :  { %v1733_v25 = vmul.f32 %v1706_v63, %v4463_v13  ;;  %v1796_v45 = vmul.f32 %v4262_v42, %v4480_v33  ;;  %v1813_v37 = vmul.f32 %v2746_v11, %v1706_v63  ;;  %v1988_v59 = vmul.f32 %v4298_v4, %v4480_v33  ;;  %v2437_v46 = vld [vmem:[%s4927_s17 + $0x20] sm:$0xff] }
 0x3f2   :  { %3136 = vset.pattern.permute.xlu1 %v4984_v20  ;;  %3154 = vrot.lane.b32.xlu0 %v3153_v2, %s3380_s14  ;;  %v2438_v20 = vld [vmem:[%s4927_s17 + $0x28] sm:$0xff] }
 0x3f3   :  { %v1741_v7 = vadd.f32 %v1733_v25, %v4339_v58  ;;  %2153 = vperm.xlu1 %3136, %v4090_v1   ;;  %v1015_v58 = vld [vmem:[%s4926_s1 + $0x8] sm:$0xff]  ;;  %v1877_v1 = vmul.f32 %v1850_v49, %v4327_v5  ;;  %v1820_v52 = vadd.f32 %v1812_v41, %v1796_v45 }
 0x3f4   :  { %v1797_v21 = vmul.f32 %v4331_v31, %v1015_v58  ;;  %v1989_v54 = vmul.f32 %v1850_v49, %v1015_v58  ;;  %v2433_v31 = vld [vmem:[%s4927_s17] sm:$0xff]  ;;  %v2012_v49 = vadd.f32 %v2004_v32, %v1988_v59  ;;  %v4537_v41 = vpop.permute.xlu0 %1725 }
 0x3f5   :  { %v1898_v9 = vpop.permute.xlu1 %1897 }
 0x3f6   :  { %v1925_v16 = vmul.f32 %v1898_v9, %v4463_v13  ;;  %3159 = vrot.lane.b32.xlu0 %v3158_v28, %s3381_s16  ;;  %v1821_v40 = vadd.f32 %v1813_v37, %v1797_v21  ;;  %v2005_v55 = vmul.f32 %v2746_v11, %v1898_v9  ;;  %v2028_v4 = vadd.f32 %v2020_v3, %v2012_v49  ;;  %v4989_v49 = vld [vmem:[#allocation7_spill] sm:$0xff] }
 0x3f7   :  { %2157 = vperm.xlu1 %3136, %v4079_v19   ;;  %v1836_v19 = vadd.f32 %v1828_v29, %v1820_v52  ;;  %v2448_v28 = vpack.c.bf16 %v2438_v20, %v2437_v46  ;;  %v2196_v9 = vmul.f32 %v4471_v51, %v4300_v26  ;;  %v2441_v29 = vld [vmem:[%s4927_s17 + $0x40] sm:$0xff] }
 0x3f8   :  { %v1933_v23 = vadd.f32 %v1925_v16, %v1877_v1  ;;  %v2013_v60 = vadd.f32 %v2005_v55, %v1989_v54  ;;  %v2213_v1 = vmul.f32 %v2754_v39, %v2138_v12 }
 0x3fa   :  { %v1981_v30 = vadd.f32 %v1973_v15, %v1933_v23  ;;  %v1754_v42 = vpop.permute.xlu1 %1753  ;;  %v2029_v17 = vadd.f32 %v2021_v6, %v2013_v60 }
 0x3fb   :  { %v1781_v47 = vmul.f32 %v1754_v42, %v1007_v34  ;;  %v1829_v14 = vmul.f32 %v2754_v39, %v1754_v42  ;;  %v4562_v39 = vpop.permute.xlu0 %1869  ;;  %v2450_v42 = vpack.c.bf16 %v2441_v29, %v2441_v29 }
 0x3fc   :  { %v3168_v36 = vpack.i.bf16 %v1981_v30, %v4323_v38  ;;  %v2446_v38 = vpack.c.bf16 %v2434_v56, %v2433_v31  ;;  %v3173_v44 = vpack.i.bf16 %v2029_v17, %v2028_v4  ;;  %v4578_v31 = vld [vmem:[%s4926_s1 + $0x70] sm:$0xff] }
 0x3fd   :  { %v4506_v35 = vadd.f32 %v1781_v47, %v1741_v7  ;;  %v1837_v62 = vadd.f32 %v1829_v14, %v1821_v40  ;;  %v2180_v7 = vmul.f32 %v4329_v8, %v4480_v33  ;;  %v2439_v8 = vld [vmem:[%s4927_s17 + $0x30] sm:$0xff]  ;;  %v2440_v33 = vld [vmem:[%s4927_s17 + $0x38] sm:$0xff]  ;;  %v2465_v40 = vsel %vm1382_vm3, %v2450_v42, 0 }
 0x3fe   :  { %2993 = vmatprep.subr.bf16.mxu1 %v2446_v38  ;;  %v2449_v15 = vpack.c.bf16 %v2440_v33, %v2439_v8  ;;  %v4986_v47 = vld [vmem:[#allocation8_spill] sm:$0xff] }
 0x3ff   :  { %v2042_v43 = vpop.permute.xlu1 %2041  ;;  %v3163_v0 = vpack.i.bf16 %v1837_v62, %v1836_v19  ;;  %2994 = vmatpush3.bf16.msra.mxu1 %v2446_v38  ;;  %v2204_v26 = vadd.f32 %v2196_v9, %v2180_v7  ;;  %v4583_v56 = vld [vmem:[%s4926_s1 + $0x30] sm:$0xff] }
 0x400   :  { %2995 = vmatprep.subr.bf16.mxu1 %v2447_v57  ;;  %v2069_v24 = vmul.f32 %v2042_v43, %v4327_v5  ;;  %v2181_v2 = vmul.f32 %v2042_v43, %v1015_v58  ;;  %v2165_v5 = vmul.f32 %v2138_v12, %v1007_v34  ;;  %v2212_v58 = vmul.f32 %v2753_v50, %v4345_v27  ;;  %v4985_v50 = vld [vmem:[#allocation14_spill] sm:$0xff] }
 0x401   :  { %3164 = vrot.lane.b32.xlu1 %v3163_v0, %s3377_s30  ;;  %v1738_v34 = vmul.f32 %v4537_v41, %v3999_v22 }
 0x402   :  { %v2220_v52 = vadd.f32 %v2212_v58, %v2204_v26 }
 0x403   :  { %2996 = vmatpush3.bf16.msra.mxu1 %v2447_v57 }
 0x404   :  { %v2090_v63 = vpop.permute.xlu1 %2089  ;;  %2997 = vmatprep.subr.bf16.mxu1 %v2448_v28 }
 0x405   :  { %v2117_v25 = vmul.f32 %v2090_v63, %v4463_v13  ;;  %v2197_v53 = vmul.f32 %v2746_v11, %v2090_v63  ;;  %3169 = vrot.lane.b32.xlu1 %v3168_v36, %s3378_s15  ;;  %v4568_v36 = vpop.permute.xlu0 %1965 }
 0x407   :  { %v2125_v13 = vadd.f32 %v2117_v25, %v2069_v24  ;;  %v2205_v11 = vadd.f32 %v2197_v53, %v2181_v2  ;;  %2998 = vmatpush3.bf16.msra.mxu1 %v2448_v28  ;;  %v4990_v25 = vld [vmem:[#allocation9_spill] sm:$0xff] }
 0x408   :  { %2999 = vmatprep.subr.bf16.mxu1 %v2449_v15 }
 0x409   :  { %v2173_v16 = vadd.f32 %v2165_v5, %v2125_v13  ;;  %v4542_v45 = vpop.permute.xlu1 %1676  ;;  %3174 = vrot.lane.b32.xlu1 %v3173_v44, %s3379_s2  ;;  %v2221_v51 = vadd.f32 %v2213_v1, %v2205_v11  ;;  %v4573_v32 = vpop.permute.xlu0 %1666 }
 0x40a   :  { %v1690_v27 = vmul.f32 %v4542_v45, %v3985_v61  ;;  %v1688_v10 = vmul.f32 %v4573_v32, %v4988_v18 }
 0x40b   :  { %v3178_v37 = vpack.i.bf16 %v2173_v16, %v4985_v50  ;;  %3000 = vmatpush3.bf16.msra.mxu1 %v2449_v15  ;;  %v3183_v30 = vpack.i.bf16 %v2221_v51, %v2220_v52  ;;  %v4991_v50 = vld [vmem:[#allocation4_spill] sm:$0xff]  ;;  %v4992_v15 = vld [vmem:[#allocation3_spill] sm:$0xff] }
 0x40c   :  { %v1746_v23 = vadd.f32 %v1738_v34, %v1690_v27  ;;  %3051 = vmatprep.subr.msk.bf16.mxu1 %vm1382_vm3, %v2450_v42  ;;  %v4643_v42 = vld [vmem:[%s4926_s1 + $0x78] sm:$0xff]  ;;  %vm2396_vm3 = vcmask 195584  }
 0x40d   :  { %3179 = vrot.lane.b32.xlu1 %v3178_v37, %s3380_s14  ;;  %v4592_v6 = vpop.permute.xlu0 %1861 }
 0x40e   :  { %v4557_v21 = vpop.permute.xlu1 %1917  ;;  %v1880_v24 = vmul.f32 %v4592_v6, %v4988_v18 }
 0x40f   :  { %3002 = vmatpush3.bf16.msra.mxu1 %v2465_v40  ;;  %v1802_v40 = vmul.f32 %v4542_v45, %v4583_v56  ;;  %v1930_v45 = vmul.f32 %v4557_v21, %v3999_v22 }
 0x411   :  { %3184 = vrot.lane.b32.xlu1 %v3183_v30, %s3381_s16  ;;  %v4600_v4 = vpop.permute.xlu0 %1957 }
 0x412   :  { %v1976_v53 = vmul.f32 %v4600_v4, %v4990_v25 }
 0x413   :  { %v1774_v55 = vpop.permute.xlu1 %1773 }
 0x414   :  { %v1786_v14 = vmul.f32 %v1774_v55, %v4986_v47 }
 0x415   :  { %v4614_v28 = vpop.permute.xlu0 %2149 }
 0x416   :  { %v4570_v19 = vadd.f32 %v1786_v14, %v1746_v23  ;;  %v2168_v16 = vmul.f32 %v4614_v28, %v4990_v25 }
 0x418   :  { %4987 = vst [vmem:[#allocation14_spill] sm:$0xff] %v4570_v19  ;;  %v2062_v54 = vpop.permute.xlu1 %2061 }
 0x419   :  { %v2074_v62 = vmul.f32 %v2062_v54, %v3985_v61  ;;  %v2186_v43 = vmul.f32 %v2062_v54, %v4583_v56  ;;  %v1922_v44 = vpop.permute.xlu0 %1921  ;;  %v4651_v54 = vld [vmem:[%s4926_s1 + $0xb0] sm:$0xff] }
 0x41d   :  { %v2110_v60 = vpop.permute.xlu1 %2109  ;;  %v4630_v8 = vpop.permute.xlu0 %2065 }
 0x41e   :  { %v2122_v0 = vmul.f32 %v2110_v60, %v3999_v22  ;;  %v2202_v38 = vmul.f32 %v4578_v31, %v2110_v60  ;;  %v1818_v60 = vmul.f32 %v4578_v31, %v4537_v41 }
 0x420   :  { %v4588_v59 = vadd.f32 %v2122_v0, %v2074_v62  ;;  %v4590_v3 = vadd.f32 %v2202_v38, %v2186_v43  ;;  %v4656_v62 = vld [vmem:[%s4926_s1 + $0x38] sm:$0xff]  ;;  %v1834_v43 = vmul.f32 %v4651_v54, %v1774_v55  ;;  %v1882_v55 = vmul.f32 %v4562_v39, %v3985_v61 }
 0x421   :  { %v4634_v26 = vpop.permute.xlu0 %1721  ;;  %v4667_v38 = vld [vmem:[%s4926_s1 + $0xb8] sm:$0xff]  ;;  %v1978_v61 = vmul.f32 %v4568_v36, %v4986_v47 }
 0x422   :  { %v4594_v12 = vpop.permute.xlu1 %1717 }
 0x423   :  { %v1736_v57 = vmul.f32 %v4594_v12, %v4989_v49 }
 0x425   :  { %v1744_v17 = vadd.f32 %v1736_v57, %v1688_v10  ;;  %v4638_v29 = vpop.permute.xlu0 %1913  ;;  %v1826_v10 = vadd.f32 %v1818_v60, %v1802_v40 }
 0x427   :  { %v4602_v63 = vpop.permute.xlu1 %1909  ;;  %v1842_v22 = vadd.f32 %v1834_v43, %v1826_v10  ;;  %v4994_v10 = vld [vmem:[#allocation5_spill] sm:$0xff] }
 0x428   :  { %v1928_v2 = vmul.f32 %v4602_v63, %v4989_v49 }
 0x42a   :  { %v1936_v46 = vadd.f32 %v1928_v2, %v1880_v24 }
 0x42c   :  { %v4610_v20 = vadd.f32 %v1976_v53, %v1936_v46  ;;  %v4612_v7 = vpop.permute.xlu1 %1765  ;;  %v1931_v46 = vmul.f32 %v1922_v44, %v4992_v15 }
 0x42d   :  { %v1784_v5 = vmul.f32 %v4612_v7, %v4990_v25 }
 0x42f   :  { %v4618_v13 = vadd.f32 %v1784_v5, %v1744_v17  ;;  %v4993_v17 = vld [vmem:[#allocation10_spill] sm:$0xff]  ;;  %v1938_v5 = vadd.f32 %v1930_v45, %v1882_v55 }
 0x431   :  { %v4620_v11 = vpop.permute.xlu1 %2053 }
 0x432   :  { %v2072_v58 = vmul.f32 %v4620_v11, %v4988_v18 }
 0x436   :  { %v4622_v9 = vpop.permute.xlu1 %2101 }
 0x437   :  { %v2120_v1 = vmul.f32 %v4622_v9, %v4989_v49  ;;  %v4669_v49 = vpop.permute.xlu0 %2057 }
 0x439   :  { %v2128_v33 = vadd.f32 %v2120_v1, %v2072_v58  ;;  %v2010_v58 = vmul.f32 %v4578_v31, %v4557_v21  ;;  %v1986_v21 = vadd.f32 %v1978_v61, %v1938_v5  ;;  %v4729_v61 = vld [vmem:[%s4926_s1 + $0xa0] sm:$0xff] }
 0x43b   :  { %v4632_v34 = vadd.f32 %v2168_v16, %v2128_v33  ;;  %v1682_v27 = vpop.permute.xlu1 %1681  ;;  %v1994_v16 = vmul.f32 %v4562_v39, %v4583_v56  ;;  %v4689_v40 = vpop.permute.xlu0 %2161  ;;  %v2026_v56 = vmul.f32 %v4651_v54, %v4568_v36  ;;  %v4704_v36 = vld [vmem:[%s4926_s1 + $0x60] sm:$0xff] }
 0x43c   :  { %v1691_v37 = vmul.f32 %v1682_v27, %v4991_v50  ;;  %v1803_v0 = vmul.f32 %v1682_v27, %v4656_v62  ;;  %v1816_v5 = vmul.f32 %v4704_v36, %v4594_v12  ;;  %v1832_v12 = vmul.f32 %v4729_v61, %v4612_v7 }
 0x43d   :  { %v2018_v31 = vadd.f32 %v2010_v58, %v1994_v16 }
 0x440   :  { %v1730_v51 = vpop.permute.xlu1 %1729 }
 0x441   :  { %v1739_v23 = vmul.f32 %v1730_v51, %v4992_v15  ;;  %v1819_v14 = vmul.f32 %v4643_v42, %v1730_v51  ;;  %v2011_v51 = vmul.f32 %v4643_v42, %v1922_v44 }
 0x443   :  { %v1747_v52 = vadd.f32 %v1739_v23, %v1691_v37  ;;  %v1827_v57 = vadd.f32 %v1819_v14, %v1803_v0  ;;  %v2034_v0 = vadd.f32 %v2026_v56, %v2018_v31 }
 0x445   :  { %v1874_v30 = vpop.permute.xlu1 %1873 }
 0x446   :  { %v1883_v2 = vmul.f32 %v1874_v30, %v4991_v50  ;;  %v1995_v1 = vmul.f32 %v1874_v30, %v4656_v62 }
 0x448   :  { %v1939_v37 = vadd.f32 %v1931_v46, %v1883_v2  ;;  %v2019_v30 = vadd.f32 %v2011_v51, %v1995_v1  ;;  %v4719_v46 = vld [vmem:[%s4926_s1 + $0x28] sm:$0xff] }
 0x44a   :  { %v1778_v18 = vpop.permute.xlu1 %1777 }
 0x44b   :  { %v1787_v24 = vmul.f32 %v1778_v18, %v4993_v17  ;;  %v1835_v41 = vmul.f32 %v4667_v38, %v1778_v18 }
 0x44d   :  { %v4676_v25 = vadd.f32 %v1787_v24, %v1747_v52  ;;  %v1843_v53 = vadd.f32 %v1835_v41, %v1827_v57  ;;  %v1737_v57 = vmul.f32 %v4634_v26, %v4994_v10  ;;  %v4995_v24 = vld [vmem:[#allocation6_spill] sm:$0xff] }
 0x44f   :  { %v1970_v33 = vpop.permute.xlu1 %1969  ;;  %v3188_v27 = vpack.i.bf16 %v1843_v53, %v1842_v22  ;;  %v4709_v22 = vld [vmem:[%s4926_s1 + $0x20] sm:$0xff]  ;;  %v4714_v53 = vld [vmem:[%s4926_s1 + $0x68] sm:$0xff] }
 0x450   :  { %v1979_v23 = vmul.f32 %v1970_v33, %v4993_v17  ;;  %v2027_v52 = vmul.f32 %v4667_v38, %v1970_v33  ;;  %v1800_v16 = vmul.f32 %v4573_v32, %v4709_v22  ;;  %v4738_v32 = vld [vmem:[%s4926_s1 + $0xa8] sm:$0xff] }
 0x451   :  { %3189 = vrot.lane.b32.xlu0 %v3188_v27, %s3377_s30  ;;  %v1817_v27 = vmul.f32 %v4714_v53, %v4634_v26 }
 0x452   :  { %v1987_v39 = vadd.f32 %v1979_v23, %v1939_v37  ;;  %v2035_v14 = vadd.f32 %v2027_v52, %v2019_v30  ;;  %v1992_v23 = vmul.f32 %v4592_v6, %v4709_v22  ;;  %v1929_v52 = vmul.f32 %v4638_v29, %v4994_v10 }
 0x453   :  { %v2008_v6 = vmul.f32 %v4704_v36, %v4602_v63 }
 0x454   :  { %v4694_v60 = vpop.permute.xlu1 %2113  ;;  %v3193_v44 = vpack.i.bf16 %v1987_v39, %v1986_v21  ;;  %v3198_v45 = vpack.i.bf16 %v2035_v14, %v2034_v0  ;;  %v1824_v21 = vadd.f32 %v1816_v5, %v1800_v16 }
 0x455   :  { %v3140_v43 = vpop.permute.xlu0 %3139 }
 0x456   :  { %3194 = vrot.lane.b32.xlu0 %v3193_v44, %s3378_s15  ;;  %v3142_v51 = vunpack.i.h.bf16 %v3140_v43  ;;  %v3141_v37 = vunpack.i.l.bf16 %v3140_v43  ;;  %v4996_v43 = vld [vmem:[#allocation11_spill] sm:$0xff] }
 0x459   :  { %v1672_v18 = vpop.permute.xlu1 %1671  ;;  %v3145_v55 = vpop.permute.xlu0 %3144 }
 0x45a   :  { %v1689_v41 = vmul.f32 %v1672_v18, %v4995_v24  ;;  %3199 = vrot.lane.b32.xlu0 %v3198_v45, %s3379_s2  ;;  %v1801_v1 = vmul.f32 %v1672_v18, %v4719_v46  ;;  %v3147_v26 = vunpack.i.h.bf16 %v3145_v55  ;;  %v3146_v30 = vunpack.i.l.bf16 %v3145_v55 }
 0x45b   :  { %v1840_v18 = vadd.f32 %v1832_v12, %v1824_v21 }
 0x45c   :  { %v1745_v2 = vadd.f32 %v1737_v57, %v1689_v41  ;;  %v1825_v31 = vadd.f32 %v1817_v27, %v1801_v1  ;;  %v2391_v57 = vsel %vm266_vm0, %v4428_v48, %v3142_v51  ;;  %v4997_v41 = vld [vmem:[#allocation12_spill] sm:$0xff]  ;;  %v2009_v27 = vmul.f32 %v4714_v53, %v4638_v29 }
 0x45d   :  { %v3150_v33 = vpop.permute.xlu0 %3149  ;;  %v2390_v55 = vsel %vm266_vm0, %v4997_v41, %v3141_v37  ;;  %v2400_v19 = vsel %vm2396_vm3, %v2391_v57, %v3147_v26 }
 0x45e   :  { %v1866_v58 = vpop.permute.xlu1 %1865  ;;  %v3152_v39 = vunpack.i.h.bf16 %v3150_v33  ;;  %v3151_v56 = vunpack.i.l.bf16 %v3150_v33 }
 0x45f   :  { %v1881_v14 = vmul.f32 %v1866_v58, %v4995_v24  ;;  %v1993_v63 = vmul.f32 %v1866_v58, %v4719_v46 }
 0x460   :  { %v2409_v48 = vsel %vm2405_vm15, %v2400_v19, %v3152_v39 }
 0x461   :  { %v1937_v51 = vadd.f32 %v1929_v52, %v1881_v14  ;;  %v2017_v58 = vadd.f32 %v2009_v27, %v1993_v63 }
 0x463   :  { %v1770_v7 = vpop.permute.xlu1 %1769 }
 0x464   :  { %v1833_v44 = vmul.f32 %v4738_v32, %v1770_v7  ;;  %v1785_v0 = vmul.f32 %v1770_v7, %v4996_v43  ;;  %v3155_v45 = vpop.permute.xlu0 %3154  ;;  %v2399_v7 = vsel %vm2396_vm3, %v2390_v55, %v3146_v30  ;;  %v2200_v55 = vmul.f32 %v4704_v36, %v4622_v9 }
 0x465   :  { %v3157_v16 = vunpack.i.h.bf16 %v3155_v45  ;;  %v3156_v33 = vunpack.i.l.bf16 %v3155_v45  ;;  %v2408_v12 = vsel %vm2405_vm15, %v2399_v7, %v3151_v56  ;;  %v2016_v45 = vadd.f32 %v2008_v6, %v1992_v23 }
 0x466   :  { %v1841_v5 = vadd.f32 %v1833_v44, %v1825_v31  ;;  %v4753_v1 = vadd.f32 %v1785_v0, %v1745_v2  ;;  %v2024_v23 = vmul.f32 %v4729_v61, %v4600_v4  ;;  %v2185_v7 = vmul.f32 %v4669_v49, %v4719_v46 }
 0x467   :  { %v2417_v30 = vsel %vm2414_vm1, %v2408_v12, %v3156_v33  ;;  %v2418_v26 = vsel %vm2414_vm1, %v2409_v48, %v3157_v16  ;;  %v2123_v16 = vmul.f32 %v4694_v60, %v4992_v15 }
 0x468   :  { %v3208_v37 = vpack.i.bf16 %v1841_v5, %v1840_v18  ;;  %v1962_v21 = vpop.permute.xlu1 %1961  ;;  %v3160_v2 = vpop.permute.xlu0 %3159  ;;  %v2032_v57 = vadd.f32 %v2024_v23, %v2016_v45  ;;  %v2073_v5 = vmul.f32 %v4669_v49, %v4995_v24  ;;  %v2187_v49 = vmul.f32 %v4630_v8, %v4656_v62 }
 0x469   :  { %v2025_v31 = vmul.f32 %v4738_v32, %v1962_v21  ;;  %v1977_v44 = vmul.f32 %v1962_v21, %v4996_v43  ;;  %v3162_v0 = vunpack.i.h.bf16 %v3160_v2  ;;  %v3161_v29 = vunpack.i.l.bf16 %v3160_v2 }
 0x46a   :  { %3209 = vrot.lane.b32.xlu1 %v3208_v37, %s3377_s30 }
 0x46b   :  { %v1985_v56 = vadd.f32 %v1977_v44, %v1937_v51  ;;  %v4768_v19 = vsel %vm2423_vm6, %v2417_v30, %v3161_v29  ;;  %v4771_v52 = vsel %vm2423_vm6, %v2418_v26, %v3162_v0  ;;  %v2033_v14 = vadd.f32 %v2025_v31, %v2017_v58 }
 0x46c   :  { %v2443_v39 = vpack.c.bf16 %v4771_v52, %v4768_v19  ;;  %v2550_v19 = vld [vmem:[%s4928_s19 + $0x20] sm:$0xff]  ;;  %v2551_v52 = vld [vmem:[%s4928_s19 + $0x28] sm:$0xff] }
 0x46d   :  { %v3213_v6 = vpack.i.bf16 %v1985_v56, %v4610_v20  ;;  %v2106_v18 = vpop.permute.xlu1 %2105  ;;  %v3218_v33 = vpack.i.bf16 %v2033_v14, %v2032_v57  ;;  %v2075_v20 = vmul.f32 %v4630_v8, %v4991_v50  ;;  %v2546_v8 = vld [vmem:[%s4928_s19] sm:$0xff]  ;;  %v4998_v56 = vld [vmem:[#allocation13_spill] sm:$0xff] }
 0x46e   :  { %v2121_v41 = vmul.f32 %v2106_v18, %v4994_v10  ;;  %v2201_v4 = vmul.f32 %v4714_v53, %v2106_v18  ;;  %v2184_v10 = vmul.f32 %v4620_v11, %v4709_v22  ;;  %v2203_v53 = vmul.f32 %v4643_v42, %v4694_v60 }
 0x46f   :  { %3214 = vrot.lane.b32.xlu1 %v3213_v6, %s3378_s15  ;;  %v2131_v63 = vadd.f32 %v2123_v16, %v2075_v20  ;;  %v2216_v11 = vmul.f32 %v4729_v61, %v4614_v28  ;;  %v2171_v22 = vmul.f32 %v4689_v40, %v4993_v17 }
 0x470   :  { %v2129_v9 = vadd.f32 %v2121_v41, %v2073_v5  ;;  %v2208_v15 = vadd.f32 %v2200_v55, %v2184_v10  ;;  %v2209_v50 = vadd.f32 %v2201_v4, %v2185_v7  ;;  %v2211_v37 = vadd.f32 %v2203_v53, %v2187_v49 }
 0x471   :  { %v2179_v60 = vadd.f32 %v2171_v22, %v2131_v63 }
 0x472   :  { %v2154_v27 = vpop.permute.xlu1 %2153  ;;  %v2224_v42 = vadd.f32 %v2216_v11, %v2208_v15  ;;  %v2549_v15 = vld [vmem:[%s4928_s19 + $0x18] sm:$0xff] }
 0x473   :  { %v2217_v36 = vmul.f32 %v4738_v32, %v2154_v27  ;;  %v2169_v24 = vmul.f32 %v2154_v27, %v4996_v43  ;;  %3219 = vrot.lane.b32.xlu1 %v3218_v33, %s3379_s2 }
 0x475   :  { %v2177_v12 = vadd.f32 %v2169_v24, %v2129_v9  ;;  %v2225_v32 = vadd.f32 %v2217_v36, %v2209_v50  ;;  %v2548_v24 = vld [vmem:[%s4928_s19 + $0x10] sm:$0xff] }
 0x476   :  { %v2158_v46 = vpop.permute.xlu1 %2157  ;;  %v2557_v53 = vpack.c.bf16 %v2549_v15, %v2548_v24 }
 0x477   :  { %v3223_v43 = vpack.i.bf16 %v2177_v12, %v4632_v34  ;;  %v2170_v48 = vmul.f32 %v2158_v46, %v4986_v47  ;;  %v2218_v51 = vmul.f32 %v4651_v54, %v2158_v46  ;;  %v2547_v34 = vld [vmem:[%s4928_s19 + $0x8] sm:$0xff]  ;;  %v2219_v47 = vmul.f32 %v4667_v38, %v4689_v40 }
 0x478   :  { %v3228_v54 = vpack.i.bf16 %v2225_v32, %v2224_v42  ;;  %v2556_v61 = vpack.c.bf16 %v2547_v34, %v2546_v8  ;;  %v2558_v46 = vpack.c.bf16 %v2551_v52, %v2550_v19 }
 0x479   :  { %v2178_v21 = vadd.f32 %v2170_v48, %v4588_v59  ;;  %3224 = vrot.lane.b32.xlu1 %v3223_v43, %s3380_s14  ;;  %v2226_v62 = vadd.f32 %v2218_v51, %v4590_v3  ;;  %v2227_v59 = vadd.f32 %v2219_v47, %v2211_v37 }
 0x47a   :  { %v3165_v28 = vpop.permute.xlu1 %3164  ;;  %3011 = vmatprep.subr.bf16.mxu0 %v2556_v61 }
 0x47b   :  { %v3203_v17 = vpack.i.bf16 %v2179_v60, %v2178_v21  ;;  %v3233_v31 = vpack.i.bf16 %v2227_v59, %v2226_v62  ;;  %3012 = vmatpush3.bf16.msra.mxu0 %v2556_v61  ;;  %v3167_v0 = vunpack.i.h.bf16 %v3165_v28  ;;  %v3166_v29 = vunpack.i.l.bf16 %v3165_v28 }
 0x47c   :  { %3013 = vmatprep.subr.bf16.mxu0 %v2557_v53 }
 0x47d   :  { %3204 = vrot.lane.b32.xlu0 %v3203_v17, %s3380_s14  ;;  %3229 = vrot.lane.b32.xlu1 %v3228_v54, %s3381_s16  ;;  %v2388_v23 = vsel %vm266_vm0, %v4998_v56, %v3166_v29  ;;  %v2389_v14 = vsel %vm266_vm0, %v4506_v35, %v3167_v0 }
 0x47e   :  { %v3170_v2 = vpop.permute.xlu1 %3169 }
 0x47f   :  { %v3172_v38 = vunpack.i.h.bf16 %v3170_v2  ;;  %v3171_v40 = vunpack.i.l.bf16 %v3170_v2  ;;  %3014 = vmatpush3.bf16.msra.mxu0 %v2557_v53 }
 0x480   :  { %3015 = vmatprep.subr.bf16.mxu0 %v2558_v46 }
 0x481   :  { %3234 = vrot.lane.b32.xlu0 %v3233_v31, %s3381_s16  ;;  %v2398_v6 = vsel %vm2396_vm3, %v2389_v14, %v3172_v38  ;;  %v2397_v18 = vsel %vm2396_vm3, %v2388_v23, %v3171_v40  ;;  %v4999_v40 = vld [vmem:[#allocation14_spill] sm:$0xff] }
 0x482   :  { %v3175_v44 = vpop.permute.xlu1 %3174 }
 0x483   :  { %v3177_v3 = vunpack.i.h.bf16 %v3175_v44  ;;  %v3176_v30 = vunpack.i.l.bf16 %v3175_v44  ;;  %3016 = vmatpush3.bf16.msra.mxu0 %v2558_v46  ;;  %v2807_v46 = vld [vmem:[%s4930_s20] ss:$0 sm:$0xff] }
 0x485   :  { %v2406_v41 = vsel %vm2405_vm15, %v2397_v18, %v3176_v30  ;;  %v2407_v55 = vsel %vm2405_vm15, %v2398_v6, %v3177_v3 }
 0x486   :  { %v3180_v45 = vpop.permute.xlu1 %3179 }
 0x487   :  { %v3182_v26 = vunpack.i.h.bf16 %v3180_v45  ;;  %v3181_v58 = vunpack.i.l.bf16 %v3180_v45 }
 0x489   :  { %v2415_v33 = vsel %vm2414_vm1, %v2406_v41, %v3181_v58  ;;  %v2416_v4 = vsel %vm2414_vm1, %v2407_v55, %v3182_v26 }
 0x48a   :  { %v3185_v57 = vpop.permute.xlu1 %3184 }
 0x48b   :  { %v3187_v5 = vunpack.i.h.bf16 %v3185_v57  ;;  %v3186_v16 = vunpack.i.l.bf16 %v3185_v57 }
 0x48d   :  { %v2424_v20 = vsel %vm2423_vm6, %v2415_v33, %v3186_v16  ;;  %v2425_v10 = vsel %vm2423_vm6, %v2416_v4, %v3187_v5  ;;  %v2806_v33 = vld [vmem:[%s4929_s18] ss:$0 sm:$0xff] }
 0x48e   :  { %v2442_v35 = vpack.c.bf16 %v2425_v10, %v2424_v20 }
 0x490   :  { %3003 = vmatprep.mubr.msk.bf16.mxu1 %vm2451_vm2, %v2442_v35 }
 0x491   :  { %3004 = vmatmul.mubr.msk.bf16.vlgmr.msra.gmra.mrb[44].mxu1 %vm2451_vm2, %v2443_v39 }
 0x4c3   :  { %v3190_v7 = vpop.permute.xlu0 %3189 }
 0x4c4   :  { %v3192_v48 = vunpack.i.h.bf16 %v3190_v7  ;;  %v3191_v51 = vunpack.i.l.bf16 %v3190_v7 }
 0x4c6   :  { %v2395_v38 = vsel %vm266_vm0, %v4676_v25, %v3192_v48  ;;  %v2394_v45 = vsel %vm266_vm0, %v4999_v40, %v3191_v51 }
 0x4c8   :  { %v3195_v36 = vpop.permute.xlu0 %3194 }
 0x4c9   :  { %v3197_v37 = vunpack.i.h.bf16 %v3195_v36  ;;  %v3196_v21 = vunpack.i.l.bf16 %v3195_v36 }
 0x4cb   :  { %v2403_v26 = vsel %vm2396_vm3, %v2394_v45, %v3196_v21  ;;  %v2404_v58 = vsel %vm2396_vm3, %v2395_v38, %v3197_v37 }
 0x4cc   :  { %v3200_v39 = vpop.permute.xlu0 %3199 }
 0x4cd   :  { %v3202_v34 = vunpack.i.h.bf16 %v3200_v39  ;;  %v3201_v47 = vunpack.i.l.bf16 %v3200_v39 }
 0x4cf   :  { %v2412_v14 = vsel %vm2405_vm15, %v2403_v26, %v3201_v47  ;;  %v2413_v6 = vsel %vm2405_vm15, %v2404_v58, %v3202_v34 }
 0x4dc   :  { %v3210_v27 = vpop.permute.xlu1 %3209 }
 0x4dd   :  { %v3212_v50 = vunpack.i.h.bf16 %v3210_v27  ;;  %v3211_v12 = vunpack.i.l.bf16 %v3210_v27 }
 0x4df   :  { %v2393_v28 = vsel %vm266_vm0, %v4753_v1, %v3212_v50  ;;  %v2392_v8 = vsel %vm266_vm0, %v4618_v13, %v3211_v12 }
 0x4e1   :  { %v3215_v9 = vpop.permute.xlu1 %3214 }
 0x4e2   :  { %v3217_v11 = vunpack.i.h.bf16 %v3215_v9  ;;  %v3216_v49 = vunpack.i.l.bf16 %v3215_v9 }
 0x4e4   :  { %v2401_v54 = vsel %vm2396_vm3, %v2392_v8, %v3216_v49  ;;  %v2402_v62 = vsel %vm2396_vm3, %v2393_v28, %v3217_v11 }
 0x4e5   :  { %v3220_v63 = vpop.permute.xlu1 %3219 }
 0x4e6   :  { %v3222_v32 = vunpack.i.h.bf16 %v3220_v63  ;;  %v3221_v43 = vunpack.i.l.bf16 %v3220_v63 }
 0x4e8   :  { %v2410_v59 = vsel %vm2405_vm15, %v2401_v54, %v3221_v43  ;;  %v2411_v2 = vsel %vm2405_vm15, %v2402_v62, %v3222_v32 }
 0x4eb   :  { %v3225_v22 = vpop.permute.xlu1 %3224 }
 0x4ec   :  { %v3227_v42 = vunpack.i.h.bf16 %v3225_v22  ;;  %v3226_v60 = vunpack.i.l.bf16 %v3225_v22 }
 0x4ee   :  { %v2419_v1 = vsel %vm2414_vm1, %v2410_v59, %v3226_v60  ;;  %v2420_v0 = vsel %vm2414_vm1, %v2411_v2, %v3227_v42 }
 0x4ef   :  { %v3205_v17 = vpop.permute.xlu0 %3204  ;;  %v3230_v61 = vpop.permute.xlu1 %3229 }
 0x4f0   :  { %v3232_v31 = vunpack.i.h.bf16 %v3230_v61  ;;  %v3231_v44 = vunpack.i.l.bf16 %v3230_v61  ;;  %v3207_v13 = vunpack.i.h.bf16 %v3205_v17  ;;  %v3206_v29 = vunpack.i.l.bf16 %v3205_v17 }
 0x4f2   :  { %v2428_v3 = vsel %vm2423_vm6, %v2419_v1, %v3231_v44  ;;  %v2429_v30 = vsel %vm2423_vm6, %v2420_v0, %v3232_v31  ;;  %v2421_v25 = vsel %vm2414_vm1, %v2412_v14, %v3206_v29  ;;  %v2422_v41 = vsel %vm2414_vm1, %v2413_v6, %v3207_v13 }
 0x4f3   :  { %v2444_v56 = vpack.c.bf16 %v2429_v30, %v2428_v3  ;;  %v3235_v23 = vpop.permute.xlu0 %3234 }
 0x4f4   :  { %v3237_v18 = vunpack.i.h.bf16 %v3235_v23  ;;  %v3236_v57 = vunpack.i.l.bf16 %v3235_v23 }
 0x4f5   :  { %3007 = vmatprep.mubr.msk.bf16.mxu1 %vm2451_vm2, %v2444_v56 }
 0x4f6   :  { %v2430_v55 = vsel %vm2423_vm6, %v2421_v25, %v3236_v57  ;;  %v2431_v5 = vsel %vm2423_vm6, %v2422_v41, %v3237_v18 }
 0x4f7   :  { %v2445_v16 = vpack.c.bf16 %v2431_v5, %v2430_v55 }
 0x4f9   :  { %3008 = vmatmul.mubr.msk.bf16.gmra.mrb[48].mxu1 %vm2451_vm2, %v2445_v16 }
 0x564   :  { %v3005_v4 = vpop.f32.mrb[44].mxu1 }
 0x565   :  { %v2501_v20 = vpop.f32.mrb[45].mxu1  ;;  %v2540_v35 = vadd.f32 %v3005_v4, %v2806_v33 }
 0x566   :  { %v3006_v10 = vpop.f32.mrb[46].mxu1  ;;  %v2538_v9 = vadd.f32 %v2806_v33, %v2501_v20 }
 0x567   :  { %v2541_v27 = vadd.f32 %v3006_v10, %v2806_v33  ;;  %v2504_v7 = vpop.f32.mrb[47].mxu1 }
 0x568   :  { %v2539_v36 = vadd.f32 %v2806_v33, %v2504_v7 }
 0x569   :  { %v2553_v24 = vpack.c.bf16 %v2541_v27, %v2540_v35 }
 0x56a   :  { %v2552_v15 = vpack.c.bf16 %v2539_v36, %v2538_v9 }
 0x56c   :  { %3017 = vmatprep.mubr.msk.bf16.mxu0 %vm2414_vm1, %v2552_v15 }
 0x56d   :  { %3018 = vmatmul.mubr.msk.bf16.vlgmr.msra.gmra.mrb[28].mxu0 %vm2414_vm1, %v2553_v24 }
 0x5cc   :  { %v3009_v63 = vpop.f32.mrb[48].mxu1 }
 0x5cd   :  { %v2517_v53 = vpop.f32.mrb[49].mxu1  ;;  %v2544_v12 = vadd.f32 %v3009_v63, %v2806_v33 }
 0x5ce   :  { %v3010_v50 = vpop.f32.mrb[50].mxu1  ;;  %v2542_v39 = vadd.f32 %v2806_v33, %v2517_v53 }
 0x5cf   :  { %v2545_v19 = vadd.f32 %v3010_v50, %v2806_v33  ;;  %v2520_v52 = vpop.f32.mrb[51].mxu1 }
 0x5d0   :  { %v2543_v11 = vadd.f32 %v2806_v33, %v2520_v52 }
 0x5d1   :  { %v2555_v49 = vpack.c.bf16 %v2545_v19, %v2544_v12 }
 0x5d2   :  { %v2554_v22 = vpack.c.bf16 %v2543_v11, %v2542_v39 }
 0x5d4   :  { %3021 = vmatprep.mubr.msk.bf16.mxu0 %vm2414_vm1, %v2554_v22 }
 0x5d5   :  { %3022 = vmatmul.mubr.msk.bf16.gmra.mrb[32].mxu0 %vm2414_vm1, %v2555_v49 }
 0x640   :  { %v3019_v32 = vpop.f32.mrb[28].mxu0 }
 0x641   :  { %v2621_v43 = vadd.f32 %v3019_v32, %v2807_v46  ;;  %v2612_v48 = vpop.f32.mrb[29].mxu0 }
 0x642   :  { %v2613_v51 = vadd.f32 %v2807_v46, %v2612_v48  ;;  %v3020_v42 = vpop.f32.mrb[30].mxu0 }
 0x643   :  { %2645 = vst [vmem:[%s4931_s21 + $0x10] sm:$0xff] %v2621_v43  ;;  %v2624_v60 = vadd.f32 %v3020_v42, %v2807_v46  ;;  %v2615_v37 = vpop.f32.mrb[31].mxu0 }
 0x644   :  { %2643 = vst [vmem:[%s4931_s21] sm:$0xff] %v2613_v51  ;;  %v2616_v21 = vadd.f32 %v2807_v46, %v2615_v37 }
 0x645   :  { %2646 = vst [vmem:[%s4931_s21 + $0x18] sm:$0xff] %v2624_v60 }
 0x646   :  { %2644 = vst [vmem:[%s4931_s21 + $0x8] sm:$0xff] %v2616_v21 }
 0x6a8   :  { %v3023_v28 = vpop.f32.mrb[32].mxu0 }
 0x6a9   :  { %v2637_v8 = vadd.f32 %v3023_v28, %v2807_v46  ;;  %v2628_v34 = vpop.f32.mrb[33].mxu0 }
 0x6aa   :  { %v2629_v47 = vadd.f32 %v2807_v46, %v2628_v34  ;;  %v3024_v54 = vpop.f32.mrb[34].mxu0 }
 0x6ab   :  { %2649 = vst [vmem:[%s4931_s21 + $0x30] sm:$0xff] %v2637_v8  ;;  %v2640_v62 = vadd.f32 %v3024_v54, %v2807_v46  ;;  %v2631_v17 = vpop.f32.mrb[35].mxu0 }
 0x6ac   :  { %2647 = vst [vmem:[%s4931_s21 + $0x20] sm:$0xff] %v2629_v47  ;;  %v2632_v61 = vadd.f32 %v2807_v46, %v2631_v17 }
 0x6ad   :  { %2650 = vst [vmem:[%s4931_s21 + $0x38] sm:$0xff] %v2640_v62 }
 0x6ae   :  { %2648 = vst [vmem:[%s4931_s21 + $0x28] sm:$0xff] %v2632_v61 }

// kernel: mdl_conv_bn_forward.2
= control target key start
LH: loop header
LB: loop body
LE: loop exit
PB: predicated region body
PF: predicated region fallthrough
CT: control target
= control target key end

     0   :  { %s5372_s21 = smov 0   ;;  %s5374_s22 = smov 0   ;;  %s7141_s0 = inlined_call_operand.vmem [shape: f32[64,1], index: 0, kind: input, shape index: {}]   ;;  %s7142_s1 = inlined_call_operand.vmem [shape: f32[3,64,3], index: 1, kind: input, shape index: {}]   ;;  %s7143_s2 = inlined_call_operand.vmem [shape: f32[3,16], index: 2, kind: input, shape index: {}]   ;;  %s7144_s3 = inlined_call_operand.vmem [shape: f32[1,16], index: 3, kind: input, shape index: {}]   ;;  %s7145_s4 = inlined_call_operand.vmem [shape: f32[16,16], index: 4, kind: input, shape index: {}]   ;;  %s7146_s5 = inlined_call_operand.vmem [shape: f32[1,16], index: 5, kind: input, shape index: {}]   ;;  %s7147_s6 = inlined_call_operand.vmem [shape: f32[3,3,9], index: 6, kind: input, shape index: {}]   ;;  %s7148_s7 = inlined_call_operand.vmem [shape: f32[1,9], index: 7, kind: input, shape index: {}]   ;;  %s7149_s8 = inlined_call_operand.vmem [shape: f32[9,9], index: 8, kind: input, shape index: {}]   ;;  %s7150_s9 = inlined_call_operand.vmem [shape: f32[1,9], index: 9, kind: input, shape index: {}]   ;;  %s7151_s10 = inlined_call_operand.vmem [shape: f32[9,9], index: 10, kind: input, shape index: {}]   ;;  %s7152_s11 = inlined_call_operand.vmem [shape: f32[1,9], index: 11, kind: input, shape index: {}]   ;;  %s7153_s12 = inlined_call_operand.vmem [shape: f32[2,16], index: 12, kind: output, shape index: {0}]   ;;  %s7154_s13 = inlined_call_operand.vmem [shape: f32[2,16], index: 13, kind: output, shape index: {1}]   ;;  %s7155_s14 = inlined_call_operand.vmem [shape: f32[2,9], index: 14, kind: output, shape index: {2}]   ;;  %s7156_s15 = inlined_call_operand.vmem [shape: f32[2,9], index: 15, kind: output, shape index: {3}]   ;;  %s7157_s16 = inlined_call_operand.vmem [shape: f32[2,9], index: 16, kind: output, shape index: {4}]  }
   0x1   :  { %7159 = sst [smem:[#allocation2_spill]] %s7141_s0  ;;  %s5376_s23 = smov 0  }
   0x2 LB: > { %s39_s24 = sadd.s32 1, %s5272_s22  ;;  %p4295_p0 = scmp.ge.s32.totalorder %s5276_s23, 1  ;;  %s5276_s23 = sphi %s5376_s23, %s27_s23   ;;  %s5272_s22 = sphi %s5374_s22, %s7162_s22   ;;  %s5268_s21 = sphi %s5372_s21, %s7161_s21  }
   0x3   : > { %p41_p1 = scmp.ge.s32.totalorder %s39_s24, 3  ;;  %p470_p2 = scmp.lt.s32.totalorder %s5276_s23, 4 }
   0x5   : > { %s7164_s24 = smov (%p41_p1, %s39_s24), 0  ;;  %p471_p3 = pnand %p4295_p0, %p470_p2 }
   0x6   : > { %s7160_s27 = sld [smem:[#allocation2_spill]] (!%p471_p3)  ;;  %p4296_p4 = scmp.ne.s32.totalorder (!%p471_p3), %s5268_s21, 0 }
   0x7   : > { %474 = sbr.rel (%p471_p3) target bundleno = 1873 (0x751), region = 68 }
   0xc   : > { %v5395_v0 = vld [vmem:[%s7160_s27] sm:$0xff] (!%p471_p3)  ;;  %v5400_v1 = vld [vmem:[%s7160_s27 + $0x8] sm:$0xff] (!%p471_p3)  ;;  %v5405_v2 = vld [vmem:[%s7160_s27 + $0x10] sm:$0xff] (!%p471_p3) }
   0xd   : > { %v5410_v3 = vld [vmem:[%s7160_s27 + $0x18] sm:$0xff] (!%p471_p3)  ;;  %v5415_v4 = vld [vmem:[%s7160_s27 + $0x20] sm:$0xff] (!%p471_p3)  ;;  %v5420_v5 = vld [vmem:[%s7160_s27 + $0x28] sm:$0xff] (!%p471_p3) }
   0xe   : > { %v5425_v6 = vld [vmem:[%s7160_s27 + $0x30] sm:$0xff]  ;;  %v5430_v7 = vld [vmem:[%s7160_s27 + $0x38] sm:$0xff]  ;;  %544 = sbr.rel (%p4296_p4) target bundleno = 411 (0x19b), region = 72  ;;  %v553_v8 = vld [vmem:[%s7143_s2] sm:$0x7] (!%p4296_p4)  ;;  %vm579_vm0 = vcmask (!%p4296_p4), 1040384  }
   0xf   : > { %vm580_vm1 = vcmask (!%p4296_p4), 1041408   ;;  %v545_v9 = vld [vmem:[%s7142_s1] sm:$0xff] (!%p4296_p4)  ;;  %v558_v10 = vpack.c.bf16 (!%p4296_p4), %v553_v8, %v553_v8  ;;  %v5278_v11 = vmov (!%p4296_p4), 65535   ;;  %v546_v14 = vld [vmem:[%s7142_s1 + $0x8] sm:$0xff] (!%p4296_p4)  ;;  %vm566_vm2 = vcmask (!%p4296_p4), 23552   ;;  %v547_v18 = vld [vmem:[%s7142_s1 + $0x10] sm:$0xff] (!%p4296_p4) }
  0x10   : > { %v581_v12 = vsel (!%p4296_p4), %vm579_vm0, 4294967295, %v5278_v11  ;;  %v1230_v13 = vld [vmem:[%s7147_s6] sm:$0x7] (!%p4296_p4)  ;;  %v554_v17 = vpack.c.bf16 (!%p4296_p4), %v546_v14, %v545_v9  ;;  %v548_v19 = vld [vmem:[%s7142_s1 + $0x18] sm:$0xff] (!%p4296_p4)  ;;  %v4363_v20 = vld [vmem:[%s7147_s6 + $0x4] sm:$0x7] (!%p4296_p4) }
  0x11   : > { %v582_v15 = vsel (!%p4296_p4), %vm580_vm1, %v581_v12, 0  ;;  %v1235_v16 = vpack.c.bf16 (!%p4296_p4), %v1230_v13, %v1230_v13  ;;  %v1344_v22 = vpack.c.bf16 (!%p4296_p4), %v4363_v20, %v4363_v20  ;;  %v5279_v23 = vmov (!%p4296_p4), 0   ;;  %v549_v25 = vld [vmem:[%s7142_s1 + $0x20] sm:$0xff] (!%p4296_p4)  ;;  %v550_v26 = vld [vmem:[%s7142_s1 + $0x28] sm:$0xff] (!%p4296_p4)  ;;  %v551_v33 = vld [vmem:[%s7142_s1 + $0x30] sm:$0xff] (!%p4296_p4) }
  0x12   : > { %v584_v21 = vand.u32 (!%p4296_p4), %v582_v15, %v558_v10  ;;  %5014 = vset.pattern.permute.xlu0 (!%p4296_p4), %v5279_v23  ;;  %5015 = vset.pattern.permute.xlu1 (!%p4296_p4), %v5279_v23  ;;  %v555_v27 = vpack.c.bf16 (!%p4296_p4), %v548_v19, %v547_v18  ;;  %v4376_v29 = vld [vmem:[%s7147_s6 + $0x8] sm:$0x7] (!%p4296_p4)  ;;  %v556_v31 = vpack.c.bf16 (!%p4296_p4), %v550_v26, %v549_v25  ;;  %v552_v34 = vld [vmem:[%s7142_s1 + $0x38] sm:$0xff] (!%p4296_p4)  ;;  %v4310_v35 = vld [vmem:[%s7142_s1 + $0x40] sm:$0xff] (!%p4296_p4)  ;;  %vm979_vm3 = vcmask (!%p4296_p4), 123904  }
  0x13   : > { %v1249_v24 = vand.u32 (!%p4296_p4), %v1235_v16, %v582_v15  ;;  %4699 = vmatprep.mubr.msk.bf16.mxu0 (!%p4296_p4), %vm566_vm2, %v554_v17  ;;  %4729 = vmatprep.mubr.msk.bf16.mxu1 (!%p4296_p4), %vm566_vm2, %v554_v17  ;;  %v1358_v28 = vand.u32 (!%p4296_p4), %v1344_v22, %v582_v15  ;;  %v1447_v30 = vpack.c.bf16 (!%p4296_p4), %v4376_v29, %v4376_v29  ;;  %v4311_v36 = vld [vmem:[%s7142_s1 + $0x48] sm:$0xff] (!%p4296_p4)  ;;  %v4312_v39 = vld [vmem:[%s7142_s1 + $0x50] sm:$0xff] (!%p4296_p4)  ;;  %v4313_v40 = vld [vmem:[%s7142_s1 + $0x58] sm:$0xff] (!%p4296_p4)  ;;  %v5280_v60 = vmov (!%p4296_p4), 0.0  }
  0x14   : > { %4697 = vmatprep.subr.bf16.mxu0 (!%p4296_p4), %v584_v21  ;;  %984 = vperm.xlu0 (!%p4296_p4), %5014, %v5395_v0   ;;  %v557_v37 = vpack.c.bf16 (!%p4296_p4), %v552_v34, %v551_v33  ;;  %v708_v38 = vpack.c.bf16 (!%p4296_p4), %v4311_v36, %v4310_v35  ;;  %v4314_v41 = vld [vmem:[%s7142_s1 + $0x60] sm:$0xff] (!%p4296_p4)  ;;  %v4315_v42 = vld [vmem:[%s7142_s1 + $0x68] sm:$0xff] (!%p4296_p4)  ;;  %v709_v43 = vpack.c.bf16 (!%p4296_p4), %v4313_v40, %v4312_v39  ;;  %v4316_v45 = vld [vmem:[%s7142_s1 + $0x70] sm:$0xff] (!%p4296_p4)  ;;  %vm1587_vm4 = vcmask (!%p4296_p4), 66560  }
  0x15   : > { %4727 = vmatprep.subr.bf16.mxu1 %v1249_v24  ;;  %4698 = vmatpush3.bf16.msra.mxu0 %v584_v21  ;;  %v1461_v32 = vand.u32 %v1447_v30, %v582_v15  ;;  %v710_v44 = vpack.c.bf16 %v4315_v42, %v4314_v41  ;;  %v4317_v46 = vld [vmem:[%s7142_s1 + $0x78] sm:$0xff]  ;;  %v4330_v47 = vld [vmem:[%s7142_s1 + $0x80] sm:$0xff]  ;;  %v4331_v48 = vld [vmem:[%s7142_s1 + $0x88] sm:$0xff]  ;;  %980 = vst.msk [vmem:[%s7153_s12] sm:$0x3] %vm979_vm3, %v5280_v60  ;;  %vm1030_vm9 = vcmask 130048  }
  0x16   : > { %4728 = vmatpush3.bf16.msra.mxu1 %v1249_v24  ;;  %4707 = vmatprep.subr.bf16.mxu0 %v584_v21  ;;  %v711_v49 = vpack.c.bf16 %v4317_v46, %v4316_v45  ;;  %v846_v50 = vpack.c.bf16 %v4331_v48, %v4330_v47  ;;  %v4332_v51 = vld [vmem:[%s7142_s1 + $0x90] sm:$0xff]  ;;  %v4333_v52 = vld [vmem:[%s7142_s1 + $0x98] sm:$0xff]  ;;  %v4334_v53 = vld [vmem:[%s7142_s1 + $0xa0] sm:$0xff]  ;;  %1588 = vst.msk [vmem:[%s7155_s14] sm:$0x3] %vm1587_vm4, %v5280_v60 }
  0x17   : > { %4737 = vmatprep.subr.bf16.mxu1 %v1358_v28  ;;  %994 = vperm.xlu1 %5015, %v5405_v2   ;;  %v4335_v54 = vld [vmem:[%s7142_s1 + $0xa8] sm:$0xff]  ;;  %v847_v55 = vpack.c.bf16 %v4333_v52, %v4332_v51  ;;  %v4336_v57 = vld [vmem:[%s7142_s1 + $0xb0] sm:$0xff]  ;;  %v4337_v58 = vld [vmem:[%s7142_s1 + $0xb8] sm:$0xff] }
  0x18   : > { %4700 = vmatmul.mubr.msk.bf16.vlgmr.msra.gmra.mrb[0].mxu0 %vm566_vm2, %v555_v27  ;;  %989 = vperm.xlu0 %5014, %v5400_v1   ;;  %v848_v56 = vpack.c.bf16 %v4335_v54, %v4334_v53  ;;  %v849_v59 = vpack.c.bf16 %v4337_v58, %v4336_v57  ;;  %v5557_v61 = vld [vmem:[%s7144_s3] ss:$0 sm:$0xff] }
  0x19   : > { %4730 = vmatmul.mubr.msk.bf16.vlgmr.msra.gmra.mrb[0].mxu1 %vm566_vm2, %v555_v27  ;;  %4708 = vmatpush3.bf16.msra.mxu0 %v584_v21 }
  0x1a   : > { %4738 = vmatpush3.bf16.msra.mxu1 %v1358_v28  ;;  %4703 = vmatprep.mubr.msk.bf16.mxu0 %vm566_vm2, %v556_v31 }
  0x1b   : > { %4733 = vmatprep.mubr.msk.bf16.mxu1 %vm566_vm2, %v556_v31  ;;  %4717 = vmatprep.subr.bf16.mxu0 %v584_v21 }
  0x1c   : > { %4747 = vmatprep.subr.bf16.mxu1 %v1461_v32  ;;  %999 = vperm.xlu1 %5015, %v5410_v3  }
  0x1d   : > { %1004 = vperm.xlu0 %5014, %v5415_v4  }
  0x20   : > { %4704 = vmatmul.mubr.msk.bf16.gmra.mrb[4].mxu0 %vm566_vm2, %v557_v37  ;;  %1009 = vperm.xlu1 %5015, %v5420_v5  }
  0x21   : > { %4734 = vmatmul.mubr.msk.bf16.gmra.mrb[4].mxu1 %vm566_vm2, %v557_v37  ;;  %4709 = vmatprep.mubr.msk.bf16.mxu0 %vm566_vm2, %v708_v38 }
  0x22   : > { %4739 = vmatprep.mubr.msk.bf16.mxu1 %vm566_vm2, %v708_v38  ;;  %1014 = vperm.xlu0 %5014, %v5425_v6  }
  0x24   : > { %1019 = vperm.xlu1 %5015, %v5430_v7  }
  0x28   : > { %4710 = vmatmul.mubr.msk.bf16.vlgmr.msra.gmra.mrb[8].mxu0 %vm566_vm2, %v709_v43 }
  0x29   : > { %4740 = vmatmul.mubr.msk.bf16.vlgmr.msra.gmra.mrb[0].mxu1 %vm566_vm2, %v709_v43  ;;  %4718 = vmatpush3.bf16.msra.mxu0 %v584_v21 }
  0x2a   : > { %4748 = vmatpush3.bf16.msra.mxu1 %v1461_v32  ;;  %4713 = vmatprep.mubr.msk.bf16.mxu0 %vm566_vm2, %v710_v44 }
  0x2b   : > { %4743 = vmatprep.mubr.msk.bf16.mxu1 %vm566_vm2, %v710_v44 }
  0x30   : > { %4714 = vmatmul.mubr.msk.bf16.gmra.mrb[12].mxu0 %vm566_vm2, %v711_v49 }
  0x31   : > { %4744 = vmatmul.mubr.msk.bf16.gmra.mrb[4].mxu1 %vm566_vm2, %v711_v49  ;;  %4719 = vmatprep.mubr.msk.bf16.mxu0 %vm566_vm2, %v846_v50 }
  0x32   : > { %4749 = vmatprep.mubr.msk.bf16.mxu1 %vm566_vm2, %v846_v50 }
  0x38   : > { %4720 = vmatmul.mubr.msk.bf16.vlgmr.msra.gmra.mrb[16].mxu0 %vm566_vm2, %v847_v55 }
  0x39   : > { %4750 = vmatmul.mubr.msk.bf16.vlgmr.msra.gmra.mrb[0].mxu1 %vm566_vm2, %v847_v55  ;;  %4723 = vmatprep.mubr.msk.bf16.mxu0 %vm566_vm2, %v848_v56 }
  0x3a   : > { %4753 = vmatprep.mubr.msk.bf16.mxu1 %vm566_vm2, %v848_v56 }
  0x40   : > { %4724 = vmatmul.mubr.msk.bf16.gmra.mrb[20].mxu0 %vm566_vm2, %v849_v59 }
  0x41   : > { %4754 = vmatmul.mubr.msk.bf16.gmra.mrb[4].mxu1 %vm566_vm2, %v849_v59 }
  0x93   : > { %v5588_v35 = vpop.permute.xlu0 %984 }
  0x96   : > { %v5594_v41 = vpop.permute.xlu1 %994 }
  0xeb   : > { %v4701_v62 = vpop.f32.mrb[0].mxu0 }
  0xec   : > { %v629_v63 = vadd.f32 %v4701_v62, %v5557_v61  ;;  %v620_v8 = vpop.f32.mrb[1].mxu0 }
  0xed   : > { %v621_v9 = vadd.f32 %v5557_v61, %v620_v8  ;;  %v4702_v10 = vpop.f32.mrb[2].mxu0 }
  0xee   : > { %v661_v11 = vmin.f32 %v629_v63, 0.0  ;;  %v5562_v12 = vadd.f32 %v4702_v10, %v5557_v61  ;;  %v623_v13 = vpop.f32.mrb[3].mxu0  ;;  %vm653_vm5 = vcmp.gt.f32.partialorder %v629_v63, 0.0 }
  0xef   : > { %v659_v14 = vmin.f32 %v621_v9, 0.0  ;;  %v5565_v15 = vadd.f32 %v5557_v61, %v623_v13  ;;  %vm651_vm6 = vcmp.gt.f32.partialorder %v621_v9, 0.0 }
  0xf0   : > { %v671_v16 = vmul.f32 1.442695, %v661_v11  ;;  %v662_v17 = vmin.f32 %v5562_v12, 0.0  ;;  %vm654_vm7 = vcmp.gt.f32.partialorder %v5562_v12, 0.0  ;;  %v5618_v11 = vpop.permute.xlu1 %999 }
  0xf1   : > { %v667_v18 = vmul.f32 1.442695, %v659_v14  ;;  %v660_v19 = vmin.f32 %v5565_v15, 0.0  ;;  %vm652_vm8 = vcmp.gt.f32.partialorder %v5565_v15, 0.0 }
  0xf2   : > { %5016 = vpow2.f32 %v671_v16  ;;  %v673_v20 = vmul.f32 1.442695, %v662_v17 }
  0xf3   : > { %5018 = vpow2.f32 %v667_v18  ;;  %v669_v21 = vmul.f32 1.442695, %v660_v19  ;;  %v4705_v22 = vpop.f32.mrb[4].mxu0 }
  0xf4   : > { %5020 = vpow2.f32 %v673_v20  ;;  %v636_v23 = vpop.f32.mrb[5].mxu0  ;;  %v5574_v24 = vadd.f32 %v4705_v22, %v5557_v61 }
  0xf5   : > { %5022 = vpow2.f32 %v669_v21  ;;  %v5577_v25 = vadd.f32 %v5557_v61, %v636_v23  ;;  %v4706_v26 = vpop.f32.mrb[6].mxu0 }
  0xf6   : > { %v639_v27 = vpop.f32.mrb[7].mxu0  ;;  %v5584_v30 = vadd.f32 %v4706_v26, %v5557_v61  ;;  %v665_v31 = vmin.f32 %v5574_v24, 0.0  ;;  %vm657_vm14 = vcmp.gt.f32.partialorder %v5574_v24, 0.0 }
  0xf7   : > { %v663_v28 = vmin.f32 %v5577_v25, 0.0  ;;  %v5581_v29 = vadd.f32 %v5557_v61, %v639_v27  ;;  %vm655_vm10 = vcmp.gt.f32.partialorder %v5577_v25, 0.0 }
  0xf8   : > { %v666_v38 = vmin.f32 %v5584_v30, 0.0  ;;  %v679_v44 = vmul.f32 1.442695, %v665_v31  ;;  %vm658_vm15 = vcmp.gt.f32.partialorder %v5584_v30, 0.0 }
  0xf9   : > { %v675_v32 = vmul.f32 1.442695, %v663_v28  ;;  %v664_v33 = vmin.f32 %v5581_v29, 0.0  ;;  %vm656_vm11 = vcmp.gt.f32.partialorder %v5581_v29, 0.0 }
  0xfa   : > { %v681_v58 = vmul.f32 1.442695, %v666_v38 }
  0xfb   : > { %5024 = vpow2.f32 %v675_v32  ;;  %v677_v34 = vmul.f32 1.442695, %v664_v33  ;;  %v4711_v36 = vpop.f32.mrb[8].mxu0 }
  0xfc   : > { %v5017_v37 = vpop.eup %5016  ;;  %v5592_v39 = vadd.f32 %v4711_v36, %v5557_v61  ;;  %v758_v40 = vpop.f32.mrb[9].mxu0 }
  0xfd   : > { %v5019_v42 = vpop.eup %5018  ;;  %v4304_v43 = vadd.f32 -1.0, %v5017_v37  ;;  %5026 = vpow2.f32 %v677_v34  ;;  %v5597_v45 = vadd.f32 %v5557_v61, %v758_v40  ;;  %v4712_v46 = vpop.f32.mrb[10].mxu0 }
  0xfe   : > { %v5021_v47 = vpop.eup %5020  ;;  %v4302_v48 = vadd.f32 -1.0, %v5019_v42  ;;  %v799_v49 = vmin.f32 %v5592_v39, 0.0  ;;  %v761_v50 = vpop.f32.mrb[11].mxu0  ;;  %v5605_v55 = vadd.f32 %v4712_v46, %v5557_v61  ;;  %5028 = vpow2.f32 %v679_v44 }
  0xff   : > { %v5023_v51 = vpop.eup %5022  ;;  %v693_v52 = vsel %vm653_vm5, %v629_v63, %v4304_v43  ;;  %v4305_v53 = vadd.f32 -1.0, %v5021_v47  ;;  %v797_v54 = vmin.f32 %v5597_v45, 0.0  ;;  %vm791_vm12 = vcmp.gt.f32.partialorder %v5592_v39, 0.0 }
 0x100   : > { %v691_v56 = vsel %vm651_vm6, %v621_v9, %v4302_v48  ;;  %v4303_v57 = vadd.f32 -1.0, %v5023_v51  ;;  %v809_v59 = vmul.f32 1.442695, %v799_v49  ;;  %v1024_v8 = vmul.f32 %v5594_v41, %v693_v52  ;;  %v5616_v9 = vpop.permute.xlu0 %989 }
 0x101   : > { %v1022_v60 = vmul.f32 %v5588_v35, %v691_v56  ;;  %v805_v62 = vmul.f32 1.442695, %v797_v54  ;;  %v694_v63 = vsel %vm654_vm7, %v5562_v12, %v4305_v53  ;;  %v800_v14 = vmin.f32 %v5605_v55, 0.0 }
 0x102   : > { %v692_v10 = vsel %vm652_vm8, %v5565_v15, %v4303_v57  ;;  %5030 = vpow2.f32 %v809_v59  ;;  %v5624_v12 = vadd.f32 %v5557_v61, %v761_v50  ;;  %v1034_v19 = vsel %vm1030_vm9, %v1024_v8, 0.0 }
 0x103   : > { %v1053_v13 = vmul.f32 %v1022_v60, %v691_v56  ;;  %5032 = vpow2.f32 %v805_v62  ;;  %v4715_v16 = vpop.f32.mrb[12].mxu0  ;;  %v1023_v15 = vmul.f32 %v5616_v9, %v692_v10  ;;  %v1055_v20 = vmul.f32 %v1024_v8, %v693_v52 }
 0x104   : > { %5034 = vpow2.f32 %v681_v58  ;;  %v774_v17 = vpop.f32.mrb[13].mxu0  ;;  %v811_v21 = vmul.f32 1.442695, %v800_v14  ;;  %v1025_v22 = vmul.f32 %v5618_v11, %v694_v63  ;;  %v1031_v27 = vsel %vm1030_vm9, %v1022_v60, 0.0  ;;  %v5639_v43 = vpop.permute.xlu0 %1004 }
 0x105   : > { %v5025_v18 = vpop.eup %5024  ;;  %v4716_v23 = vpop.f32.mrb[14].mxu0  ;;  %v798_v28 = vmin.f32 %v5624_v12, 0.0  ;;  %v1032_v31 = vsel %vm1030_vm9, %v1023_v15, 0.0  ;;  %v1061_v34 = vsel %vm1030_vm9, %v1053_v13, 0.0  ;;  %v1054_v37 = vmul.f32 %v1023_v15, %v692_v10 }
 0x106   : > { %v4306_v26 = vadd.f32 -1.0, %v5025_v18  ;;  %v5633_v32 = vpop.f32.mrb[15].mxu0  ;;  %5036 = vpow2.f32 %v811_v21  ;;  %v1033_v36 = vadd.f32 %v1032_v31, %v1031_v27  ;;  %v5642_v44 = vadd.f32 %v4715_v16, %v5557_v61  ;;  %v5652_v58 = vpop.permute.xlu1 %1009 }
 0x107   : > { %v5027_v33 = vpop.eup %5026  ;;  %v807_v42 = vmul.f32 1.442695, %v798_v28  ;;  %v1062_v46 = vsel %vm1030_vm9, %v1054_v37, 0.0  ;;  %v1056_v48 = vmul.f32 %v1025_v22, %v694_v63  ;;  %v1064_v53 = vsel %vm1030_vm9, %v1055_v20, 0.0 }
 0x108   : > { %v695_v38 = vsel %vm655_vm10, %v5577_v25, %v4306_v26  ;;  %v4307_v40 = vadd.f32 -1.0, %v5027_v33  ;;  %v1035_v47 = vadd.f32 %v1034_v19, %v1033_v36  ;;  %v1063_v51 = vadd.f32 %v1062_v46, %v1061_v34  ;;  %v5029_v52 = vpop.eup %5028 }
 0x109   : > { %v1026_v49 = vmul.f32 %v5639_v43, %v695_v38  ;;  %5038 = vpow2.f32 %v807_v42  ;;  %v1036_v25 = vsel %vm1030_vm9, %v1025_v22, 0.0  ;;  %v803_v8 = vmin.f32 %v5642_v44, 0.0 }
 0x10a   : > { %v696_v50 = vsel %vm656_vm11, %v5581_v29, %v4307_v40  ;;  %v1037_v54 = vadd.f32 %v1036_v25, %v1035_v47  ;;  %v1065_v62 = vadd.f32 %v1064_v53, %v1063_v51  ;;  %v5658_v29 = vadd.f32 %v5557_v61, %v774_v17  ;;  %v5698_v25 = vpop.permute.xlu0 %1014 }
 0x10b   : > { %v1038_v56 = vsel %vm1030_vm9, %v1026_v49, 0.0  ;;  %v1057_v57 = vmul.f32 %v1026_v49, %v695_v38  ;;  %v5654_v59 = vpop.f32.mrb[16].mxu0  ;;  %v1027_v63 = vmul.f32 %v5652_v58, %v696_v50  ;;  %v1066_v15 = vsel %vm1030_vm9, %v1056_v48, 0.0 }
 0x10c   : > { %v5031_v60 = vpop.eup %5030  ;;  %v5661_v10 = vpop.f32.mrb[0].mxu1  ;;  %v1039_v18 = vadd.f32 %v1038_v56, %v1037_v54  ;;  %v1067_v26 = vadd.f32 %v1066_v15, %v1065_v62  ;;  %v817_v27 = vmul.f32 1.442695, %v803_v8  ;;  %v5672_v28 = vadd.f32 %v4716_v23, %v5557_v61 }
 0x10d   : > { %v5663_v13 = vpop.f32.mrb[17].mxu0  ;;  %v5033_v14 = vpop.eup %5032  ;;  %v4324_v16 = vadd.f32 -1.0, %v5031_v60  ;;  %v1068_v19 = vsel %vm1030_vm9, %v1057_v57, 0.0  ;;  %v4308_v34 = vadd.f32 -1.0, %v5029_v52  ;;  %vm789_vm13 = vcmp.gt.f32.partialorder %v5597_v45, 0.0 }
 0x10e   : > { %v5667_v20 = vpop.f32.mrb[1].mxu1  ;;  %v5669_v21 = vpop.f32.mrb[18].mxu0  ;;  %v4322_v17 = vadd.f32 -1.0, %v5033_v14  ;;  %v801_v37 = vmin.f32 %v5658_v29, 0.0  ;;  %v1069_v42 = vadd.f32 %v1068_v19, %v1067_v26  ;;  %5040 = vpow2.f32 %v817_v27 }
 0x10f   : > { %v5035_v22 = vpop.eup %5034  ;;  %v5674_v31 = vpop.f32.mrb[2].mxu1  ;;  %v831_v36 = vsel %vm791_vm12, %v5592_v39, %v4324_v16  ;;  %v1058_v23 = vmul.f32 %v1027_v63, %v696_v50  ;;  %vm792_vm1 = vcmp.gt.f32.partialorder %v5605_v55, 0.0  ;;  %vm790_vm2 = vcmp.gt.f32.partialorder %v5624_v12, 0.0 }
 0x110   : > { %v5676_v33 = vpop.f32.mrb[19].mxu0  ;;  %v5683_v38 = vpop.f32.mrb[3].mxu1  ;;  %v829_v40 = vsel %vm789_vm13, %v5597_v45, %v4322_v17  ;;  %v1085_v47 = vmul.f32 %v5594_v41, %v831_v36  ;;  %v813_v48 = vmul.f32 1.442695, %v801_v37  ;;  %v804_v49 = vmin.f32 %v5672_v28, 0.0 }
 0x111   : > { %v5037_v46 = vpop.eup %5036  ;;  %v1083_v45 = vmul.f32 %v5588_v35, %v829_v40  ;;  %v1040_v50 = vsel %vm1030_vm9, %v1027_v63, 0.0  ;;  %v5696_v51 = vadd.f32 %v5557_v61, %v5633_v32  ;;  %v1070_v56 = vsel %vm1030_vm9, %v1058_v23, 0.0 }
 0x112   : > { %v4325_v39 = vadd.f32 -1.0, %v5037_v46  ;;  %5042 = vpow2.f32 %v813_v48  ;;  %v819_v57 = vmul.f32 1.442695, %v804_v49  ;;  %v697_v60 = vsel %vm657_vm14, %v5574_v24, %v4308_v34 }
 0x113   : > { %v5700_v52 = vpop.f32.mrb[20].mxu0  ;;  %v5039_v53 = vpop.eup %5038  ;;  %v4309_v32 = vadd.f32 -1.0, %v5035_v22  ;;  %v1094_v63 = vsel %vm1030_vm9, %v1085_v47, 0.0  ;;  %v1115_v14 = vmul.f32 %v1085_v47, %v831_v36  ;;  %v1028_v17 = vmul.f32 %v5698_v25, %v697_v60 }
 0x114   : > { %v832_v54 = vsel %vm792_vm1, %v5605_v55, %v4325_v39  ;;  %v5707_v62 = vpop.f32.mrb[4].mxu1  ;;  %v5709_v8 = vpop.f32.mrb[21].mxu0  ;;  %v4323_v16 = vadd.f32 -1.0, %v5039_v53  ;;  %5044 = vpow2.f32 %v819_v57  ;;  %v802_v55 = vmin.f32 %v5696_v51, 0.0 }
 0x115   : > { %v5712_v15 = vpop.f32.mrb[5].mxu1  ;;  %v5714_v19 = vpop.f32.mrb[22].mxu0  ;;  %v1041_v26 = vadd.f32 %v1040_v50, %v1039_v18  ;;  %v1113_v34 = vmul.f32 %v1083_v45, %v829_v40  ;;  %v1086_v36 = vmul.f32 %v5618_v11, %v832_v54  ;;  %vm795_vm5 = vcmp.gt.f32.partialorder %v5642_v44, 0.0 }
 0x116   : > { %v5718_v24 = vpop.f32.mrb[6].mxu1  ;;  %v5720_v27 = vpop.f32.mrb[23].mxu0  ;;  %v830_v22 = vsel %vm790_vm2, %v5624_v12, %v4323_v16  ;;  %v1071_v37 = vadd.f32 %v1070_v56, %v1069_v42  ;;  %v815_v47 = vmul.f32 1.442695, %v802_v55  ;;  %v1042_v18 = vsel %vm1030_vm9, %v1028_v17, 0.0 }
 0x117   : > { %v5727_v23 = vpop.f32.mrb[7].mxu1  ;;  %v1084_v46 = vmul.f32 %v5616_v9, %v830_v22  ;;  %v1059_v48 = vmul.f32 %v1028_v17, %v697_v60  ;;  %v5731_v39 = vpop.permute.xlu1 %1019  ;;  %v1091_v40 = vsel %vm1030_vm9, %v1083_v45, 0.0  ;;  %v1043_v49 = vadd.f32 %v1042_v18, %v1041_v26  ;;  %v5750_v26 = vld [vmem:[%s7148_s7] ss:$0 sm:$0xff] }
 0x118   : > { %v698_v12 = vsel %vm658_vm15, %v5584_v30, %v4309_v32  ;;  %v5739_v42 = vadd.f32 %v5654_v59, %v5557_v61  ;;  %v5041_v50 = vpop.eup %5040  ;;  %5046 = vpow2.f32 %v815_v47  ;;  %v1121_v60 = vsel %vm1030_vm9, %v1113_v34, 0.0 }
 0x119   : > { %v1092_v53 = vsel %vm1030_vm9, %v1084_v46, 0.0  ;;  %v1114_v56 = vmul.f32 %v1084_v46, %v830_v22  ;;  %v1072_v57 = vsel %vm1030_vm9, %v1059_v48, 0.0  ;;  %v1029_v55 = vmul.f32 %v5731_v39, %v698_v12 }
 0x11a   : > { %v1093_v16 = vadd.f32 %v1092_v53, %v1091_v40  ;;  %v1073_v45 = vadd.f32 %v1072_v57, %v1071_v37  ;;  %v1116_v30 = vmul.f32 %v1086_v36, %v832_v54  ;;  %v4328_v32 = vadd.f32 -1.0, %v5041_v50 }
 0x11b   : > { %v1122_v17 = vsel %vm1030_vm9, %v1114_v56, 0.0  ;;  %v937_v59 = vmin.f32 %v5739_v42, 0.0  ;;  %v1124_v46 = vsel %vm1030_vm9, %v1115_v14, 0.0  ;;  %v1044_v37 = vsel %vm1030_vm9, %v1029_v55, 0.0 }
 0x11c   : > { %v5043_v22 = vpop.eup %5042  ;;  %v1123_v47 = vadd.f32 %v1122_v17, %v1121_v60  ;;  %v1095_v34 = vadd.f32 %v1094_v63, %v1093_v16  ;;  %v1096_v18 = vsel %vm1030_vm9, %v1086_v36, 0.0  ;;  %v1045_v40 = vadd.f32 %v1044_v37, %v1043_v49 }
 0x11d   : > { %v4326_v48 = vadd.f32 -1.0, %v5043_v22  ;;  %v1060_v54 = vmul.f32 %v1029_v55, %v698_v12  ;;  %vm793_vm6 = vcmp.gt.f32.partialorder %v5658_v29, 0.0  ;;  %v5758_v56 = vadd.f32 %v5661_v10, %v5750_v26 }
 0x11e   : > { %v1097_v50 = vadd.f32 %v1096_v18, %v1095_v34  ;;  %v1125_v53 = vadd.f32 %v1124_v46, %v1123_v47  ;;  %v5045_v57 = vpop.eup %5044  ;;  %v1126_v14 = vsel %vm1030_vm9, %v1116_v30, 0.0  ;;  %v835_v36 = vsel %vm795_vm5, %v5642_v44, %v4328_v32 }
 0x11f   : > { %v833_v63 = vsel %vm793_vm6, %v5658_v29, %v4326_v48  ;;  %v947_v60 = vmul.f32 1.442695, %v937_v59  ;;  %v4329_v16 = vadd.f32 -1.0, %v5045_v57  ;;  %v1074_v55 = vsel %vm1030_vm9, %v1060_v54, 0.0 }
 0x120   : > { %v1127_v49 = vadd.f32 %v1126_v14, %v1125_v53  ;;  %v1087_v12 = vmul.f32 %v5639_v43, %v833_v63  ;;  %vm796_vm7 = vcmp.gt.f32.partialorder %v5672_v28, 0.0  ;;  %v1046_v10 = vrot.slane %v1045_v40, 4 }
 0x121   : > { %v1075_v17 = vadd.f32 %v1074_v55, %v1073_v45  ;;  %v1089_v29 = vmul.f32 %v5698_v25, %v835_v36  ;;  %v1546_v46 = vmin.f32 %v5758_v56, 0.0  ;;  %v836_v32 = vsel %vm796_vm7, %v5672_v28, %v4329_v16 }
 0x122   : > { %v1098_v22 = vsel %vm1030_vm9, %v1087_v12, 0.0  ;;  %v1117_v30 = vmul.f32 %v1087_v12, %v833_v63  ;;  %v5047_v47 = vpop.eup %5046  ;;  %5048 = vpow2.f32 %v947_v60  ;;  %v5775_v45 = vadd.f32 %v5557_v61, %v5663_v13 }
 0x123   : > { %v1099_v44 = vadd.f32 %v1098_v22, %v1097_v50  ;;  %v1076_v59 = vrot.slane %v1075_v17, 4  ;;  %v4327_v37 = vadd.f32 -1.0, %v5047_v47  ;;  %v1556_v18 = vmul.f32 1.442695, %v1546_v46 }
 0x124   : > { %v1128_v34 = vsel %vm1030_vm9, %v1117_v30, 0.0  ;;  %vm794_vm8 = vcmp.gt.f32.partialorder %v5696_v51, 0.0  ;;  %v1047_v54 = vadd.f32 %v1046_v10, %v1045_v40  ;;  %v1090_v57 = vmul.f32 %v5731_v39, %v836_v32 }
 0x125   : > { %v1129_v48 = vadd.f32 %v1128_v34, %v1127_v49  ;;  %v834_v53 = vsel %vm794_vm8, %v5696_v51, %v4327_v37  ;;  %5050 = vpow2.f32 %v1556_v18  ;;  %v1077_v28 = vadd.f32 %v1076_v59, %v1075_v17 }
 0x126   : > { %v1088_v50 = vmul.f32 %v5652_v58, %v834_v53  ;;  %v935_v14 = vmin.f32 %v5775_v45, 0.0  ;;  %v1119_v63 = vmul.f32 %v1089_v29, %v835_v36  ;;  %v5784_v60 = vadd.f32 %v5750_v26, %v5667_v20 }
 0x127   : > { %v1048_v12 = vrot.slane %v1047_v54, 2  ;;  %v5789_v51 = vadd.f32 %v5669_v21, %v5557_v61  ;;  %v5794_v10 = vadd.f32 %v5674_v31, %v5750_v26  ;;  %v1102_v20 = vsel %vm1030_vm9, %v1089_v29, 0.0 }
 0x128   : > { %v1100_v13 = vsel %vm1030_vm9, %v1088_v50, 0.0  ;;  %v1118_v49 = vmul.f32 %v1088_v50, %v834_v53  ;;  %v943_v16 = vmul.f32 1.442695, %v935_v14  ;;  %v1544_v55 = vmin.f32 %v5784_v60, 0.0 }
 0x129   : > { %v1101_v40 = vadd.f32 %v1100_v13, %v1099_v44  ;;  %v1078_v17 = vrot.slane %v1077_v28, 2  ;;  %v1120_v22 = vmul.f32 %v1090_v57, %v836_v32  ;;  %v1132_v47 = vsel %vm1030_vm9, %v1119_v63, 0.0 }
 0x12a   : > { %v1130_v36 = vsel %vm1030_vm9, %v1118_v49, 0.0  ;;  %5052 = vpow2.f32 %v943_v16  ;;  %v1049_v44 = vadd.f32 %v1048_v12, %v1047_v54  ;;  %v1104_v59 = vsel %vm1030_vm9, %v1090_v57, 0.0 }
 0x12b   : > { %v1131_v30 = vadd.f32 %v1130_v36, %v1129_v48  ;;  %v1103_v46 = vadd.f32 %v1102_v20, %v1101_v40  ;;  %v1552_v34 = vmul.f32 1.442695, %v1544_v55  ;;  %v938_v37 = vmin.f32 %v5789_v51, 0.0 }
 0x12c   : > { %v5049_v21 = vpop.eup %5048  ;;  %v1547_v53 = vmin.f32 %v5794_v10, 0.0  ;;  %v1079_v50 = vadd.f32 %v1078_v17, %v1077_v28  ;;  %v1134_v29 = vsel %vm1030_vm9, %v1120_v22, 0.0  ;;  %v5805_v54 = vadd.f32 %v5557_v61, %v5676_v33 }
 0x12d   : > { %v1133_v31 = vadd.f32 %v1132_v47, %v1131_v30  ;;  %v1105_v18 = vadd.f32 %v1104_v59, %v1103_v46  ;;  %5054 = vpow2.f32 %v1552_v34  ;;  %v949_v32 = vmul.f32 1.442695, %v938_v37 }
 0x12e   : > { %v1558_v13 = vmul.f32 1.442695, %v1547_v53  ;;  %v1050_v57 = vrot.slane %v1049_v44, 1  ;;  %v4344_v49 = vadd.f32 -1.0, %v5049_v21  ;;  %v1080_v28 = vrot.slane %v1079_v50, 1 }
 0x12f   : > { %v5051_v48 = vpop.eup %5050  ;;  %v1106_v14 = vrot.slane %v1105_v18, 4  ;;  %v1135_v63 = vadd.f32 %v1134_v29, %v1133_v31  ;;  %5056 = vpow2.f32 %v949_v32  ;;  %v936_v55 = vmin.f32 %v5805_v54, 0.0  ;;  %v981_v21 = vld [vmem:[%s7153_s12] sm:$0x3] }
 0x130   : > { %v4383_v16 = vadd.f32 -1.0, %v5051_v48  ;;  %5058 = vpow2.f32 %v1558_v13  ;;  %v5810_v36 = vadd.f32 %v5750_v26, %v5683_v38  ;;  %vm929_vm10 = vcmp.gt.f32.partialorder %v5739_v42, 0.0 }
 0x131   : > { %v1107_v12 = vadd.f32 %v1106_v14, %v1105_v18  ;;  %v1136_v40 = vrot.slane %v1135_v63, 4  ;;  %vm1538_vm11 = vcmp.gt.f32.partialorder %v5758_v56, 0.0  ;;  %v1051_v33 = vadd.f32 %v1050_v57, %v1049_v44 }
 0x132   : > { %v969_v22 = vsel %vm929_vm10, %v5739_v42, %v4344_v49  ;;  %v945_v30 = vmul.f32 1.442695, %v936_v55  ;;  %v1545_v46 = vmin.f32 %v5810_v36, 0.0  ;;  %v1578_v34 = vsel %vm1538_vm11, %v5758_v56, %v4383_v16 }
 0x133   : > { %v1108_v20 = vrot.slane %v1107_v12, 2  ;;  %v1137_v17 = vadd.f32 %v1136_v40, %v1135_v63  ;;  %vm1598_vm12 = vcmask 72704   ;;  %v1081_v37 = vadd.f32 %v1080_v28, %v1079_v50 }
 0x134   : > { %v5053_v47 = vpop.eup %5052  ;;  %5060 = vpow2.f32 %v945_v30  ;;  %v1554_v18 = vmul.f32 1.442695, %v1545_v46  ;;  %v1145_v42 = vmul.f32 %v5594_v41, %v969_v22  ;;  %vm927_vm13 = vcmp.gt.f32.partialorder %v5775_v45, 0.0 }
 0x135   : > { %v1109_v59 = vadd.f32 %v1108_v20, %v1107_v12  ;;  %v1138_v38 = vrot.slane %v1137_v17, 2  ;;  %v4342_v31 = vadd.f32 -1.0, %v5053_v47  ;;  %v1052_v32 = vadd.f32 %v1051_v33, %v981_v21 }
 0x136   : > { %v1592_v48 = vmul.f32 %v1578_v34, %v5594_v41  ;;  %vm1536_vm14 = vcmp.gt.f32.partialorder %v5784_v60, 0.0  ;;  %5062 = vpow2.f32 %v1554_v18  ;;  %v5826_v50 = vadd.f32 %v5700_v52, %v5557_v61 }
 0x137   : > { %v1110_v44 = vrot.slane %v1109_v59, 1  ;;  %v1139_v53 = vadd.f32 %v1138_v38, %v1137_v17  ;;  %v5055_v29 = vpop.eup %5054  ;;  %v1082_v57 = vadd.f32 %v1081_v37, %v981_v21  ;;  %v967_v49 = vsel %vm927_vm13, %v5775_v45, %v4342_v31 }
 0x138   : > { %v4381_v63 = vadd.f32 -1.0, %v5055_v29  ;;  %vm930_vm15 = vcmp.gt.f32.partialorder %v5789_v51, 0.0  ;;  %v5832_v12 = vadd.f32 %v5557_v61, %v5709_v8  ;;  %v1175_v28 = vmul.f32 %v1145_v42, %v969_v22 }
 0x139   : > { %v1111_v14 = vadd.f32 %v1110_v44, %v1109_v59  ;;  %v1140_v56 = vrot.slane %v1139_v53, 1  ;;  %v5057_v13 = vpop.eup %5056  ;;  %v5838_v55 = vadd.f32 %v5707_v62, %v5750_v26  ;;  %v1623_v52 = vmul.f32 %v1592_v48, %v1578_v34 }
 0x13a   : > { %v5059_v41 = vpop.eup %5058  ;;  %v1576_v45 = vsel %vm1536_vm14, %v5784_v60, %v4381_v63  ;;  %v4345_v20 = vadd.f32 -1.0, %v5057_v13  ;;  %v5845_v17 = vadd.f32 %v5750_v26, %v5712_v15  ;;  %v1143_v33 = vmul.f32 %v5588_v35, %v967_v49 }
 0x13b   : > { %v5834_v40 = vadd.f32 %v1111_v14, %v1052_v32  ;;  %v1141_v16 = vadd.f32 %v1140_v56, %v1139_v53  ;;  %v4384_v30 = vadd.f32 -1.0, %v5059_v41  ;;  %v941_v22 = vmin.f32 %v5826_v50, 0.0 }
 0x13c   : > { %v1154_v62 = vsel %vm1030_vm9, %v1145_v42, 0.0  ;;  %v1590_v46 = vmul.f32 %v1576_v45, %v5588_v35  ;;  %vm1539_vm1 = vcmp.gt.f32.partialorder %v5794_v10, 0.0  ;;  %v939_v60 = vmin.f32 %v5832_v12, 0.0 }
 0x13d   : > { %v5847_v8 = vadd.f32 %v1141_v16, %v1082_v57  ;;  %v1184_v47 = vsel %vm1030_vm9, %v1175_v28, 0.0  ;;  %vm928_vm2 = vcmp.gt.f32.partialorder %v5805_v54, 0.0  ;;  %vm1537_vm5 = vcmp.gt.f32.partialorder %v5810_v36, 0.0 }
 0x13e   : > { %v1550_v15 = vmin.f32 %v5838_v55, 0.0  ;;  %v5061_v21 = vpop.eup %5060  ;;  %v1602_v59 = vsel %vm1598_vm12, %v1592_v48, 0.0  ;;  %v970_v38 = vsel %vm930_vm15, %v5789_v51, %v4345_v20  ;;  %v951_v35 = vmul.f32 1.442695, %v939_v60 }
 0x13f   : > { %v1548_v34 = vmin.f32 %v5845_v17, 0.0  ;;  %v1632_v37 = vsel %vm1598_vm12, %v1623_v52, 0.0  ;;  %v1173_v31 = vmul.f32 %v1143_v33, %v967_v49  ;;  %v1579_v18 = vsel %vm1539_vm1, %v5794_v10, %v4384_v30 }
 0x140   : > { %v955_v44 = vmul.f32 1.442695, %v941_v22  ;;  %v5063_v53 = vpop.eup %5062  ;;  %v1621_v42 = vmul.f32 %v1590_v46, %v1576_v45  ;;  %v4343_v29 = vadd.f32 -1.0, %v5061_v21  ;;  %5064 = vpow2.f32 %v951_v35 }
 0x141   : > { %v1560_v32 = vmul.f32 1.442695, %v1548_v34  ;;  %v1146_v48 = vmul.f32 %v5618_v11, %v970_v38  ;;  %v4382_v14 = vadd.f32 -1.0, %v5063_v53  ;;  %v1564_v56 = vmul.f32 1.442695, %v1550_v15 }
 0x142   : > { %v5869_v51 = vadd.f32 %v5714_v19, %v5557_v61  ;;  %v1151_v63 = vsel %vm1030_vm9, %v1143_v33, 0.0  ;;  %v968_v10 = vsel %vm928_vm2, %v5805_v54, %v4343_v29  ;;  %v5877_v13 = vadd.f32 %v5718_v24, %v5750_v26 }
 0x143   : > { %5066 = vpow2.f32 %v1560_v32  ;;  %v1593_v57 = vmul.f32 %v1579_v18, %v5618_v11  ;;  %v1144_v49 = vmul.f32 %v5616_v9, %v968_v10  ;;  %v1577_v19 = vsel %vm1537_vm5, %v5810_v36, %v4382_v14 }
 0x144   : > { %5068 = vpow2.f32 %v955_v44  ;;  %v1181_v41 = vsel %vm1030_vm9, %v1173_v31, 0.0  ;;  %v1599_v16 = vsel %vm1598_vm12, %v1590_v46, 0.0  ;;  %v1629_v54 = vsel %vm1598_vm12, %v1621_v42, 0.0 }
 0x145   : > { %v1591_v28 = vmul.f32 %v1577_v19, %v5616_v9  ;;  %v1176_v52 = vmul.f32 %v1146_v48, %v970_v38  ;;  %v1152_v24 = vsel %vm1030_vm9, %v1144_v49, 0.0  ;;  %v1174_v45 = vmul.f32 %v1144_v49, %v968_v10 }
 0x146   : > { %v942_v11 = vmin.f32 %v5869_v51, 0.0  ;;  %v1153_v20 = vadd.f32 %v1152_v24, %v1151_v63  ;;  %v1551_v36 = vmin.f32 %v5877_v13, 0.0  ;;  %v1156_v22 = vsel %vm1030_vm9, %v1146_v48, 0.0 }
 0x147   : > { %v1600_v33 = vsel %vm1598_vm12, %v1591_v28, 0.0  ;;  %v1622_v30 = vmul.f32 %v1591_v28, %v1577_v19  ;;  %v1604_v46 = vsel %vm1598_vm12, %v1593_v57, 0.0  ;;  %v1182_v60 = vsel %vm1030_vm9, %v1174_v45, 0.0 }
 0x148   : > { %v1601_v15 = vadd.f32 %v1600_v33, %v1599_v16  ;;  %v1624_v9 = vmul.f32 %v1593_v57, %v1579_v18  ;;  %v1155_v21 = vadd.f32 %v1154_v62, %v1153_v20  ;;  %v1183_v38 = vadd.f32 %v1182_v60, %v1181_v41 }
 0x149   : > { %v1630_v35 = vsel %vm1598_vm12, %v1622_v30, 0.0  ;;  %v1186_v34 = vsel %vm1030_vm9, %v1176_v52, 0.0  ;;  %v957_v53 = vmul.f32 1.442695, %v942_v11  ;;  %v1566_v32 = vmul.f32 1.442695, %v1551_v36 }
 0x14a   : > { %v1603_v31 = vadd.f32 %v1602_v59, %v1601_v15  ;;  %v1631_v44 = vadd.f32 %v1630_v35, %v1629_v54  ;;  %v5065_v42 = vpop.eup %5064  ;;  %v1185_v29 = vadd.f32 %v1184_v47, %v1183_v38  ;;  %v916_v48 = vadd.f32 %v5557_v61, %v5720_v27 }
 0x14b   : > { %v5901_v14 = vadd.f32 %v5750_v26, %v5727_v23  ;;  %v4346_v62 = vadd.f32 -1.0, %v5065_v42  ;;  %v1157_v63 = vadd.f32 %v1156_v22, %v1155_v21  ;;  %v1634_v49 = vsel %vm1598_vm12, %v1624_v9, 0.0 }
 0x14c   : > { %v1633_v18 = vadd.f32 %v1632_v37, %v1631_v44  ;;  %v1605_v10 = vadd.f32 %v1604_v46, %v1603_v31  ;;  %5070 = vpow2.f32 %v1564_v56  ;;  %vm931_vm6 = vcmp.gt.f32.partialorder %v5832_v12, 0.0 }
 0x14d   : > { %v5067_v57 = vpop.eup %5066  ;;  %v1187_v59 = vadd.f32 %v1186_v34, %v1185_v29  ;;  %v971_v19 = vsel %vm931_vm6, %v5832_v12, %v4346_v62  ;;  %5072 = vpow2.f32 %v957_v53  ;;  %vm1540_vm7 = vcmp.gt.f32.partialorder %v5845_v17, 0.0 }
 0x14e   : > { %v5069_v47 = vpop.eup %5068  ;;  %v4385_v41 = vadd.f32 -1.0, %v5067_v57  ;;  %v1635_v61 = vadd.f32 %v1634_v49, %v1633_v18  ;;  %v1147_v27 = vmul.f32 %v5639_v43, %v971_v19  ;;  %5074 = vpow2.f32 %v1566_v32 }
 0x14f   : > { %v940_v23 = vmin.f32 %v916_v48, 0.0  ;;  %v1549_v37 = vmin.f32 %v5901_v14, 0.0  ;;  %v4348_v60 = vadd.f32 -1.0, %v5069_v47  ;;  %vm933_vm8 = vcmp.gt.f32.partialorder %v5826_v50, 0.0 }
 0x150   : > { %v1580_v26 = vsel %vm1540_vm7, %v5845_v17, %v4385_v41  ;;  %v1158_v56 = vsel %vm1030_vm9, %v1147_v27, 0.0  ;;  %v1177_v16 = vmul.f32 %v1147_v27, %v971_v19  ;;  %vm1542_vm10 = vcmp.gt.f32.partialorder %v5838_v55, 0.0 }
 0x151   : > { %v1594_v54 = vmul.f32 %v1580_v26, %v5639_v43  ;;  %v1159_v28 = vadd.f32 %v1158_v56, %v1157_v63  ;;  %v953_v12 = vmul.f32 1.442695, %v940_v23  ;;  %v1562_v52 = vmul.f32 1.442695, %v1549_v37 }
 0x152   : > { %v1188_v24 = vsel %vm1030_vm9, %v1177_v16, 0.0  ;;  %v973_v21 = vsel %vm933_vm8, %v5826_v50, %v4348_v60  ;;  %vm934_vm11 = vcmp.gt.f32.partialorder %v5869_v51, 0.0  ;;  %vm1543_vm13 = vcmp.gt.f32.partialorder %v5877_v13, 0.0 }
 0x153   : > { %v1606_v45 = vsel %vm1598_vm12, %v1594_v54, 0.0  ;;  %v1625_v11 = vmul.f32 %v1594_v54, %v1580_v26  ;;  %v1189_v20 = vadd.f32 %v1188_v24, %v1187_v59  ;;  %5076 = vpow2.f32 %v953_v12 }
 0x154   : > { %v1607_v33 = vadd.f32 %v1606_v45, %v1605_v10  ;;  %5078 = vpow2.f32 %v1562_v52  ;;  %v1149_v53 = vmul.f32 %v5698_v25, %v973_v21  ;;  %vm932_vm14 = vcmp.gt.f32.partialorder %v916_v48, 0.0 }
 0x155   : > { %v1636_v17 = vsel %vm1598_vm12, %v1625_v11, 0.0  ;;  %vm1541_vm15 = vcmp.gt.f32.partialorder %v5901_v14, 0.0 }
 0x156   : > { %v1637_v30 = vadd.f32 %v1636_v17, %v1635_v61  ;;  %v5071_v36 = vpop.eup %5070  ;;  %v1162_v10 = vsel %vm1030_vm9, %v1149_v53, 0.0 }
 0x157   : > { %v5073_v22 = vpop.eup %5072  ;;  %v4387_v43 = vadd.f32 -1.0, %v5071_v36 }
 0x158   : > { %v5075_v46 = vpop.eup %5074  ;;  %v4349_v15 = vadd.f32 -1.0, %v5073_v22 }
 0x159   : > { %v4388_v9 = vadd.f32 -1.0, %v5075_v46  ;;  %v1582_v35 = vsel %vm1542_vm10, %v5838_v55, %v4387_v43 }
 0x15a   : > { %v974_v31 = vsel %vm934_vm11, %v5869_v51, %v4349_v15  ;;  %v1596_v50 = vmul.f32 %v1582_v35, %v5698_v25 }
 0x15b   : > { %v1583_v42 = vsel %vm1543_vm13, %v5877_v13, %v4388_v9  ;;  %v1150_v55 = vmul.f32 %v5731_v39, %v974_v31  ;;  %v1179_v13 = vmul.f32 %v1149_v53, %v973_v21 }
 0x15c   : > { %v1597_v62 = vmul.f32 %v1583_v42, %v5731_v39  ;;  %v1627_v25 = vmul.f32 %v1596_v50, %v1582_v35  ;;  %v1610_v19 = vsel %vm1598_vm12, %v1596_v50, 0.0 }
 0x15d   : > { %v5077_v38 = vpop.eup %5076  ;;  %v1180_v41 = vmul.f32 %v1150_v55, %v974_v31  ;;  %v1192_v26 = vsel %vm1030_vm9, %v1179_v13, 0.0  ;;  %v1164_v37 = vsel %vm1030_vm9, %v1150_v55, 0.0 }
 0x15e   : > { %v5079_v34 = vpop.eup %5078  ;;  %v4347_v44 = vadd.f32 -1.0, %v5077_v38  ;;  %v1628_v39 = vmul.f32 %v1597_v62, %v1583_v42  ;;  %v1640_v54 = vsel %vm1598_vm12, %v1627_v25, 0.0 }
 0x15f   : > { %v4386_v29 = vadd.f32 -1.0, %v5079_v34  ;;  %v1194_v24 = vsel %vm1030_vm9, %v1180_v41, 0.0 }
 0x160   : > { %v972_v32 = vsel %vm932_vm14, %v916_v48, %v4347_v44 }
 0x161   : > { %v1148_v18 = vmul.f32 %v5652_v58, %v972_v32  ;;  %v1581_v51 = vsel %vm1541_vm15, %v5901_v14, %v4386_v29 }
 0x162   : > { %v1595_v63 = vmul.f32 %v1581_v51, %v5652_v58 }
 0x163   : > { %v1160_v57 = vsel %vm1030_vm9, %v1148_v18, 0.0  ;;  %v1178_v49 = vmul.f32 %v1148_v18, %v972_v32 }
 0x164   : > { %v1161_v48 = vadd.f32 %v1160_v57, %v1159_v28  ;;  %v1608_v59 = vsel %vm1598_vm12, %v1595_v63, 0.0  ;;  %v1626_v47 = vmul.f32 %v1595_v63, %v1581_v51  ;;  %v1612_v28 = vsel %vm1598_vm12, %v1597_v62, 0.0 }
 0x165   : > { %v1190_v14 = vsel %vm1030_vm9, %v1178_v49, 0.0  ;;  %v1609_v61 = vadd.f32 %v1608_v59, %v1607_v33 }
 0x166   : > { %v1163_v27 = vadd.f32 %v1162_v10, %v1161_v48  ;;  %v1191_v58 = vadd.f32 %v1190_v14, %v1189_v20  ;;  %v1638_v23 = vsel %vm1598_vm12, %v1626_v47, 0.0  ;;  %v1642_v20 = vsel %vm1598_vm12, %v1628_v39, 0.0  ;;  %v1589_v10 = vld [vmem:[%s7155_s14] sm:$0x3] }
 0x167   : > { %v1611_v56 = vadd.f32 %v1610_v19, %v1609_v61  ;;  %v1639_v16 = vadd.f32 %v1638_v23, %v1637_v30 }
 0x168   : > { %v1165_v12 = vadd.f32 %v1164_v37, %v1163_v27  ;;  %v1193_v52 = vadd.f32 %v1192_v26, %v1191_v58 }
 0x169   : > { %v1613_v45 = vadd.f32 %v1612_v28, %v1611_v56  ;;  %v1641_v11 = vadd.f32 %v1640_v54, %v1639_v16 }
 0x16a   : > { %v1166_v33 = vrot.slane %v1165_v12, 4  ;;  %v1195_v17 = vadd.f32 %v1194_v24, %v1193_v52 }
 0x16b   : > { %v1614_v36 = vrot.slane %v1613_v45, 4  ;;  %v1643_v22 = vadd.f32 %v1642_v20, %v1641_v11 }
 0x16c   : > { %v1167_v46 = vadd.f32 %v1166_v33, %v1165_v12  ;;  %v1196_v60 = vrot.slane %v1195_v17, 4 }
 0x16d   : > { %v1615_v43 = vadd.f32 %v1614_v36, %v1613_v45  ;;  %v1644_v30 = vrot.slane %v1643_v22, 4 }
 0x16e   : > { %v1168_v15 = vrot.slane %v1167_v46, 2  ;;  %v1197_v9 = vadd.f32 %v1196_v60, %v1195_v17 }
 0x16f   : > { %v1616_v21 = vrot.slane %v1615_v43, 2  ;;  %v1645_v38 = vadd.f32 %v1644_v30, %v1643_v22 }
 0x170   : > { %v1169_v35 = vadd.f32 %v1168_v15, %v1167_v46  ;;  %v1198_v34 = vrot.slane %v1197_v9, 2 }
 0x171   : > { %v1617_v31 = vadd.f32 %v1616_v21, %v1615_v43  ;;  %v1646_v44 = vrot.slane %v1645_v38, 2 }
 0x172   : > { %v1170_v53 = vrot.slane %v1169_v35, 1  ;;  %v1199_v42 = vadd.f32 %v1198_v34, %v1197_v9 }
 0x173   : > { %v1618_v29 = vrot.slane %v1617_v31, 1  ;;  %v1647_v50 = vadd.f32 %v1646_v44, %v1645_v38 }
 0x174   : > { %v1171_v32 = vadd.f32 %v1170_v53, %v1169_v35  ;;  %v1200_v55 = vrot.slane %v1199_v42, 1 }
 0x175   : > { %v1619_v18 = vadd.f32 %v1618_v29, %v1617_v31  ;;  %v1648_v51 = vrot.slane %v1647_v50, 1 }
 0x176   : > { %v1172_v62 = vadd.f32 %v1171_v32, %v5834_v40  ;;  %v1201_v63 = vadd.f32 %v1200_v55, %v1199_v42 }
 0x177   : > { %v1649_v13 = vadd.f32 %v1648_v51, %v1647_v50  ;;  %v1620_v49 = vadd.f32 %v1619_v18, %v1589_v10 }
 0x178   : > { %v1202_v57 = vadd.f32 %v1201_v63, %v5847_v8 }
 0x179   : > { %v1650_v25 = vadd.f32 %v1649_v13, %v1589_v10 }
 0x17a   : > { %v1203_v48 = vsel %vm579_vm0, %v1172_v62, %v1202_v57 }
 0x17b   : > { %1205 = vst.msk [vmem:[%s7153_s12] sm:$0x3] %vm979_vm3, %v1203_v48  ;;  %v1651_v59 = vsel %vm579_vm0, %v1620_v49, %v1650_v25 }
 0x17c   : > { %1653 = vst.msk [vmem:[%s7155_s14] sm:$0x3] %vm1587_vm4, %v1651_v59 }
 0x182   : > { %v1209_v40 = vld [vmem:[%s7153_s12] sm:$0x3] }
 0x183   : > { %v1211_v8 = vmul.f32 0.0052083335, %v1209_v40  ;;  %v1657_v47 = vld [vmem:[%s7155_s14] sm:$0x3] }
 0x184   : > { %v1659_v19 = vmul.f32 0.015625, %v1657_v47 }
 0x185   : > { %v1212_v41 = vmul.f32 %v1211_v8, %v1211_v8 }
 0x186   : > { %v1660_v14 = vmul.f32 %v1659_v19, %v1659_v19 }
 0x187   : > { %v1214_v61 = vrot.slane %v1212_v41, 7 }
 0x188   : > { %v1662_v39 = vrot.slane %v1660_v14, 7 }
 0x189   : > { %v1216_v27 = vsub.f32 %v1211_v8, %v1214_v61 }
 0x18a   : > { %v1664_v58 = vsub.f32 %v1659_v19, %v1662_v39 }
 0x18b   : > { %v1217_v23 = vadd.f32 1e-05, %v1216_v27 }
 0x18c   : > { %v1665_v26 = vadd.f32 1e-05, %v1664_v58 }
 0x18d   : > { %5080 = vrsqrt.f32 %v1217_v23 }
 0x18e   : > { %5082 = vrsqrt.f32 %v1665_v26 }
 0x197   : > { %v5081_v37 = vpop.eup %5080 }
 0x198   : > { %v5083_v56 = vpop.eup %5082  ;;  %v1219_v16 = vsel %vm579_vm0, %v1211_v8, %v5081_v37 }
 0x199   : > { %1220 = vst.msk [vmem:[%s7153_s12] sm:$0x3] %vm979_vm3, %v1219_v16  ;;  %v1667_v54 = vsel %vm579_vm0, %v1659_v19, %v5083_v56 }
 0x19a   : > { %1668 = vst.msk [vmem:[%s7155_s14] sm:$0x3] %vm1587_vm4, %v1667_v54 }
 0x19b PF: > { %p4389_p5 = scmp.ne.s32.totalorder %s5268_s21, 1 }
 0x19c   : > { %v1681_v28 = vld [vmem:[%s7143_s2] sm:$0x7] (!%p4389_p5)  ;;  %vm1707_vm9 = vcmask (!%p4389_p5), 1040384   ;;  %vm1708_vm12 = vcmask (!%p4389_p5), 1041408   ;;  %v5281_v24 = vmov (!%p4389_p5), 65535   ;;  %v1674_v11 = vld [vmem:[%s7142_s1 + $0x8] sm:$0xff] (!%p4389_p5) }
 0x19d   : > { %1672 = sbr.rel (%p4389_p5) target bundleno = 1069 (0x42d), region = 92  ;;  %v1673_v12 = vld [vmem:[%s7142_s1] sm:$0xff] (!%p4389_p5)  ;;  %v1686_v52 = vpack.c.bf16 (!%p4389_p5), %v1681_v28, %v1681_v28  ;;  %v1709_v45 = vsel (!%p4389_p5), %vm1707_vm9, 4294967295, %v5281_v24  ;;  %vm1694_vm0 = vcmask (!%p4389_p5), 23552   ;;  %v4417_v33 = vld [vmem:[%s7142_s1 + $0x48] sm:$0xff] (!%p4389_p5)  ;;  %v1675_v46 = vld [vmem:[%s7142_s1 + $0x10] sm:$0xff] (!%p4389_p5)  ;;  %v1828_v28 = vlaneseq (!%p4389_p5) }
 0x19e   : > { %v4416_v20 = vld [vmem:[%s7142_s1 + $0x40] sm:$0xff] (!%p4389_p5)  ;;  %v5992_v17 = vsel (!%p4389_p5), %vm1708_vm12, %v1709_v45, 0  ;;  %v1682_v36 = vpack.c.bf16 (!%p4389_p5), %v1674_v11, %v1673_v12  ;;  %v1676_v60 = vld [vmem:[%s7142_s1 + $0x18] sm:$0xff] (!%p4389_p5)  ;;  %v4418_v43 = vld [vmem:[%s7142_s1 + $0x50] sm:$0xff] (!%p4389_p5)  ;;  %v5282_v16 = vmov (!%p4389_p5), 0  }
 0x19f   : > { %v5994_v22 = vpack.c.bf16 (!%p4389_p5), %v4417_v33, %v4416_v20  ;;  %v1712_v30 = vand.u32 (!%p4389_p5), %v5992_v17, %v1686_v52  ;;  %v4419_v15 = vld [vmem:[%s7142_s1 + $0x58] sm:$0xff] (!%p4389_p5)  ;;  %v1677_v9 = vld [vmem:[%s7142_s1 + $0x20] sm:$0xff] (!%p4389_p5)  ;;  %v1678_v21 = vld [vmem:[%s7142_s1 + $0x28] sm:$0xff] (!%p4389_p5)  ;;  %v1683_v34 = vpack.c.bf16 (!%p4389_p5), %v1676_v60, %v1675_v46  ;;  %5084 = vset.pattern.permute.xlu0 (!%p4389_p5), %v5282_v16  ;;  %5085 = vset.pattern.permute.xlu1 (!%p4389_p5), %v5282_v16 }
 0x1a0   : > { %4759 = vmatprep.mubr.msk.bf16.mxu1 (!%p4389_p5), %vm1694_vm0, %v1682_v36  ;;  %v4420_v38 = vld [vmem:[%s7142_s1 + $0x60] sm:$0xff] (!%p4389_p5)  ;;  %v4421_v35 = vld [vmem:[%s7142_s1 + $0x68] sm:$0xff] (!%p4389_p5)  ;;  %v2002_v31 = vpack.c.bf16 (!%p4389_p5), %v4419_v15, %v4418_v43  ;;  %v1684_v44 = vpack.c.bf16 (!%p4389_p5), %v1678_v21, %v1677_v9  ;;  %v1679_v50 = vld [vmem:[%s7142_s1 + $0x30] sm:$0xff] (!%p4389_p5)  ;;  %2567 = vperm.xlu0 (!%p4389_p5), %5084, %v5395_v0   ;;  %v6132_v43 = vshrl.u32 (!%p4389_p5), %v1828_v28, 7 }
 0x1a1   : > { %4779 = vmatprep.mubr.msk.bf16.mxu0 (!%p4389_p5), %vm1694_vm0, %v5994_v22  ;;  %4757 = vmatprep.subr.bf16.mxu1 (!%p4389_p5), %v1712_v30  ;;  %v2003_v53 = vpack.c.bf16 (!%p4389_p5), %v4421_v35, %v4420_v38  ;;  %v2812_v42 = vld [vmem:[%s7147_s6] sm:$0x7] (!%p4389_p5)  ;;  %v1680_v32 = vld [vmem:[%s7142_s1 + $0x38] sm:$0xff] (!%p4389_p5)  ;;  %v4422_v55 = vld [vmem:[%s7142_s1 + $0x70] sm:$0xff] (!%p4389_p5) }
 0x1a2   : > { %4777 = vmatprep.subr.bf16.mxu0 (!%p4389_p5), %v1712_v30  ;;  %4758 = vmatpush3.bf16.msra.mxu1 (!%p4389_p5), %v1712_v30  ;;  %v2817_v29 = vpack.c.bf16 (!%p4389_p5), %v2812_v42, %v2812_v42  ;;  %v4423_v18 = vld [vmem:[%s7142_s1 + $0x78] sm:$0xff] (!%p4389_p5)  ;;  %v4448_v62 = vld [vmem:[%s7142_s1 + $0x80] sm:$0xff] (!%p4389_p5)  ;;  %v4449_v63 = vld [vmem:[%s7142_s1 + $0x88] sm:$0xff] (!%p4389_p5)  ;;  %v1685_v10 = vpack.c.bf16 (!%p4389_p5), %v1680_v32, %v1679_v50  ;;  %v1830_v32 = vsub.s32 (!%p4389_p5), 0, %v6132_v43 }
 0x1a3   : > { %4778 = vmatpush3.bf16.msra.mxu0 (!%p4389_p5), %v1712_v30  ;;  %v2004_v13 = vpack.c.bf16 (!%p4389_p5), %v4423_v18, %v4422_v55  ;;  %v2284_v57 = vpack.c.bf16 (!%p4389_p5), %v4449_v63, %v4448_v62  ;;  %v4493_v49 = vld [vmem:[%s7147_s6 + $0x4] sm:$0x7] (!%p4389_p5)  ;;  %v4450_v25 = vld [vmem:[%s7142_s1 + $0x90] sm:$0xff] (!%p4389_p5)  ;;  %v4451_v48 = vld [vmem:[%s7142_s1 + $0x98] sm:$0xff] (!%p4389_p5)  ;;  %2577 = vperm.xlu1 (!%p4389_p5), %5085, %v5405_v2  }
 0x1a4   : > { %4797 = vmatprep.subr.bf16.mxu0 %v1712_v30  ;;  %v2831_v51 = vand.u32 %v2817_v29, %v5992_v17  ;;  %v4452_v59 = vld [vmem:[%s7142_s1 + $0xa0] sm:$0xff]  ;;  %v4453_v40 = vld [vmem:[%s7142_s1 + $0xa8] sm:$0xff]  ;;  %v2926_v8 = vpack.c.bf16 %v4493_v49, %v4493_v49  ;;  %v2285_v47 = vpack.c.bf16 %v4451_v48, %v4450_v25  ;;  %v4454_v14 = vld [vmem:[%s7142_s1 + $0xb0] sm:$0xff]  ;;  %2572 = vperm.xlu0 %5084, %v5400_v1  }
 0x1a5   : > { %4760 = vmatmul.mubr.msk.bf16.vlgmr.msra.gmra.mrb[0].mxu1 %vm1694_vm0, %v1683_v34  ;;  %v2286_v19 = vpack.c.bf16 %v4453_v40, %v4452_v59  ;;  %v4455_v61 = vld [vmem:[%s7142_s1 + $0xb8] sm:$0xff]  ;;  %v4506_v27 = vld [vmem:[%s7147_s6 + $0x8] sm:$0x7]  ;;  %v1852_v26 = vld [vmem:[%s7145_s4] sm:$0xff] }
 0x1a6   : > { %4780 = vmatmul.mubr.msk.bf16.vlgmr.msra.gmra.mrb[0].mxu0 %vm1694_vm0, %v2002_v31  ;;  %4763 = vmatprep.mubr.msk.bf16.mxu1 %vm1694_vm0, %v1684_v44  ;;  %v2940_v41 = vand.u32 %v2926_v8, %v5992_v17  ;;  %v2287_v39 = vpack.c.bf16 %v4455_v61, %v4454_v14  ;;  %v3029_v58 = vpack.c.bf16 %v4506_v27, %v4506_v27  ;;  %v1853_v37 = vld [vmem:[%s7145_s4 + $0x8] sm:$0xff]  ;;  %v6117_v54 = vld [vmem:[%s7144_s3] ss:$0 sm:$0xff] }
 0x1a7   : > { %4798 = vmatpush3.bf16.msra.mxu0 %v1712_v30  ;;  %4783 = vmatprep.mubr.msk.bf16.mxu0 %vm1694_vm0, %v2003_v53  ;;  %v6101_v56 = vpack.c.bf16 %v1853_v37, %v1852_v26  ;;  %v1827_v18 = vld [vmem:[%s7153_s12] sm:$0x3] }
 0x1a8   : > { %4817 = vmatprep.subr.bf16.mxu0 %v2831_v51  ;;  %v3043_v23 = vand.u32 %v3029_v58, %v5992_v17  ;;  %2582 = vperm.xlu1 %5085, %v5410_v3   ;;  %v6175_v26 = vrot.slane %v1827_v18, %v1830_v32 }
 0x1a9   : > { %4767 = vmatprep.subr.bf16.mxu1 %v6101_v56  ;;  %2587 = vperm.xlu0 %5084, %v5415_v4  }
 0x1aa   : > { %4768 = vmatpush3.bf16.msra.mxu1 %v6101_v56 }
 0x1ab   : > { %4787 = vmatprep.subr.bf16.mxu1 %v6101_v56 }
 0x1ac   : > { %2592 = vperm.xlu1 %5085, %v5420_v5  }
 0x1ad   : > { %4764 = vmatmul.mubr.msk.bf16.gmra.mrb[4].mxu1 %vm1694_vm0, %v1685_v10  ;;  %2597 = vperm.xlu0 %5084, %v5425_v6  }
 0x1ae   : > { %4784 = vmatmul.mubr.msk.bf16.gmra.mrb[4].mxu0 %vm1694_vm0, %v2004_v13 }
 0x1af   : > { %4799 = vmatprep.mubr.msk.bf16.mxu0 %vm1694_vm0, %v2284_v57 }
 0x1b0   : > { %2602 = vperm.xlu1 %5085, %v5430_v7  }
 0x1b6   : > { %4800 = vmatmul.mubr.msk.bf16.vlgmr.msra.gmra.mrb[8].mxu0 %vm1694_vm0, %v2285_v47 }
 0x1b7   : > { %4818 = vmatpush3.bf16.msra.mxu0 %v2831_v51  ;;  %4803 = vmatprep.mubr.msk.bf16.mxu0 %vm1694_vm0, %v2286_v19 }
 0x1b8   : > { %4827 = vmatprep.subr.bf16.mxu0 %v2940_v41 }
 0x1be   : > { %4804 = vmatmul.mubr.msk.bf16.gmra.mrb[12].mxu0 %vm1694_vm0, %v2287_v39 }
 0x1bf   : > { %4819 = vmatprep.mubr.msk.bf16.mxu0 %vm1694_vm0, %v1682_v36 }
 0x1c6   : > { %4820 = vmatmul.mubr.msk.bf16.vlgmr.msra.gmra.mrb[16].mxu0 %vm1694_vm0, %v1683_v34 }
 0x1c7   : > { %4828 = vmatpush3.bf16.msra.mxu0 %v2940_v41  ;;  %4823 = vmatprep.mubr.msk.bf16.mxu0 %vm1694_vm0, %v1684_v44 }
 0x1c8   : > { %4837 = vmatprep.subr.bf16.mxu0 %v3043_v23 }
 0x1ce   : > { %4824 = vmatmul.mubr.msk.bf16.gmra.mrb[20].mxu0 %vm1694_vm0, %v1685_v10 }
 0x1cf   : > { %4829 = vmatprep.mubr.msk.bf16.mxu0 %vm1694_vm0, %v5994_v22 }
 0x1d6   : > { %4830 = vmatmul.mubr.msk.bf16.vlgmr.msra.gmra.mrb[16].mxu0 %vm1694_vm0, %v2002_v31 }
 0x1d7   : > { %4838 = vmatpush3.bf16.msra.mxu0 %v3043_v23  ;;  %4833 = vmatprep.mubr.msk.bf16.mxu0 %vm1694_vm0, %v2003_v53 }
 0x1de   : > { %4834 = vmatmul.mubr.msk.bf16.gmra.mrb[20].mxu0 %vm1694_vm0, %v2004_v13  ;;  %v1842_v13 = vsub.s32 1, %v6132_v43 }
 0x1df   : > { %4839 = vmatprep.mubr.msk.bf16.mxu0 %vm1694_vm0, %v2284_v57 }
 0x1e0   : > { %v6179_v37 = vrot.slane %v1827_v18, %v1842_v13 }
 0x1e6   : > { %4840 = vmatmul.mubr.msk.bf16.vlgmr.msra.gmra.mrb[16].mxu0 %vm1694_vm0, %v2285_v47 }
 0x1e7   : > { %4843 = vmatprep.mubr.msk.bf16.mxu0 %vm1694_vm0, %v2286_v19 }
 0x1ee   : > { %4844 = vmatmul.mubr.msk.bf16.gmra.mrb[20].mxu0 %vm1694_vm0, %v2287_v39 }
 0x278   : > { %v4761_v12 = vpop.f32.mrb[0].mxu1 }
 0x279   : > { %v4781_v52 = vpop.f32.mrb[0].mxu0  ;;  %v6120_v45 = vadd.f32 %v4761_v12, %v6117_v54  ;;  %v1748_v20 = vpop.f32.mrb[1].mxu1 }
 0x27a   : > { %v6123_v11 = vadd.f32 %v4781_v52, %v6117_v54  ;;  %v2051_v33 = vpop.f32.mrb[1].mxu0  ;;  %v6126_v17 = vadd.f32 %v6117_v54, %v1748_v20  ;;  %v4762_v22 = vpop.f32.mrb[2].mxu1 }
 0x27b   : > { %v6129_v36 = vadd.f32 %v6117_v54, %v2051_v33  ;;  %v4782_v46 = vpop.f32.mrb[2].mxu0  ;;  %v1789_v60 = vmin.f32 %v6120_v45, 0.0  ;;  %v1751_v15 = vpop.f32.mrb[3].mxu1  ;;  %v6138_v31 = vadd.f32 %v4762_v22, %v6117_v54  ;;  %vm1781_vm3 = vcmp.gt.f32.partialorder %v6120_v45, 0.0 }
 0x27c   : > { %v2092_v30 = vmin.f32 %v6123_v11, 0.0  ;;  %v2054_v9 = vpop.f32.mrb[3].mxu0  ;;  %v1787_v21 = vmin.f32 %v6126_v17, 0.0  ;;  %v6141_v44 = vadd.f32 %v4782_v46, %v6117_v54  ;;  %v6144_v29 = vadd.f32 %v6117_v54, %v1751_v15 }
 0x27d   : > { %v2090_v38 = vmin.f32 %v6129_v36, 0.0  ;;  %v1799_v35 = vmul.f32 1.442695, %v1789_v60  ;;  %v6147_v50 = vadd.f32 %v6117_v54, %v2054_v9  ;;  %v1790_v55 = vmin.f32 %v6138_v31, 0.0 }
 0x27e   : > { %v2102_v34 = vmul.f32 1.442695, %v2092_v30  ;;  %v1795_v53 = vmul.f32 1.442695, %v1787_v21  ;;  %v2093_v51 = vmin.f32 %v6141_v44, 0.0  ;;  %v1788_v62 = vmin.f32 %v6144_v29, 0.0 }
 0x27f   : > { %v2098_v42 = vmul.f32 1.442695, %v2090_v38  ;;  %5086 = vpow2.f32 %v1799_v35  ;;  %v1801_v57 = vmul.f32 1.442695, %v1790_v55  ;;  %v2091_v49 = vmin.f32 %v6147_v50, 0.0 }
 0x280   : > { %5088 = vpow2.f32 %v2102_v34  ;;  %v4765_v63 = vpop.f32.mrb[4].mxu1  ;;  %v2104_v59 = vmul.f32 1.442695, %v2093_v51  ;;  %v1797_v40 = vmul.f32 1.442695, %v1788_v62  ;;  %vm2084_vm4 = vcmp.gt.f32.partialorder %v6123_v11, 0.0 }
 0x281   : > { %v4785_v10 = vpop.f32.mrb[4].mxu0  ;;  %5090 = vpow2.f32 %v1795_v53  ;;  %v1764_v25 = vpop.f32.mrb[5].mxu1  ;;  %v6159_v8 = vadd.f32 %v4765_v63, %v6117_v54  ;;  %v2100_v41 = vmul.f32 1.442695, %v2091_v49  ;;  %vm1779_vm1 = vcmp.gt.f32.partialorder %v6126_v17, 0.0 }
 0x282   : > { %v2067_v48 = vpop.f32.mrb[5].mxu0  ;;  %5092 = vpow2.f32 %v2098_v42  ;;  %v4766_v47 = vpop.f32.mrb[6].mxu1  ;;  %v6162_v14 = vadd.f32 %v4785_v10, %v6117_v54  ;;  %v6165_v61 = vadd.f32 %v6117_v54, %v1764_v25  ;;  %vm2082_vm2 = vcmp.gt.f32.partialorder %v6129_v36, 0.0 }
 0x283   : > { %v4786_v19 = vpop.f32.mrb[6].mxu0  ;;  %5094 = vpow2.f32 %v1801_v57  ;;  %v1767_v39 = vpop.f32.mrb[7].mxu1  ;;  %v1793_v58 = vmin.f32 %v6159_v8, 0.0  ;;  %v6171_v23 = vadd.f32 %v6117_v54, %v2067_v48  ;;  %v6186_v33 = vadd.f32 %v4766_v47, %v6117_v54 }
 0x284   : > { %v6167_v27 = vpop.f32.mrb[7].mxu0  ;;  %5096 = vpow2.f32 %v2104_v59  ;;  %v2096_v16 = vmin.f32 %v6162_v14, 0.0  ;;  %v1791_v12 = vmin.f32 %v6165_v61, 0.0  ;;  %v6189_v22 = vadd.f32 %v4786_v19, %v6117_v54 }
 0x285   : > { %5098 = vpow2.f32 %v1797_v40  ;;  %v1807_v28 = vmul.f32 1.442695, %v1793_v58  ;;  %v2094_v20 = vmin.f32 %v6171_v23, 0.0  ;;  %v1794_v9 = vmin.f32 %v6186_v33, 0.0 }
 0x286   : > { %5100 = vpow2.f32 %v2100_v41  ;;  %v2110_v52 = vmul.f32 1.442695, %v2096_v16  ;;  %v1803_v46 = vmul.f32 1.442695, %v1791_v12  ;;  %v6198_v21 = vadd.f32 %v6117_v54, %v1767_v39 }
 0x287   : > { %5102 = vpow2.f32 %v1807_v28  ;;  %v2106_v15 = vmul.f32 1.442695, %v2094_v20  ;;  %vm1782_vm5 = vcmp.gt.f32.partialorder %v6138_v31, 0.0  ;;  %v2097_v53 = vmin.f32 %v6189_v22, 0.0 }
 0x288   : > { %5104 = vpow2.f32 %v2110_v52  ;;  %vm2085_vm6 = vcmp.gt.f32.partialorder %v6141_v44, 0.0  ;;  %vm1780_vm7 = vcmp.gt.f32.partialorder %v6144_v29, 0.0  ;;  %v1809_v51 = vmul.f32 1.442695, %v1794_v9 }
 0x289   : > { %v6193_v60 = vpop.f32.mrb[8].mxu0  ;;  %v5087_v30 = vpop.eup %5086  ;;  %5106 = vpow2.f32 %v1803_v46  ;;  %vm2083_vm8 = vcmp.gt.f32.partialorder %v6147_v50, 0.0  ;;  %v2112_v57 = vmul.f32 1.442695, %v2097_v53  ;;  %v1792_v59 = vmin.f32 %v6198_v21, 0.0 }
 0x28a   : > { %v6200_v38 = vpop.f32.mrb[9].mxu0  ;;  %v5089_v35 = vpop.eup %5088  ;;  %v4397_v34 = vadd.f32 -1.0, %v5087_v30  ;;  %5108 = vpow2.f32 %v2106_v15  ;;  %vm1785_vm10 = vcmp.gt.f32.partialorder %v6159_v8, 0.0  ;;  %vm2088_vm11 = vcmp.gt.f32.partialorder %v6162_v14, 0.0 }
 0x28b   : > { %v6204_v42 = vpop.f32.mrb[10].mxu0  ;;  %v5091_v55 = vpop.eup %5090  ;;  %v4430_v18 = vadd.f32 -1.0, %v5089_v35  ;;  %5110 = vpow2.f32 %v1809_v51  ;;  %vm1783_vm13 = vcmp.gt.f32.partialorder %v6165_v61, 0.0  ;;  %v6228_v12 = vadd.f32 %v6117_v54, %v6167_v27 }
 0x28c   : > { %v6208_v62 = vpop.f32.mrb[11].mxu0  ;;  %v5093_v63 = vpop.eup %5092  ;;  %v1821_v10 = vsel %vm1781_vm3, %v6120_v45, %v4397_v34  ;;  %v4395_v48 = vadd.f32 -1.0, %v5091_v55  ;;  %5112 = vpow2.f32 %v2112_v57  ;;  %vm2086_vm14 = vcmp.gt.f32.partialorder %v6171_v23, 0.0 }
 0x28d   : > { %v5095_v49 = vpop.eup %5094  ;;  %v2124_v25 = vsel %vm2084_vm4, %v6123_v11, %v4430_v18  ;;  %v1834_v47 = vsub.f32 %v1821_v10, %v6175_v26  ;;  %v4428_v19 = vadd.f32 -1.0, %v5093_v63  ;;  %vm1786_vm15 = vcmp.gt.f32.partialorder %v6186_v33, 0.0 }
 0x28e   : > { %v5097_v40 = vpop.eup %5096  ;;  %v4398_v41 = vadd.f32 -1.0, %v5095_v49  ;;  %v2132_v39 = vsub.f32 %v2124_v25, %v6175_v26  ;;  %v1819_v20 = vsel %vm1779_vm1, %v6126_v17, %v4395_v48  ;;  %v1805_v17 = vmul.f32 1.442695, %v1792_v59 }
 0x28f   : > { %v5099_v45 = vpop.eup %5098  ;;  %v4431_v58 = vadd.f32 -1.0, %v5097_v40  ;;  %v6242_v35 = vmul.f32 %v6179_v37, %v1834_v47  ;;  %v2122_v27 = vsel %vm2082_vm2, %v6129_v36, %v4428_v19  ;;  %v1832_v48 = vsub.f32 %v1819_v20, %v6175_v26 }
 0x290   : > { %v5101_v16 = vpop.eup %5100  ;;  %v1822_v11 = vsel %vm1782_vm5, %v6138_v31, %v4398_v41  ;;  %v4396_v28 = vadd.f32 -1.0, %v5099_v45  ;;  %v6251_v18 = vmul.f32 %v2132_v39, %v6179_v37  ;;  %5114 = vpow2.f32 %v1805_v17 }
 0x291   : > { %v6230_v52 = vpop.f32.mrb[12].mxu0  ;;  %v1835_v46 = vsub.f32 %v1822_v11, %v6175_v26  ;;  %v2125_v30 = vsel %vm2085_vm6, %v6141_v44, %v4431_v58  ;;  %v4429_v31 = vadd.f32 -1.0, %v5101_v16  ;;  %v5103_v9 = vpop.eup %5102  ;;  %v2130_v59 = vsub.f32 %v2122_v27, %v6175_v26 }
 0x292   : > { %v6239_v15 = vpop.f32.mrb[13].mxu0  ;;  %v2133_v34 = vsub.f32 %v2125_v30, %v6175_v26  ;;  %v5105_v55 = vpop.eup %5104  ;;  %v1820_v51 = vsel %vm1780_vm7, %v6144_v29, %v4396_v28  ;;  %v4401_v63 = vadd.f32 -1.0, %v5103_v9  ;;  %vm2089_vm12 = vcmp.gt.f32.partialorder %v6189_v22, 0.0 }
 0x293   : > { %v6248_v53 = vpop.f32.mrb[14].mxu0  ;;  %v6254_v44 = vmul.f32 %v6179_v37, %v1835_v46  ;;  %v5107_v36 = vpop.eup %5106  ;;  %v2123_v49 = vsel %vm2083_vm8, %v6147_v50, %v4429_v31  ;;  %v4434_v25 = vadd.f32 -1.0, %v5105_v55  ;;  %v1833_v41 = vsub.f32 %v1820_v51, %v6175_v26 }
 0x294   : > { %v6259_v10 = vpop.f32.mrb[15].mxu0  ;;  %v6262_v57 = vmul.f32 %v2133_v34, %v6179_v37  ;;  %v1825_v40 = vsel %vm1785_vm10, %v6159_v8, %v4401_v63  ;;  %v5109_v47 = vpop.eup %5108  ;;  %v2131_v45 = vsub.f32 %v2123_v49, %v6175_v26  ;;  %v4399_v58 = vadd.f32 -1.0, %v5107_v36 }
 0x295   : > { %v1855_v29 = vpack.c.bf16 %v6254_v44, %v6242_v35  ;;  %v5111_v50 = vpop.eup %5110  ;;  %v2128_v39 = vsel %vm2088_vm11, %v6162_v14, %v4434_v25  ;;  %v1838_v16 = vsub.f32 %v1825_v40, %v6175_v26  ;;  %vm1784_vm0 = vcmp.gt.f32.partialorder %v6198_v21, 0.0  ;;  %v3191_v35 = vld [vmem:[%s7149_s8] sm:$0xff]  ;;  %v3192_v44 = vld [vmem:[%s7149_s8 + $0x8] sm:$0x1] }
 0x296   : > { %v2147_v19 = vpack.c.bf16 %v6262_v57, %v6251_v18  ;;  %v5113_v8 = vpop.eup %5112  ;;  %v4402_v11 = vadd.f32 -1.0, %v5111_v50  ;;  %v2095_v28 = vmin.f32 %v6228_v12, 0.0  ;;  %v6288_v20 = vmul.f32 %v6179_v37, %v1832_v48 }
 0x297   : > { %v6291_v46 = vmul.f32 %v2130_v59, %v6179_v37  ;;  %v4435_v30 = vadd.f32 -1.0, %v5113_v8  ;;  %v6295_v14 = vadd.f32 %v6193_v60, %v6117_v54  ;;  %v1845_v31 = vmul.f32 %v6179_v37, %v1833_v41 }
 0x298   : > { %v2136_v9 = vsub.f32 %v2128_v39, %v6175_v26  ;;  %v1826_v27 = vsel %vm1786_vm15, %v6186_v33, %v4402_v11  ;;  %v2108_v34 = vmul.f32 1.442695, %v2095_v28  ;;  %v6303_v17 = vmul.f32 %v2131_v45, %v6179_v37 }
 0x299   : > { %v1823_v55 = vsel %vm1783_vm13, %v6165_v61, %v4399_v58  ;;  %v4432_v51 = vadd.f32 -1.0, %v5109_v47  ;;  %v2375_v60 = vmin.f32 %v6295_v14, 0.0  ;;  %v6310_v63 = vmul.f32 %v6179_v37, %v1838_v16 }
 0x29a   : > { %v1839_v36 = vsub.f32 %v1826_v27, %v6175_v26  ;;  %5116 = vpow2.f32 %v2108_v34  ;;  %v6315_v33 = vadd.f32 %v6117_v54, %v6200_v38  ;;  %vm1866_vm3 = vcmask 130048   ;;  %v5115_v59 = vpop.eup %5114 }
 0x29b   : > { %v2129_v49 = vsel %vm2089_vm12, %v6189_v22, %v4435_v30  ;;  %v2385_v25 = vmul.f32 1.442695, %v2375_v60  ;;  %v6322_v61 = vadd.f32 %v6204_v42, %v6117_v54  ;;  %v6326_v48 = vadd.f32 %v6117_v54, %v6208_v62 }
 0x29c   : > { %v6329_v40 = vmul.f32 %v2136_v9, %v6179_v37  ;;  %v1836_v38 = vsub.f32 %v1823_v55, %v6175_v26  ;;  %v2373_v47 = vmin.f32 %v6315_v33, 0.0  ;;  %v6335_v22 = vadd.f32 %v6230_v52, %v6117_v54 }
 0x29d   : > { %v2126_v42 = vsel %vm2086_vm14, %v6171_v23, %v4432_v51  ;;  %v4400_v41 = vadd.f32 -1.0, %v5115_v59  ;;  %5118 = vpow2.f32 %v2385_v25  ;;  %v2376_v62 = vmin.f32 %v6322_v61, 0.0 }
 0x29e   : > { %v6342_v50 = vmul.f32 %v6179_v37, %v1839_v36  ;;  %v2137_v45 = vsub.f32 %v2129_v49, %v6175_v26  ;;  %v2381_v39 = vmul.f32 1.442695, %v2373_v47  ;;  %v2374_v58 = vmin.f32 %v6326_v48, 0.0 }
 0x29f   : > { %v1824_v52 = vsel %vm1784_vm0, %v6198_v21, %v4400_v41  ;;  %v2387_v8 = vmul.f32 1.442695, %v2376_v62  ;;  %v2379_v16 = vmin.f32 %v6335_v22, 0.0  ;;  %v6352_v23 = vadd.f32 %v6117_v54, %v6239_v15 }
 0x2a0   : > { %v1837_v11 = vsub.f32 %v1824_v52, %v6175_v26  ;;  %5120 = vpow2.f32 %v2381_v39  ;;  %v2383_v28 = vmul.f32 1.442695, %v2374_v58  ;;  %v6357_v30 = vadd.f32 %v6248_v53, %v6117_v54 }
 0x2a1   : > { %v1848_v9 = vmul.f32 %v6179_v37, %v1836_v38  ;;  %5122 = vpow2.f32 %v2387_v8  ;;  %v2393_v27 = vmul.f32 1.442695, %v2379_v16  ;;  %v2377_v21 = vmin.f32 %v6352_v23, 0.0 }
 0x2a2   : > { %v6362_v34 = vmul.f32 %v2137_v45, %v6179_v37  ;;  %v1849_v15 = vmul.f32 %v6179_v37, %v1837_v11  ;;  %5124 = vpow2.f32 %v2383_v28  ;;  %v2380_v55 = vmin.f32 %v6357_v30, 0.0 }
 0x2a3   : > { %5126 = vpow2.f32 %v2393_v27  ;;  %v2389_v51 = vmul.f32 1.442695, %v2377_v21  ;;  %v6368_v53 = vadd.f32 %v6117_v54, %v6259_v10  ;;  %v1854_v60 = vpack.c.bf16 %v1845_v31, %v6288_v20 }
 0x2a4   : > { %v5117_v36 = vpop.eup %5116  ;;  %v2395_v49 = vmul.f32 1.442695, %v2380_v55  ;;  %v1856_v25 = vpack.c.bf16 %v1849_v15, %v1848_v9  ;;  %v1857_v59 = vpack.c.bf16 %v6342_v50, %v6310_v63  ;;  %v2146_v38 = vpack.c.bf16 %v6303_v17, %v6291_v46 }
 0x2a5   : > { %v4433_v47 = vadd.f32 -1.0, %v5117_v36  ;;  %5128 = vpow2.f32 %v2389_v51  ;;  %v2378_v41 = vmin.f32 %v6368_v53, 0.0  ;;  %4769 = vmatprep.mubr.msk.bf16.mxu1 %vm1866_vm3, %v1854_v60  ;;  %v2134_v54 = vsub.f32 %v2126_v42, %v6175_v26 }
 0x2a6   : > { %vm2087_vm4 = vcmp.gt.f32.partialorder %v6228_v12, 0.0  ;;  %5130 = vpow2.f32 %v2395_v49  ;;  %4770 = vmatmul.mubr.msk.bf16.vlgmr.msra.gmra.mrb[8].mxu1 %vm1866_vm3, %v1855_v29  ;;  %v2149_v10 = vpack.c.bf16 %v6362_v34, %v6329_v40  ;;  %vm2367_vm1 = vcmp.gt.f32.partialorder %v6295_v14, 0.0 }
 0x2a7   : > { %v5119_v20 = vpop.eup %5118  ;;  %v2127_v46 = vsel %vm2087_vm4, %v6228_v12, %v4433_v47  ;;  %v2391_v31 = vmul.f32 1.442695, %v2378_v41  ;;  %4773 = vmatprep.mubr.msk.bf16.mxu1 %vm1866_vm3, %v1856_v25  ;;  %4788 = vmatpush3.bf16.msra.mxu1 %v6101_v56  ;;  %vm3218_vm2 = vcmask 1043456   ;;  %v2142_v29 = vmul.f32 %v2134_v54, %v6179_v37 }
 0x2a8   : > { %v2135_v17 = vsub.f32 %v2127_v46, %v6175_v26  ;;  %v4462_v63 = vadd.f32 -1.0, %v5119_v20  ;;  %4807 = vmatprep.subr.bf16.mxu1 %v6101_v56  ;;  %v3197_v39 = vpack.c.bf16 %v3192_v44, %v3191_v35  ;;  %vm3219_vm5 = vcmask 1044480   ;;  %v4484_v35 = vld [vmem:[%s7148_s7] ss:$0 sm:$0xff] }
 0x2a9   : > { %5132 = vpow2.f32 %v2391_v31  ;;  %vm2365_vm6 = vcmp.gt.f32.partialorder %v6315_v33, 0.0  ;;  %v3220_v16 = vsel %vm3218_vm2, 4294967295, %v5281_v24  ;;  %vm2368_vm7 = vcmp.gt.f32.partialorder %v6322_v61, 0.0 }
 0x2aa   : > { %v5121_v12 = vpop.eup %5120  ;;  %v2143_v42 = vmul.f32 %v2135_v17, %v6179_v37  ;;  %v2407_v62 = vsel %vm2367_vm1, %v6295_v14, %v4462_v63  ;;  %vm2366_vm8 = vcmp.gt.f32.partialorder %v6326_v48, 0.0  ;;  %vm2371_vm10 = vcmp.gt.f32.partialorder %v6335_v22, 0.0 }
 0x2ab   : > { %v5123_v50 = vpop.eup %5122  ;;  %v4460_v45 = vadd.f32 -1.0, %v5121_v12  ;;  %v2415_v28 = vsub.f32 %v2407_v62, %v6175_v26  ;;  %vm2369_vm11 = vcmp.gt.f32.partialorder %v6352_v23, 0.0  ;;  %vm2372_vm13 = vcmp.gt.f32.partialorder %v6357_v30, 0.0 }
 0x2ac   : > { %v5125_v58 = vpop.eup %5124  ;;  %v4463_v52 = vadd.f32 -1.0, %v5123_v50  ;;  %v2148_v8 = vpack.c.bf16 %v2143_v42, %v2142_v29  ;;  %vm2370_vm14 = vcmp.gt.f32.partialorder %v6368_v53, 0.0  ;;  %vm3205_vm2 = vcmask 72704  }
 0x2ad   : > { %v5127_v11 = vpop.eup %5126  ;;  %v2405_v9 = vsel %vm2365_vm6, %v6315_v33, %v4460_v45  ;;  %v4461_v27 = vadd.f32 -1.0, %v5125_v58  ;;  %v3221_v33 = vsel %vm3219_vm5, %v3220_v16, 0  ;;  %v6418_v25 = vmul.f32 %v2415_v28, %v6179_v37 }
 0x2ae   : > { %v2413_v14 = vsub.f32 %v2405_v9, %v6175_v26  ;;  %v2408_v21 = vsel %vm2368_vm7, %v6322_v61, %v4463_v52  ;;  %v4466_v15 = vadd.f32 -1.0, %v5127_v11  ;;  %4774 = vmatmul.mubr.msk.bf16.gmra.mrb[12].mxu1 %vm1866_vm3, %v1857_v59  ;;  %v3223_v44 = vand.u32 %v3221_v33, %v3197_v39 }
 0x2af   : > { %v5129_v55 = vpop.eup %5128  ;;  %v2416_v24 = vsub.f32 %v2408_v21, %v6175_v26  ;;  %v2406_v51 = vsel %vm2366_vm8, %v6326_v48, %v4461_v27  ;;  %4789 = vmatprep.mubr.msk.bf16.mxu1 %vm1866_vm3, %v2146_v38  ;;  %vm2562_vm8 = vcmask 123904  }
 0x2b0   : > { %v5131_v60 = vpop.eup %5130  ;;  %v2414_v36 = vsub.f32 %v2406_v51, %v6175_v26  ;;  %v2411_v61 = vsel %vm2371_vm10, %v6335_v22, %v4466_v15  ;;  %v4464_v49 = vadd.f32 -1.0, %v5129_v55  ;;  %v2421_v38 = vmul.f32 %v2413_v14, %v6179_v37 }
 0x2b1   : > { %v6421_v59 = vmul.f32 %v2416_v24, %v6179_v37  ;;  %v4467_v48 = vadd.f32 -1.0, %v5131_v60  ;;  %v2419_v41 = vsub.f32 %v2411_v61, %v6175_v26  ;;  %vm3341_vm10 = vcmask 66560  }
 0x2b2   : > { %v2422_v47 = vmul.f32 %v2414_v36, %v6179_v37  ;;  %v2409_v22 = vsel %vm2369_vm11, %v6352_v23, %v4464_v49  ;;  %v3166_v49 = vld [vmem:[%s7155_s14] sm:$0x3] }
 0x2b3   : > { %v5133_v54 = vpop.eup %5132  ;;  %v2430_v20 = vpack.c.bf16 %v6421_v59, %v6418_v25  ;;  %v2412_v46 = vsel %vm2372_vm13, %v6357_v30, %v4467_v48  ;;  %v2417_v12 = vsub.f32 %v2409_v22, %v6175_v26  ;;  %v6438_v23 = vmul.f32 %v2419_v41, %v6179_v37 }
 0x2b4   : > { %v2420_v31 = vsub.f32 %v2412_v46, %v6175_v26  ;;  %v4465_v17 = vadd.f32 -1.0, %v5133_v54  ;;  %v2429_v63 = vpack.c.bf16 %v2422_v47, %v2421_v38  ;;  %v3170_v41 = vrot.slane %v3166_v49, %v1830_v32 }
 0x2b6   : > { %v6441_v29 = vmul.f32 %v2420_v31, %v6179_v37  ;;  %v2410_v30 = vsel %vm2370_vm14, %v6368_v53, %v4465_v17  ;;  %4790 = vmatmul.mubr.msk.bf16.vlgmr.msra.gmra.mrb[16].mxu1 %vm1866_vm3, %v2147_v19  ;;  %v2425_v53 = vmul.f32 %v2417_v12, %v6179_v37 }
 0x2b7   : > { %v2418_v62 = vsub.f32 %v2410_v30, %v6175_v26  ;;  %4793 = vmatprep.mubr.msk.bf16.mxu1 %vm1866_vm3, %v2148_v8  ;;  %4808 = vmatpush3.bf16.msra.mxu1 %v6101_v56 }
 0x2b8   : > { %v2432_v52 = vpack.c.bf16 %v6441_v29, %v6438_v23  ;;  %4847 = vmatprep.subr.bf16.mxu1 %v3223_v44 }
 0x2b9   : > { %v4841_v42 = vpop.f32.mrb[16].mxu0  ;;  %v2426_v18 = vmul.f32 %v2418_v62, %v6179_v37 }
 0x2ba   : > { %v4931_v50 = vadd.f32 %v4841_v42, %v4484_v35  ;;  %v3079_v45 = vpop.f32.mrb[17].mxu0 }
 0x2bb   : > { %v4932_v39 = vadd.f32 %v4484_v35, %v3079_v45  ;;  %v4842_v58 = vpop.f32.mrb[18].mxu0  ;;  %v2431_v8 = vpack.c.bf16 %v2426_v18, %v2425_v53 }
 0x2bc   : > { %v3128_v57 = vmin.f32 %v4931_v50, 0.0  ;;  %v4933_v19 = vadd.f32 %v4842_v58, %v4484_v35  ;;  %v3082_v16 = vpop.f32.mrb[19].mxu0  ;;  %vm3120_vm15 = vcmp.gt.f32.partialorder %v4931_v50, 0.0 }
 0x2bd   : > { %v3126_v26 = vmin.f32 %v4932_v39, 0.0  ;;  %v4934_v11 = vadd.f32 %v4484_v35, %v3082_v16  ;;  %vm3118_vm12 = vcmp.gt.f32.partialorder %v4932_v39, 0.0 }
 0x2be   : > { %v3138_v28 = vmul.f32 1.442695, %v3128_v57  ;;  %v3129_v56 = vmin.f32 %v4933_v19, 0.0  ;;  %4794 = vmatmul.mubr.msk.bf16.gmra.mrb[20].mxu1 %vm1866_vm3, %v2149_v10  ;;  %vm3121_vm0 = vcmp.gt.f32.partialorder %v4933_v19, 0.0 }
 0x2bf   : > { %v3134_v9 = vmul.f32 1.442695, %v3126_v26  ;;  %v3127_v27 = vmin.f32 %v4934_v11, 0.0  ;;  %4809 = vmatprep.mubr.msk.bf16.mxu1 %vm1866_vm3, %v2429_v63  ;;  %vm3119_vm4 = vcmp.gt.f32.partialorder %v4934_v11, 0.0 }
 0x2c0   : > { %5134 = vpow2.f32 %v3138_v28  ;;  %v3140_v14 = vmul.f32 1.442695, %v3129_v56 }
 0x2c1   : > { %5136 = vpow2.f32 %v3134_v9  ;;  %v3136_v21 = vmul.f32 1.442695, %v3127_v27  ;;  %v4845_v37 = vpop.f32.mrb[20].mxu0 }
 0x2c2   : > { %5138 = vpow2.f32 %v3140_v14  ;;  %v4935_v15 = vadd.f32 %v4845_v37, %v4484_v35  ;;  %v3095_v55 = vpop.f32.mrb[21].mxu0 }
 0x2c3   : > { %5140 = vpow2.f32 %v3136_v21  ;;  %v6460_v24 = vadd.f32 %v4484_v35, %v3095_v55  ;;  %v4846_v51 = vpop.f32.mrb[22].mxu0 }
 0x2c4   : > { %v3132_v33 = vmin.f32 %v4935_v15, 0.0  ;;  %v6462_v60 = vadd.f32 %v4846_v51, %v4484_v35  ;;  %v3098_v36 = vpop.f32.mrb[23].mxu0  ;;  %vm3124_vm1 = vcmp.gt.f32.partialorder %v4935_v15, 0.0 }
 0x2c5   : > { %v3130_v40 = vmin.f32 %v6460_v24, 0.0  ;;  %v6465_v34 = vadd.f32 %v4484_v35, %v3098_v36  ;;  %vm3122_vm5 = vcmp.gt.f32.partialorder %v6460_v24, 0.0 }
 0x2c6   : > { %v3146_v10 = vmul.f32 1.442695, %v3132_v33  ;;  %v3133_v61 = vmin.f32 %v6462_v60, 0.0  ;;  %4810 = vmatmul.mubr.msk.bf16.vlgmr.msra.gmra.mrb[24].mxu1 %vm1866_vm3, %v2430_v20  ;;  %v3182_v20 = vrot.slane %v3166_v49, %v1842_v13  ;;  %vm3125_vm6 = vcmp.gt.f32.partialorder %v6462_v60, 0.0 }
 0x2c7   : > { %v3142_v25 = vmul.f32 1.442695, %v3130_v40  ;;  %v3131_v59 = vmin.f32 %v6465_v34, 0.0  ;;  %4813 = vmatprep.mubr.msk.bf16.mxu1 %vm1866_vm3, %v2431_v8  ;;  %4848 = vmatpush3.bf16.msra.mxu1 %v3223_v44  ;;  %vm3123_vm7 = vcmp.gt.f32.partialorder %v6465_v34, 0.0  ;;  %v6499_v40 = vld [vmem:[%s7146_s5] ss:$0 sm:$0xff] }
 0x2c8   : > { %5142 = vpow2.f32 %v3146_v10  ;;  %v3148_v48 = vmul.f32 1.442695, %v3133_v61 }
 0x2c9   : > { %5144 = vpow2.f32 %v3142_v25  ;;  %v3144_v38 = vmul.f32 1.442695, %v3131_v59 }
 0x2ca   : > { %v5135_v47 = vpop.eup %5134  ;;  %5146 = vpow2.f32 %v3148_v48 }
 0x2cb   : > { %v5137_v22 = vpop.eup %5136  ;;  %v4513_v54 = vadd.f32 -1.0, %v5135_v47  ;;  %5148 = vpow2.f32 %v3144_v38 }
 0x2cc   : > { %v5139_v46 = vpop.eup %5138  ;;  %v4511_v31 = vadd.f32 -1.0, %v5137_v22 }
 0x2cd   : > { %v5141_v17 = vpop.eup %5140  ;;  %v3160_v63 = vsel %vm3120_vm15, %v4931_v50, %v4513_v54  ;;  %v4514_v35 = vadd.f32 -1.0, %v5139_v46 }
 0x2ce   : > { %v3173_v12 = vsub.f32 %v3160_v63, %v3170_v41  ;;  %v3158_v30 = vsel %vm3118_vm12, %v4932_v39, %v4511_v31  ;;  %v4512_v42 = vadd.f32 -1.0, %v5141_v17  ;;  %4814 = vmatmul.mubr.msk.bf16.gmra.mrb[28].mxu1 %vm1866_vm3, %v2432_v52 }
 0x2cf   : > { %v3171_v32 = vsub.f32 %v3158_v30, %v3170_v41  ;;  %v3161_v62 = vsel %vm3121_vm0, %v4933_v19, %v4514_v35 }
 0x2d0   : > { %v3174_v44 = vsub.f32 %v3161_v62, %v3170_v41  ;;  %v3159_v45 = vsel %vm3119_vm4, %v4934_v11, %v4512_v42  ;;  %v3185_v43 = vmul.f32 %v3182_v20, %v3173_v12 }
 0x2d1   : > { %v3172_v58 = vsub.f32 %v3159_v45, %v3170_v41  ;;  %v3183_v18 = vmul.f32 %v3182_v20, %v3171_v32 }
 0x2d2   : > { %v5143_v50 = vpop.eup %5142  ;;  %v3186_v13 = vmul.f32 %v3182_v20, %v3174_v44 }
 0x2d3   : > { %v5145_v53 = vpop.eup %5144  ;;  %v3184_v57 = vmul.f32 %v3182_v20, %v3172_v58  ;;  %v4517_v39 = vadd.f32 -1.0, %v5143_v50 }
 0x2d4   : > { %v5147_v16 = vpop.eup %5146  ;;  %v3194_v26 = vpack.c.bf16 %v3186_v13, %v3185_v43  ;;  %v4515_v19 = vadd.f32 -1.0, %v5145_v53  ;;  %v6530_v53 = vpop.permute.xlu0 %2567 }
 0x2d5   : > { %v5149_v8 = vpop.eup %5148  ;;  %v3164_v11 = vsel %vm3124_vm1, %v4935_v15, %v4517_v39  ;;  %v4518_v28 = vadd.f32 -1.0, %v5147_v16  ;;  %v3193_v23 = vpack.c.bf16 %v3184_v57, %v3183_v18 }
 0x2d6   : > { %v3177_v29 = vsub.f32 %v3164_v11, %v3170_v41  ;;  %v3162_v52 = vsel %vm3122_vm5, %v6460_v24, %v4515_v19  ;;  %v4516_v56 = vadd.f32 -1.0, %v5149_v8  ;;  %v6536_v19 = vpop.permute.xlu1 %2577 }
 0x2d7   : > { %v3175_v9 = vsub.f32 %v3162_v52, %v3170_v41  ;;  %v3165_v27 = vsel %vm3125_vm6, %v6462_v60, %v4518_v28  ;;  %4849 = vmatprep.mubr.msk.bf16.mxu1 %vm3205_vm2, %v3193_v23  ;;  %v5283_v60 = vmov 0.0  }
 0x2d8   : > { %v3178_v14 = vsub.f32 %v3165_v27, %v3170_v41  ;;  %v3163_v21 = vsel %vm3123_vm7, %v6465_v34, %v4516_v56  ;;  %4850 = vmatmul.mubr.msk.bf16.vlgmr.msra.gmra.mrb[32].mxu1 %vm3205_vm2, %v3194_v26  ;;  %v3189_v15 = vmul.f32 %v3182_v20, %v3177_v29  ;;  %2563 = vst.msk [vmem:[%s7154_s13] sm:$0x3] %vm2562_vm8, %v5283_v60 }
 0x2d9   : > { %v3176_v37 = vsub.f32 %v3163_v21, %v3170_v41  ;;  %v3187_v51 = vmul.f32 %v3182_v20, %v3175_v9  ;;  %3342 = vst.msk [vmem:[%s7156_s15] sm:$0x3] %vm3341_vm10, %v5283_v60 }
 0x2da   : > { %v3190_v55 = vmul.f32 %v3182_v20, %v3178_v14 }
 0x2db   : > { %v3188_v24 = vmul.f32 %v3182_v20, %v3176_v37 }
 0x2dc   : > { %v3196_v33 = vpack.c.bf16 %v3190_v55, %v3189_v15 }
 0x2dd   : > { %v3195_v36 = vpack.c.bf16 %v3188_v24, %v3187_v51 }
 0x2df   : > { %4853 = vmatprep.mubr.msk.bf16.mxu1 %vm3205_vm2, %v3195_v36 }
 0x2e0   : > { %4854 = vmatmul.mubr.msk.bf16.gmra.mrb[36].mxu1 %vm3205_vm2, %v3196_v33 }
 0x379   : > { %v4771_v34 = vpop.f32.mrb[8].mxu1 }
 0x37a   : > { %v1922_v10 = vadd.f32 %v4771_v34, %v6499_v40  ;;  %v1913_v61 = vpop.f32.mrb[9].mxu1 }
 0x37b   : > { %v1914_v49 = vadd.f32 %v6499_v40, %v1913_v61  ;;  %v4772_v25 = vpop.f32.mrb[10].mxu1 }
 0x37c   : > { %v1954_v59 = vmin.f32 %v1922_v10, 0.0  ;;  %v6504_v48 = vadd.f32 %v4772_v25, %v6499_v40  ;;  %v1916_v38 = vpop.f32.mrb[11].mxu1  ;;  %vm1946_vm11 = vcmp.gt.f32.partialorder %v1922_v10, 0.0 }
 0x37d   : > { %v1952_v47 = vmin.f32 %v1914_v49, 0.0  ;;  %v6507_v41 = vadd.f32 %v6499_v40, %v1916_v38  ;;  %vm1944_vm13 = vcmp.gt.f32.partialorder %v1914_v49, 0.0 }
 0x37e   : > { %v1964_v22 = vmul.f32 1.442695, %v1954_v59  ;;  %v1955_v54 = vmin.f32 %v6504_v48, 0.0  ;;  %vm1947_vm14 = vcmp.gt.f32.partialorder %v6504_v48, 0.0  ;;  %v6558_v59 = vpop.permute.xlu0 %2572 }
 0x37f   : > { %v1960_v46 = vmul.f32 1.442695, %v1952_v47  ;;  %v1953_v31 = vmin.f32 %v6507_v41, 0.0  ;;  %vm1945_vm15 = vcmp.gt.f32.partialorder %v6507_v41, 0.0 }
 0x380   : > { %5150 = vpow2.f32 %v1964_v22  ;;  %v1966_v17 = vmul.f32 1.442695, %v1955_v54 }
 0x381   : > { %5152 = vpow2.f32 %v1960_v46  ;;  %v1962_v63 = vmul.f32 1.442695, %v1953_v31  ;;  %v4775_v20 = vpop.f32.mrb[12].mxu1 }
 0x382   : > { %5154 = vpow2.f32 %v1966_v17  ;;  %v1929_v35 = vpop.f32.mrb[13].mxu1  ;;  %v6512_v12 = vadd.f32 %v4775_v20, %v6499_v40 }
 0x383   : > { %5156 = vpow2.f32 %v1962_v63  ;;  %v6515_v30 = vadd.f32 %v6499_v40, %v1929_v35  ;;  %v4776_v42 = vpop.f32.mrb[14].mxu1 }
 0x384   : > { %v1932_v32 = vpop.f32.mrb[15].mxu1  ;;  %v6526_v45 = vadd.f32 %v4776_v42, %v6499_v40  ;;  %v1958_v58 = vmin.f32 %v6512_v12, 0.0  ;;  %vm1950_vm5 = vcmp.gt.f32.partialorder %v6512_v12, 0.0 }
 0x385   : > { %v1956_v62 = vmin.f32 %v6515_v30, 0.0  ;;  %v6523_v44 = vadd.f32 %v6499_v40, %v1932_v32  ;;  %vm1948_vm12 = vcmp.gt.f32.partialorder %v6515_v30, 0.0 }
 0x386   : > { %v1959_v39 = vmin.f32 %v6526_v45, 0.0  ;;  %v1972_v28 = vmul.f32 1.442695, %v1958_v58  ;;  %vm1951_vm6 = vcmp.gt.f32.partialorder %v6526_v45, 0.0 }
 0x387   : > { %v1968_v50 = vmul.f32 1.442695, %v1956_v62  ;;  %v1957_v43 = vmin.f32 %v6523_v44, 0.0  ;;  %vm1949_vm0 = vcmp.gt.f32.partialorder %v6523_v44, 0.0 }
 0x388   : > { %v1974_v33 = vmul.f32 1.442695, %v1959_v39 }
 0x389   : > { %5158 = vpow2.f32 %v1968_v50  ;;  %v1970_v13 = vmul.f32 1.442695, %v1957_v43  ;;  %v4791_v18 = vpop.f32.mrb[16].mxu1 }
 0x38a   : > { %v5151_v57 = vpop.eup %5150  ;;  %v6534_v16 = vadd.f32 %v4791_v18, %v6499_v40  ;;  %v2196_v26 = vpop.f32.mrb[17].mxu1 }
 0x38b   : > { %v5153_v8 = vpop.eup %5152  ;;  %v4410_v11 = vadd.f32 -1.0, %v5151_v57  ;;  %5160 = vpow2.f32 %v1970_v13  ;;  %v6539_v23 = vadd.f32 %v6499_v40, %v2196_v26  ;;  %v4792_v29 = vpop.f32.mrb[18].mxu1 }
 0x38c   : > { %v5155_v52 = vpop.eup %5154  ;;  %v4408_v56 = vadd.f32 -1.0, %v5153_v8  ;;  %v2237_v9 = vmin.f32 %v6534_v16, 0.0  ;;  %v2199_v27 = vpop.f32.mrb[19].mxu1  ;;  %v6547_v55 = vadd.f32 %v4792_v29, %v6499_v40  ;;  %5162 = vpow2.f32 %v1972_v28 }
 0x38d   : > { %v5157_v14 = vpop.eup %5156  ;;  %v1986_v21 = vsel %vm1946_vm11, %v1922_v10, %v4410_v11  ;;  %v4411_v37 = vadd.f32 -1.0, %v5155_v52  ;;  %v2235_v15 = vmin.f32 %v6539_v23, 0.0  ;;  %vm2229_vm4 = vcmp.gt.f32.partialorder %v6534_v16, 0.0  ;;  %v6581_v11 = vpop.permute.xlu0 %2587 }
 0x38e   : > { %v1984_v51 = vsel %vm1944_vm13, %v1914_v49, %v4408_v56  ;;  %v4409_v24 = vadd.f32 -1.0, %v5157_v14  ;;  %v2247_v36 = vmul.f32 1.442695, %v2237_v9  ;;  %v2607_v61 = vmul.f32 %v6536_v19, %v1986_v21  ;;  %v6560_v49 = vpop.permute.xlu1 %2582 }
 0x38f   : > { %v2605_v60 = vmul.f32 %v6530_v53, %v1984_v51  ;;  %v2243_v34 = vmul.f32 1.442695, %v2235_v15  ;;  %v1987_v10 = vsel %vm1947_vm14, %v6504_v48, %v4411_v37  ;;  %v2238_v47 = vmin.f32 %v6547_v55, 0.0 }
 0x390   : > { %v1985_v25 = vsel %vm1945_vm15, %v6507_v41, %v4409_v24  ;;  %5164 = vpow2.f32 %v2247_v36  ;;  %v6566_v48 = vadd.f32 %v6499_v40, %v2199_v27  ;;  %v2616_v31 = vsel %vm1866_vm3, %v2607_v61, 0.0 }
 0x391   : > { %v2635_v38 = vmul.f32 %v2605_v60, %v1984_v51  ;;  %5166 = vpow2.f32 %v2243_v34  ;;  %v4795_v22 = vpop.f32.mrb[20].mxu1  ;;  %v2606_v41 = vmul.f32 %v6558_v59, %v1985_v25  ;;  %v2637_v17 = vmul.f32 %v2607_v61, %v1986_v21 }
 0x392   : > { %5168 = vpow2.f32 %v1974_v33  ;;  %v2212_v54 = vpop.f32.mrb[21].mxu1  ;;  %v2249_v63 = vmul.f32 1.442695, %v2238_v47  ;;  %v2608_v20 = vmul.f32 %v6560_v49, %v1987_v10  ;;  %v2613_v32 = vsel %vm1866_vm3, %v2605_v60, 0.0  ;;  %v6594_v33 = vpop.permute.xlu1 %2592 }
 0x393   : > { %v5159_v46 = vpop.eup %5158  ;;  %v4796_v35 = vpop.f32.mrb[22].mxu1  ;;  %v2236_v62 = vmin.f32 %v6566_v48, 0.0  ;;  %v2614_v58 = vsel %vm1866_vm3, %v2606_v41, 0.0  ;;  %v2643_v13 = vsel %vm1866_vm3, %v2635_v38, 0.0  ;;  %v2636_v57 = vmul.f32 %v2606_v41, %v1985_v25 }
 0x394   : > { %v4412_v42 = vadd.f32 -1.0, %v5159_v46  ;;  %v6575_v50 = vpop.f32.mrb[23].mxu1  ;;  %5170 = vpow2.f32 %v2249_v63  ;;  %v2615_v18 = vadd.f32 %v2614_v58, %v2613_v32  ;;  %v6584_v28 = vadd.f32 %v4795_v22, %v6499_v40 }
 0x395   : > { %v5161_v43 = vpop.eup %5160  ;;  %v2245_v8 = vmul.f32 1.442695, %v2236_v62  ;;  %v2644_v29 = vsel %vm1866_vm3, %v2636_v57, 0.0  ;;  %v2638_v56 = vmul.f32 %v2608_v20, %v1987_v10  ;;  %v2646_v37 = vsel %vm1866_vm3, %v2637_v17, 0.0 }
 0x396   : > { %v1988_v39 = vsel %vm1948_vm12, %v6515_v30, %v4412_v42  ;;  %v4413_v26 = vadd.f32 -1.0, %v5161_v43  ;;  %v2617_v52 = vadd.f32 %v2616_v31, %v2615_v18  ;;  %v2645_v14 = vadd.f32 %v2644_v29, %v2643_v13  ;;  %v5163_v21 = vpop.eup %5162 }
 0x397   : > { %v2609_v9 = vmul.f32 %v6581_v11, %v1988_v39  ;;  %5172 = vpow2.f32 %v2245_v8  ;;  %v2618_v30 = vsel %vm1866_vm3, %v2608_v20, 0.0  ;;  %v2241_v61 = vmin.f32 %v6584_v28, 0.0 }
 0x398   : > { %v1989_v27 = vsel %vm1949_vm0, %v6523_v44, %v4413_v26  ;;  %v2619_v15 = vadd.f32 %v2618_v30, %v2617_v52  ;;  %v2647_v34 = vadd.f32 %v2646_v37, %v2645_v14  ;;  %v6600_v44 = vadd.f32 %v6499_v40, %v2212_v54 }
 0x399   : > { %v2620_v51 = vsel %vm1866_vm3, %v2609_v9, 0.0  ;;  %v2639_v24 = vmul.f32 %v2609_v9, %v1988_v39  ;;  %v6596_v36 = vpop.f32.mrb[24].mxu1  ;;  %v2610_v10 = vmul.f32 %v6594_v33, %v1989_v27  ;;  %v2648_v22 = vsel %vm1866_vm3, %v2638_v56, 0.0  ;;  %v6632_v56 = vpop.permute.xlu0 %2597 }
 0x39a   : > { %v5165_v60 = vpop.eup %5164  ;;  %v6603_v25 = vpop.f32.mrb[25].mxu1  ;;  %v2621_v41 = vadd.f32 %v2620_v51, %v2619_v15  ;;  %v2649_v20 = vadd.f32 %v2648_v22, %v2647_v34  ;;  %v2255_v42 = vmul.f32 1.442695, %v2241_v61  ;;  %v6610_v54 = vadd.f32 %v4796_v35, %v6499_v40 }
 0x39b   : > { %v5167_v38 = vpop.eup %5166  ;;  %v4442_v47 = vadd.f32 -1.0, %v5165_v60  ;;  %v2650_v46 = vsel %vm1866_vm3, %v2639_v24, 0.0  ;;  %v6607_v31 = vpop.f32.mrb[26].mxu1  ;;  %v4414_v62 = vadd.f32 -1.0, %v5163_v21  ;;  %vm2227_vm1 = vcmp.gt.f32.partialorder %v6539_v23, 0.0 }
 0x39c   : > { %v5169_v17 = vpop.eup %5168  ;;  %v4440_v63 = vadd.f32 -1.0, %v5167_v38  ;;  %v6612_v32 = vpop.f32.mrb[27].mxu1  ;;  %v2239_v43 = vmin.f32 %v6600_v44, 0.0  ;;  %v2651_v18 = vadd.f32 %v2650_v46, %v2649_v20  ;;  %5174 = vpow2.f32 %v2255_v42 }
 0x39d   : > { %v2269_v58 = vsel %vm2229_vm4, %v6534_v16, %v4442_v47  ;;  %v2640_v57 = vmul.f32 %v2610_v10, %v1989_v27  ;;  %vm2230_vm7 = vcmp.gt.f32.partialorder %v6547_v55, 0.0  ;;  %vm2228_vm11 = vcmp.gt.f32.partialorder %v6566_v48, 0.0  ;;  %v6658_v42 = vpop.permute.xlu1 %2602 }
 0x39e   : > { %v2267_v13 = vsel %vm2227_vm1, %v6539_v23, %v4440_v63  ;;  %v5171_v39 = vpop.eup %5170  ;;  %v2667_v35 = vmul.f32 %v6536_v19, %v2269_v58  ;;  %v2251_v26 = vmul.f32 1.442695, %v2239_v43  ;;  %v2242_v8 = vmin.f32 %v6610_v54, 0.0 }
 0x39f   : > { %v4443_v16 = vadd.f32 -1.0, %v5171_v39  ;;  %v2665_v23 = vmul.f32 %v6530_v53, %v2267_v13  ;;  %v2622_v29 = vsel %vm1866_vm3, %v2610_v10, 0.0  ;;  %v6630_v52 = vadd.f32 %v6499_v40, %v6575_v50 }
 0x3a0   : > { %5176 = vpow2.f32 %v2251_v26  ;;  %v2652_v30 = vsel %vm1866_vm3, %v2640_v57, 0.0  ;;  %v2257_v21 = vmul.f32 1.442695, %v2242_v8  ;;  %v1990_v37 = vsel %vm1950_vm5, %v6512_v12, %v4414_v62 }
 0x3a1   : > { %v6634_v9 = vpop.f32.mrb[28].mxu1  ;;  %v5173_v27 = vpop.eup %5172  ;;  %v2270_v14 = vsel %vm2230_vm7, %v6547_v55, %v4443_v16  ;;  %v4415_v51 = vadd.f32 -1.0, %v5169_v17  ;;  %v2676_v50 = vsel %vm1866_vm3, %v2667_v35, 0.0  ;;  %v2697_v24 = vmul.f32 %v2667_v35, %v2269_v58 }
 0x3a2   : > { %v6641_v15 = vpop.f32.mrb[29].mxu1  ;;  %v4441_v60 = vadd.f32 -1.0, %v5173_v27  ;;  %5178 = vpow2.f32 %v2257_v21  ;;  %v2240_v61 = vmin.f32 %v6630_v52, 0.0  ;;  %v2611_v55 = vmul.f32 %v6632_v56, %v1990_v37 }
 0x3a3   : > { %v6644_v34 = vpop.f32.mrb[30].mxu1  ;;  %v2623_v10 = vadd.f32 %v2622_v29, %v2621_v41  ;;  %v2695_v47 = vmul.f32 %v2665_v23, %v2267_v13  ;;  %v2668_v22 = vmul.f32 %v6560_v49, %v2270_v14  ;;  %vm2233_vm13 = vcmp.gt.f32.partialorder %v6584_v28, 0.0 }
 0x3a4   : > { %v6648_v38 = vpop.f32.mrb[31].mxu1  ;;  %v2268_v12 = vsel %vm2228_vm11, %v6566_v48, %v4441_v60  ;;  %vm2231_vm14 = vcmp.gt.f32.partialorder %v6600_v44, 0.0  ;;  %v2653_v46 = vadd.f32 %v2652_v30, %v2651_v18  ;;  %v2253_v63 = vmul.f32 1.442695, %v2240_v61 }
 0x3a5   : > { %v2666_v17 = vmul.f32 %v6558_v59, %v2268_v12  ;;  %v2624_v20 = vsel %vm1866_vm3, %v2611_v55, 0.0  ;;  %v2641_v41 = vmul.f32 %v2611_v55, %v1990_v37  ;;  %v2673_v62 = vsel %vm1866_vm3, %v2665_v23, 0.0 }
 0x3a6   : > { %v2625_v58 = vadd.f32 %v2624_v20, %v2623_v10  ;;  %v1991_v48 = vsel %vm1951_vm6, %v6526_v45, %v4415_v51  ;;  %v6666_v43 = vadd.f32 %v6596_v36, %v6499_v40  ;;  %v5175_v13 = vpop.eup %5174  ;;  %5180 = vpow2.f32 %v2253_v63 }
 0x3a7   : > { %v2674_v18 = vsel %vm1866_vm3, %v2666_v17, 0.0  ;;  %v2696_v57 = vmul.f32 %v2666_v17, %v2268_v12  ;;  %v2654_v39 = vsel %vm1866_vm3, %v2641_v41, 0.0  ;;  %v2703_v35 = vsel %vm1866_vm3, %v2695_v47, 0.0 }
 0x3a8   : > { %v2675_v26 = vadd.f32 %v2674_v18, %v2673_v62  ;;  %v2655_v16 = vadd.f32 %v2654_v39, %v2653_v46  ;;  %v2612_v8 = vmul.f32 %v6658_v42, %v1991_v48  ;;  %v2698_v29 = vmul.f32 %v2668_v22, %v2270_v14 }
 0x3a9   : > { %v2704_v45 = vsel %vm1866_vm3, %v2696_v57, 0.0  ;;  %v4446_v36 = vadd.f32 -1.0, %v5175_v13  ;;  %v2520_v27 = vmin.f32 %v6666_v43, 0.0  ;;  %v2706_v37 = vsel %vm1866_vm3, %v2697_v24, 0.0 }
 0x3aa   : > { %v5177_v21 = vpop.eup %5176  ;;  %v2705_v51 = vadd.f32 %v2704_v45, %v2703_v35  ;;  %v2677_v60 = vadd.f32 %v2676_v50, %v2675_v26  ;;  %v2626_v61 = vsel %vm1866_vm3, %v2612_v8, 0.0  ;;  %v2678_v10 = vsel %vm1866_vm3, %v2668_v22, 0.0 }
 0x3ab   : > { %v6672_v23 = vpop.f32.mrb[32].mxu1  ;;  %v4444_v47 = vadd.f32 -1.0, %v5177_v21  ;;  %v2627_v12 = vadd.f32 %v2626_v61, %v2625_v58  ;;  %v2642_v46 = vmul.f32 %v2612_v8, %v1991_v48  ;;  %v2530_v20 = vmul.f32 1.442695, %v2520_v27 }
 0x3ac   : > { %v6676_v30 = vpop.f32.mrb[33].mxu1  ;;  %v2679_v17 = vadd.f32 %v2678_v10, %v2677_v60  ;;  %v2707_v63 = vadd.f32 %v2706_v37, %v2705_v51  ;;  %v6687_v41 = vadd.f32 %v6499_v40, %v6603_v25  ;;  %v5179_v24 = vpop.eup %5178  ;;  %v2708_v50 = vsel %vm1866_vm3, %v2698_v29, 0.0 }
 0x3ad   : > { %v6680_v55 = vpop.f32.mrb[34].mxu1  ;;  %v2271_v62 = vsel %vm2231_vm14, %v6600_v44, %v4444_v47  ;;  %v2273_v22 = vsel %vm2233_vm13, %v6584_v28, %v4446_v36  ;;  %v2628_v58 = vrot.slane %v2627_v12, 4  ;;  %v4447_v18 = vadd.f32 -1.0, %v5179_v24 }
 0x3ae   : > { %v6683_v14 = vpop.f32.mrb[35].mxu1  ;;  %v2709_v48 = vadd.f32 %v2708_v50, %v2707_v63  ;;  %v2669_v13 = vmul.f32 %v6581_v11, %v2271_v62  ;;  %v2656_v57 = vsel %vm1866_vm3, %v2642_v46, 0.0  ;;  %vm2234_vm15 = vcmp.gt.f32.partialorder %v6610_v54, 0.0 }
 0x3af   : > { %v2629_v25 = vadd.f32 %v2628_v58, %v2627_v12  ;;  %v2657_v39 = vadd.f32 %v2656_v57, %v2655_v16  ;;  %5182 = vpow2.f32 %v2530_v20  ;;  %v2274_v44 = vsel %vm2234_vm15, %v6610_v54, %v4447_v18 }
 0x3b0   : > { %v2680_v35 = vsel %vm1866_vm3, %v2669_v13, 0.0  ;;  %v2699_v26 = vmul.f32 %v2669_v13, %v2271_v62  ;;  %v2518_v8 = vmin.f32 %v6687_v41, 0.0  ;;  %v5181_v45 = vpop.eup %5180  ;;  %v2671_v36 = vmul.f32 %v6632_v56, %v2273_v22 }
 0x3b1   : > { %v2681_v29 = vadd.f32 %v2680_v35, %v2679_v17  ;;  %v2630_v27 = vrot.slane %v2629_v25, 2  ;;  %v2658_v21 = vrot.slane %v2657_v39, 4  ;;  %v4445_v51 = vadd.f32 -1.0, %v5181_v45 }
 0x3b2   : > { %v2710_v16 = vsel %vm1866_vm3, %v2699_v26, 0.0  ;;  %v2526_v60 = vmul.f32 1.442695, %v2518_v8  ;;  %v6710_v61 = vadd.f32 %v6607_v31, %v6499_v40  ;;  %vm2232_vm12 = vcmp.gt.f32.partialorder %v6630_v52, 0.0 }
 0x3b3   : > { %v6702_v28 = vpop.f32.mrb[36].mxu1  ;;  %v2711_v10 = vadd.f32 %v2710_v16, %v2709_v48  ;;  %v2659_v47 = vadd.f32 %v2658_v21, %v2657_v39  ;;  %v2672_v12 = vmul.f32 %v6658_v42, %v2274_v44  ;;  %v2272_v17 = vsel %vm2232_vm12, %v6630_v52, %v4445_v51 }
 0x3b4   : > { %v6705_v37 = vpop.f32.mrb[37].mxu1  ;;  %5184 = vpow2.f32 %v2526_v60  ;;  %v2670_v63 = vmul.f32 %v6594_v33, %v2272_v17  ;;  %v2701_v20 = vmul.f32 %v2671_v36, %v2273_v22  ;;  %v2521_v31 = vmin.f32 %v6710_v61, 0.0 }
 0x3b5   : > { %v6712_v54 = vpop.f32.mrb[38].mxu1  ;;  %v2660_v24 = vrot.slane %v2659_v47, 2  ;;  %v2631_v50 = vadd.f32 %v2630_v27, %v2629_v25  ;;  %vm2512_vm0 = vcmp.gt.f32.partialorder %v6666_v43, 0.0  ;;  %v6724_v62 = vadd.f32 %v6499_v40, %v6612_v32 }
 0x3b6   : > { %v6716_v46 = vpop.f32.mrb[39].mxu1  ;;  %v2682_v58 = vsel %vm1866_vm3, %v2670_v63, 0.0  ;;  %v2700_v48 = vmul.f32 %v2670_v63, %v2272_v17  ;;  %v2702_v13 = vmul.f32 %v2672_v12, %v2274_v44  ;;  %v6729_v52 = vadd.f32 %v6634_v9, %v6499_v40 }
 0x3b7   : > { %v2683_v18 = vadd.f32 %v2682_v58, %v2681_v29  ;;  %v2532_v22 = vmul.f32 1.442695, %v2521_v31  ;;  %v2519_v57 = vmin.f32 %v6724_v62, 0.0  ;;  %v6734_v25 = vadd.f32 %v6499_v40, %v6641_v15 }
 0x3b8   : > { %v2712_v32 = vsel %vm1866_vm3, %v2700_v48, 0.0  ;;  %v2684_v35 = vsel %vm1866_vm3, %v2671_v36, 0.0  ;;  %v2714_v26 = vsel %vm1866_vm3, %v2701_v20, 0.0  ;;  %v2661_v44 = vadd.f32 %v2660_v24, %v2659_v47  ;;  %v6754_v48 = vld [vmem:[%s7150_s9] ss:$0 sm:$0xff] }
 0x3b9   : > { %v5183_v39 = vpop.eup %5182  ;;  %v2713_v8 = vadd.f32 %v2712_v32, %v2711_v10  ;;  %v2685_v45 = vadd.f32 %v2684_v35, %v2683_v18  ;;  %5186 = vpow2.f32 %v2532_v22  ;;  %v2632_v29 = vrot.slane %v2631_v50, 1 }
 0x3ba   : > { %v4474_v9 = vadd.f32 -1.0, %v5183_v39  ;;  %v2686_v27 = vsel %vm1866_vm3, %v2672_v12, 0.0  ;;  %v2528_v21 = vmul.f32 1.442695, %v2519_v57  ;;  %v2524_v16 = vmin.f32 %v6729_v52, 0.0 }
 0x3bb   : > { %v2715_v15 = vadd.f32 %v2714_v26, %v2713_v8  ;;  %v2687_v51 = vadd.f32 %v2686_v27, %v2685_v45  ;;  %v2716_v60 = vsel %vm1866_vm3, %v2702_v13, 0.0  ;;  %v2522_v17 = vmin.f32 %v6734_v25, 0.0 }
 0x3bc   : > { %v2662_v36 = vrot.slane %v2661_v44, 1  ;;  %v2552_v10 = vsel %vm2512_vm0, %v6666_v43, %v4474_v9  ;;  %5188 = vpow2.f32 %v2528_v21  ;;  %v2538_v47 = vmul.f32 1.442695, %v2524_v16  ;;  %v2564_v43 = vld [vmem:[%s7154_s13] sm:$0x3] }
 0x3bd   : > { %v2688_v20 = vrot.slane %v2687_v51, 4  ;;  %v2717_v24 = vadd.f32 %v2716_v60, %v2715_v15  ;;  %v2534_v12 = vmul.f32 1.442695, %v2522_v17  ;;  %v6748_v31 = vadd.f32 %v6644_v34, %v6499_v40 }
 0x3be   : > { %v5185_v63 = vpop.eup %5184  ;;  %v2633_v58 = vadd.f32 %v2632_v29, %v2631_v50  ;;  %vm2510_vm4 = vcmp.gt.f32.partialorder %v6687_v41, 0.0  ;;  %5190 = vpow2.f32 %v2538_v47  ;;  %v2727_v22 = vmul.f32 %v6536_v19, %v2552_v10 }
 0x3bf   : > { %v2689_v13 = vadd.f32 %v2688_v20, %v2687_v51  ;;  %v2718_v18 = vrot.slane %v2717_v24, 4  ;;  %5192 = vpow2.f32 %v2534_v12  ;;  %v4472_v34 = vadd.f32 -1.0, %v5185_v63 }
 0x3c0   : > { %vm2513_vm1 = vcmp.gt.f32.partialorder %v6710_v61, 0.0  ;;  %v2525_v50 = vmin.f32 %v6748_v31, 0.0  ;;  %v6764_v57 = vadd.f32 %v6499_v40, %v6648_v38  ;;  %v2663_v39 = vadd.f32 %v2662_v36, %v2661_v44 }
 0x3c1   : > { %v2690_v32 = vrot.slane %v2689_v13, 2  ;;  %v2719_v35 = vadd.f32 %v2718_v18, %v2717_v24  ;;  %vm2511_vm5 = vcmp.gt.f32.partialorder %v6724_v62, 0.0  ;;  %v6769_v26 = vadd.f32 %v6672_v23, %v6754_v48 }
 0x3c2   : > { %v2634_v8 = vadd.f32 %v2633_v58, %v2564_v43  ;;  %v2540_v45 = vmul.f32 1.442695, %v2525_v50  ;;  %v2523_v9 = vmin.f32 %v6764_v57, 0.0  ;;  %v6774_v29 = vadd.f32 %v6754_v48, %v6676_v30 }
 0x3c3   : > { %v5187_v27 = vpop.eup %5186  ;;  %v2691_v40 = vadd.f32 %v2690_v32, %v2689_v13  ;;  %v2720_v38 = vrot.slane %v2719_v35, 2  ;;  %v2757_v44 = vmul.f32 %v2727_v22, %v2552_v10  ;;  %vm2516_vm6 = vcmp.gt.f32.partialorder %v6729_v52, 0.0 }
 0x3c4   : > { %vm2514_vm7 = vcmp.gt.f32.partialorder %v6734_v25, 0.0  ;;  %v2550_v23 = vsel %vm2510_vm4, %v6687_v41, %v4472_v34  ;;  %v4475_v21 = vadd.f32 -1.0, %v5187_v27  ;;  %5194 = vpow2.f32 %v2540_v45 }
 0x3c5   : > { %v2536_v16 = vmul.f32 1.442695, %v2523_v9  ;;  %v2664_v15 = vadd.f32 %v2663_v39, %v2564_v43  ;;  %v2692_v51 = vrot.slane %v2691_v40, 1  ;;  %v2721_v60 = vadd.f32 %v2720_v38, %v2719_v35 }
 0x3c6   : > { %v3300_v30 = vmin.f32 %v6769_v26, 0.0  ;;  %v5189_v17 = vpop.eup %5188  ;;  %v2736_v36 = vsel %vm1866_vm3, %v2727_v22, 0.0  ;;  %v2553_v10 = vsel %vm2513_vm1, %v6710_v61, %v4475_v21  ;;  %v3298_v47 = vmin.f32 %v6774_v29, 0.0 }
 0x3c7   : > { %5196 = vpow2.f32 %v2536_v16  ;;  %v2693_v63 = vadd.f32 %v2692_v51, %v2691_v40  ;;  %v2722_v41 = vrot.slane %v2721_v60, 1  ;;  %v2725_v20 = vmul.f32 %v6530_v53, %v2550_v23 }
 0x3c8   : > { %v4473_v24 = vadd.f32 -1.0, %v5189_v17  ;;  %v5191_v12 = vpop.eup %5190  ;;  %v2766_v58 = vsel %vm1866_vm3, %v2757_v44, 0.0  ;;  %v3310_v43 = vmul.f32 1.442695, %v3300_v30  ;;  %v3306_v13 = vmul.f32 1.442695, %v3298_v47 }
 0x3c9   : > { %v6791_v18 = vadd.f32 %v6680_v55, %v6754_v48  ;;  %v5193_v22 = vpop.eup %5192  ;;  %v6793_v34 = vadd.f32 %v2693_v63, %v2634_v8  ;;  %v2723_v61 = vadd.f32 %v2722_v41, %v2721_v60  ;;  %v2728_v50 = vmul.f32 %v6560_v49, %v2553_v10 }
 0x3ca   : > { %vm2517_vm11 = vcmp.gt.f32.partialorder %v6748_v31, 0.0  ;;  %v6799_v39 = vadd.f32 %v6754_v48, %v6683_v14  ;;  %v2551_v32 = vsel %vm2511_vm5, %v6724_v62, %v4473_v24  ;;  %v4478_v35 = vadd.f32 -1.0, %v5191_v12 }
 0x3cb   : > { %v4476_v45 = vadd.f32 -1.0, %v5193_v22  ;;  %5198 = vpow2.f32 %v3310_v43  ;;  %v6804_v55 = vadd.f32 %v2723_v61, %v2664_v15  ;;  %v2755_v8 = vmul.f32 %v2725_v20, %v2550_v23 }
 0x3cc   : > { %v2726_v9 = vmul.f32 %v6558_v59, %v2551_v32  ;;  %5200 = vpow2.f32 %v3306_v13  ;;  %v2556_v27 = vsel %vm2516_vm6, %v6729_v52, %v4478_v35  ;;  %vm2515_vm13 = vcmp.gt.f32.partialorder %v6764_v57, 0.0 }
 0x3cd   : > { %v2554_v14 = vsel %vm2514_vm7, %v6734_v25, %v4476_v45  ;;  %v3301_v62 = vmin.f32 %v6791_v18, 0.0  ;;  %v2733_v40 = vsel %vm1866_vm3, %v2725_v20, 0.0  ;;  %v2758_v16 = vmul.f32 %v2728_v50, %v2553_v10 }
 0x3ce   : > { %v2734_v38 = vsel %vm1866_vm3, %v2726_v9, 0.0  ;;  %v2756_v44 = vmul.f32 %v2726_v9, %v2551_v32  ;;  %v2729_v23 = vmul.f32 %v6581_v11, %v2554_v14  ;;  %v5195_v21 = vpop.eup %5194  ;;  %v3299_v52 = vmin.f32 %v6799_v39, 0.0 }
 0x3cf   : > { %v2735_v15 = vadd.f32 %v2734_v38, %v2733_v40  ;;  %v3312_v51 = vmul.f32 1.442695, %v3301_v62  ;;  %v2763_v60 = vsel %vm1866_vm3, %v2755_v8, 0.0  ;;  %v2738_v25 = vsel %vm1866_vm3, %v2728_v50, 0.0 }
 0x3d0   : > { %v2764_v30 = vsel %vm1866_vm3, %v2756_v44, 0.0  ;;  %v2731_v17 = vmul.f32 %v6632_v56, %v2556_v27  ;;  %v2759_v20 = vmul.f32 %v2729_v23, %v2554_v14  ;;  %v4479_v24 = vadd.f32 -1.0, %v5195_v21 }
 0x3d1   : > { %v5197_v47 = vpop.eup %5196  ;;  %v2737_v63 = vadd.f32 %v2736_v36, %v2735_v15  ;;  %v2765_v41 = vadd.f32 %v2764_v30, %v2763_v60  ;;  %v2740_v12 = vsel %vm1866_vm3, %v2729_v23, 0.0  ;;  %5202 = vpow2.f32 %v3312_v51 }
 0x3d2   : > { %v4477_v10 = vadd.f32 -1.0, %v5197_v47  ;;  %v3308_v43 = vmul.f32 1.442695, %v3299_v52  ;;  %v2768_v13 = vsel %vm1866_vm3, %v2758_v16, 0.0  ;;  %v2557_v50 = vsel %vm2517_vm11, %v6748_v31, %v4479_v24 }
 0x3d3   : > { %v2767_v22 = vadd.f32 %v2766_v58, %v2765_v41  ;;  %v2739_v61 = vadd.f32 %v2738_v25, %v2737_v63  ;;  %v2770_v32 = vsel %vm1866_vm3, %v2759_v20, 0.0  ;;  %v6834_v35 = vadd.f32 %v6702_v28, %v6754_v48 }
 0x3d4   : > { %v2555_v36 = vsel %vm2515_vm13, %v6764_v57, %v4477_v10  ;;  %5204 = vpow2.f32 %v3308_v43  ;;  %v2732_v58 = vmul.f32 %v6658_v42, %v2557_v50  ;;  %v2761_v31 = vmul.f32 %v2731_v17, %v2556_v27 }
 0x3d5   : > { %v5199_v45 = vpop.eup %5198  ;;  %v2741_v8 = vadd.f32 %v2740_v12, %v2739_v61  ;;  %v2769_v9 = vadd.f32 %v2768_v13, %v2767_v22  ;;  %v2730_v14 = vmul.f32 %v6594_v33, %v2555_v36  ;;  %v6840_v40 = vadd.f32 %v6754_v48, %v6705_v37 }
 0x3d6   : > { %v5201_v62 = vpop.eup %5200  ;;  %vm3292_vm14 = vcmp.gt.f32.partialorder %v6769_v26, 0.0  ;;  %v4526_v21 = vadd.f32 -1.0, %v5199_v45  ;;  %v3304_v16 = vmin.f32 %v6834_v35, 0.0  ;;  %v2744_v15 = vsel %vm1866_vm3, %v2731_v17, 0.0 }
 0x3d7   : > { %v2771_v38 = vadd.f32 %v2770_v32, %v2769_v9  ;;  %v2742_v57 = vsel %vm1866_vm3, %v2730_v14, 0.0  ;;  %v2760_v44 = vmul.f32 %v2730_v14, %v2555_v36  ;;  %v4524_v23 = vadd.f32 -1.0, %v5201_v62 }
 0x3d8   : > { %v2743_v28 = vadd.f32 %v2742_v57, %v2741_v8  ;;  %v2762_v51 = vmul.f32 %v2732_v58, %v2557_v50  ;;  %vm3290_vm15 = vcmp.gt.f32.partialorder %v6774_v29, 0.0  ;;  %v2774_v37 = vsel %vm1866_vm3, %v2761_v31, 0.0 }
 0x3d9   : > { %v2772_v27 = vsel %vm1866_vm3, %v2760_v44, 0.0  ;;  %v3318_v25 = vmul.f32 1.442695, %v3304_v16  ;;  %v2746_v30 = vsel %vm1866_vm3, %v2732_v58, 0.0  ;;  %v3330_v47 = vsel %vm3290_vm15, %v6774_v29, %v4524_v23 }
 0x3da   : > { %v2745_v52 = vadd.f32 %v2744_v15, %v2743_v28  ;;  %v2773_v60 = vadd.f32 %v2772_v27, %v2771_v38  ;;  %v3302_v63 = vmin.f32 %v6840_v40, 0.0  ;;  %v6854_v41 = vadd.f32 %v6712_v54, %v6754_v48 }
 0x3db   : > { %v5203_v17 = vpop.eup %5202  ;;  %v3332_v12 = vsel %vm3292_vm14, %v6769_v26, %v4526_v21  ;;  %vm3293_vm12 = vcmp.gt.f32.partialorder %v6791_v18, 0.0  ;;  %v2776_v10 = vsel %vm1866_vm3, %v2762_v51, 0.0  ;;  %vm3291_vm0 = vcmp.gt.f32.partialorder %v6799_v39, 0.0 }
 0x3dc   : > { %v2747_v20 = vadd.f32 %v2746_v30, %v2745_v52  ;;  %v2775_v24 = vadd.f32 %v2774_v37, %v2773_v60  ;;  %v4527_v43 = vadd.f32 -1.0, %v5203_v17  ;;  %v3314_v29 = vmul.f32 1.442695, %v3302_v63 }
 0x3dd   : > { %v3344_v54 = vmul.f32 %v3330_v47, %v6530_v53  ;;  %5206 = vpow2.f32 %v3318_v25  ;;  %v3346_v50 = vmul.f32 %v3332_v12, %v6536_v19  ;;  %v3305_v26 = vmin.f32 %v6854_v41, 0.0 }
 0x3de   : > { %v5205_v13 = vpop.eup %5204  ;;  %v2748_v22 = vrot.slane %v2747_v20, 4  ;;  %v2777_v61 = vadd.f32 %v2776_v10, %v2775_v24  ;;  %5208 = vpow2.f32 %v3314_v29  ;;  %v3333_v8 = vsel %vm3293_vm12, %v6791_v18, %v4527_v43 }
 0x3df   : > { %v4525_v32 = vadd.f32 -1.0, %v5205_v13  ;;  %v6870_v9 = vadd.f32 %v6754_v48, %v6716_v46  ;;  %v3320_v53 = vmul.f32 1.442695, %v3305_v26  ;;  %v3374_v19 = vmul.f32 %v3344_v54, %v3330_v47 }
 0x3e0   : > { %v2749_v36 = vadd.f32 %v2748_v22, %v2747_v20  ;;  %v2778_v45 = vrot.slane %v2777_v61, 4  ;;  %v3347_v31 = vmul.f32 %v3333_v8, %v6560_v49  ;;  %v3376_v18 = vmul.f32 %v3346_v50, %v3332_v12 }
 0x3e1   : > { %v3331_v58 = vsel %vm3291_vm0, %v6799_v39, %v4525_v32  ;;  %5210 = vpow2.f32 %v3320_v53  ;;  %v3303_v57 = vmin.f32 %v6870_v9, 0.0  ;;  %v3352_v28 = vsel %vm3205_vm2, %v3344_v54, 0.0 }
 0x3e2   : > { %v2750_v14 = vrot.slane %v2749_v36, 2  ;;  %v2779_v62 = vadd.f32 %v2778_v45, %v2777_v61  ;;  %v3345_v38 = vmul.f32 %v3331_v58, %v6558_v59  ;;  %v3355_v15 = vsel %vm3205_vm2, %v3346_v50, 0.0 }
 0x3e3   : > { %v3316_v39 = vmul.f32 1.442695, %v3303_v57  ;;  %v3382_v49 = vsel %vm3205_vm2, %v3374_v19, 0.0  ;;  %v3377_v59 = vmul.f32 %v3347_v31, %v3333_v8  ;;  %v3385_v63 = vsel %vm3205_vm2, %v3376_v18, 0.0 }
 0x3e4   : > { %v2751_v44 = vadd.f32 %v2750_v14, %v2749_v36  ;;  %v2780_v23 = vrot.slane %v2779_v62, 2  ;;  %v3353_v46 = vsel %vm3205_vm2, %v3345_v38, 0.0  ;;  %v3375_v48 = vmul.f32 %v3345_v38, %v3331_v58 }
 0x3e5   : > { %v3354_v51 = vadd.f32 %v3353_v46, %v3352_v28  ;;  %5212 = vpow2.f32 %v3316_v39  ;;  %v3357_v17 = vsel %vm3205_vm2, %v3347_v31, 0.0  ;;  %v3387_v43 = vsel %vm3205_vm2, %v3377_v59, 0.0 }
 0x3e6   : > { %v2752_v21 = vrot.slane %v2751_v44, 1  ;;  %v2781_v16 = vadd.f32 %v2780_v23, %v2779_v62  ;;  %v3383_v27 = vsel %vm3205_vm2, %v3375_v48, 0.0  ;;  %vm3294_vm3 = vcmp.gt.f32.partialorder %v6840_v40, 0.0 }
 0x3e7   : > { %v5207_v37 = vpop.eup %5206  ;;  %v3356_v25 = vadd.f32 %v3355_v15, %v3354_v51  ;;  %v3384_v30 = vadd.f32 %v3383_v27, %v3382_v49  ;;  %vm3296_vm4 = vcmp.gt.f32.partialorder %v6834_v35, 0.0  ;;  %vm3297_vm1 = vcmp.gt.f32.partialorder %v6854_v41, 0.0 }
 0x3e8   : > { %v2753_v52 = vadd.f32 %v2752_v21, %v2751_v44  ;;  %v2782_v60 = vrot.slane %v2781_v16, 1  ;;  %v5209_v47 = vpop.eup %5208  ;;  %v4530_v22 = vadd.f32 -1.0, %v5207_v37  ;;  %vm3295_vm5 = vcmp.gt.f32.partialorder %v6870_v9, 0.0 }
 0x3e9   : > { %v3386_v12 = vadd.f32 %v3385_v63, %v3384_v30  ;;  %v4528_v10 = vadd.f32 -1.0, %v5209_v47  ;;  %v3358_v29 = vadd.f32 %v3357_v17, %v3356_v25 }
 0x3ea   : > { %v2754_v20 = vadd.f32 %v2753_v52, %v6793_v34  ;;  %v2783_v24 = vadd.f32 %v2782_v60, %v2781_v16  ;;  %v3336_v45 = vsel %vm3296_vm4, %v6834_v35, %v4530_v22 }
 0x3eb   : > { %v3334_v61 = vsel %vm3294_vm3, %v6840_v40, %v4528_v10  ;;  %v3388_v54 = vadd.f32 %v3387_v43, %v3386_v12  ;;  %v5211_v50 = vpop.eup %5210  ;;  %v3350_v62 = vmul.f32 %v3336_v45, %v6632_v56  ;;  %v3343_v10 = vld [vmem:[%s7156_s15] sm:$0x3] }
 0x3ec   : > { %v2784_v13 = vadd.f32 %v2783_v24, %v6804_v55  ;;  %v3348_v32 = vmul.f32 %v3334_v61, %v6581_v11  ;;  %v4531_v34 = vadd.f32 -1.0, %v5211_v50 }
 0x3ed   : > { %v3380_v44 = vmul.f32 %v3350_v62, %v3336_v45  ;;  %v3363_v56 = vsel %vm3205_vm2, %v3350_v62, 0.0 }
 0x3ee   : > { %v2785_v26 = vsel %vm1707_vm9, %v2754_v20, %v2784_v13  ;;  %v3359_v36 = vsel %vm3205_vm2, %v3348_v32, 0.0  ;;  %v3378_v55 = vmul.f32 %v3348_v32, %v3334_v61  ;;  %v3337_v53 = vsel %vm3297_vm1, %v6854_v41, %v4531_v34 }
 0x3ef   : > { %2787 = vst.msk [vmem:[%s7154_s13] sm:$0x3] %vm2562_vm8, %v2785_v26  ;;  %v3360_v40 = vadd.f32 %v3359_v36, %v3358_v29  ;;  %v5213_v8 = vpop.eup %5212  ;;  %v3351_v31 = vmul.f32 %v3337_v53, %v6658_v42 }
 0x3f0   : > { %v3389_v58 = vsel %vm3205_vm2, %v3378_v55, 0.0  ;;  %v4529_v14 = vadd.f32 -1.0, %v5213_v8 }
 0x3f1   : > { %v3390_v11 = vadd.f32 %v3389_v58, %v3388_v54  ;;  %v3381_v46 = vmul.f32 %v3351_v31, %v3337_v53  ;;  %v3365_v21 = vsel %vm3205_vm2, %v3351_v31, 0.0 }
 0x3f2   : > { %v3335_v19 = vsel %vm3295_vm5, %v6870_v9, %v4529_v14 }
 0x3f3   : > { %v3349_v35 = vmul.f32 %v3335_v19, %v6594_v33  ;;  %v3393_v33 = vsel %vm3205_vm2, %v3380_v44, 0.0  ;;  %v3395_v49 = vsel %vm3205_vm2, %v3381_v46, 0.0 }
 0x3f5   : > { %v3361_v23 = vsel %vm3205_vm2, %v3349_v35, 0.0  ;;  %v3379_v41 = vmul.f32 %v3349_v35, %v3335_v19 }
 0x3f6   : > { %v2791_v38 = vld [vmem:[%s7154_s13] sm:$0x3]  ;;  %v3362_v18 = vadd.f32 %v3361_v23, %v3360_v40 }
 0x3f7   : > { %v2793_v57 = vmul.f32 0.0052083335, %v2791_v38  ;;  %v3391_v9 = vsel %vm3205_vm2, %v3379_v41, 0.0 }
 0x3f8   : > { %v3364_v48 = vadd.f32 %v3363_v56, %v3362_v18  ;;  %v3392_v42 = vadd.f32 %v3391_v9, %v3390_v11 }
 0x3f9   : > { %v2794_v28 = vmul.f32 %v2793_v57, %v2793_v57 }
 0x3fa   : > { %v3366_v16 = vadd.f32 %v3365_v21, %v3364_v48  ;;  %v3394_v15 = vadd.f32 %v3393_v33, %v3392_v42 }
 0x3fb   : > { %v2796_v39 = vrot.slane %v2794_v28, 7 }
 0x3fc   : > { %v3367_v59 = vrot.slane %v3366_v16, 4  ;;  %v3396_v27 = vadd.f32 %v3395_v49, %v3394_v15 }
 0x3fd   : > { %v2798_v51 = vsub.f32 %v2793_v57, %v2796_v39 }
 0x3fe   : > { %v3368_v52 = vadd.f32 %v3367_v59, %v3366_v16  ;;  %v3397_v60 = vrot.slane %v3396_v27, 4 }
 0x3ff   : > { %v2799_v37 = vadd.f32 1e-05, %v2798_v51 }
 0x400   : > { %v3369_v25 = vrot.slane %v3368_v52, 2  ;;  %v3398_v30 = vadd.f32 %v3397_v60, %v3396_v27 }
 0x401   : > { %5214 = vrsqrt.f32 %v2799_v37 }
 0x402   : > { %v3370_v47 = vadd.f32 %v3369_v25, %v3368_v52  ;;  %v3399_v63 = vrot.slane %v3398_v30, 2 }
 0x404   : > { %v3371_v17 = vrot.slane %v3370_v47, 1  ;;  %v3400_v20 = vadd.f32 %v3399_v63, %v3398_v30 }
 0x406   : > { %v3372_v24 = vadd.f32 %v3371_v17, %v3370_v47  ;;  %v3401_v12 = vrot.slane %v3400_v20, 1 }
 0x408   : > { %v3402_v43 = vadd.f32 %v3401_v12, %v3400_v20  ;;  %v3373_v22 = vadd.f32 %v3372_v24, %v3343_v10 }
 0x40a   : > { %v3403_v61 = vadd.f32 %v3402_v43, %v3343_v10 }
 0x40b   : > { %v5215_v29 = vpop.eup %5214 }
 0x40c   : > { %v2801_v13 = vsel %vm1707_vm9, %v2793_v57, %v5215_v29  ;;  %v3404_v54 = vsel %vm1707_vm9, %v3373_v22, %v3403_v61 }
 0x40d   : > { %2802 = vst.msk [vmem:[%s7154_s13] sm:$0x3] %vm2562_vm8, %v2801_v13 }
 0x40e   : > { %3406 = vst.msk [vmem:[%s7156_s15] sm:$0x3] %vm3341_vm10, %v3404_v54 }
 0x415   : > { %v3410_v50 = vld [vmem:[%s7156_s15] sm:$0x3] }
 0x416   : > { %v3412_v32 = vmul.f32 0.015625, %v3410_v50 }
 0x418   : > { %v3413_v26 = vmul.f32 %v3412_v32, %v3412_v32 }
 0x41a   : > { %v3415_v34 = vrot.slane %v3413_v26, 7 }
 0x41c   : > { %v3417_v36 = vsub.f32 %v3412_v32, %v3415_v34 }
 0x41e   : > { %v3418_v55 = vadd.f32 1e-05, %v3417_v36 }
 0x420   : > { %5216 = vrsqrt.f32 %v3418_v55 }
 0x42a   : > { %v5217_v45 = vpop.eup %5216 }
 0x42b   : > { %v3420_v40 = vsel %vm1707_vm9, %v3412_v32, %v5217_v45 }
 0x42c   : > { %3421 = vst.msk [vmem:[%s7156_s15] sm:$0x3] %vm3341_vm10, %v3420_v40 }
 0x42d PF: > { %p4532_p6 = scmp.ne.s32.totalorder %s5268_s21, 2 }
 0x42e   : > { %v3435_v8 = vld [vmem:[%s7147_s6] sm:$0x7] (!%p4532_p6)  ;;  %vm3454_vm2 = vcmask (!%p4532_p6), 1040384   ;;  %vm3455_vm8 = vcmask (!%p4532_p6), 1041408   ;;  %v5284_v53 = vmov (!%p4532_p6), 65535   ;;  %v3428_v62 = vld [vmem:[%s7142_s1 + $0x8] sm:$0xff] (!%p4532_p6) }
 0x42f   : > { %3425 = sbr.rel (%p4532_p6) target bundleno = 1873 (0x751), region = 112  ;;  %v3427_v58 = vld [vmem:[%s7142_s1] sm:$0xff] (!%p4532_p6)  ;;  %v3440_v11 = vpack.c.bf16 (!%p4532_p6), %v3435_v8, %v3435_v8  ;;  %v3456_v14 = vsel (!%p4532_p6), %vm3454_vm2, 4294967295, %v5284_v53  ;;  %vm3441_vm9 = vcmask (!%p4532_p6), 23552   ;;  %v3429_v35 = vld [vmem:[%s7142_s1 + $0x10] sm:$0xff] (!%p4532_p6)  ;;  %v3430_v38 = vld [vmem:[%s7142_s1 + $0x18] sm:$0xff] (!%p4532_p6) }
 0x430   : > { %v3457_v19 = vsel (!%p4532_p6), %vm3455_vm8, %v3456_v14, 0  ;;  %v3436_v31 = vpack.c.bf16 (!%p4532_p6), %v3428_v62, %v3427_v58  ;;  %v4546_v57 = vld [vmem:[%s7147_s6 + $0x4] sm:$0x7] (!%p4532_p6)  ;;  %v4539_v18 = vld [vmem:[%s7142_s1 + $0x48] sm:$0xff] (!%p4532_p6)  ;;  %v3437_v46 = vpack.c.bf16 (!%p4532_p6), %v3430_v38, %v3429_v35  ;;  %v3433_v21 = vld [vmem:[%s7142_s1 + $0x30] sm:$0xff] (!%p4532_p6)  ;;  %vm3848_vm10 = vcmask (!%p4532_p6), 1043456  }
 0x431   : > { %v3459_v44 = vand.u32 (!%p4532_p6), %v3457_v19, %v3440_v11  ;;  %v3555_v23 = vpack.c.bf16 (!%p4532_p6), %v4546_v57, %v4546_v57  ;;  %v4538_v41 = vld [vmem:[%s7142_s1 + $0x40] sm:$0xff] (!%p4532_p6)  ;;  %v4559_v28 = vld [vmem:[%s7147_s6 + $0x8] sm:$0x7] (!%p4532_p6)  ;;  %v3434_v16 = vld [vmem:[%s7142_s1 + $0x38] sm:$0xff] (!%p4532_p6)  ;;  %vm3849_vm6 = vcmask (!%p4532_p6), 1044480   ;;  %v3850_v34 = vsel (!%p4532_p6), %vm3848_vm10, 4294967295, %v5284_v53 }
 0x432   : > { %4859 = vmatprep.mubr.msk.bf16.mxu0 (!%p4532_p6), %vm3441_vm9, %v3436_v31  ;;  %v3659_v56 = vpack.c.bf16 (!%p4532_p6), %v4559_v28, %v4559_v28  ;;  %v3551_v48 = vpack.c.bf16 (!%p4532_p6), %v4539_v18, %v4538_v41  ;;  %v3431_v42 = vld [vmem:[%s7142_s1 + $0x20] sm:$0xff] (!%p4532_p6)  ;;  %v3432_v33 = vld [vmem:[%s7142_s1 + $0x28] sm:$0xff] (!%p4532_p6)  ;;  %v3439_v51 = vpack.c.bf16 (!%p4532_p6), %v3434_v16, %v3433_v21  ;;  %v4540_v49 = vld [vmem:[%s7142_s1 + $0x50] sm:$0xff] (!%p4532_p6)  ;;  %v7038_v36 = vsel (!%p4532_p6), %vm3849_vm6, %v3850_v34, 0 }
 0x433   : > { %4857 = vmatprep.subr.bf16.mxu0 (!%p4532_p6), %v3459_v44  ;;  %v3569_v9 = vand.u32 (!%p4532_p6), %v3555_v23, %v3457_v19  ;;  %4955 = vmatprep.subr.bf16.mxu1 (!%p4532_p6), %v3459_v44  ;;  %v3438_v15 = vpack.c.bf16 (!%p4532_p6), %v3432_v33, %v3431_v42  ;;  %v4541_v59 = vld [vmem:[%s7142_s1 + $0x58] sm:$0xff] (!%p4532_p6)  ;;  %v4542_v27 = vld [vmem:[%s7142_s1 + $0x60] sm:$0xff] (!%p4532_p6)  ;;  %v4543_v37 = vld [vmem:[%s7142_s1 + $0x68] sm:$0xff] (!%p4532_p6)  ;;  %v3797_v18 = vlaneseq (!%p4532_p6)  ;;  %vm3835_vm12 = vcmask (!%p4532_p6), 72704  }
 0x434   : > { %4858 = vmatpush3.bf16.msra.mxu0 (!%p4532_p6), %v3459_v44  ;;  %4956 = vmatpush3.bf16.msra.mxu1 (!%p4532_p6), %v3459_v44  ;;  %v3673_v39 = vand.u32 (!%p4532_p6), %v3659_v56, %v3457_v19  ;;  %v3552_v52 = vpack.c.bf16 (!%p4532_p6), %v4541_v59, %v4540_v49  ;;  %v3553_v60 = vpack.c.bf16 (!%p4532_p6), %v4543_v37, %v4542_v27  ;;  %v4544_v25 = vld [vmem:[%s7142_s1 + $0x70] sm:$0xff] (!%p4532_p6)  ;;  %v4545_v30 = vld [vmem:[%s7142_s1 + $0x78] sm:$0xff] (!%p4532_p6)  ;;  %v4551_v47 = vld [vmem:[%s7142_s1 + $0x80] sm:$0xff] (!%p4532_p6) }
 0x435   : > { %4867 = vmatprep.subr.bf16.mxu0 (!%p4532_p6), %v3569_v9  ;;  %4863 = vmatprep.mubr.msk.bf16.mxu1 (!%p4532_p6), %vm3441_vm9, %v3438_v15  ;;  %v4552_v63 = vld [vmem:[%s7142_s1 + $0x88] sm:$0xff] (!%p4532_p6)  ;;  %v3554_v17 = vpack.c.bf16 (!%p4532_p6), %v4545_v30, %v4544_v25  ;;  %v4553_v24 = vld [vmem:[%s7142_s1 + $0x90] sm:$0xff] (!%p4532_p6)  ;;  %v4554_v12 = vld [vmem:[%s7142_s1 + $0x98] sm:$0xff] (!%p4532_p6)  ;;  %v7044_v21 = vshrl.u32 (!%p4532_p6), %v3797_v18, 7 }
 0x436   : > { %v3655_v20 = vpack.c.bf16 %v4552_v63, %v4551_v47  ;;  %v4555_v10 = vld [vmem:[%s7142_s1 + $0xa0] sm:$0xff]  ;;  %v4556_v43 = vld [vmem:[%s7142_s1 + $0xa8] sm:$0xff]  ;;  %v3656_v29 = vpack.c.bf16 %v4554_v12, %v4553_v24  ;;  %v4557_v22 = vld [vmem:[%s7142_s1 + $0xb0] sm:$0xff] }
 0x437   : > { %4860 = vmatmul.mubr.msk.bf16.vlgmr.msra.gmra.mrb[0].mxu0 %vm3441_vm9, %v3437_v46  ;;  %4864 = vmatmul.mubr.msk.bf16.vlgmr.msra.gmra.mrb[0].mxu1 %vm3441_vm9, %v3439_v51  ;;  %v3657_v13 = vpack.c.bf16 %v4556_v43, %v4555_v10  ;;  %v4558_v61 = vld [vmem:[%s7142_s1 + $0xb8] sm:$0xff]  ;;  %v3821_v50 = vld [vmem:[%s7149_s8] sm:$0xff]  ;;  %v3822_v32 = vld [vmem:[%s7149_s8 + $0x8] sm:$0x1]  ;;  %v3799_v47 = vsub.s32 0, %v7044_v21  ;;  %v3811_v43 = vsub.s32 1, %v7044_v21 }
 0x438   : > { %4868 = vmatpush3.bf16.msra.mxu0 %v3569_v9  ;;  %4869 = vmatprep.mubr.msk.bf16.mxu0 %vm3441_vm9, %v3551_v48  ;;  %v3658_v54 = vpack.c.bf16 %v4558_v61, %v4557_v22  ;;  %v3827_v26 = vpack.c.bf16 %v3822_v32, %v3821_v50  ;;  %v4537_v11 = vld [vmem:[%s7148_s7] ss:$0 sm:$0xff] }
 0x439   : > { %4877 = vmatprep.subr.bf16.mxu0 %v3673_v39 }
 0x43a   : > { %v3853_v55 = vand.u32 %v7038_v36, %v3827_v26 }
 0x43c   : > { %4887 = vmatprep.subr.bf16.mxu1 %v3853_v55 }
 0x43d   : > { %4888 = vmatpush3.bf16.msra.mxu1 %v3853_v55 }
 0x443   : > { %4870 = vmatmul.mubr.msk.bf16.vlgmr.msra.gmra.mrb[0].mxu0 %vm3441_vm9, %v3552_v52 }
 0x444   : > { %4878 = vmatpush3.bf16.msra.mxu0 %v3673_v39  ;;  %4873 = vmatprep.mubr.msk.bf16.mxu0 %vm3441_vm9, %v3553_v60 }
 0x44b   : > { %4874 = vmatmul.mubr.msk.bf16.gmra.mrb[4].mxu0 %vm3441_vm9, %v3554_v17 }
 0x44c   : > { %4879 = vmatprep.mubr.msk.bf16.mxu0 %vm3441_vm9, %v3655_v20  ;;  %v3796_v20 = vld [vmem:[%s7155_s14] sm:$0x3] }
 0x44d   : > { %v3800_v22 = vrot.slane %v3796_v20, %v3799_v47  ;;  %v3812_v55 = vrot.slane %v3796_v20, %v3811_v43 }
 0x453   : > { %4880 = vmatmul.mubr.msk.bf16.vlgmr.msra.gmra.mrb[0].mxu0 %vm3441_vm9, %v3656_v29 }
 0x454   : > { %4883 = vmatprep.mubr.msk.bf16.mxu0 %vm3441_vm9, %v3657_v13 }
 0x45b   : > { %4884 = vmatmul.mubr.msk.bf16.gmra.mrb[4].mxu0 %vm3441_vm9, %v3658_v54 }
 0x50a   : > { %v4865_v45 = vpop.f32.mrb[0].mxu1 }
 0x50b   : > { %v3511_v40 = vpop.f32.mrb[1].mxu1  ;;  %v3538_v56 = vadd.f32 %v4865_v45, %v4537_v11 }
 0x50c   : > { %v4866_v8 = vpop.f32.mrb[2].mxu1  ;;  %v3536_v48 = vadd.f32 %v4537_v11, %v3511_v40 }
 0x50d   : > { %v3514_v58 = vpop.f32.mrb[3].mxu1  ;;  %v3539_v16 = vadd.f32 %v4866_v8, %v4537_v11 }
 0x50e   : > { %v3537_v49 = vadd.f32 %v4537_v11, %v3514_v58 }
 0x526   : > { %v4881_v14 = vpop.f32.mrb[0].mxu0 }
 0x527   : > { %v4957_v62 = vadd.f32 %v4881_v14, %v4537_v11  ;;  %v3709_v19 = vpop.f32.mrb[1].mxu0 }
 0x528   : > { %v4958_v31 = vadd.f32 %v4537_v11, %v3709_v19  ;;  %v4882_v35 = vpop.f32.mrb[2].mxu0 }
 0x529   : > { %v3758_v53 = vmin.f32 %v4957_v62, 0.0  ;;  %v4959_v38 = vadd.f32 %v4882_v35, %v4537_v11  ;;  %v3712_v57 = vpop.f32.mrb[3].mxu0  ;;  %vm3750_vm7 = vcmp.gt.f32.partialorder %v4957_v62, 0.0 }
 0x52a   : > { %v3756_v44 = vmin.f32 %v4958_v31, 0.0  ;;  %v4960_v23 = vadd.f32 %v4537_v11, %v3712_v57  ;;  %vm3748_vm11 = vcmp.gt.f32.partialorder %v4958_v31, 0.0 }
 0x52b   : > { %v3768_v41 = vmul.f32 1.442695, %v3758_v53  ;;  %v3759_v28 = vmin.f32 %v4959_v38, 0.0  ;;  %vm3751_vm13 = vcmp.gt.f32.partialorder %v4959_v38, 0.0 }
 0x52c   : > { %v3764_v46 = vmul.f32 1.442695, %v3756_v44  ;;  %v3757_v9 = vmin.f32 %v4960_v23, 0.0  ;;  %vm3749_vm14 = vcmp.gt.f32.partialorder %v4960_v23, 0.0 }
 0x52d   : > { %5220 = vpow2.f32 %v3768_v41  ;;  %v3770_v42 = vmul.f32 1.442695, %v3759_v28 }
 0x52e   : > { %5222 = vpow2.f32 %v3764_v46  ;;  %v3766_v39 = vmul.f32 1.442695, %v3757_v9  ;;  %v4885_v33 = vpop.f32.mrb[4].mxu0 }
 0x52f   : > { %5224 = vpow2.f32 %v3770_v42  ;;  %v4962_v15 = vadd.f32 %v4885_v33, %v3538_v56  ;;  %v3725_v51 = vpop.f32.mrb[5].mxu0 }
 0x530   : > { %5226 = vpow2.f32 %v3766_v39  ;;  %v4964_v59 = vadd.f32 %v3725_v51, %v3536_v48  ;;  %v4886_v27 = vpop.f32.mrb[6].mxu0 }
 0x531   : > { %v3762_v37 = vmin.f32 %v4962_v15, 0.0  ;;  %v4966_v52 = vadd.f32 %v4886_v27, %v3539_v16  ;;  %v3728_v60 = vpop.f32.mrb[7].mxu0  ;;  %vm3754_vm15 = vcmp.gt.f32.partialorder %v4962_v15, 0.0 }
 0x532   : > { %v3760_v25 = vmin.f32 %v4964_v59, 0.0  ;;  %v7046_v30 = vadd.f32 %v3728_v60, %v3537_v49  ;;  %vm3752_vm0 = vcmp.gt.f32.partialorder %v4964_v59, 0.0 }
 0x533   : > { %v3776_v63 = vmul.f32 1.442695, %v3762_v37  ;;  %v3763_v17 = vmin.f32 %v4966_v52, 0.0  ;;  %vm3755_vm3 = vcmp.gt.f32.partialorder %v4966_v52, 0.0 }
 0x534   : > { %v3772_v24 = vmul.f32 1.442695, %v3760_v25  ;;  %v3761_v12 = vmin.f32 %v7046_v30, 0.0  ;;  %vm3753_vm4 = vcmp.gt.f32.partialorder %v7046_v30, 0.0 }
 0x535   : > { %5228 = vpow2.f32 %v3776_v63  ;;  %v3778_v10 = vmul.f32 1.442695, %v3763_v17 }
 0x536   : > { %5230 = vpow2.f32 %v3772_v24  ;;  %v3774_v29 = vmul.f32 1.442695, %v3761_v12 }
 0x537   : > { %v5221_v13 = vpop.eup %5220  ;;  %5232 = vpow2.f32 %v3778_v10  ;;  %v5285_v10 = vmov 0  }
 0x538   : > { %v5223_v61 = vpop.eup %5222  ;;  %v4566_v54 = vadd.f32 -1.0, %v5221_v13  ;;  %5234 = vpow2.f32 %v3774_v29  ;;  %5218 = vset.pattern.permute.xlu0 %v5285_v10  ;;  %5219 = vset.pattern.permute.xlu1 %v5285_v10 }
 0x539   : > { %v5225_v50 = vpop.eup %5224  ;;  %v4564_v32 = vadd.f32 -1.0, %v5223_v61  ;;  %4096 = vperm.xlu0 %5218, %v5395_v0   ;;  %4106 = vperm.xlu1 %5219, %v5405_v2  }
 0x53a   : > { %v5227_v26 = vpop.eup %5226  ;;  %v3790_v34 = vsel %vm3750_vm7, %v4957_v62, %v4566_v54  ;;  %v4567_v45 = vadd.f32 -1.0, %v5225_v50 }
 0x53b   : > { %v3803_v40 = vsub.f32 %v3790_v34, %v3800_v22  ;;  %v3788_v8 = vsel %vm3748_vm11, %v4958_v31, %v4564_v32  ;;  %v4565_v58 = vadd.f32 -1.0, %v5227_v26 }
 0x53c   : > { %v3801_v11 = vsub.f32 %v3788_v8, %v3800_v22  ;;  %v3791_v14 = vsel %vm3751_vm13, %v4959_v38, %v4567_v45  ;;  %vm4091_vm13 = vcmask 66560  }
 0x53d   : > { %v3804_v19 = vsub.f32 %v3791_v14, %v3800_v22  ;;  %v3789_v35 = vsel %vm3749_vm14, %v4960_v23, %v4565_v58  ;;  %v3815_v44 = vmul.f32 %v3812_v55, %v3803_v40  ;;  %4101 = vperm.xlu0 %5218, %v5400_v1   ;;  %4111 = vperm.xlu1 %5219, %v5410_v3  }
 0x53e   : > { %v3802_v53 = vsub.f32 %v3789_v35, %v3800_v22  ;;  %v3813_v62 = vmul.f32 %v3812_v55, %v3801_v11 }
 0x53f   : > { %v5229_v57 = vpop.eup %5228  ;;  %v3816_v41 = vmul.f32 %v3812_v55, %v3804_v19 }
 0x540   : > { %v5231_v18 = vpop.eup %5230  ;;  %v3814_v28 = vmul.f32 %v3812_v55, %v3802_v53  ;;  %v4570_v56 = vadd.f32 -1.0, %v5229_v57 }
 0x541   : > { %v5233_v46 = vpop.eup %5232  ;;  %v3824_v9 = vpack.c.bf16 %v3816_v41, %v3815_v44  ;;  %v4568_v48 = vadd.f32 -1.0, %v5231_v18  ;;  %4116 = vperm.xlu0 %5218, %v5415_v4   ;;  %4121 = vperm.xlu1 %5219, %v5420_v5   ;;  %v3968_v44 = vld [vmem:[%s7156_s15] sm:$0x3] }
 0x542   : > { %v5235_v31 = vpop.eup %5234  ;;  %v3794_v42 = vsel %vm3754_vm15, %v4962_v15, %v4570_v56  ;;  %v4571_v38 = vadd.f32 -1.0, %v5233_v46  ;;  %v3823_v39 = vpack.c.bf16 %v3814_v28, %v3813_v62  ;;  %v3972_v46 = vrot.slane %v3968_v44, %v3799_v47 }
 0x543   : > { %v3807_v33 = vsub.f32 %v3794_v42, %v3800_v22  ;;  %v3792_v23 = vsel %vm3752_vm0, %v4964_v59, %v4568_v48  ;;  %v4569_v16 = vadd.f32 -1.0, %v5235_v31 }
 0x544   : > { %v3805_v51 = vsub.f32 %v3792_v23, %v3800_v22  ;;  %v3795_v49 = vsel %vm3755_vm3, %v4966_v52, %v4571_v38  ;;  %4889 = vmatprep.mubr.msk.bf16.mxu1 %vm3835_vm12, %v3823_v39  ;;  %v3993_v52 = vld [vmem:[%s7151_s10] sm:$0xff] }
 0x545   : > { %v3808_v27 = vsub.f32 %v3795_v49, %v3800_v22  ;;  %v3793_v37 = vsel %vm3753_vm4, %v7046_v30, %v4569_v16  ;;  %4890 = vmatmul.mubr.msk.bf16.vlgmr.msra.gmra.mrb[4].mxu1 %vm3835_vm12, %v3824_v9  ;;  %v3819_v15 = vmul.f32 %v3812_v55, %v3807_v33  ;;  %v3994_v30 = vld [vmem:[%s7151_s10 + $0x8] sm:$0x1]  ;;  %4126 = vperm.xlu0 %5218, %v5425_v6  }
 0x546   : > { %v3806_v60 = vsub.f32 %v3793_v37, %v3800_v22  ;;  %v3817_v63 = vmul.f32 %v3812_v55, %v3805_v51  ;;  %v3999_v24 = vpack.c.bf16 %v3994_v30, %v3993_v52  ;;  %4131 = vperm.xlu1 %5219, %v5430_v7   ;;  %v3984_v33 = vrot.slane %v3968_v44, %v3811_v43 }
 0x547   : > { %v3820_v25 = vmul.f32 %v3812_v55, %v3808_v27 }
 0x548   : > { %v3818_v17 = vmul.f32 %v3812_v55, %v3806_v60  ;;  %v4020_v12 = vand.u32 %v3999_v24, %v7038_v36  ;;  %v4572_v36 = vld [vmem:[%s7150_s9] ss:$0 sm:$0xff] }
 0x549   : > { %v3826_v20 = vpack.c.bf16 %v3820_v25, %v3819_v15 }
 0x54a   : > { %v3825_v59 = vpack.c.bf16 %v3818_v17, %v3817_v63  ;;  %4897 = vmatprep.subr.bf16.mxu1 %v4020_v12 }
 0x54b   : > { %4898 = vmatpush3.bf16.msra.mxu1 %v4020_v12 }
 0x54c   : > { %4893 = vmatprep.mubr.msk.bf16.mxu1 %vm3835_vm12, %v3825_v59 }
 0x54d   : > { %4894 = vmatmul.mubr.msk.bf16.gmra.mrb[8].mxu1 %vm3835_vm12, %v3826_v20 }
 0x618   : > { %v4891_v29 = vpop.f32.mrb[4].mxu1 }
 0x619   : > { %v3898_v0 = vadd.f32 %v4891_v29, %v4572_v36  ;;  %v3889_v13 = vpop.f32.mrb[5].mxu1 }
 0x61a   : > { %v3890_v2 = vadd.f32 %v4572_v36, %v3889_v13  ;;  %v4892_v22 = vpop.f32.mrb[6].mxu1 }
 0x61b   : > { %v3930_v1 = vmin.f32 %v3898_v0, 0.0  ;;  %v3901_v61 = vadd.f32 %v4892_v22, %v4572_v36  ;;  %v3892_v3 = vpop.f32.mrb[7].mxu1  ;;  %vm3922_vm1 = vcmp.gt.f32.partialorder %v3898_v0, 0.0 }
 0x61c   : > { %v3928_v54 = vmin.f32 %v3890_v2, 0.0  ;;  %v3893_v4 = vadd.f32 %v4572_v36, %v3892_v3  ;;  %vm3920_vm5 = vcmp.gt.f32.partialorder %v3890_v2, 0.0 }
 0x61d   : > { %v3940_v50 = vmul.f32 1.442695, %v3930_v1  ;;  %v3931_v5 = vmin.f32 %v3901_v61, 0.0  ;;  %vm3923_vm8 = vcmp.gt.f32.partialorder %v3901_v61, 0.0 }
 0x61e   : > { %v3936_v32 = vmul.f32 1.442695, %v3928_v54  ;;  %v3929_v6 = vmin.f32 %v3893_v4, 0.0  ;;  %vm3921_vm9 = vcmp.gt.f32.partialorder %v3893_v4, 0.0 }
 0x61f   : > { %5236 = vpow2.f32 %v3940_v50  ;;  %v3942_v7 = vmul.f32 1.442695, %v3931_v5 }
 0x620   : > { %5238 = vpow2.f32 %v3936_v32  ;;  %v3938_v26 = vmul.f32 1.442695, %v3929_v6  ;;  %v4895_v34 = vpop.f32.mrb[8].mxu1 }
 0x621   : > { %5240 = vpow2.f32 %v3942_v7  ;;  %v3914_v55 = vadd.f32 %v4895_v34, %v4572_v36  ;;  %v3905_v45 = vpop.f32.mrb[9].mxu1  ;;  %v4097_v34 = vpop.permute.xlu0 %4096 }
 0x622   : > { %5242 = vpow2.f32 %v3938_v26  ;;  %v3906_v40 = vadd.f32 %v4572_v36, %v3905_v45  ;;  %v4896_v8 = vpop.f32.mrb[10].mxu1  ;;  %v5286_v26 = vmov 0.0   ;;  %v4585_v45 = vld [vmem:[%s7152_s11] ss:$0 sm:$0xff] }
 0x623   : > { %v3934_v58 = vmin.f32 %v3914_v55, 0.0  ;;  %v3917_v11 = vadd.f32 %v4896_v8, %v4572_v36  ;;  %v3908_v14 = vpop.f32.mrb[11].mxu1  ;;  %vm3926_vm10 = vcmp.gt.f32.partialorder %v3914_v55, 0.0  ;;  %4092 = vst.msk [vmem:[%s7157_s16] sm:$0x3] %vm4091_vm13, %v5286_v26 }
 0x624   : > { %v3932_v19 = vmin.f32 %v3906_v40, 0.0  ;;  %v3909_v35 = vadd.f32 %v4572_v36, %v3908_v14  ;;  %vm3924_vm6 = vcmp.gt.f32.partialorder %v3906_v40, 0.0 }
 0x625   : > { %v3948_v53 = vmul.f32 1.442695, %v3934_v58  ;;  %v3935_v57 = vmin.f32 %v3917_v11, 0.0  ;;  %vm3927_vm7 = vcmp.gt.f32.partialorder %v3917_v11, 0.0 }
 0x626   : > { %v3944_v41 = vmul.f32 1.442695, %v3932_v19  ;;  %v3933_v18 = vmin.f32 %v3909_v35, 0.0  ;;  %vm3925_vm11 = vcmp.gt.f32.partialorder %v3909_v35, 0.0 }
 0x627   : > { %5244 = vpow2.f32 %v3948_v53  ;;  %v3950_v62 = vmul.f32 1.442695, %v3935_v57 }
 0x628   : > { %5246 = vpow2.f32 %v3944_v41  ;;  %v3946_v28 = vmul.f32 1.442695, %v3933_v18 }
 0x629   : > { %v5237_v56 = vpop.eup %5236  ;;  %5248 = vpow2.f32 %v3950_v62 }
 0x62a   : > { %v5239_v9 = vpop.eup %5238  ;;  %v4579_v48 = vadd.f32 -1.0, %v5237_v56  ;;  %5250 = vpow2.f32 %v3946_v28 }
 0x62b   : > { %v5241_v31 = vpop.eup %5240  ;;  %v4577_v42 = vadd.f32 -1.0, %v5239_v9 }
 0x62c   : > { %v5243_v38 = vpop.eup %5242  ;;  %v3962_v39 = vsel %vm3922_vm1, %v3898_v0, %v4579_v48  ;;  %v4580_v23 = vadd.f32 -1.0, %v5241_v31 }
 0x62d   : > { %v3975_v16 = vsub.f32 %v3962_v39, %v3972_v46  ;;  %v3960_v51 = vsel %vm3920_vm5, %v3890_v2, %v4577_v42  ;;  %v4578_v49 = vadd.f32 -1.0, %v5243_v38 }
 0x62e   : > { %v3973_v27 = vsub.f32 %v3960_v51, %v3972_v46  ;;  %v3963_v47 = vsel %vm3923_vm8, %v3901_v61, %v4580_v23 }
 0x62f   : > { %v3976_v37 = vsub.f32 %v3963_v47, %v3972_v46  ;;  %v3961_v60 = vsel %vm3921_vm9, %v3893_v4, %v4578_v49  ;;  %v3987_v63 = vmul.f32 %v3984_v33, %v3975_v16 }
 0x630   : > { %v3974_v15 = vsub.f32 %v3961_v60, %v3972_v46  ;;  %v3985_v59 = vmul.f32 %v3984_v33, %v3973_v27 }
 0x631   : > { %v5245_v25 = vpop.eup %5244  ;;  %v3988_v17 = vmul.f32 %v3984_v33, %v3976_v37 }
 0x632   : > { %v5247_v20 = vpop.eup %5246  ;;  %v3986_v52 = vmul.f32 %v3984_v33, %v3974_v15  ;;  %v4583_v21 = vadd.f32 -1.0, %v5245_v25 }
 0x633   : > { %v5249_v43 = vpop.eup %5248  ;;  %v3996_v30 = vpack.c.bf16 %v3988_v17, %v3987_v63  ;;  %v4581_v24 = vadd.f32 -1.0, %v5247_v20 }
 0x634   : > { %v5251_v12 = vpop.eup %5250  ;;  %v3966_v10 = vsel %vm3926_vm10, %v3914_v55, %v4583_v21  ;;  %v4584_v36 = vadd.f32 -1.0, %v5249_v43  ;;  %v3995_v29 = vpack.c.bf16 %v3986_v52, %v3985_v59  ;;  %v4107_v55 = vpop.permute.xlu1 %4106 }
 0x635   : > { %v3979_v0 = vsub.f32 %v3966_v10, %v3972_v46  ;;  %v3964_v13 = vsel %vm3924_vm6, %v3906_v40, %v4581_v24  ;;  %v4582_v2 = vadd.f32 -1.0, %v5251_v12  ;;  %v4102_v40 = vpop.permute.xlu0 %4101 }
 0x636   : > { %v3977_v22 = vsub.f32 %v3964_v13, %v3972_v46  ;;  %v3967_v1 = vsel %vm3927_vm7, %v3917_v11, %v4584_v36  ;;  %4899 = vmatprep.mubr.msk.bf16.mxu1 %vm3835_vm12, %v3995_v29 }
 0x637   : > { %v3980_v61 = vsub.f32 %v3967_v1, %v3972_v46  ;;  %v3965_v3 = vsel %vm3925_vm11, %v3909_v35, %v4582_v2  ;;  %4900 = vmatmul.mubr.msk.bf16.vlgmr.msra.gmra.mrb[12].mxu1 %vm3835_vm12, %v3996_v30  ;;  %v3991_v4 = vmul.f32 %v3984_v33, %v3979_v0 }
 0x638   : > { %v3978_v54 = vsub.f32 %v3965_v3, %v3972_v46  ;;  %v3989_v5 = vmul.f32 %v3984_v33, %v3977_v22  ;;  %v4112_v14 = vpop.permute.xlu1 %4111 }
 0x639   : > { %v3992_v50 = vmul.f32 %v3984_v33, %v3980_v61  ;;  %v4117_v62 = vpop.permute.xlu0 %4116 }
 0x63a   : > { %v3990_v32 = vmul.f32 %v3984_v33, %v3978_v54 }
 0x63b   : > { %v3998_v6 = vpack.c.bf16 %v3992_v50, %v3991_v4 }
 0x63c   : > { %v3997_v7 = vpack.c.bf16 %v3990_v32, %v3989_v5  ;;  %v4122_v31 = vpop.permute.xlu1 %4121 }
 0x63d   : > { %v4127_v59 = vpop.permute.xlu0 %4126 }
 0x63e   : > { %4903 = vmatprep.mubr.msk.bf16.mxu1 %vm3835_vm12, %v3997_v7 }
 0x63f   : > { %4904 = vmatmul.mubr.msk.bf16.gmra.mrb[16].mxu1 %vm3835_vm12, %v3998_v6 }
 0x640   : > { %v4132_v36 = vpop.permute.xlu1 %4131 }
 0x70a   : > { %v4901_v8 = vpop.f32.mrb[12].mxu1 }
 0x70b   : > { %v4065_v58 = vadd.f32 %v4901_v8, %v4585_v45  ;;  %v4056_v11 = vpop.f32.mrb[13].mxu1 }
 0x70c   : > { %v4057_v19 = vadd.f32 %v4585_v45, %v4056_v11  ;;  %v4902_v35 = vpop.f32.mrb[14].mxu1 }
 0x70d   : > { %v4068_v53 = vadd.f32 %v4902_v35, %v4585_v45  ;;  %v4059_v57 = vpop.f32.mrb[15].mxu1  ;;  %v4136_v44 = vmul.f32 %v4107_v55, %v4065_v58 }
 0x70e   : > { %v4134_v41 = vmul.f32 %v4097_v34, %v4057_v19  ;;  %v4060_v18 = vadd.f32 %v4585_v45, %v4059_v57 }
 0x70f   : > { %v4137_v56 = vmul.f32 %v4112_v14, %v4068_v53  ;;  %v4166_v9 = vmul.f32 %v4136_v44, %v4065_v58  ;;  %v4145_v33 = vsel %vm3835_vm12, %v4136_v44, 0.0 }
 0x710   : > { %v4164_v28 = vmul.f32 %v4134_v41, %v4057_v19  ;;  %v4135_v46 = vmul.f32 %v4102_v40, %v4060_v18  ;;  %v4142_v48 = vsel %vm3835_vm12, %v4134_v41, 0.0 }
 0x711   : > { %v4167_v27 = vmul.f32 %v4137_v56, %v4068_v53  ;;  %v4175_v20 = vsel %vm3835_vm12, %v4166_v9, 0.0  ;;  %v4147_v52 = vsel %vm3835_vm12, %v4137_v56, 0.0 }
 0x712   : > { %v4143_v42 = vsel %vm3835_vm12, %v4135_v46, 0.0  ;;  %v4165_v38 = vmul.f32 %v4135_v46, %v4060_v18  ;;  %v4905_v39 = vpop.f32.mrb[16].mxu1  ;;  %v4172_v49 = vsel %vm3835_vm12, %v4164_v28, 0.0  ;;  %v4093_v46 = vld [vmem:[%s7157_s16] sm:$0x3] }
 0x713   : > { %v4144_v23 = vadd.f32 %v4143_v42, %v4142_v48  ;;  %v4081_v16 = vadd.f32 %v4905_v39, %v4585_v45  ;;  %v4072_v51 = vpop.f32.mrb[17].mxu1  ;;  %v4177_v10 = vsel %vm3835_vm12, %v4167_v27, 0.0 }
 0x714   : > { %v4173_v47 = vsel %vm3835_vm12, %v4165_v38, 0.0  ;;  %v4073_v37 = vadd.f32 %v4585_v45, %v4072_v51  ;;  %v4906_v60 = vpop.f32.mrb[18].mxu1 }
 0x715   : > { %v4146_v15 = vadd.f32 %v4145_v33, %v4144_v23  ;;  %v4174_v25 = vadd.f32 %v4173_v47, %v4172_v49  ;;  %v4084_v63 = vadd.f32 %v4906_v60, %v4585_v45  ;;  %v4075_v17 = vpop.f32.mrb[19].mxu1  ;;  %v4140_v24 = vmul.f32 %v4127_v59, %v4081_v16 }
 0x716   : > { %v4138_v21 = vmul.f32 %v4117_v62, %v4073_v37  ;;  %v4076_v43 = vadd.f32 %v4585_v45, %v4075_v17 }
 0x717   : > { %v4176_v30 = vadd.f32 %v4175_v20, %v4174_v25  ;;  %v4148_v12 = vadd.f32 %v4147_v52, %v4146_v15  ;;  %v4141_v1 = vmul.f32 %v4132_v36, %v4084_v63  ;;  %v4170_v54 = vmul.f32 %v4140_v24, %v4081_v16 }
 0x718   : > { %v4149_v29 = vsel %vm3835_vm12, %v4138_v21, 0.0  ;;  %v4168_v0 = vmul.f32 %v4138_v21, %v4073_v37  ;;  %v4139_v13 = vmul.f32 %v4122_v31, %v4076_v43  ;;  %v4153_v32 = vsel %vm3835_vm12, %v4140_v24, 0.0 }
 0x719   : > { %v4150_v2 = vadd.f32 %v4149_v29, %v4148_v12  ;;  %v4178_v22 = vadd.f32 %v4177_v10, %v4176_v30  ;;  %v4171_v6 = vmul.f32 %v4141_v1, %v4084_v63  ;;  %v4155_v34 = vsel %vm3835_vm12, %v4141_v1, 0.0 }
 0x71a   : > { %v4179_v61 = vsel %vm3835_vm12, %v4168_v0, 0.0  ;;  %v4151_v3 = vsel %vm3835_vm12, %v4139_v13, 0.0  ;;  %v4169_v5 = vmul.f32 %v4139_v13, %v4076_v43  ;;  %v4183_v45 = vsel %vm3835_vm12, %v4170_v54, 0.0 }
 0x71b   : > { %v4180_v4 = vadd.f32 %v4179_v61, %v4178_v22  ;;  %v4152_v50 = vadd.f32 %v4151_v3, %v4150_v2  ;;  %v4185_v58 = vsel %vm3835_vm12, %v4171_v6, 0.0 }
 0x71c   : > { %v4181_v26 = vsel %vm3835_vm12, %v4169_v5, 0.0 }
 0x71d   : > { %v4154_v7 = vadd.f32 %v4153_v32, %v4152_v50  ;;  %v4182_v55 = vadd.f32 %v4181_v26, %v4180_v4 }
 0x71f   : > { %v4156_v40 = vadd.f32 %v4155_v34, %v4154_v7  ;;  %v4184_v8 = vadd.f32 %v4183_v45, %v4182_v55 }
 0x721   : > { %v4157_v11 = vrot.slane %v4156_v40, 4  ;;  %v4186_v14 = vadd.f32 %v4185_v58, %v4184_v8 }
 0x723   : > { %v4158_v19 = vadd.f32 %v4157_v11, %v4156_v40  ;;  %v4187_v35 = vrot.slane %v4186_v14, 4 }
 0x725   : > { %v4159_v53 = vrot.slane %v4158_v19, 2  ;;  %v4188_v57 = vadd.f32 %v4187_v35, %v4186_v14 }
 0x727   : > { %v4160_v44 = vadd.f32 %v4159_v53, %v4158_v19  ;;  %v4189_v41 = vrot.slane %v4188_v57, 2 }
 0x729   : > { %v4161_v18 = vrot.slane %v4160_v44, 1  ;;  %v4190_v62 = vadd.f32 %v4189_v41, %v4188_v57 }
 0x72b   : > { %v4162_v28 = vadd.f32 %v4161_v18, %v4160_v44  ;;  %v4191_v56 = vrot.slane %v4190_v62, 1 }
 0x72d   : > { %v4192_v9 = vadd.f32 %v4191_v56, %v4190_v62  ;;  %v4163_v48 = vadd.f32 %v4162_v28, %v4093_v46 }
 0x72f   : > { %v4193_v31 = vadd.f32 %v4192_v9, %v4093_v46 }
 0x731   : > { %v4194_v42 = vsel %vm3454_vm2, %v4163_v48, %v4193_v31 }
 0x732   : > { %4196 = vst.msk [vmem:[%s7157_s16] sm:$0x3] %vm4091_vm13, %v4194_v42 }
 0x739   : > { %v4200_v38 = vld [vmem:[%s7157_s16] sm:$0x3] }
 0x73a   : > { %v4202_v39 = vmul.f32 0.015625, %v4200_v38 }
 0x73c   : > { %v4203_v33 = vmul.f32 %v4202_v39, %v4202_v39 }
 0x73e   : > { %v4205_v23 = vrot.slane %v4203_v33, 7 }
 0x740   : > { %v4207_v16 = vsub.f32 %v4202_v39, %v4205_v23 }
 0x742   : > { %v4208_v51 = vadd.f32 1e-05, %v4207_v16 }
 0x744   : > { %5252 = vrsqrt.f32 %v4208_v51 }
 0x74e   : > { %v5253_v49 = vpop.eup %5252 }
 0x74f   : > { %v4210_v27 = vsel %vm3454_vm2, %v4202_v39, %v5253_v49 }
 0x750   : > { %4211 = vst.msk [vmem:[%s7157_s16] sm:$0x3] %vm4091_vm13, %v4210_v27 }
 0x751 PF: > { %s27_s23 = sadd.s32 1, %s5276_s23   ;;  %s7161_s21 = smov %s5272_s22 }
 0x752   : > { %p24_p7 = scmp.ge.s32.totalorder %s27_s23, 5   ;;  %s7162_s22 = smov %s7164_s24 }
 0x754   :  { %26 = sbr.rel (!%p24_p7) target bundleno = 2 (0x2), region = 193 }

</bundles_post_ra>
